<compile_context>
chip_gen: v7x
topology: tpu7x:2x2x1
jax: 0.10.0
libtpu: 0.0.40
codegen_flags: <defaults>
</compile_context>

<pallas_src>
from functools import partial

import jax
import jax.numpy as jnp
import numpy as np
from jax.experimental import pallas as pl
from jax.experimental.pallas import tpu as pltpu


# ----------------------------- kernel helpers ------------------------------

def _layernorm(x, g, b, eps=1e-5):
    mu = jnp.mean(x, axis=-1, keepdims=True)
    var = jnp.mean((x - mu) ** 2, axis=-1, keepdims=True)
    return (x - mu) * jax.lax.rsqrt(var + eps) * g + b


_SQRT_2_OVER_PI = np.float32(np.sqrt(2.0 / np.pi))
_GELU_C = np.float32(0.044715)


def _gelu_tanh(x):
    # tanh-approx GELU: the transcendental goes to the EUP slot (free on this
    # VALU-bound kernel).  Deviates from torch.nn.GELU()'s exact erf by <~3e-3.
    return 0.5 * x * (1.0 + jnp.tanh(_SQRT_2_OVER_PI * (x + _GELU_C * x * x * x)))


def _gelu_erf(x):
    # exact (erf) GELU matching torch.nn.GELU() default -- reference only.
    return 0.5 * x * (1.0 + jax.lax.erf(x * np.float32(1.0 / np.sqrt(2.0))))


# ------------------------------- Pallas kernel ------------------------------

def zero2one_kernel(x_ref, c_ref, w1_ref, w2_ref, w3_ref, vec_ref, b3_ref,
                    red_ref, out_ref):
    # vec_ref packs (b1, g1, be1, b2, g2, be2) as rows of a (6, MID) array.
    b1, g1, be1 = vec_ref[0:1, :], vec_ref[1:2, :], vec_ref[2:3, :]
    b2, g2, be2 = vec_ref[3:4, :], vec_ref[4:5, :], vec_ref[5:6, :]

    x = x_ref[...]                                                    # (TR, DM) bf16
    h = jnp.dot(x, w1_ref[...], preferred_element_type=jnp.float32) + b1
    h = _gelu_tanh(_layernorm(h, g1, be1))
    h = jnp.dot(h.astype(jnp.bfloat16), w2_ref[...],
                preferred_element_type=jnp.float32) + b2
    h = _gelu_tanh(_layernorm(h, g2, be2))

    # last linear; w3_ref columns pre-permuted + tiled in the wrapper so
    # w[r, d*M*O + m*O + o] == weights[r, o, m] for every spatial dim d.
    w = jnp.dot(h.astype(jnp.bfloat16), w3_ref[...],
                preferred_element_type=jnp.float32) + b3_ref[...]     # (TR, 3*M*O)

    # weights * coords (coords already broadcast over o), then reduce over m
    # with an exact 0/1 matmul whose columns are zero-padded so the single
    # store below is a full 128-lane (lane-dense) tile.
    out_ref[...] = jnp.dot(w * c_ref[...], red_ref[...],
                           preferred_element_type=jnp.float32)        # (TR, OUT_W)


# --------------------------------- wrapper ----------------------------------

@partial(jax.jit, static_argnames=("dim_out", "coord_dim_in", "block_rows"))
def zero2one_forward(feats, coords, edges, self_feats, params, *,
                     dim_out, coord_dim_in, block_rows=1024):
    """Pallas implementation of Zero2One.forward (jitted end-to-end)."""
    lead = feats.shape[:-2]
    M = coord_dim_in
    O = dim_out
    MID = params["w1"].shape[1]

    # glue: concat + flatten leading dims (pure JAX, fused under jit)
    if self_feats is not None:
        edge_info = jnp.concatenate(
            [feats[..., 0], self_feats[..., 0], edges], axis=-1)
    else:
        edge_info = jnp.concatenate([feats[..., 0], edges], axis=-1)
    DM = edge_info.shape[-1]

    R = int(np.prod(lead)) if lead else 1
    x2d = edge_info.reshape(R, DM).astype(jnp.bfloat16)               # bf16 MXU inputs

    # coords broadcast over the output channel axis:
    # c_rep[r, d*M*O + m*O + o] = coords[r, m, d]
    c3 = jnp.swapaxes(coords, -1, -2).reshape(R, 3, M).astype(jnp.float32)
    c_rep = jnp.broadcast_to(c3[..., None], (R, 3, M, O)).reshape(R, 3 * M * O)

    # row tile: multiple of 256 (full MXU row tiles on all generations), and
    # at least 2 grid steps when R allows so v7x's two TensorCores both work.
    br = max(256, (int(block_rows) // 256) * 256)
    half = -(-(-(-R // 2)) // 256) * 256          # ceil(ceil(R/2) / 256) * 256
    br = max(256, min(br, half))
    n_steps = -(-R // br)
    Rpad = n_steps * br
    if Rpad != R:
        x2d = jnp.pad(x2d, ((0, Rpad - R), (0, 0)))
        c_rep = jnp.pad(c_rep, ((0, Rpad - R), (0, 0)))

    # permute last-linear columns from (o, m) order to (m, o) order and tile
    # them 3x (one copy per spatial dim d) so the kernel's epilogue is dense.
    w3_mo = params["w3"].reshape(MID, O, M).transpose(0, 2, 1).reshape(MID, M * O)
    b3_mo = params["b3"].reshape(1, O, M).transpose(0, 2, 1).reshape(1, M * O)
    w3_big = jnp.concatenate([w3_mo] * 3, axis=1).astype(jnp.bfloat16)   # (MID, 3*M*O)
    b3_big = jnp.concatenate([b3_mo] * 3, axis=1).astype(jnp.float32)    # (1,   3*M*O)

    w1 = params["w1"].astype(jnp.bfloat16)
    w2 = params["w2"].astype(jnp.bfloat16)
    vec6 = jnp.concatenate([params["b1"], params["g1"], params["be1"],
                            params["b2"], params["g2"], params["be2"]],
                           axis=0).astype(jnp.float32)                   # (6, MID)

    # reduce-over-m 0/1 matrix, zero-padded to a lane-dense output width:
    # red[d*M*O + m*O + o, d*O + o] = 1, all other columns (>= 3*O) are zero.
    out_w = max(128, -(-3 * O // 128) * 128)
    red_np = np.zeros((3 * M * O, out_w), dtype=np.float32)
    red_np[:, :3 * O] = np.kron(np.eye(3, dtype=np.float32),
                                np.kron(np.ones((M, 1), dtype=np.float32),
                                        np.eye(O, dtype=np.float32)))
    red = jnp.asarray(red_np)                                            # (3MO, OUT_W)

    weight_args = (w1, w2, w3_big, vec6, b3_big, red)

    out2d = pl.pallas_call(
        zero2one_kernel,
        out_shape=jax.ShapeDtypeStruct((Rpad, out_w), jnp.float32),
        grid_spec=pltpu.PrefetchScalarGridSpec(
            num_scalar_prefetch=0,
            grid=(n_steps,),
            in_specs=[pl.BlockSpec((br, DM), lambda i: (i, 0)),
                      pl.BlockSpec((br, 3 * M * O), lambda i: (i, 0))] +
                     [pl.BlockSpec(a.shape, lambda i: (0, 0))
                      for a in weight_args],
            out_specs=pl.BlockSpec((br, out_w), lambda i: (i, 0)),
        ),
        compiler_params=pltpu.CompilerParams(
            dimension_semantics=("parallel",)),
    )(x2d, c_rep, *weight_args)

    # (Rpad, OUT_W) -> (R, 3, O) -> (R, O, 3) -> (..., O, 3)
    out = out2d[:R, :3 * O].reshape(R, 3, O).transpose(0, 2, 1)
    return out.reshape(*lead, O, 3)


# ------------------------------ pure-JAX reference ---------------------------

def zero2one_reference(feats, coords, edges, self_feats, params, *,
                       dim_out, coord_dim_in, emulate_kernel=False):
    """emulate_kernel=True mirrors the kernel's bf16 matmuls + tanh GELU;
    emulate_kernel=False is the exact module semantics (f32, erf GELU)."""
    gelu = _gelu_tanh if emulate_kernel else _gelu_erf

    def mm(a, b):
        if emulate_kernel:
            a = a.astype(jnp.bfloat16)
            b = b.astype(jnp.bfloat16)
        return jnp.dot(a, b, preferred_element_type=jnp.float32)

    edge_info = jnp.concatenate(
        [feats[..., 0], self_feats[..., 0], edges], axis=-1)
    h = mm(edge_info, params["w1"]) + params["b1"]
    h = gelu(_layernorm(h, params["g1"], params["be1"]))
    h = mm(h, params["w2"]) + params["b2"]
    h = gelu(_layernorm(h, params["g2"], params["be2"]))
    w = mm(h, params["w3"]) + params["b3"]                             # (..., O*M)
    weights = w.reshape(*w.shape[:-1], dim_out, coord_dim_in, 1)       # (..., O, M, 1)
    crds = coords[..., None, :, :]                                     # (..., 1, M, 3)
    return jnp.sum(weights * crds, axis=-2)                            # (..., O, 3)


# ----------------------------------- main ------------------------------------

if __name__ == "__main__":
    feat_dim_in = 16
    coord_dim_in = 4
    dim_out = 8
    edge_dim = 32
    DM = 2 * feat_dim_in + edge_dim            # dim_message
    MID = max(128, DM)                         # mid_dim = max(128, dim_message)

    key = jax.random.PRNGKey(0)
    ks = jax.random.split(key, 12)

    def w_init(k, shape, scale=0.05):
        return scale * jax.random.normal(k, shape, jnp.float32)

    params = dict(
        w1=w_init(ks[0], (DM, MID)),
        b1=w_init(ks[1], (1, MID)),
        g1=1.0 + 0.1 * jax.random.normal(ks[2], (1, MID), jnp.float32),
        be1=0.1 * jax.random.normal(ks[3], (1, MID), jnp.float32),
        w2=w_init(ks[4], (MID, MID)),
        b2=w_init(ks[5], (1, MID)),
        g2=1.0 + 0.1 * jax.random.normal(ks[6], (1, MID), jnp.float32),
        be2=0.1 * jax.random.normal(ks[7], (1, MID), jnp.float32),
        w3=w_init(ks[8], (MID, dim_out * coord_dim_in)),
        b3=w_init(ks[9], (1, dim_out * coord_dim_in)),
    )

    def make_inputs(k, B, N):
        dk = jax.random.split(k, 4)
        feats = jax.random.normal(dk[0], (B, N, feat_dim_in, 1), jnp.float32)
        self_feats = jax.random.normal(dk[1], (B, N, feat_dim_in, 1), jnp.float32)
        edges = jax.random.normal(dk[2], (B, N, edge_dim), jnp.float32)
        coords = jax.random.normal(dk[3], (B, N, coord_dim_in, 3), jnp.float32)
        return feats, coords, edges, self_feats

    # case 1: R=1024 -> two 512-row tiles (>= 2 parallel steps for v7x)
    # case 2: R=120  -> exercises the zero-pad remainder path (one 256-row tile)
    for case_key, (B, N) in ((ks[10], (2, 512)), (ks[11], (2, 60))):
        feats, coords, edges, self_feats = make_inputs(case_key, B, N)

        out = jax.block_until_ready(
            zero2one_forward(feats, coords, edges, self_feats, params,
                             dim_out=dim_out, coord_dim_in=coord_dim_in))
        assert out.shape == (B, N, dim_out, 3)

        # tight check vs a reference that matches the kernel's numerics
        # (bf16 MXU matmuls + tanh-approx GELU)
        ref_k = zero2one_reference(feats, coords, edges, self_feats, params,
                                   dim_out=dim_out, coord_dim_in=coord_dim_in,
                                   emulate_kernel=True)
        np.testing.assert_allclose(np.asarray(out), np.asarray(ref_k),
                                   rtol=2e-3, atol=2e-3)

        # looser check vs the exact f32 / erf-GELU module semantics
        ref_f32 = zero2one_reference(feats, coords, edges, self_feats, params,
                                     dim_out=dim_out, coord_dim_in=coord_dim_in,
                                     emulate_kernel=False)
        np.testing.assert_allclose(np.asarray(out), np.asarray(ref_f32),
                                   rtol=6e-2, atol=6e-2)

    print("KERNEL_OK")
</pallas_src>

<mosaic_0001>
module attributes {stable_mosaic.version = 11 : i64} {
  func.func @zero2one_kernel(%arg0: i32, %arg1: memref<512x64xbf16, #tpu.memory_space<vmem>>, %arg2: memref<512x96xf32, #tpu.memory_space<vmem>>, %arg3: memref<64x128xbf16, #tpu.memory_space<vmem>>, %arg4: memref<128x128xbf16, #tpu.memory_space<vmem>>, %arg5: memref<128x96xbf16, #tpu.memory_space<vmem>>, %arg6: memref<6x128xf32, #tpu.memory_space<vmem>>, %arg7: memref<1x96xf32, #tpu.memory_space<vmem>>, %arg8: memref<96x128xf32, #tpu.memory_space<vmem>>, %arg9: memref<512x128xf32, #tpu.memory_space<vmem>>) attributes {dimension_semantics = [#tpu.dimension_semantics<parallel>], iteration_bounds = array<i64: 2>, scalar_prefetch = 0 : i64, scratch_operands = 0 : i64, tpu.core_type = #tpu.core_type<tc>, window_params = [{transform_indices = @transform_0, window_bounds = array<i64: 512, 64>}, {transform_indices = @transform_1, window_bounds = array<i64: 512, 96>}, {pipeline_mode = #tpu.pipeline_mode<synchronous>, transform_indices = @transform_2, window_bounds = array<i64: 64, 128>}, {pipeline_mode = #tpu.pipeline_mode<synchronous>, transform_indices = @transform_3, window_bounds = array<i64: 128, 128>}, {pipeline_mode = #tpu.pipeline_mode<synchronous>, transform_indices = @transform_4, window_bounds = array<i64: 128, 96>}, {pipeline_mode = #tpu.pipeline_mode<synchronous>, transform_indices = @transform_5, window_bounds = array<i64: 6, 128>}, {pipeline_mode = #tpu.pipeline_mode<synchronous>, transform_indices = @transform_6, window_bounds = array<i64: 1, 96>}, {pipeline_mode = #tpu.pipeline_mode<synchronous>, transform_indices = @transform_7, window_bounds = array<i64: 96, 128>}, {transform_indices = @transform_8, window_bounds = array<i64: 512, 128>}]} {
    %c0 = arith.constant 0 : index
    %c0_0 = arith.constant 0 : index
    %0 = vector.load %arg6[%c0, %c0_0] : memref<6x128xf32, #tpu.memory_space<vmem>>, vector<1x128xf32>
    %c1 = arith.constant 1 : index
    %c0_1 = arith.constant 0 : index
    %1 = vector.load %arg6[%c1, %c0_1] : memref<6x128xf32, #tpu.memory_space<vmem>>, vector<1x128xf32>
    %c2 = arith.constant 2 : index
    %c0_2 = arith.constant 0 : index
    %2 = vector.load %arg6[%c2, %c0_2] : memref<6x128xf32, #tpu.memory_space<vmem>>, vector<1x128xf32>
    %c3 = arith.constant 3 : index
    %c0_3 = arith.constant 0 : index
    %3 = vector.load %arg6[%c3, %c0_3] : memref<6x128xf32, #tpu.memory_space<vmem>>, vector<1x128xf32>
    %c4 = arith.constant 4 : index
    %c0_4 = arith.constant 0 : index
    %4 = vector.load %arg6[%c4, %c0_4] : memref<6x128xf32, #tpu.memory_space<vmem>>, vector<1x128xf32>
    %c5 = arith.constant 5 : index
    %c0_5 = arith.constant 0 : index
    %5 = vector.load %arg6[%c5, %c0_5] : memref<6x128xf32, #tpu.memory_space<vmem>>, vector<1x128xf32>
    %c0_6 = arith.constant 0 : index
    %c0_7 = arith.constant 0 : index
    %6 = vector.load %arg1[%c0_6, %c0_7] : memref<512x64xbf16, #tpu.memory_space<vmem>>, vector<512x64xbf16>
    %c0_8 = arith.constant 0 : index
    %c0_9 = arith.constant 0 : index
    %7 = vector.load %arg3[%c0_8, %c0_9] : memref<64x128xbf16, #tpu.memory_space<vmem>>, vector<64x128xbf16>
    %cst = arith.constant dense<0.000000e+00> : vector<512x128xf32>
    %8 = tpu.matmul %6, %7, %cst {dimension_numbers = #tpu.dot_dimension_numbers<[1], [0], [0], [1], [0, 0, 1, 1], [], []>} : vector<512x64xbf16>, vector<64x128xbf16>, vector<512x128xf32> -> vector<512x128xf32>
    %9 = vector.broadcast %0 : vector<1x128xf32> to vector<512x128xf32>
    %10 = arith.addf %8, %9 : vector<512x128xf32>
    %cst_10 = arith.constant dense<0.000000e+00> : vector<512xf32>
    %11 = vector.multi_reduction <add>, %10, %cst_10 [1] : vector<512x128xf32> to vector<512xf32>
    %12 = vector.shape_cast %11 : vector<512xf32> to vector<512x1xf32>
    %cst_11 = arith.constant 1.280000e+02 : f32
    %13 = vector.broadcast %cst_11 : f32 to vector<512x1xf32>
    %14 = arith.divf %12, %13 : vector<512x1xf32>
    %15 = vector.broadcast %14 : vector<512x1xf32> to vector<512x128xf32>
    %16 = arith.subf %10, %15 : vector<512x128xf32>
    %17 = arith.mulf %16, %16 : vector<512x128xf32>
    %cst_12 = arith.constant dense<0.000000e+00> : vector<512xf32>
    %18 = vector.multi_reduction <add>, %17, %cst_12 [1] : vector<512x128xf32> to vector<512xf32>
    %19 = vector.shape_cast %18 : vector<512xf32> to vector<512x1xf32>
    %cst_13 = arith.constant 1.280000e+02 : f32
    %20 = vector.broadcast %cst_13 : f32 to vector<512x1xf32>
    %21 = arith.divf %19, %20 : vector<512x1xf32>
    %22 = vector.broadcast %14 : vector<512x1xf32> to vector<512x128xf32>
    %23 = arith.subf %10, %22 : vector<512x128xf32>
    %cst_14 = arith.constant 9.99999974E-6 : f32
    %24 = vector.broadcast %cst_14 : f32 to vector<512x1xf32>
    %25 = arith.addf %21, %24 : vector<512x1xf32>
    %26 = math.rsqrt %25 : vector<512x1xf32>
    %27 = vector.broadcast %26 : vector<512x1xf32> to vector<512x128xf32>
    %28 = arith.mulf %23, %27 : vector<512x128xf32>
    %29 = vector.broadcast %1 : vector<1x128xf32> to vector<512x128xf32>
    %30 = arith.mulf %28, %29 : vector<512x128xf32>
    %31 = vector.broadcast %2 : vector<1x128xf32> to vector<512x128xf32>
    %32 = arith.addf %30, %31 : vector<512x128xf32>
    %cst_15 = arith.constant 5.000000e-01 : f32
    %33 = vector.broadcast %cst_15 : f32 to vector<512x128xf32>
    %34 = arith.mulf %33, %32 : vector<512x128xf32>
    %cst_16 = arith.constant 4.471500e-02 : f32
    %35 = vector.broadcast %cst_16 : f32 to vector<512x128xf32>
    %36 = arith.mulf %35, %32 : vector<512x128xf32>
    %37 = arith.mulf %36, %32 : vector<512x128xf32>
    %38 = arith.mulf %37, %32 : vector<512x128xf32>
    %39 = arith.addf %32, %38 : vector<512x128xf32>
    %cst_17 = arith.constant 0.797884583 : f32
    %40 = vector.broadcast %cst_17 : f32 to vector<512x128xf32>
    %41 = arith.mulf %40, %39 : vector<512x128xf32>
    %42 = math.tanh %41 : vector<512x128xf32>
    %cst_18 = arith.constant 1.000000e+00 : f32
    %43 = vector.broadcast %cst_18 : f32 to vector<512x128xf32>
    %44 = arith.addf %43, %42 : vector<512x128xf32>
    %45 = arith.mulf %34, %44 : vector<512x128xf32>
    %46 = arith.truncf %45 : vector<512x128xf32> to vector<512x128xbf16>
    %c0_19 = arith.constant 0 : index
    %c0_20 = arith.constant 0 : index
    %47 = vector.load %arg4[%c0_19, %c0_20] : memref<128x128xbf16, #tpu.memory_space<vmem>>, vector<128x128xbf16>
    %cst_21 = arith.constant dense<0.000000e+00> : vector<512x128xf32>
    %48 = tpu.matmul %46, %47, %cst_21 {dimension_numbers = #tpu.dot_dimension_numbers<[1], [0], [0], [1], [0, 0, 1, 1], [], []>} : vector<512x128xbf16>, vector<128x128xbf16>, vector<512x128xf32> -> vector<512x128xf32>
    %49 = vector.broadcast %3 : vector<1x128xf32> to vector<512x128xf32>
    %50 = arith.addf %48, %49 : vector<512x128xf32>
    %cst_22 = arith.constant dense<0.000000e+00> : vector<512xf32>
    %51 = vector.multi_reduction <add>, %50, %cst_22 [1] : vector<512x128xf32> to vector<512xf32>
    %52 = vector.shape_cast %51 : vector<512xf32> to vector<512x1xf32>
    %cst_23 = arith.constant 1.280000e+02 : f32
    %53 = vector.broadcast %cst_23 : f32 to vector<512x1xf32>
    %54 = arith.divf %52, %53 : vector<512x1xf32>
    %55 = vector.broadcast %54 : vector<512x1xf32> to vector<512x128xf32>
    %56 = arith.subf %50, %55 : vector<512x128xf32>
    %57 = arith.mulf %56, %56 : vector<512x128xf32>
    %cst_24 = arith.constant dense<0.000000e+00> : vector<512xf32>
    %58 = vector.multi_reduction <add>, %57, %cst_24 [1] : vector<512x128xf32> to vector<512xf32>
    %59 = vector.shape_cast %58 : vector<512xf32> to vector<512x1xf32>
    %cst_25 = arith.constant 1.280000e+02 : f32
    %60 = vector.broadcast %cst_25 : f32 to vector<512x1xf32>
    %61 = arith.divf %59, %60 : vector<512x1xf32>
    %62 = vector.broadcast %54 : vector<512x1xf32> to vector<512x128xf32>
    %63 = arith.subf %50, %62 : vector<512x128xf32>
    %cst_26 = arith.constant 9.99999974E-6 : f32
    %64 = vector.broadcast %cst_26 : f32 to vector<512x1xf32>
    %65 = arith.addf %61, %64 : vector<512x1xf32>
    %66 = math.rsqrt %65 : vector<512x1xf32>
    %67 = vector.broadcast %66 : vector<512x1xf32> to vector<512x128xf32>
    %68 = arith.mulf %63, %67 : vector<512x128xf32>
    %69 = vector.broadcast %4 : vector<1x128xf32> to vector<512x128xf32>
    %70 = arith.mulf %68, %69 : vector<512x128xf32>
    %71 = vector.broadcast %5 : vector<1x128xf32> to vector<512x128xf32>
    %72 = arith.addf %70, %71 : vector<512x128xf32>
    %cst_27 = arith.constant 5.000000e-01 : f32
    %73 = vector.broadcast %cst_27 : f32 to vector<512x128xf32>
    %74 = arith.mulf %73, %72 : vector<512x128xf32>
    %cst_28 = arith.constant 4.471500e-02 : f32
    %75 = vector.broadcast %cst_28 : f32 to vector<512x128xf32>
    %76 = arith.mulf %75, %72 : vector<512x128xf32>
    %77 = arith.mulf %76, %72 : vector<512x128xf32>
    %78 = arith.mulf %77, %72 : vector<512x128xf32>
    %79 = arith.addf %72, %78 : vector<512x128xf32>
    %cst_29 = arith.constant 0.797884583 : f32
    %80 = vector.broadcast %cst_29 : f32 to vector<512x128xf32>
    %81 = arith.mulf %80, %79 : vector<512x128xf32>
    %82 = math.tanh %81 : vector<512x128xf32>
    %cst_30 = arith.constant 1.000000e+00 : f32
    %83 = vector.broadcast %cst_30 : f32 to vector<512x128xf32>
    %84 = arith.addf %83, %82 : vector<512x128xf32>
    %85 = arith.mulf %74, %84 : vector<512x128xf32>
    %86 = arith.truncf %85 : vector<512x128xf32> to vector<512x128xbf16>
    %c0_31 = arith.constant 0 : index
    %c0_32 = arith.constant 0 : index
    %87 = vector.load %arg5[%c0_31, %c0_32] : memref<128x96xbf16, #tpu.memory_space<vmem>>, vector<128x96xbf16>
    %cst_33 = arith.constant dense<0.000000e+00> : vector<512x96xf32>
    %88 = tpu.matmul %86, %87, %cst_33 {dimension_numbers = #tpu.dot_dimension_numbers<[1], [0], [0], [1], [0, 0, 1, 1], [], []>} : vector<512x128xbf16>, vector<128x96xbf16>, vector<512x96xf32> -> vector<512x96xf32>
    %c0_34 = arith.constant 0 : index
    %c0_35 = arith.constant 0 : index
    %89 = vector.load %arg7[%c0_34, %c0_35] : memref<1x96xf32, #tpu.memory_space<vmem>>, vector<1x96xf32>
    %90 = vector.broadcast %89 : vector<1x96xf32> to vector<512x96xf32>
    %91 = arith.addf %88, %90 : vector<512x96xf32>
    %c0_36 = arith.constant 0 : index
    %c0_37 = arith.constant 0 : index
    %92 = vector.load %arg2[%c0_36, %c0_37] : memref<512x96xf32, #tpu.memory_space<vmem>>, vector<512x96xf32>
    %93 = arith.mulf %91, %92 : vector<512x96xf32>
    %c0_38 = arith.constant 0 : index
    %c0_39 = arith.constant 0 : index
    %94 = vector.load %arg8[%c0_38, %c0_39] : memref<96x128xf32, #tpu.memory_space<vmem>>, vector<96x128xf32>
    %cst_40 = arith.constant dense<0.000000e+00> : vector<512x128xf32>
    %95 = tpu.matmul %93, %94, %cst_40 {dimension_numbers = #tpu.dot_dimension_numbers<[1], [0], [0], [1], [0, 0, 1, 1], [], []>} : vector<512x96xf32>, vector<96x128xf32>, vector<512x128xf32> -> vector<512x128xf32>
    %c0_41 = arith.constant 0 : index
    %c0_42 = arith.constant 0 : index
    %96 = vector.load %arg9[%c0_41, %c0_42] : memref<512x128xf32, #tpu.memory_space<vmem>>, vector<512x128xf32>
    tpu.vector_store %arg9[%c0_41, %c0_42], %95 {strides = array<i32>} : memref<512x128xf32, #tpu.memory_space<vmem>>, vector<512x128xf32>,
    return
  }
  func.func @transform_0(%arg0: i32) -> (i32, i32) {
    %c0_i32 = arith.constant 0 : i32
    %c0_i32_0 = arith.constant 0 : i32
    return %arg0, %c0_i32 : i32, i32
  }
  func.func @transform_1(%arg0: i32) -> (i32, i32) {
    %c0_i32 = arith.constant 0 : i32
    %c0_i32_0 = arith.constant 0 : i32
    return %arg0, %c0_i32 : i32, i32
  }
  func.func @transform_2(%arg0: i32) -> (i32, i32) {
    %c0_i32 = arith.constant 0 : i32
    %c0_i32_0 = arith.constant 0 : i32
    %c0_i32_1 = arith.constant 0 : i32
    return %c0_i32, %c0_i32_0 : i32, i32
  }
  func.func @transform_3(%arg0: i32) -> (i32, i32) {
    %c0_i32 = arith.constant 0 : i32
    %c0_i32_0 = arith.constant 0 : i32
    %c0_i32_1 = arith.constant 0 : i32
    return %c0_i32, %c0_i32_0 : i32, i32
  }
  func.func @transform_4(%arg0: i32) -> (i32, i32) {
    %c0_i32 = arith.constant 0 : i32
    %c0_i32_0 = arith.constant 0 : i32
    %c0_i32_1 = arith.constant 0 : i32
    return %c0_i32, %c0_i32_0 : i32, i32
  }
  func.func @transform_5(%arg0: i32) -> (i32, i32) {
    %c0_i32 = arith.constant 0 : i32
    %c0_i32_0 = arith.constant 0 : i32
    %c0_i32_1 = arith.constant 0 : i32
    return %c0_i32, %c0_i32_0 : i32, i32
  }
  func.func @transform_6(%arg0: i32) -> (i32, i32) {
    %c0_i32 = arith.constant 0 : i32
    %c0_i32_0 = arith.constant 0 : i32
    %c0_i32_1 = arith.constant 0 : i32
    return %c0_i32, %c0_i32_0 : i32, i32
  }
  func.func @transform_7(%arg0: i32) -> (i32, i32) {
    %c0_i32 = arith.constant 0 : i32
    %c0_i32_0 = arith.constant 0 : i32
    %c0_i32_1 = arith.constant 0 : i32
    return %c0_i32, %c0_i32_0 : i32, i32
  }
  func.func @transform_8(%arg0: i32) -> (i32, i32) {
    %c0_i32 = arith.constant 0 : i32
    %c0_i32_0 = arith.constant 0 : i32
    return %arg0, %c0_i32 : i32, i32
  }
}

</mosaic_0001>

<bundles_post_ra>
// kernel: zero2one_forward.1
= control target key start
LH: loop header
LB: loop body
LE: loop exit
PB: predicated region body
PF: predicated region fallthrough
CT: control target
= control target key end

     0   :  { %s6829_s27 = smov 0   ;;  %s9944_s0 = inlined_call_operand.vmem [shape: bf16[1024,64], index: 0, kind: input, shape index: {}]   ;;  %s9945_s1 = inlined_call_operand.vmem [shape: f32[1024,96], index: 1, kind: input, shape index: {}]   ;;  %s9946_s2 = inlined_call_operand.vmem [shape: bf16[64,128], index: 2, kind: input, shape index: {}]   ;;  %s9947_s3 = inlined_call_operand.vmem [shape: bf16[128,128], index: 3, kind: input, shape index: {}]   ;;  %s9948_s4 = inlined_call_operand.vmem [shape: bf16[128,96], index: 4, kind: input, shape index: {}]   ;;  %s9949_s5 = inlined_call_operand.vmem [shape: f32[6,128], index: 5, kind: input, shape index: {}]   ;;  %s9950_s6 = inlined_call_operand.vmem [shape: f32[1,96], index: 6, kind: input, shape index: {}]   ;;  %s9951_s7 = inlined_call_operand.vmem [shape: f32[96,128], index: 7, kind: input, shape index: {}]   ;;  %s9952_s8 = inlined_call_operand.vmem [shape: f32[1024,128], index: 8, kind: output, shape index: {}]  }
   0x1 LB: > { %s5448_s28 = sadd.s32 4294967295, %s6782_s27   ;;  %p5452_p0 = scmp.ge.s32.totalorder %s6782_s27, 1  ;;  %s6782_s27 = sphi %s6829_s27, %s18_s27  }
   0x2   : > { %p274_p1 = scmp.lt.s32.totalorder %s6782_s27, 3 }
   0x4   : > { %p275_p2 = pnand %p5452_p0, %p274_p1 }
   0x6   : > { %278 = sbr.rel (%p275_p2) target bundleno = 1920 (0x780), region = 52 }
   0xd   : > { %v6204_v0 = vld [vmem:[%s9946_s2] sm:$0xff]   ;;  %s5453_s9 = sshll.u32 %s5448_s28, 6  ;;  %v6205_v1 = vld [vmem:[%s9946_s2 + $0x8] sm:$0xff]   ;;  %v6206_v2 = vld [vmem:[%s9946_s2 + $0x10] sm:$0xff]   ;;  %vm598_vm0 = vcmask 523264   ;;  %vm4738_vm1 = vcmask 785408  }
   0xe   : > { %p314_p3 = scmp.lt.s32.totalorder %s5453_s9, 127  ;;  %5808 = vmatprep.subr.bf16.mxu0 %v6204_v0  ;;  %v6207_v4 = vld [vmem:[%s9946_s2 + $0x18] sm:$0xff]   ;;  %v6924_v36 = vld [vmem:[%s9949_s5] ss:$0 sm:$0xff] }
   0xf   : > { %5809 = vmatpush3.bf16.msra.mxu0 %v6204_v0 }
  0x10   : > { %s10245_s9 = smov (!%p314_p3, %s5453_s9), 127  ;;  %5810 = vmatprep.subr.bf16.mxu0 %v6205_v1 }
  0x11   : > { %s5454_s14 = sshll.u32 %s10245_s9, 2  ;;  %s5456_s24 = sshll.u32 %s10245_s9, 3 }
  0x12   : > { %s6852_s17 = scalar_lea.vmem %s9944_s0, %s5454_s14  ;;  %s9676_s30 = scalar_lea.vmem %s9945_s1, %s5456_s24 }
  0x13   : > { %5811 = vmatpush3.bf16.msra.mxu0 %v6205_v1  ;;  %v6208_v3 = vld [vmem:[%s6852_s17] sm:$0xff]   ;;  %v6209_v5 = vld [vmem:[%s6852_s17 + $0x8] sm:$0xff]   ;;  %v6210_v6 = vld [vmem:[%s6852_s17 + $0x10] sm:$0xff]   ;;  %s9871_s12 = scalar_lea.vmem %s9952_s8, %s5456_s24 }
  0x14   : > { %5812 = vmatprep.subr.bf16.mxu0 %v6206_v2  ;;  %5816 = vmatprep.mubr.msk.bf16.mxu0 %vm598_vm0, %v6208_v3  ;;  %v6211_v7 = vld [vmem:[%s6852_s17 + $0x18] sm:$0xff]   ;;  %v6212_v8 = vld [vmem:[%s6852_s17 + $0x20] sm:$0xff]   ;;  %v6213_v9 = vld [vmem:[%s6852_s17 + $0x28] sm:$0xff]  }
  0x15   : > { %v6214_v10 = vld [vmem:[%s6852_s17 + $0x30] sm:$0xff]   ;;  %v6215_v11 = vld [vmem:[%s6852_s17 + $0x38] sm:$0xff]   ;;  %v6216_v12 = vld [vmem:[%s6852_s17 + $0x40] sm:$0xff]  }
  0x16   : > { %v6217_v13 = vld [vmem:[%s6852_s17 + $0x48] sm:$0xff]   ;;  %v6218_v14 = vld [vmem:[%s6852_s17 + $0x50] sm:$0xff]   ;;  %v6219_v15 = vld [vmem:[%s6852_s17 + $0x58] sm:$0xff]  }
  0x17   : > { %5813 = vmatpush3.bf16.msra.mxu0 %v6206_v2  ;;  %v6220_v16 = vld [vmem:[%s6852_s17 + $0x60] sm:$0xff]   ;;  %v6221_v17 = vld [vmem:[%s6852_s17 + $0x68] sm:$0xff]   ;;  %v6222_v18 = vld [vmem:[%s6852_s17 + $0x70] sm:$0xff]  }
  0x18   : > { %5814 = vmatprep.subr.bf16.mxu0 %v6207_v4  ;;  %v6223_v19 = vld [vmem:[%s6852_s17 + $0x78] sm:$0xff]   ;;  %v6224_v20 = vld [vmem:[%s6852_s17 + $0x80] sm:$0xff]   ;;  %v6225_v21 = vld [vmem:[%s6852_s17 + $0x88] sm:$0xff]  }
  0x19   : > { %v6226_v22 = vld [vmem:[%s6852_s17 + $0x90] sm:$0xff]   ;;  %v6227_v23 = vld [vmem:[%s6852_s17 + $0x98] sm:$0xff]   ;;  %v6228_v24 = vld [vmem:[%s6852_s17 + $0xa0] sm:$0xff]  }
  0x1a   : > { %v6229_v25 = vld [vmem:[%s6852_s17 + $0xa8] sm:$0xff]   ;;  %v6230_v26 = vld [vmem:[%s6852_s17 + $0xb0] sm:$0xff]   ;;  %v6231_v27 = vld [vmem:[%s6852_s17 + $0xb8] sm:$0xff]  }
  0x1b   : > { %5815 = vmatpush3.bf16.msra.mxu0 %v6207_v4  ;;  %v6232_v28 = vld [vmem:[%s6852_s17 + $0xc0] sm:$0xff]   ;;  %v6233_v29 = vld [vmem:[%s6852_s17 + $0xc8] sm:$0xff]   ;;  %v6234_v30 = vld [vmem:[%s6852_s17 + $0xd0] sm:$0xff]  }
  0x1c   : > { %v6235_v31 = vld [vmem:[%s6852_s17 + $0xd8] sm:$0xff]   ;;  %v6236_v32 = vld [vmem:[%s6852_s17 + $0xe0] sm:$0xff]   ;;  %v6237_v33 = vld [vmem:[%s6852_s17 + $0xe8] sm:$0xff]  }
  0x1d   : > { %v6238_v34 = vld [vmem:[%s6852_s17 + $0xf0] sm:$0xff]   ;;  %v6239_v35 = vld [vmem:[%s6852_s17 + $0xf8] sm:$0xff]  }
  0x1e   : > { %5817 = vmatmul.mubr.msk.bf16.vlgmr.msra.gmra.mrb[0].mxu0 %vm598_vm0, %v6209_v5 }
  0x1f   : > { %5820 = vmatprep.mubr.msk.bf16.mxu0 %vm598_vm0, %v6210_v6 }
  0x26   : > { %5821 = vmatmul.mubr.msk.bf16.gmra.mrb[4].mxu0 %vm598_vm0, %v6211_v7 }
  0x27   : > { %5824 = vmatprep.mubr.msk.bf16.mxu0 %vm598_vm0, %v6212_v8 }
  0x2e   : > { %5825 = vmatmul.mubr.msk.bf16.gmra.mrb[8].mxu0 %vm598_vm0, %v6213_v9 }
  0x2f   : > { %5828 = vmatprep.mubr.msk.bf16.mxu0 %vm598_vm0, %v6214_v10 }
  0x36   : > { %5829 = vmatmul.mubr.msk.bf16.gmra.mrb[12].mxu0 %vm598_vm0, %v6215_v11 }
  0x37   : > { %5832 = vmatprep.mubr.msk.bf16.mxu0 %vm598_vm0, %v6216_v12 }
  0x3e   : > { %5833 = vmatmul.mubr.msk.bf16.gmra.mrb[16].mxu0 %vm598_vm0, %v6217_v13 }
  0x3f   : > { %5836 = vmatprep.mubr.msk.bf16.mxu0 %vm598_vm0, %v6218_v14 }
  0x46   : > { %5837 = vmatmul.mubr.msk.bf16.gmra.mrb[20].mxu0 %vm598_vm0, %v6219_v15 }
  0x47   : > { %5840 = vmatprep.mubr.msk.bf16.mxu0 %vm598_vm0, %v6220_v16 }
  0x4e   : > { %5841 = vmatmul.mubr.msk.bf16.gmra.mrb[24].mxu0 %vm598_vm0, %v6221_v17 }
  0x4f   : > { %5844 = vmatprep.mubr.msk.bf16.mxu0 %vm598_vm0, %v6222_v18 }
  0x56   : > { %5845 = vmatmul.mubr.msk.bf16.gmra.mrb[28].mxu0 %vm598_vm0, %v6223_v19 }
  0x57   : > { %5848 = vmatprep.mubr.msk.bf16.mxu0 %vm598_vm0, %v6224_v20 }
  0x5e   : > { %5849 = vmatmul.mubr.msk.bf16.gmra.mrb[32].mxu0 %vm598_vm0, %v6225_v21 }
  0x5f   : > { %5852 = vmatprep.mubr.msk.bf16.mxu0 %vm598_vm0, %v6226_v22 }
  0x66   : > { %5853 = vmatmul.mubr.msk.bf16.gmra.mrb[36].mxu0 %vm598_vm0, %v6227_v23 }
  0x67   : > { %5856 = vmatprep.mubr.msk.bf16.mxu0 %vm598_vm0, %v6228_v24 }
  0x6e   : > { %5857 = vmatmul.mubr.msk.bf16.gmra.mrb[40].mxu0 %vm598_vm0, %v6229_v25 }
  0x6f   : > { %5860 = vmatprep.mubr.msk.bf16.mxu0 %vm598_vm0, %v6230_v26 }
  0x76   : > { %5861 = vmatmul.mubr.msk.bf16.gmra.mrb[44].mxu0 %vm598_vm0, %v6231_v27 }
  0x77   : > { %5864 = vmatprep.mubr.msk.bf16.mxu0 %vm598_vm0, %v6232_v28 }
  0x7e   : > { %5865 = vmatmul.mubr.msk.bf16.gmra.mrb[48].mxu0 %vm598_vm0, %v6233_v29 }
  0x7f   : > { %5868 = vmatprep.mubr.msk.bf16.mxu0 %vm598_vm0, %v6234_v30 }
  0x86   : > { %5869 = vmatmul.mubr.msk.bf16.gmra.mrb[52].mxu0 %vm598_vm0, %v6235_v31 }
  0x87   : > { %5872 = vmatprep.mubr.msk.bf16.mxu0 %vm598_vm0, %v6236_v32 }
  0x8e   : > { %5873 = vmatmul.mubr.msk.bf16.gmra.mrb[56].mxu0 %vm598_vm0, %v6237_v33 }
  0x8f   : > { %5876 = vmatprep.mubr.msk.bf16.mxu0 %vm598_vm0, %v6238_v34 }
  0x96   : > { %5877 = vmatmul.mubr.msk.bf16.gmra.mrb[60].mxu0 %vm598_vm0, %v6239_v35 }
  0xf1   : > { %v5818_v37 = vpop.f32.mrb[0].mxu0 }
  0xf2   : > { %v6927_v38 = vadd.f32 %v5818_v37, %v6924_v36  ;;  %v729_v39 = vpop.f32.mrb[1].mxu0 }
  0xf3   : > { %v6930_v40 = vadd.f32 %v6924_v36, %v729_v39  ;;  %v5819_v41 = vpop.f32.mrb[2].mxu0 }
  0xf4   : > { %988 = vadd.xlane.f32.xlu1 %v6927_v38  ;;  %v732_v42 = vpop.f32.mrb[3].mxu0  ;;  %v6935_v43 = vadd.f32 %v5819_v41, %v6924_v36 }
  0xf5   : > { %984 = vadd.xlane.f32.xlu0 %v6930_v40  ;;  %v6938_v44 = vadd.f32 %v6924_v36, %v732_v42 }
  0xf8   : > { %990 = vadd.xlane.f32.xlu1 %v6935_v43 }
  0xf9   : > { %v5822_v45 = vpop.f32.mrb[4].mxu0  ;;  %986 = vadd.xlane.f32.xlu0 %v6938_v44 }
  0xfa   : > { %v6943_v46 = vadd.f32 %v5822_v45, %v6924_v36  ;;  %v745_v47 = vpop.f32.mrb[5].mxu0 }
  0xfb   : > { %v5823_v48 = vpop.f32.mrb[6].mxu0  ;;  %v6951_v51 = vadd.f32 %v6924_v36, %v745_v47 }
  0xfc   : > { %v6946_v49 = vadd.f32 %v5823_v48, %v6924_v36  ;;  %v748_v50 = vpop.f32.mrb[7].mxu0 }
  0xfd   : > { %996 = vadd.xlane.f32.xlu0 %v6943_v46  ;;  %v6954_v52 = vadd.f32 %v6924_v36, %v748_v50 }
  0xfe   : > { %998 = vadd.xlane.f32.xlu1 %v6946_v49 }
 0x101   : > { %v5826_v53 = vpop.f32.mrb[8].mxu0  ;;  %992 = vadd.xlane.f32.xlu0 %v6951_v51 }
 0x102   : > { %v6958_v54 = vadd.f32 %v5826_v53, %v6924_v36  ;;  %v761_v55 = vpop.f32.mrb[9].mxu0  ;;  %994 = vadd.xlane.f32.xlu1 %v6954_v52 }
 0x103   : > { %v5827_v56 = vpop.f32.mrb[10].mxu0  ;;  %v6967_v59 = vadd.f32 %v6924_v36, %v761_v55 }
 0x104   : > { %v6962_v57 = vadd.f32 %v5827_v56, %v6924_v36  ;;  %v764_v58 = vpop.f32.mrb[11].mxu0 }
 0x105   : > { %1004 = vadd.xlane.f32.xlu0 %v6958_v54  ;;  %v6970_v60 = vadd.f32 %v6924_v36, %v764_v58 }
 0x106   : > { %1006 = vadd.xlane.f32.xlu1 %v6962_v57 }
 0x109   : > { %v5830_v61 = vpop.f32.mrb[12].mxu0  ;;  %1000 = vadd.xlane.f32.xlu0 %v6967_v59 }
 0x10a   : > { %v6974_v62 = vadd.f32 %v5830_v61, %v6924_v36  ;;  %v777_v63 = vpop.f32.mrb[13].mxu0  ;;  %1002 = vadd.xlane.f32.xlu1 %v6970_v60 }
 0x10b   : > { %v5831_v0 = vpop.f32.mrb[14].mxu0  ;;  %v6983_v3 = vadd.f32 %v6924_v36, %v777_v63 }
 0x10c   : > { %v6978_v1 = vadd.f32 %v5831_v0, %v6924_v36  ;;  %v780_v2 = vpop.f32.mrb[15].mxu0 }
 0x10d   : > { %1012 = vadd.xlane.f32.xlu0 %v6974_v62  ;;  %v6986_v4 = vadd.f32 %v6924_v36, %v780_v2 }
 0x10e   : > { %1014 = vadd.xlane.f32.xlu1 %v6978_v1 }
 0x111   : > { %v5834_v5 = vpop.f32.mrb[16].mxu0  ;;  %1008 = vadd.xlane.f32.xlu0 %v6983_v3 }
 0x112   : > { %v6990_v6 = vadd.f32 %v5834_v5, %v6924_v36  ;;  %v793_v7 = vpop.f32.mrb[17].mxu0  ;;  %1010 = vadd.xlane.f32.xlu1 %v6986_v4 }
 0x113   : > { %v5835_v8 = vpop.f32.mrb[18].mxu0  ;;  %v6999_v11 = vadd.f32 %v6924_v36, %v793_v7 }
 0x114   : > { %v6994_v9 = vadd.f32 %v5835_v8, %v6924_v36  ;;  %v796_v10 = vpop.f32.mrb[19].mxu0 }
 0x115   : > { %1020 = vadd.xlane.f32.xlu0 %v6990_v6  ;;  %v7002_v12 = vadd.f32 %v6924_v36, %v796_v10 }
 0x116   : > { %1022 = vadd.xlane.f32.xlu1 %v6994_v9 }
 0x119   : > { %v5838_v13 = vpop.f32.mrb[20].mxu0  ;;  %1016 = vadd.xlane.f32.xlu0 %v6999_v11 }
 0x11a   : > { %v7006_v14 = vadd.f32 %v5838_v13, %v6924_v36  ;;  %v809_v15 = vpop.f32.mrb[21].mxu0  ;;  %1018 = vadd.xlane.f32.xlu1 %v7002_v12 }
 0x11b   : > { %v5839_v16 = vpop.f32.mrb[22].mxu0  ;;  %v7015_v19 = vadd.f32 %v6924_v36, %v809_v15 }
 0x11c   : > { %v7010_v17 = vadd.f32 %v5839_v16, %v6924_v36  ;;  %v812_v18 = vpop.f32.mrb[23].mxu0 }
 0x11d   : > { %1028 = vadd.xlane.f32.xlu0 %v7006_v14  ;;  %v7018_v20 = vadd.f32 %v6924_v36, %v812_v18 }
 0x11e   : > { %1030 = vadd.xlane.f32.xlu1 %v7010_v17 }
 0x121   : > { %v5842_v21 = vpop.f32.mrb[24].mxu0  ;;  %1024 = vadd.xlane.f32.xlu0 %v7015_v19 }
 0x122   : > { %v7022_v22 = vadd.f32 %v5842_v21, %v6924_v36  ;;  %v825_v23 = vpop.f32.mrb[25].mxu0  ;;  %1026 = vadd.xlane.f32.xlu1 %v7018_v20 }
 0x123   : > { %v5843_v24 = vpop.f32.mrb[26].mxu0  ;;  %v7029_v27 = vadd.f32 %v6924_v36, %v825_v23 }
 0x124   : > { %v7026_v25 = vadd.f32 %v5843_v24, %v6924_v36  ;;  %v828_v26 = vpop.f32.mrb[27].mxu0 }
 0x125   : > { %1036 = vadd.xlane.f32.xlu0 %v7022_v22  ;;  %v7034_v28 = vadd.f32 %v6924_v36, %v828_v26 }
 0x126   : > { %1038 = vadd.xlane.f32.xlu1 %v7026_v25 }
 0x129   : > { %v5846_v29 = vpop.f32.mrb[28].mxu0  ;;  %1032 = vadd.xlane.f32.xlu0 %v7029_v27 }
 0x12a   : > { %v7038_v30 = vadd.f32 %v5846_v29, %v6924_v36  ;;  %v841_v31 = vpop.f32.mrb[29].mxu0  ;;  %1034 = vadd.xlane.f32.xlu1 %v7034_v28 }
 0x12b   : > { %v5847_v32 = vpop.f32.mrb[30].mxu0  ;;  %v7045_v35 = vadd.f32 %v6924_v36, %v841_v31 }
 0x12c   : > { %v7042_v33 = vadd.f32 %v5847_v32, %v6924_v36  ;;  %v844_v34 = vpop.f32.mrb[31].mxu0 }
 0x12d   : > { %1044 = vadd.xlane.f32.xlu0 %v7038_v30  ;;  %v7050_v37 = vadd.f32 %v6924_v36, %v844_v34 }
 0x12e   : > { %1046 = vadd.xlane.f32.xlu1 %v7042_v33 }
 0x131   : > { %v5850_v39 = vpop.f32.mrb[32].mxu0  ;;  %1040 = vadd.xlane.f32.xlu0 %v7045_v35 }
 0x132   : > { %v7054_v41 = vadd.f32 %v5850_v39, %v6924_v36  ;;  %v857_v42 = vpop.f32.mrb[33].mxu0  ;;  %1042 = vadd.xlane.f32.xlu1 %v7050_v37 }
 0x133   : > { %v5851_v45 = vpop.f32.mrb[34].mxu0  ;;  %v7061_v50 = vadd.f32 %v6924_v36, %v857_v42 }
 0x134   : > { %v7058_v47 = vadd.f32 %v5851_v45, %v6924_v36  ;;  %v860_v48 = vpop.f32.mrb[35].mxu0 }
 0x135   : > { %1052 = vadd.xlane.f32.xlu0 %v7054_v41  ;;  %v7066_v53 = vadd.f32 %v6924_v36, %v860_v48 }
 0x136   : > { %1054 = vadd.xlane.f32.xlu1 %v7058_v47 }
 0x139   : > { %v5854_v55 = vpop.f32.mrb[36].mxu0  ;;  %1048 = vadd.xlane.f32.xlu0 %v7061_v50 }
 0x13a   : > { %v7070_v56 = vadd.f32 %v5854_v55, %v6924_v36  ;;  %v873_v58 = vpop.f32.mrb[37].mxu0  ;;  %1050 = vadd.xlane.f32.xlu1 %v7066_v53 }
 0x13b   : > { %v5855_v61 = vpop.f32.mrb[38].mxu0  ;;  %v7077_v2 = vadd.f32 %v6924_v36, %v873_v58 }
 0x13c   : > { %v7074_v63 = vadd.f32 %v5855_v61, %v6924_v36  ;;  %v876_v0 = vpop.f32.mrb[39].mxu0 }
 0x13d   : > { %1060 = vadd.xlane.f32.xlu0 %v7070_v56  ;;  %v7082_v5 = vadd.f32 %v6924_v36, %v876_v0 }
 0x13e   : > { %1062 = vadd.xlane.f32.xlu1 %v7074_v63 }
 0x141   : > { %v5858_v7 = vpop.f32.mrb[40].mxu0  ;;  %1056 = vadd.xlane.f32.xlu0 %v7077_v2 }
 0x142   : > { %v7086_v8 = vadd.f32 %v5858_v7, %v6924_v36  ;;  %v889_v10 = vpop.f32.mrb[41].mxu0  ;;  %1058 = vadd.xlane.f32.xlu1 %v7082_v5 }
 0x143   : > { %v5859_v13 = vpop.f32.mrb[42].mxu0  ;;  %v7093_v18 = vadd.f32 %v6924_v36, %v889_v10 }
 0x144   : > { %v7090_v15 = vadd.f32 %v5859_v13, %v6924_v36  ;;  %v892_v16 = vpop.f32.mrb[43].mxu0 }
 0x145   : > { %1068 = vadd.xlane.f32.xlu0 %v7086_v8  ;;  %v7098_v21 = vadd.f32 %v6924_v36, %v892_v16 }
 0x146   : > { %1070 = vadd.xlane.f32.xlu1 %v7090_v15 }
 0x149   : > { %v5862_v23 = vpop.f32.mrb[44].mxu0  ;;  %1064 = vadd.xlane.f32.xlu0 %v7093_v18 }
 0x14a   : > { %v7102_v24 = vadd.f32 %v5862_v23, %v6924_v36  ;;  %v905_v26 = vpop.f32.mrb[45].mxu0  ;;  %1066 = vadd.xlane.f32.xlu1 %v7098_v21 }
 0x14b   : > { %v5863_v29 = vpop.f32.mrb[46].mxu0  ;;  %v7109_v34 = vadd.f32 %v6924_v36, %v905_v26 }
 0x14c   : > { %v7106_v31 = vadd.f32 %v5863_v29, %v6924_v36  ;;  %v908_v32 = vpop.f32.mrb[47].mxu0 }
 0x14d   : > { %1076 = vadd.xlane.f32.xlu0 %v7102_v24  ;;  %v7114_v39 = vadd.f32 %v6924_v36, %v908_v32 }
 0x14e   : > { %1078 = vadd.xlane.f32.xlu1 %v7106_v31 }
 0x151   : > { %v5866_v42 = vpop.f32.mrb[48].mxu0  ;;  %1072 = vadd.xlane.f32.xlu0 %v7109_v34 }
 0x152   : > { %v7118_v45 = vadd.f32 %v5866_v42, %v6924_v36  ;;  %v921_v48 = vpop.f32.mrb[49].mxu0  ;;  %1074 = vadd.xlane.f32.xlu1 %v7114_v39 }
 0x153   : > { %v5867_v55 = vpop.f32.mrb[50].mxu0  ;;  %v7125_v0 = vadd.f32 %v6924_v36, %v921_v48 }
 0x154   : > { %10050 = vst [vmem:[#allocation2_spill] sm:$0xff] %v7118_v45  ;;  %v7122_v58 = vadd.f32 %v5867_v55, %v6924_v36  ;;  %v924_v61 = vpop.f32.mrb[51].mxu0 }
 0x155   : > { %10052 = vst [vmem:[#allocation4_spill] sm:$0xff] %v7125_v0  ;;  %1084 = vadd.xlane.f32.xlu0 %v7118_v45  ;;  %v7130_v7 = vadd.f32 %v6924_v36, %v924_v61 }
 0x156   : > { %10051 = vst [vmem:[#allocation3_spill] sm:$0xff] %v7122_v58  ;;  %1086 = vadd.xlane.f32.xlu1 %v7122_v58 }
 0x157   : > { %10053 = vst [vmem:[#allocation5_spill] sm:$0xff] %v7130_v7 }
 0x159   : > { %v5870_v10 = vpop.f32.mrb[52].mxu0  ;;  %1080 = vadd.xlane.f32.xlu0 %v7125_v0 }
 0x15a   : > { %v7134_v13 = vadd.f32 %v5870_v10, %v6924_v36  ;;  %v937_v16 = vpop.f32.mrb[53].mxu0  ;;  %1082 = vadd.xlane.f32.xlu1 %v7130_v7 }
 0x15b   : > { %v5871_v23 = vpop.f32.mrb[54].mxu0  ;;  %v7141_v32 = vadd.f32 %v6924_v36, %v937_v16 }
 0x15c   : > { %10054 = vst [vmem:[#allocation6_spill] sm:$0xff] %v7134_v13  ;;  %v7138_v26 = vadd.f32 %v5871_v23, %v6924_v36  ;;  %v940_v29 = vpop.f32.mrb[55].mxu0 }
 0x15d   : > { %10056 = vst [vmem:[#allocation8_spill] sm:$0xff] %v7141_v32  ;;  %1092 = vadd.xlane.f32.xlu0 %v7134_v13  ;;  %v7146_v42 = vadd.f32 %v6924_v36, %v940_v29 }
 0x15e   : > { %10055 = vst [vmem:[#allocation7_spill] sm:$0xff] %v7138_v26  ;;  %1094 = vadd.xlane.f32.xlu1 %v7138_v26 }
 0x15f   : > { %10057 = vst [vmem:[#allocation9_spill] sm:$0xff] %v7146_v42 }
 0x161   : > { %v5874_v48 = vpop.f32.mrb[56].mxu0  ;;  %1088 = vadd.xlane.f32.xlu0 %v7141_v32 }
 0x162   : > { %v7150_v55 = vadd.f32 %v5874_v48, %v6924_v36  ;;  %v953_v61 = vpop.f32.mrb[57].mxu0  ;;  %1090 = vadd.xlane.f32.xlu1 %v7146_v42 }
 0x163   : > { %v5875_v10 = vpop.f32.mrb[58].mxu0  ;;  %v7157_v13 = vadd.f32 %v6924_v36, %v953_v61 }
 0x164   : > { %10058 = vst [vmem:[#allocation10_spill] sm:$0xff] %v7150_v55  ;;  %v7154_v16 = vadd.f32 %v5875_v10, %v6924_v36  ;;  %v956_v23 = vpop.f32.mrb[59].mxu0 }
 0x165   : > { %10060 = vst [vmem:[#allocation12_spill] sm:$0xff] %v7157_v13  ;;  %1100 = vadd.xlane.f32.xlu0 %v7150_v55  ;;  %v7162_v29 = vadd.f32 %v6924_v36, %v956_v23 }
 0x166   : > { %10059 = vst [vmem:[#allocation11_spill] sm:$0xff] %v7154_v16  ;;  %1102 = vadd.xlane.f32.xlu1 %v7154_v16 }
 0x167   : > { %10061 = vst [vmem:[#allocation13_spill] sm:$0xff] %v7162_v29 }
 0x169   : > { %v7164_v48 = vpop.f32.mrb[60].mxu0  ;;  %1096 = vadd.xlane.f32.xlu0 %v7157_v13 }
 0x16a   : > { %v969_v26 = vpop.f32.mrb[61].mxu0  ;;  %1098 = vadd.xlane.f32.xlu1 %v7162_v29 }
 0x16b   : > { %v7169_v10 = vadd.f32 %v6924_v36, %v969_v26  ;;  %v7171_v42 = vpop.f32.mrb[62].mxu0 }
 0x16c   : > { %v972_v61 = vpop.f32.mrb[63].mxu0 }
 0x16d   : > { %10062 = vst [vmem:[#allocation14_spill] sm:$0xff] %v7169_v10  ;;  %v7174_v55 = vadd.f32 %v6924_v36, %v972_v61  ;;  %1104 = vadd.xlane.f32.xlu0 %v7169_v10 }
 0x16f   : > { %10063 = vst [vmem:[#allocation15_spill] sm:$0xff] %v7174_v55  ;;  %1106 = vadd.xlane.f32.xlu1 %v7174_v55 }
 0x181   : > { %v989_v23 = vpop.xlane.xlu1 %988 }
 0x182   : > { %v1115_v16 = vmul.f32 0.0078125, %v989_v23  ;;  %v985_v32 = vpop.xlane.xlu0 %984 }
 0x183   : > { %v1113_v13 = vmul.f32 0.0078125, %v985_v32 }
 0x184   : > { %v7179_v58 = vsub.f32 %v6927_v38, %v1115_v16 }
 0x185   : > { %v991_v29 = vpop.xlane.xlu1 %990  ;;  %v7184_v61 = vsub.f32 %v6930_v40, %v1113_v13 }
 0x186   : > { %10064 = vst [vmem:[#allocation16_spill] sm:$0xff] %v7179_v58  ;;  %v1116_v26 = vmul.f32 0.0078125, %v991_v29  ;;  %v987_v45 = vpop.xlane.xlu0 %986  ;;  %v1243_v7 = vmul.f32 %v7179_v58, %v7179_v58 }
 0x187   : > { %v1114_v0 = vmul.f32 0.0078125, %v987_v45  ;;  %v1241_v38 = vmul.f32 %v7184_v61, %v7184_v61 }
 0x188   : > { %1309 = vadd.xlane.f32.xlu0 %v1243_v7  ;;  %v7187_v55 = vsub.f32 %v6935_v43, %v1116_v26 }
 0x189   : > { %v7194_v16 = vsub.f32 %v6938_v44, %v1114_v0 }
 0x18a   : > { %v997_v23 = vpop.xlane.xlu0 %996  ;;  %v1244_v32 = vmul.f32 %v7187_v55, %v7187_v55 }
 0x18b   : > { %v1119_v29 = vmul.f32 0.0078125, %v997_v23  ;;  %v999_v58 = vpop.xlane.xlu1 %998  ;;  %v1242_v45 = vmul.f32 %v7194_v16, %v7194_v16 }
 0x18c   : > { %v1120_v10 = vmul.f32 0.0078125, %v999_v58  ;;  %1311 = vadd.xlane.f32.xlu1 %v1244_v32  ;;  %1305 = vadd.xlane.f32.xlu0 %v1241_v38 }
 0x18d   : > { %v7197_v40 = vsub.f32 %v6943_v46, %v1119_v29 }
 0x18e   : > { %v993_v43 = vpop.xlane.xlu0 %992  ;;  %v7202_v7 = vsub.f32 %v6946_v49, %v1120_v10 }
 0x18f   : > { %v1117_v13 = vmul.f32 0.0078125, %v993_v43  ;;  %v995_v26 = vpop.xlane.xlu1 %994  ;;  %v1247_v44 = vmul.f32 %v7197_v40, %v7197_v40 }
 0x190   : > { %v1118_v0 = vmul.f32 0.0078125, %v995_v26  ;;  %1307 = vadd.xlane.f32.xlu1 %v1242_v45  ;;  %v1248_v23 = vmul.f32 %v7202_v7, %v7202_v7 }
 0x191   : > { %1317 = vadd.xlane.f32.xlu0 %v1247_v44  ;;  %v7207_v58 = vsub.f32 %v6951_v51, %v1117_v13 }
 0x192   : > { %v1005_v46 = vpop.xlane.xlu0 %1004  ;;  %v7212_v32 = vsub.f32 %v6954_v52, %v1118_v0 }
 0x193   : > { %v1123_v49 = vmul.f32 0.0078125, %v1005_v46  ;;  %v1007_v10 = vpop.xlane.xlu1 %1006  ;;  %v1245_v38 = vmul.f32 %v7207_v58, %v7207_v58 }
 0x194   : > { %v1124_v29 = vmul.f32 0.0078125, %v1007_v10  ;;  %1319 = vadd.xlane.f32.xlu1 %v1248_v23  ;;  %v1246_v45 = vmul.f32 %v7212_v32, %v7212_v32 }
 0x195   : > { %1313 = vadd.xlane.f32.xlu0 %v1245_v38  ;;  %v7217_v43 = vsub.f32 %v6958_v54, %v1123_v49 }
 0x196   : > { %v1001_v51 = vpop.xlane.xlu0 %1000  ;;  %v7222_v13 = vsub.f32 %v6962_v57, %v1124_v29 }
 0x197   : > { %v1121_v52 = vmul.f32 0.0078125, %v1001_v51  ;;  %v1003_v26 = vpop.xlane.xlu1 %1002  ;;  %v1251_v44 = vmul.f32 %v7217_v43, %v7217_v43 }
 0x198   : > { %v1122_v0 = vmul.f32 0.0078125, %v1003_v26  ;;  %1315 = vadd.xlane.f32.xlu1 %v1246_v45  ;;  %v1252_v23 = vmul.f32 %v7222_v13, %v7222_v13 }
 0x199   : > { %1325 = vadd.xlane.f32.xlu0 %v1251_v44  ;;  %v7227_v46 = vsub.f32 %v6967_v59, %v1121_v52 }
 0x19a   : > { %v1013_v54 = vpop.xlane.xlu0 %1012  ;;  %v7232_v49 = vsub.f32 %v6970_v60, %v1122_v0 }
 0x19b   : > { %v1127_v57 = vmul.f32 0.0078125, %v1013_v54  ;;  %v1015_v10 = vpop.xlane.xlu1 %1014  ;;  %v1249_v38 = vmul.f32 %v7227_v46, %v7227_v46 }
 0x19c   : > { %v1128_v29 = vmul.f32 0.0078125, %v1015_v10  ;;  %1327 = vadd.xlane.f32.xlu1 %v1252_v23  ;;  %v1250_v45 = vmul.f32 %v7232_v49, %v7232_v49 }
 0x19d   : > { %1321 = vadd.xlane.f32.xlu0 %v1249_v38  ;;  %v7237_v51 = vsub.f32 %v6974_v62, %v1127_v57 }
 0x19e   : > { %v1009_v59 = vpop.xlane.xlu0 %1008  ;;  %v7242_v52 = vsub.f32 %v6978_v1, %v1128_v29 }
 0x19f   : > { %v1125_v60 = vmul.f32 0.0078125, %v1009_v59  ;;  %v1011_v26 = vpop.xlane.xlu1 %1010  ;;  %v1255_v44 = vmul.f32 %v7237_v51, %v7237_v51 }
 0x1a0   : > { %v1126_v0 = vmul.f32 0.0078125, %v1011_v26  ;;  %1323 = vadd.xlane.f32.xlu1 %v1250_v45  ;;  %v1256_v23 = vmul.f32 %v7242_v52, %v7242_v52 }
 0x1a1   : > { %1333 = vadd.xlane.f32.xlu0 %v1255_v44  ;;  %v7247_v54 = vsub.f32 %v6983_v3, %v1125_v60 }
 0x1a2   : > { %v1021_v62 = vpop.xlane.xlu0 %1020  ;;  %v7252_v57 = vsub.f32 %v6986_v4, %v1126_v0 }
 0x1a3   : > { %v1131_v1 = vmul.f32 0.0078125, %v1021_v62  ;;  %v1023_v10 = vpop.xlane.xlu1 %1022  ;;  %v1253_v38 = vmul.f32 %v7247_v54, %v7247_v54 }
 0x1a4   : > { %v1132_v29 = vmul.f32 0.0078125, %v1023_v10  ;;  %1335 = vadd.xlane.f32.xlu1 %v1256_v23  ;;  %v1254_v45 = vmul.f32 %v7252_v57, %v7252_v57 }
 0x1a5   : > { %1329 = vadd.xlane.f32.xlu0 %v1253_v38  ;;  %v7257_v59 = vsub.f32 %v6990_v6, %v1131_v1 }
 0x1a6   : > { %v1017_v3 = vpop.xlane.xlu0 %1016  ;;  %v7262_v60 = vsub.f32 %v6994_v9, %v1132_v29 }
 0x1a7   : > { %v1129_v4 = vmul.f32 0.0078125, %v1017_v3  ;;  %v1019_v26 = vpop.xlane.xlu1 %1018  ;;  %v1259_v44 = vmul.f32 %v7257_v59, %v7257_v59 }
 0x1a8   : > { %v1130_v0 = vmul.f32 0.0078125, %v1019_v26  ;;  %1331 = vadd.xlane.f32.xlu1 %v1254_v45  ;;  %v1260_v23 = vmul.f32 %v7262_v60, %v7262_v60 }
 0x1a9   : > { %1341 = vadd.xlane.f32.xlu0 %v1259_v44  ;;  %v7267_v62 = vsub.f32 %v6999_v11, %v1129_v4 }
 0x1aa   : > { %v1029_v6 = vpop.xlane.xlu0 %1028  ;;  %v7272_v1 = vsub.f32 %v7002_v12, %v1130_v0  ;;  %v6240_v12 = vld [vmem:[%s9947_s3] sm:$0xff]  }
 0x1ab   : > { %v1135_v9 = vmul.f32 0.0078125, %v1029_v6  ;;  %v1031_v10 = vpop.xlane.xlu1 %1030  ;;  %v1257_v38 = vmul.f32 %v7267_v62, %v7267_v62  ;;  %5880 = vmatprep.subr.bf16.mxu1 %v6240_v12 }
 0x1ac   : > { %v1136_v29 = vmul.f32 0.0078125, %v1031_v10  ;;  %1343 = vadd.xlane.f32.xlu1 %v1260_v23  ;;  %v1258_v45 = vmul.f32 %v7272_v1, %v7272_v1  ;;  %5881 = vmatpush3.bf16.msra.mxu1 %v6240_v12  ;;  %v6241_v10 = vld [vmem:[%s9947_s3 + $0x8] sm:$0xff]  }
 0x1ad   : > { %1337 = vadd.xlane.f32.xlu0 %v1257_v38  ;;  %v7277_v3 = vsub.f32 %v7006_v14, %v1135_v9  ;;  %5882 = vmatprep.subr.bf16.mxu1 %v6241_v10 }
 0x1ae   : > { %v1025_v11 = vpop.xlane.xlu0 %1024  ;;  %v7282_v4 = vsub.f32 %v7010_v17, %v1136_v29 }
 0x1af   : > { %v1133_v26 = vmul.f32 0.0078125, %v1025_v11  ;;  %v1027_v44 = vpop.xlane.xlu1 %1026  ;;  %v1263_v0 = vmul.f32 %v7277_v3, %v7277_v3 }
 0x1b0   : > { %v1134_v6 = vmul.f32 0.0078125, %v1027_v44  ;;  %1339 = vadd.xlane.f32.xlu1 %v1258_v45  ;;  %v1264_v17 = vmul.f32 %v7282_v4, %v7282_v4  ;;  %5883 = vmatpush3.bf16.msra.mxu1 %v6241_v10  ;;  %v7309_v45 = vadd.f32 %v7164_v48, %v6924_v36 }
 0x1b1   : > { %1349 = vadd.xlane.f32.xlu0 %v1263_v0  ;;  %v7290_v14 = vsub.f32 %v7015_v19, %v1133_v26 }
 0x1b2   : > { %v1037_v23 = vpop.xlane.xlu0 %1036  ;;  %v7295_v9 = vsub.f32 %v7018_v20, %v1134_v6  ;;  %v6242_v20 = vld [vmem:[%s9947_s3 + $0x10] sm:$0xff]  }
 0x1b3   : > { %v1039_v38 = vpop.xlane.xlu1 %1038  ;;  %v1261_v29 = vmul.f32 %v7290_v14, %v7290_v14  ;;  %v1139_v12 = vmul.f32 0.0078125, %v1037_v23  ;;  %5884 = vmatprep.subr.bf16.mxu1 %v6242_v20  ;;  %v6243_v23 = vld [vmem:[%s9947_s3 + $0x18] sm:$0xff]  }
 0x1b4   : > { %1351 = vadd.xlane.f32.xlu1 %v1264_v17  ;;  %v1262_v11 = vmul.f32 %v7295_v9, %v7295_v9  ;;  %5885 = vmatpush3.bf16.msra.mxu1 %v6242_v20  ;;  %v7317_v17 = vadd.f32 %v7171_v42, %v6924_v36  ;;  %v1140_v10 = vmul.f32 0.0078125, %v1039_v38  ;;  %v6244_v38 = vld [vmem:[%s9947_s3 + $0x20] sm:$0xff]  }
 0x1b5   : > { %1345 = vadd.xlane.f32.xlu0 %v1261_v29  ;;  %5886 = vmatprep.subr.bf16.mxu1 %v6243_v23 }
 0x1b6   : > { %v1033_v19 = vpop.xlane.xlu0 %1032  ;;  %v7334_v42 = vsub.f32 %v7026_v25, %v1140_v10 }
 0x1b7   : > { %v1137_v26 = vmul.f32 0.0078125, %v1033_v19  ;;  %v1035_v44 = vpop.xlane.xlu1 %1034 }
 0x1b8   : > { %v1138_v0 = vmul.f32 0.0078125, %v1035_v44  ;;  %1347 = vadd.xlane.f32.xlu1 %v1262_v11  ;;  %5887 = vmatpush3.bf16.msra.mxu1 %v6243_v23  ;;  %v1268_v23 = vmul.f32 %v7334_v42, %v7334_v42 }
 0x1b9   : > { %1108 = vadd.xlane.f32.xlu0 %v7309_v45  ;;  %v7313_v6 = vsub.f32 %v7029_v27, %v1137_v26  ;;  %v7328_v27 = vsub.f32 %v7022_v22, %v1139_v12  ;;  %5888 = vmatprep.subr.bf16.mxu1 %v6244_v38 }
 0x1ba   : > { %v1045_v29 = vpop.xlane.xlu0 %1044  ;;  %v7320_v48 = vsub.f32 %v7034_v28, %v1138_v0 }
 0x1bb   : > { %v1047_v19 = vpop.xlane.xlu1 %1046  ;;  %v1265_v11 = vmul.f32 %v7313_v6, %v7313_v6  ;;  %v1143_v20 = vmul.f32 0.0078125, %v1045_v29  ;;  %v1267_v12 = vmul.f32 %v7328_v27, %v7328_v27 }
 0x1bc   : > { %1110 = vadd.xlane.f32.xlu1 %v7317_v17  ;;  %v1266_v28 = vmul.f32 %v7320_v48, %v7320_v48  ;;  %5889 = vmatpush3.bf16.msra.mxu1 %v6244_v38  ;;  %v1144_v25 = vmul.f32 0.0078125, %v1047_v19 }
 0x1bd   : > { %1353 = vadd.xlane.f32.xlu0 %v1265_v11  ;;  %v6245_v11 = vld [vmem:[%s9947_s3 + $0x28] sm:$0xff]  }
 0x1be   : > { %v1041_v36 = vpop.xlane.xlu0 %1040  ;;  %5890 = vmatprep.subr.bf16.mxu1 %v6245_v11  ;;  %v7360_v38 = vsub.f32 %v7042_v33, %v1144_v25 }
 0x1bf   : > { %v1141_v26 = vmul.f32 0.0078125, %v1041_v36  ;;  %v1043_v22 = vpop.xlane.xlu1 %1042 }
 0x1c0   : > { %v1142_v44 = vmul.f32 0.0078125, %v1043_v22  ;;  %1355 = vadd.xlane.f32.xlu1 %v1266_v28  ;;  %5891 = vmatpush3.bf16.msra.mxu1 %v6245_v11  ;;  %v1272_v11 = vmul.f32 %v7360_v38, %v7360_v38 }
 0x1c1   : > { %1357 = vadd.xlane.f32.xlu0 %v1267_v12  ;;  %v7342_v0 = vsub.f32 %v7045_v35, %v1141_v26  ;;  %v7355_v35 = vsub.f32 %v7038_v30, %v1143_v20  ;;  %v6246_v26 = vld [vmem:[%s9947_s3 + $0x30] sm:$0xff]  }
 0x1c2   : > { %v1053_v10 = vpop.xlane.xlu0 %1052  ;;  %v7347_v29 = vsub.f32 %v7050_v37, %v1142_v44  ;;  %5892 = vmatprep.subr.bf16.mxu1 %v6246_v26 }
 0x1c3   : > { %v1055_v36 = vpop.xlane.xlu1 %1054  ;;  %v1269_v28 = vmul.f32 %v7342_v0, %v7342_v0  ;;  %v1147_v22 = vmul.f32 0.0078125, %v1053_v10  ;;  %v1271_v30 = vmul.f32 %v7355_v35, %v7355_v35 }
 0x1c4   : > { %1359 = vadd.xlane.f32.xlu1 %v1268_v23  ;;  %v1270_v37 = vmul.f32 %v7347_v29, %v7347_v29  ;;  %5893 = vmatpush3.bf16.msra.mxu1 %v6246_v26  ;;  %v1148_v33 = vmul.f32 0.0078125, %v1055_v36 }
 0x1c5   : > { %1361 = vadd.xlane.f32.xlu0 %v1269_v28  ;;  %v6247_v28 = vld [vmem:[%s9947_s3 + $0x38] sm:$0xff]  }
 0x1c6   : > { %v1049_v19 = vpop.xlane.xlu0 %1048  ;;  %5894 = vmatprep.subr.bf16.mxu1 %v6247_v28  ;;  %v7384_v36 = vsub.f32 %v7058_v47, %v1148_v33 }
 0x1c7   : > { %v1145_v12 = vmul.f32 0.0078125, %v1049_v19  ;;  %v1051_v44 = vpop.xlane.xlu1 %1050  ;;  %v7379_v19 = vsub.f32 %v7054_v41, %v1147_v22 }
 0x1c8   : > { %v1146_v20 = vmul.f32 0.0078125, %v1051_v44  ;;  %1363 = vadd.xlane.f32.xlu1 %v1270_v37  ;;  %5895 = vmatpush3.bf16.msra.mxu1 %v6247_v28  ;;  %10068 = vst [vmem:[#allocation20_spill] sm:$0xff] %v7384_v36  ;;  %v1276_v28 = vmul.f32 %v7384_v36, %v7384_v36 }
 0x1c9   : > { %1365 = vadd.xlane.f32.xlu0 %v1271_v30  ;;  %v7368_v23 = vsub.f32 %v7061_v50, %v1145_v12  ;;  %10067 = vst [vmem:[#allocation19_spill] sm:$0xff] %v7379_v19  ;;  %v1275_v41 = vmul.f32 %v7379_v19, %v7379_v19 }
 0x1ca   : > { %v1061_v25 = vpop.xlane.xlu0 %1060  ;;  %v7373_v10 = vsub.f32 %v7066_v53, %v1146_v20 }
 0x1cb   : > { %10065 = vst [vmem:[#allocation17_spill] sm:$0xff] %v7368_v23  ;;  %v1063_v37 = vpop.xlane.xlu1 %1062  ;;  %v1273_v50 = vmul.f32 %v7368_v23, %v7368_v23  ;;  %v1151_v12 = vmul.f32 0.0078125, %v1061_v25 }
 0x1cc   : > { %10066 = vst [vmem:[#allocation18_spill] sm:$0xff] %v7373_v10  ;;  %1367 = vadd.xlane.f32.xlu1 %v1272_v11  ;;  %v1274_v26 = vmul.f32 %v7373_v10, %v7373_v10  ;;  %v1152_v11 = vmul.f32 0.0078125, %v1063_v37 }
 0x1cd   : > { %1369 = vadd.xlane.f32.xlu0 %v1273_v50  ;;  %v7399_v25 = vsub.f32 %v7070_v56, %v1151_v12 }
 0x1ce   : > { %v1057_v53 = vpop.xlane.xlu0 %1056 }
 0x1cf   : > { %v1149_v44 = vmul.f32 0.0078125, %v1057_v53  ;;  %v1059_v30 = vpop.xlane.xlu1 %1058  ;;  %10071 = vst [vmem:[#allocation23_spill] sm:$0xff] %v7399_v25  ;;  %v1279_v56 = vmul.f32 %v7399_v25, %v7399_v25 }
 0x1d0   : > { %v1150_v22 = vmul.f32 0.0078125, %v1059_v30  ;;  %1371 = vadd.xlane.f32.xlu1 %v1274_v26 }
 0x1d1   : > { %v7391_v20 = vsub.f32 %v7077_v2, %v1149_v44  ;;  %1373 = vadd.xlane.f32.xlu0 %v1275_v41  ;;  %v7404_v2 = vsub.f32 %v7074_v63, %v1152_v11 }
 0x1d2   : > { %v7394_v47 = vsub.f32 %v7082_v5, %v1150_v22  ;;  %v1069_v33 = vpop.xlane.xlu0 %1068 }
 0x1d3   : > { %10069 = vst [vmem:[#allocation21_spill] sm:$0xff] %v7391_v20  ;;  %v1071_v50 = vpop.xlane.xlu1 %1070  ;;  %v1277_v53 = vmul.f32 %v7391_v20, %v7391_v20  ;;  %10072 = vst [vmem:[#allocation24_spill] sm:$0xff] %v7404_v2  ;;  %v1155_v26 = vmul.f32 0.0078125, %v1069_v33 }
 0x1d4   : > { %10070 = vst [vmem:[#allocation22_spill] sm:$0xff] %v7394_v47  ;;  %1375 = vadd.xlane.f32.xlu1 %v1276_v28  ;;  %v1278_v5 = vmul.f32 %v7394_v47, %v7394_v47  ;;  %v1156_v22 = vmul.f32 0.0078125, %v1071_v50  ;;  %v1280_v28 = vmul.f32 %v7404_v2, %v7404_v2 }
 0x1d5   : > { %1377 = vadd.xlane.f32.xlu0 %v1277_v53  ;;  %v7419_v33 = vsub.f32 %v7086_v8, %v1155_v26 }
 0x1d6   : > { %v1065_v37 = vpop.xlane.xlu0 %1064 }
 0x1d7   : > { %v1153_v44 = vmul.f32 0.0078125, %v1065_v37  ;;  %v1067_v30 = vpop.xlane.xlu1 %1066  ;;  %10075 = vst [vmem:[#allocation27_spill] sm:$0xff] %v7419_v33  ;;  %v1283_v8 = vmul.f32 %v7419_v33, %v7419_v33 }
 0x1d8   : > { %v1154_v12 = vmul.f32 0.0078125, %v1067_v30  ;;  %1379 = vadd.xlane.f32.xlu1 %v1278_v5 }
 0x1d9   : > { %v7411_v41 = vsub.f32 %v7093_v18, %v1153_v44  ;;  %1381 = vadd.xlane.f32.xlu0 %v1279_v56  ;;  %v7424_v18 = vsub.f32 %v7090_v15, %v1156_v22 }
 0x1da   : > { %v7414_v63 = vsub.f32 %v7098_v21, %v1154_v12  ;;  %v1077_v11 = vpop.xlane.xlu0 %1076 }
 0x1db   : > { %10073 = vst [vmem:[#allocation25_spill] sm:$0xff] %v7411_v41  ;;  %v1079_v53 = vpop.xlane.xlu1 %1078  ;;  %v1281_v37 = vmul.f32 %v7411_v41, %v7411_v41  ;;  %10076 = vst [vmem:[#allocation28_spill] sm:$0xff] %v7424_v18  ;;  %v1159_v5 = vmul.f32 0.0078125, %v1077_v11 }
 0x1dc   : > { %10074 = vst [vmem:[#allocation26_spill] sm:$0xff] %v7414_v63  ;;  %1383 = vadd.xlane.f32.xlu1 %v1280_v28  ;;  %v1282_v21 = vmul.f32 %v7414_v63, %v7414_v63  ;;  %v1160_v12 = vmul.f32 0.0078125, %v1079_v53  ;;  %v1284_v28 = vmul.f32 %v7424_v18, %v7424_v18 }
 0x1dd   : > { %1385 = vadd.xlane.f32.xlu0 %v1281_v37  ;;  %v7439_v11 = vsub.f32 %v7102_v24, %v1159_v5 }
 0x1de   : > { %v1073_v50 = vpop.xlane.xlu0 %1072 }
 0x1df   : > { %v1157_v44 = vmul.f32 0.0078125, %v1073_v50  ;;  %v1075_v30 = vpop.xlane.xlu1 %1074  ;;  %10079 = vst [vmem:[#allocation31_spill] sm:$0xff] %v7439_v11  ;;  %v1287_v24 = vmul.f32 %v7439_v11, %v7439_v11 }
 0x1e0   : > { %v1158_v26 = vmul.f32 0.0078125, %v1075_v30  ;;  %1387 = vadd.xlane.f32.xlu1 %v1282_v21 }
 0x1e1   : > { %v7431_v56 = vsub.f32 %v7109_v34, %v1157_v44  ;;  %1389 = vadd.xlane.f32.xlu0 %v1283_v8  ;;  %v7444_v34 = vsub.f32 %v7106_v31, %v1160_v12  ;;  %v10081_v8 = vld [vmem:[#allocation4_spill] sm:$0xff] }
 0x1e2   : > { %v7434_v15 = vsub.f32 %v7114_v39, %v1158_v26  ;;  %v1085_v22 = vpop.xlane.xlu0 %1084 }
 0x1e3   : > { %10077 = vst [vmem:[#allocation29_spill] sm:$0xff] %v7431_v56  ;;  %v1087_v37 = vpop.xlane.xlu1 %1086  ;;  %v1285_v50 = vmul.f32 %v7431_v56, %v7431_v56  ;;  %10080 = vst [vmem:[#allocation32_spill] sm:$0xff] %v7444_v34  ;;  %v1163_v21 = vmul.f32 0.0078125, %v1085_v22  ;;  %v10085_v22 = vld [vmem:[#allocation2_spill] sm:$0xff] }
 0x1e4   : > { %10078 = vst [vmem:[#allocation30_spill] sm:$0xff] %v7434_v15  ;;  %1391 = vadd.xlane.f32.xlu1 %v1284_v28  ;;  %v1286_v39 = vmul.f32 %v7434_v15, %v7434_v15  ;;  %v1164_v28 = vmul.f32 0.0078125, %v1087_v37  ;;  %v1288_v15 = vmul.f32 %v7444_v34, %v7444_v34  ;;  %v10089_v34 = vld [vmem:[#allocation8_spill] sm:$0xff] }
 0x1e5   : > { %1393 = vadd.xlane.f32.xlu0 %v1285_v50  ;;  %v10083_v50 = vld [vmem:[#allocation5_spill] sm:$0xff] }
 0x1e6   : > { %v1081_v53 = vpop.xlane.xlu0 %1080 }
 0x1e7   : > { %v1161_v44 = vmul.f32 0.0078125, %v1081_v53  ;;  %v1083_v30 = vpop.xlane.xlu1 %1082  ;;  %v7459_v53 = vsub.f32 %v10085_v22, %v1163_v21 }
 0x1e8   : > { %v1162_v5 = vmul.f32 0.0078125, %v1083_v30  ;;  %1395 = vadd.xlane.f32.xlu1 %v1286_v39  ;;  %v10087_v39 = vld [vmem:[#allocation3_spill] sm:$0xff] }
 0x1e9   : > { %v7451_v26 = vsub.f32 %v10081_v8, %v1161_v44  ;;  %1397 = vadd.xlane.f32.xlu0 %v1287_v24  ;;  %10086 = vst [vmem:[#allocation2_spill] sm:$0xff] %v7459_v53  ;;  %v7464_v44 = vsub.f32 %v10087_v39, %v1164_v28  ;;  %v1291_v21 = vmul.f32 %v7459_v53, %v7459_v53 }
 0x1ea   : > { %v7454_v31 = vsub.f32 %v10083_v50, %v1162_v5  ;;  %v1093_v12 = vpop.xlane.xlu0 %1092 }
 0x1eb   : > { %10082 = vst [vmem:[#allocation4_spill] sm:$0xff] %v7451_v26  ;;  %v1095_v56 = vpop.xlane.xlu1 %1094  ;;  %v1289_v30 = vmul.f32 %v7451_v26, %v7451_v26  ;;  %10088 = vst [vmem:[#allocation3_spill] sm:$0xff] %v7464_v44  ;;  %v1167_v5 = vmul.f32 0.0078125, %v1093_v12  ;;  %v10093_v12 = vld [vmem:[#allocation6_spill] sm:$0xff] }
 0x1ec   : > { %10084 = vst [vmem:[#allocation5_spill] sm:$0xff] %v7454_v31  ;;  %1399 = vadd.xlane.f32.xlu1 %v1288_v15  ;;  %v1290_v24 = vmul.f32 %v7454_v31, %v7454_v31  ;;  %v1168_v15 = vmul.f32 0.0078125, %v1095_v56  ;;  %v1292_v31 = vmul.f32 %v7464_v44, %v7464_v44  ;;  %v10097_v44 = vld [vmem:[#allocation12_spill] sm:$0xff] }
 0x1ed   : > { %1401 = vadd.xlane.f32.xlu0 %v1289_v30  ;;  %v10091_v30 = vld [vmem:[#allocation9_spill] sm:$0xff] }
 0x1ee   : > { %v1089_v37 = vpop.xlane.xlu0 %1088 }
 0x1ef   : > { %v1165_v8 = vmul.f32 0.0078125, %v1089_v37  ;;  %v1091_v50 = vpop.xlane.xlu1 %1090  ;;  %v7479_v37 = vsub.f32 %v10093_v12, %v1167_v5 }
 0x1f0   : > { %v1166_v22 = vmul.f32 0.0078125, %v1091_v50  ;;  %1403 = vadd.xlane.f32.xlu1 %v1290_v24 }
 0x1f1   : > { %v7471_v11 = vsub.f32 %v10089_v34, %v1165_v8  ;;  %1405 = vadd.xlane.f32.xlu0 %v1291_v21  ;;  %10094 = vst [vmem:[#allocation6_spill] sm:$0xff] %v7479_v37  ;;  %v10095_v34 = vld [vmem:[#allocation7_spill] sm:$0xff]  ;;  %v1295_v5 = vmul.f32 %v7479_v37, %v7479_v37 }
 0x1f2   : > { %v7474_v28 = vsub.f32 %v10091_v30, %v1166_v22  ;;  %v1101_v39 = vpop.xlane.xlu0 %1100  ;;  %v7484_v24 = vsub.f32 %v10095_v34, %v1168_v15 }
 0x1f3   : > { %10090 = vst [vmem:[#allocation8_spill] sm:$0xff] %v7471_v11  ;;  %v1103_v26 = vpop.xlane.xlu1 %1102  ;;  %v1293_v50 = vmul.f32 %v7471_v11, %v7471_v11  ;;  %v1171_v21 = vmul.f32 0.0078125, %v1101_v39  ;;  %v10101_v39 = vld [vmem:[#allocation10_spill] sm:$0xff] }
 0x1f4   : > { %10092 = vst [vmem:[#allocation9_spill] sm:$0xff] %v7474_v28  ;;  %1407 = vadd.xlane.f32.xlu1 %v1292_v31  ;;  %10096 = vst [vmem:[#allocation7_spill] sm:$0xff] %v7484_v24  ;;  %v1294_v8 = vmul.f32 %v7474_v28, %v7474_v28  ;;  %v1172_v31 = vmul.f32 0.0078125, %v1103_v26  ;;  %v1296_v28 = vmul.f32 %v7484_v24, %v7484_v24 }
 0x1f5   : > { %1409 = vadd.xlane.f32.xlu0 %v1293_v50  ;;  %v10099_v50 = vld [vmem:[#allocation13_spill] sm:$0xff] }
 0x1f6   : > { %v1097_v56 = vpop.xlane.xlu0 %1096 }
 0x1f7   : > { %v1169_v22 = vmul.f32 0.0078125, %v1097_v56  ;;  %v1099_v30 = vpop.xlane.xlu1 %1098  ;;  %v7499_v56 = vsub.f32 %v10101_v39, %v1171_v21 }
 0x1f8   : > { %v1170_v12 = vmul.f32 0.0078125, %v1099_v30  ;;  %1411 = vadd.xlane.f32.xlu1 %v1294_v8 }
 0x1f9   : > { %v7491_v53 = vsub.f32 %v10097_v44, %v1169_v22  ;;  %1413 = vadd.xlane.f32.xlu0 %v1295_v5  ;;  %10102 = vst [vmem:[#allocation10_spill] sm:$0xff] %v7499_v56  ;;  %v10103_v44 = vld [vmem:[#allocation11_spill] sm:$0xff]  ;;  %v1299_v21 = vmul.f32 %v7499_v56, %v7499_v56 }
 0x1fa   : > { %v7494_v15 = vsub.f32 %v10099_v50, %v1170_v12  ;;  %v1105_v34 = vpop.xlane.xlu0 %1104  ;;  %v7504_v22 = vsub.f32 %v10103_v44, %v1172_v31  ;;  %v10105_v12 = vld [vmem:[#allocation14_spill] sm:$0xff] }
 0x1fb   : > { %10098 = vst [vmem:[#allocation12_spill] sm:$0xff] %v7491_v53  ;;  %v1173_v11 = vmul.f32 0.0078125, %v1105_v34  ;;  %v1297_v30 = vmul.f32 %v7491_v53, %v7491_v53  ;;  %v10107_v34 = vld [vmem:[#allocation15_spill] sm:$0xff] }
 0x1fc   : > { %10100 = vst [vmem:[#allocation13_spill] sm:$0xff] %v7494_v15  ;;  %v1107_v8 = vpop.xlane.xlu1 %1106  ;;  %1415 = vadd.xlane.f32.xlu1 %v1296_v28  ;;  %10104 = vst [vmem:[#allocation11_spill] sm:$0xff] %v7504_v22  ;;  %v1298_v5 = vmul.f32 %v7494_v15, %v7494_v15  ;;  %v1300_v28 = vmul.f32 %v7504_v22, %v7504_v22 }
 0x1fd   : > { %1417 = vadd.xlane.f32.xlu0 %v1297_v30  ;;  %v1174_v26 = vmul.f32 0.0078125, %v1107_v8  ;;  %v7509_v50 = vsub.f32 %v10105_v12, %v1173_v11 }
 0x1ff   : > { %10106 = vst [vmem:[#allocation14_spill] sm:$0xff] %v7509_v50  ;;  %v7514_v39 = vsub.f32 %v10107_v34, %v1174_v26  ;;  %v1301_v31 = vmul.f32 %v7509_v50, %v7509_v50 }
 0x200   : > { %1419 = vadd.xlane.f32.xlu1 %v1298_v5 }
 0x201   : > { %1421 = vadd.xlane.f32.xlu0 %v1299_v21  ;;  %10108 = vst [vmem:[#allocation15_spill] sm:$0xff] %v7514_v39  ;;  %v1302_v11 = vmul.f32 %v7514_v39, %v7514_v39 }
 0x204   : > { %1423 = vadd.xlane.f32.xlu1 %v1300_v28 }
 0x205   : > { %1425 = vadd.xlane.f32.xlu0 %v1301_v31 }
 0x208   : > { %1427 = vadd.xlane.f32.xlu1 %v1302_v11 }
 0x215   : > { %v1310_v30 = vpop.xlane.xlu0 %1309 }
 0x216   : > { %v1435_v8 = vmul.f32 0.0078125, %v1310_v30 }
 0x218   : > { %v1499_v44 = vadd.f32 1e-05, %v1435_v8 }
 0x219   : > { %v1312_v5 = vpop.xlane.xlu1 %1311  ;;  %v1306_v12 = vpop.xlane.xlu0 %1305 }
 0x21a   : > { %6256 = vrsqrt.f32 %v1499_v44  ;;  %v1436_v26 = vmul.f32 0.0078125, %v1312_v5  ;;  %v1433_v21 = vmul.f32 0.0078125, %v1306_v12 }
 0x21c   : > { %v1500_v34 = vadd.f32 1e-05, %v1436_v26  ;;  %v1497_v56 = vadd.f32 1e-05, %v1433_v21 }
 0x21d   : > { %v1308_v22 = vpop.xlane.xlu1 %1307 }
 0x21e   : > { %6258 = vrsqrt.f32 %v1500_v34  ;;  %v1434_v15 = vmul.f32 0.0078125, %v1308_v22  ;;  %v1318_v50 = vpop.xlane.xlu0 %1317  ;;  %v10109_v34 = vld [vmem:[#allocation16_spill] sm:$0xff] }
 0x21f   : > { %6260 = vrsqrt.f32 %v1497_v56  ;;  %v1439_v28 = vmul.f32 0.0078125, %v1318_v50 }
 0x220   : > { %v1498_v31 = vadd.f32 1e-05, %v1434_v15  ;;  %v7526_v15 = vld [vmem:[%s9949_s5 + $0x1] ss:$0 sm:$0xff] }
 0x221   : > { %v1503_v53 = vadd.f32 1e-05, %v1439_v28  ;;  %v1320_v39 = vpop.xlane.xlu1 %1319 }
 0x222   : > { %6262 = vrsqrt.f32 %v1498_v31  ;;  %v1440_v11 = vmul.f32 0.0078125, %v1320_v39  ;;  %v1314_v30 = vpop.xlane.xlu0 %1313 }
 0x223   : > { %6264 = vrsqrt.f32 %v1503_v53  ;;  %v1437_v8 = vmul.f32 0.0078125, %v1314_v30 }
 0x224   : > { %v6257_v24 = vpop.eup %6256  ;;  %v1504_v44 = vadd.f32 1e-05, %v1440_v11 }
 0x225   : > { %v1501_v5 = vadd.f32 1e-05, %v1437_v8  ;;  %v1316_v12 = vpop.xlane.xlu1 %1315  ;;  %v1627_v22 = vmul.f32 %v6257_v24, %v10109_v34 }
 0x226   : > { %6266 = vrsqrt.f32 %v1504_v44  ;;  %v1438_v26 = vmul.f32 0.0078125, %v1316_v12  ;;  %v1326_v21 = vpop.xlane.xlu0 %1325 }
 0x227   : > { %v1443_v37 = vmul.f32 0.0078125, %v1326_v21  ;;  %6268 = vrsqrt.f32 %v1501_v5  ;;  %v1695_v24 = vmul.f32 %v7526_v15, %v1627_v22  ;;  %v7534_v21 = vld [vmem:[%s9949_s5 + $0x2] ss:$0 sm:$0xff] }
 0x228   : > { %v6259_v56 = vpop.eup %6258  ;;  %v1502_v53 = vadd.f32 1e-05, %v1438_v26 }
 0x229   : > { %v6261_v50 = vpop.eup %6260  ;;  %v1328_v39 = vpop.xlane.xlu1 %1327  ;;  %v1628_v28 = vmul.f32 %v6259_v56, %v7187_v55  ;;  %v1507_v11 = vadd.f32 1e-05, %v1443_v37 }
 0x22a   : > { %v1625_v31 = vmul.f32 %v6261_v50, %v7184_v61  ;;  %v1444_v30 = vmul.f32 0.0078125, %v1328_v39  ;;  %v1322_v8 = vpop.xlane.xlu0 %1321  ;;  %6270 = vrsqrt.f32 %v1502_v53 }
 0x22b   : > { %v1441_v44 = vmul.f32 0.0078125, %v1322_v8  ;;  %v1696_v56 = vmul.f32 %v7526_v15, %v1628_v28  ;;  %6272 = vrsqrt.f32 %v1507_v11  ;;  %v7541_v8 = vadd.f32 %v7534_v21, %v1695_v24 }
 0x22c   : > { %v6263_v12 = vpop.eup %6262  ;;  %v1693_v5 = vmul.f32 %v7526_v15, %v1625_v31  ;;  %v1508_v26 = vadd.f32 1e-05, %v1444_v30 }
 0x22d   : > { %v6265_v34 = vpop.eup %6264  ;;  %v1626_v55 = vmul.f32 %v6263_v12, %v7194_v16  ;;  %v1505_v61 = vadd.f32 1e-05, %v1441_v44  ;;  %v1324_v37 = vpop.xlane.xlu1 %1323  ;;  %v7551_v33 = vmul.f32 0.5, %v7541_v8  ;;  %v1891_v63 = vmul.f32 0.044715, %v7541_v8 }
 0x22e   : > { %v1442_v22 = vmul.f32 0.0078125, %v1324_v37  ;;  %v1334_v50 = vpop.xlane.xlu0 %1333  ;;  %v1761_v39 = vadd.f32 %v7534_v21, %v1693_v5  ;;  %6274 = vrsqrt.f32 %v1508_v26  ;;  %v1631_v16 = vmul.f32 %v6265_v34, %v7197_v40 }
 0x22f   : > { %v1694_v18 = vmul.f32 %v7526_v15, %v1626_v55  ;;  %v1447_v31 = vmul.f32 0.0078125, %v1334_v50  ;;  %6276 = vrsqrt.f32 %v1505_v61  ;;  %v7547_v5 = vadd.f32 %v7534_v21, %v1696_v56 }
 0x230   : > { %v6267_v30 = vpop.eup %6266  ;;  %v1506_v53 = vadd.f32 1e-05, %v1442_v22  ;;  %v1889_v44 = vmul.f32 0.044715, %v1761_v39  ;;  %v1699_v40 = vmul.f32 %v7526_v15, %v1631_v16 }
 0x231   : > { %v1511_v12 = vadd.f32 1e-05, %v1447_v31  ;;  %v1336_v28 = vpop.xlane.xlu1 %1335  ;;  %v1762_v11 = vadd.f32 %v7534_v21, %v1694_v18  ;;  %v6269_v37 = vpop.eup %6268  ;;  %v1632_v24 = vmul.f32 %v6267_v30, %v7202_v7 }
 0x232   : > { %6278 = vrsqrt.f32 %v1506_v53  ;;  %v1448_v55 = vmul.f32 0.0078125, %v1336_v28  ;;  %v1330_v26 = vpop.xlane.xlu0 %1329  ;;  %v1953_v22 = vmul.f32 %v1889_v44, %v1761_v39  ;;  %v1629_v18 = vmul.f32 %v6269_v37, %v7207_v58 }
 0x233   : > { %v1445_v50 = vmul.f32 0.0078125, %v1330_v26  ;;  %v1890_v61 = vmul.f32 0.044715, %v1762_v11  ;;  %6280 = vrsqrt.f32 %v1511_v12  ;;  %v1700_v7 = vmul.f32 %v7526_v15, %v1632_v24 }
 0x234   : > { %v1512_v34 = vadd.f32 1e-05, %v1448_v55  ;;  %v7558_v28 = vmul.f32 0.5, %v7547_v5  ;;  %v6271_v26 = vpop.eup %6270  ;;  %v7560_v55 = vmul.f32 0.5, %v1761_v39  ;;  %v7563_v12 = vadd.f32 %v7534_v21, %v1699_v40 }
 0x235   : > { %v1509_v31 = vadd.f32 1e-05, %v1445_v50  ;;  %v1332_v56 = vpop.xlane.xlu1 %1331  ;;  %v1954_v44 = vmul.f32 %v1890_v61, %v1762_v11  ;;  %v6273_v58 = vpop.eup %6272  ;;  %v2017_v50 = vmul.f32 %v1953_v22, %v1761_v39  ;;  %v1892_v24 = vmul.f32 0.044715, %v7547_v5 }
 0x236   : > { %6282 = vrsqrt.f32 %v1512_v34  ;;  %v1446_v30 = vmul.f32 0.0078125, %v1332_v56  ;;  %v1342_v53 = vpop.xlane.xlu0 %1341  ;;  %v1697_v56 = vmul.f32 %v7526_v15, %v1629_v18  ;;  %v7567_v25 = vmul.f32 0.5, %v1762_v11 }
 0x237   : > { %6284 = vrsqrt.f32 %v1509_v31  ;;  %v1451_v16 = vmul.f32 0.0078125, %v1342_v53  ;;  %v2018_v31 = vmul.f32 %v1954_v44, %v1762_v11  ;;  %v7570_v47 = vadd.f32 %v7534_v21, %v1700_v7 }
 0x238   : > { %v1510_v37 = vadd.f32 1e-05, %v1446_v30  ;;  %v6275_v34 = vpop.eup %6274  ;;  %v1630_v61 = vmul.f32 %v6271_v26, %v7212_v32  ;;  %v1955_v22 = vmul.f32 %v1891_v63, %v7541_v8  ;;  %v1635_v30 = vmul.f32 %v6273_v58, %v7217_v43 }
 0x239   : > { %v1515_v41 = vadd.f32 1e-05, %v1451_v16  ;;  %v1344_v2 = vpop.xlane.xlu1 %1343  ;;  %v6277_v53 = vpop.eup %6276  ;;  %v2081_v18 = vadd.f32 %v2017_v50, %v1761_v39  ;;  %v2082_v10 = vadd.f32 %v2018_v31, %v1762_v11  ;;  %v1956_v44 = vmul.f32 %v1892_v24, %v7547_v5 }
 0x23a   : > { %v1452_v40 = vmul.f32 0.0078125, %v1344_v2  ;;  %v1338_v20 = vpop.xlane.xlu0 %1337  ;;  %6286 = vrsqrt.f32 %v1510_v37  ;;  %v1636_v7 = vmul.f32 %v6275_v34, %v7222_v13  ;;  %v1633_v23 = vmul.f32 %v6277_v53, %v7227_v46 }
 0x23b   : > { %v1449_v36 = vmul.f32 0.0078125, %v1338_v20  ;;  %6288 = vrsqrt.f32 %v1515_v41  ;;  %v2145_v26 = vmul.f32 0.7978846, %v2081_v18  ;;  %v1698_v63 = vmul.f32 %v7526_v15, %v1630_v61 }
 0x23c   : > { %v6279_v16 = vpop.eup %6278  ;;  %v1516_v19 = vadd.f32 1e-05, %v1452_v40  ;;  %v2019_v20 = vmul.f32 %v1955_v22, %v7541_v8  ;;  %v2146_v37 = vmul.f32 0.7978846, %v2082_v10  ;;  %v7582_v13 = vadd.f32 %v7534_v21, %v1697_v56 }
 0x23d   : > { %v1513_v32 = vadd.f32 1e-05, %v1449_v36  ;;  %v1340_v2 = vpop.xlane.xlu1 %1339  ;;  %v6281_v39 = vpop.eup %6280  ;;  %v1634_v41 = vmul.f32 %v6279_v16, %v7232_v49  ;;  %v2020_v36 = vmul.f32 %v1956_v44, %v7547_v5  ;;  %v1704_v34 = vmul.f32 %v7526_v15, %v1636_v7 }
 0x23e   : > { %6290 = vrsqrt.f32 %v1516_v19  ;;  %v1450_v43 = vmul.f32 0.0078125, %v1340_v2  ;;  %v1350_v58 = vpop.xlane.xlu0 %1349  ;;  %v1703_v19 = vmul.f32 %v7526_v15, %v1635_v30  ;;  %v1701_v31 = vmul.f32 %v7526_v15, %v1633_v23 }
 0x23f   : > { %6292 = vrsqrt.f32 %v1513_v32  ;;  %v1455_v11 = vmul.f32 0.0078125, %v1350_v58  ;;  %v7589_v49 = vadd.f32 %v7534_v21, %v1698_v63  ;;  %v1639_v10 = vmul.f32 %v6281_v39, %v7237_v51 }
 0x240   : > { %v6283_v50 = vpop.eup %6282  ;;  %v1514_v46 = vadd.f32 1e-05, %v1450_v43  ;;  %6294 = vtanh.f32 %v2145_v26  ;;  %v1702_v22 = vmul.f32 %v7526_v15, %v1634_v41  ;;  %v2083_v30 = vadd.f32 %v2019_v20, %v7541_v8 }
 0x241   : > { %v6285_v24 = vpop.eup %6284  ;;  %v1352_v53 = vpop.xlane.xlu1 %1351  ;;  %6296 = vtanh.f32 %v2146_v37  ;;  %v1519_v56 = vadd.f32 1e-05, %v1455_v11  ;;  %v1640_v18 = vmul.f32 %v6283_v50, %v7242_v52  ;;  %v2084_v7 = vadd.f32 %v2020_v36, %v7547_v5 }
 0x242   : > { %v1456_v61 = vmul.f32 0.0078125, %v1352_v53  ;;  %v1346_v40 = vpop.xlane.xlu0 %1345  ;;  %v1637_v44 = vmul.f32 %v6285_v24, %v7247_v54  ;;  %6298 = vrsqrt.f32 %v1514_v46  ;;  %v7598_v2 = vadd.f32 %v7534_v21, %v1703_v19 }
 0x243   : > { %v1453_v16 = vmul.f32 0.0078125, %v1346_v40  ;;  %v7601_v51 = vadd.f32 %v7534_v21, %v1704_v34  ;;  %v7604_v26 = vadd.f32 %v7534_v21, %v1701_v31  ;;  %v2147_v63 = vmul.f32 0.7978846, %v2083_v30 }
 0x244   : > { %v1520_v23 = vadd.f32 1e-05, %v1456_v61  ;;  %v6287_v32 = vpop.eup %6286  ;;  %v1707_v8 = vmul.f32 %v7526_v15, %v1639_v10  ;;  %6300 = vrsqrt.f32 %v1519_v56  ;;  %v1708_v5 = vmul.f32 %v7526_v15, %v1640_v18 }
 0x245   : > { %v1348_v52 = vpop.xlane.xlu1 %1347  ;;  %v6289_v43 = vpop.eup %6288  ;;  %v1517_v54 = vadd.f32 1e-05, %v1453_v16  ;;  %v2148_v41 = vmul.f32 0.7978846, %v2084_v7  ;;  %v7609_v37 = vadd.f32 %v7534_v21, %v1702_v22  ;;  %v1705_v50 = vmul.f32 %v7526_v15, %v1637_v44 }
 0x246   : > { %v1454_v58 = vmul.f32 0.0078125, %v1348_v52  ;;  %v1109_v20 = vpop.xlane.xlu0 %1108  ;;  %6302 = vrsqrt.f32 %v1520_v23  ;;  %v1638_v24 = vmul.f32 %v6287_v32, %v7252_v57  ;;  %v1643_v19 = vmul.f32 %v6289_v43, %v7257_v59 }
 0x247   : > { %v1175_v39 = vmul.f32 0.0078125, %v1109_v20  ;;  %6304 = vtanh.f32 %v2147_v63  ;;  %v7618_v10 = vadd.f32 %v7534_v21, %v1707_v8  ;;  %v7621_v40 = vmul.f32 0.5, %v7582_v13 }
 0x248   : > { %v6291_v11 = vpop.eup %6290  ;;  %v1518_v46 = vadd.f32 1e-05, %v1454_v58  ;;  %6306 = vtanh.f32 %v2148_v41  ;;  %v7624_v57 = vadd.f32 %v7534_v21, %v1708_v5  ;;  %v7633_v23 = vadd.f32 %v7534_v21, %v1705_v50 }
 0x249   : > { %v6293_v36 = vpop.eup %6292  ;;  %v7615_v34 = vsub.f32 %v7309_v45, %v1175_v39  ;;  %v1111_v31 = vpop.xlane.xlu1 %1110  ;;  %6308 = vrsqrt.f32 %v1517_v54  ;;  %v1644_v16 = vmul.f32 %v6291_v11, %v7262_v60  ;;  %v1706_v7 = vmul.f32 %v7526_v15, %v1638_v24 }
 0x24a   : > { %v6295_v53 = vpop.eup %6294  ;;  %v1176_v56 = vmul.f32 0.0078125, %v1111_v31  ;;  %v1354_v61 = vpop.xlane.xlu0 %1353  ;;  %6310 = vrsqrt.f32 %v1518_v46  ;;  %v1711_v32 = vmul.f32 %v7526_v15, %v1643_v19  ;;  %v1641_v8 = vmul.f32 %v6293_v36, %v7267_v62 }
 0x24b   : > { %v6297_v22 = vpop.eup %6296  ;;  %v1457_v59 = vmul.f32 0.0078125, %v1354_v61  ;;  %v1303_v45 = vmul.f32 %v7615_v34, %v7615_v34  ;;  %v2273_v18 = vadd.f32 1.0, %v6295_v53  ;;  %v7643_v39 = vmul.f32 0.5, %v7589_v49 }
 0x24c   : > { %v7630_v30 = vsub.f32 %v7317_v17, %v1176_v56  ;;  %v2274_v44 = vadd.f32 1.0, %v6297_v22  ;;  %v6299_v43 = vpop.eup %6298  ;;  %v1893_v41 = vmul.f32 0.044715, %v7582_v13  ;;  %v1712_v50 = vmul.f32 %v7526_v15, %v1644_v16 }
 0x24d   : > { %v1521_v52 = vadd.f32 1e-05, %v1457_v59  ;;  %v1356_v63 = vpop.xlane.xlu1 %1355  ;;  %1429 = vadd.xlane.f32.xlu0 %v1303_v45  ;;  %v2337_v60 = vmul.f32 %v2273_v18, %v7560_v55  ;;  %v1894_v36 = vmul.f32 0.044715, %v7589_v49  ;;  %v1642_v24 = vmul.f32 %v6299_v43, %v7272_v1 }
 0x24e   : > { %v1458_v54 = vmul.f32 0.0078125, %v1356_v63  ;;  %v2338_v17 = vmul.f32 %v2274_v44, %v7567_v25  ;;  %v1358_v58 = vpop.xlane.xlu0 %1357  ;;  %v1304_v5 = vmul.f32 %v7630_v30, %v7630_v30  ;;  %v6301_v11 = vpop.eup %6300  ;;  %v7649_v25 = vadd.f32 %v7534_v21, %v1706_v7 }
 0x24f   : > { %v1459_v20 = vmul.f32 0.0078125, %v1358_v58  ;;  %6312 = vrsqrt.f32 %v1521_v52  ;;  %v7653_v56 = vadd.f32 %v7534_v21, %v1711_v32  ;;  %v1709_v61 = vmul.f32 %v7526_v15, %v1641_v8 }
 0x250   : > { %v1522_v46 = vadd.f32 1e-05, %v1458_v54  ;;  %v2401_v62 = vpack.c.bf16 %v2338_v17, %v2337_v60  ;;  %v6303_v55 = vpop.eup %6302  ;;  %1431 = vadd.xlane.f32.xlu1 %v1304_v5  ;;  %v1957_v1 = vmul.f32 %v1893_v41, %v7582_v13  ;;  %v7658_v7 = vadd.f32 %v7534_v21, %v1712_v50 }
 0x251   : > { %v1523_v19 = vadd.f32 1e-05, %v1459_v20  ;;  %v1360_v31 = vpop.xlane.xlu1 %1359  ;;  %v6305_v53 = vpop.eup %6304  ;;  %v1958_v32 = vmul.f32 %v1894_v36, %v7589_v49  ;;  %v1710_v43 = vmul.f32 %v7526_v15, %v1642_v24  ;;  %v1647_v8 = vmul.f32 %v6301_v11, %v7277_v3 }
 0x252   : > { %6314 = vrsqrt.f32 %v1522_v46  ;;  %5896 = vmatprep.mubr.bf16.mxu1 %v2401_v62  ;;  %v1460_v22 = vmul.f32 0.0078125, %v1360_v31  ;;  %v1362_v59 = vpop.xlane.xlu0 %1361  ;;  %v6307_v45 = vpop.eup %6306  ;;  %v2275_v18 = vadd.f32 1.0, %v6305_v53  ;;  %v1648_v54 = vmul.f32 %v6303_v55, %v7282_v4 }
 0x253   : > { %6316 = vrsqrt.f32 %v1523_v19  ;;  %v1461_v16 = vmul.f32 0.0078125, %v1362_v59  ;;  %v6309_v44 = vpop.eup %6308  ;;  %v2276_v52 = vadd.f32 1.0, %v6307_v45  ;;  %v7667_v46 = vadd.f32 %v7534_v21, %v1709_v61 }
 0x254   : > { %v1524_v63 = vadd.f32 1e-05, %v1460_v22  ;;  %v6311_v58 = vpop.eup %6310  ;;  %v2339_v20 = vmul.f32 %v2275_v18, %v7551_v33  ;;  %v1645_v62 = vmul.f32 %v6309_v44, %v7290_v14  ;;  %v2021_v36 = vmul.f32 %v1957_v1, %v7582_v13 }
 0x255   : > { %v1525_v60 = vadd.f32 1e-05, %v1461_v16  ;;  %v1364_v17 = vpop.xlane.xlu1 %1363  ;;  %v2340_v5 = vmul.f32 %v2276_v52, %v7558_v28  ;;  %v2022_v3 = vmul.f32 %v1958_v32, %v7589_v49  ;;  %v1715_v33 = vmul.f32 %v7526_v15, %v1647_v8 }
 0x256   : > { %6318 = vrsqrt.f32 %v1524_v63  ;;  %v1462_v41 = vmul.f32 0.0078125, %v1364_v17  ;;  %v1366_v50 = vpop.xlane.xlu0 %1365  ;;  %v1646_v28 = vmul.f32 %v6311_v58, %v7295_v9  ;;  %v2085_v24 = vadd.f32 %v2021_v36, %v7582_v13 }
 0x257   : > { %v2402_v4 = vpack.c.bf16 %v2340_v5, %v2339_v20  ;;  %6320 = vrsqrt.f32 %v1525_v60  ;;  %v1463_v55 = vmul.f32 0.0078125, %v1366_v50  ;;  %v2086_v19 = vadd.f32 %v2022_v3, %v7589_v49 }
 0x258   : > { %v1526_v11 = vadd.f32 1e-05, %v1462_v41  ;;  %v7677_v53 = vadd.f32 %v7534_v21, %v1710_v43  ;;  %v1716_v14 = vmul.f32 %v7526_v15, %v1648_v54  ;;  %v1895_v22 = vmul.f32 0.044715, %v7563_v12 }
 0x259   : > { %v1368_v31 = vpop.xlane.xlu1 %1367  ;;  %5897 = vmatmul.mubr.bf16.vlgmr.msra.gmra.mrb[0].mxu1 %v2402_v4  ;;  %v1527_v61 = vadd.f32 1e-05, %v1463_v55  ;;  %v6313_v45 = vpop.eup %6312  ;;  %v2149_v18 = vmul.f32 0.7978846, %v2085_v24  ;;  %v2150_v16 = vmul.f32 0.7978846, %v2086_v19  ;;  %v1713_v49 = vmul.f32 %v7526_v15, %v1645_v62 }
 0x25a   : > { %v1370_v59 = vpop.xlane.xlu0 %1369  ;;  %6322 = vrsqrt.f32 %v1526_v11  ;;  %v1896_v9 = vmul.f32 0.044715, %v7570_v47  ;;  %v1959_v1 = vmul.f32 %v1895_v22, %v7563_v12  ;;  %v1464_v44 = vmul.f32 0.0078125, %v1368_v31 }
 0x25b   : > { %6324 = vrsqrt.f32 %v1527_v61  ;;  %v1714_v63 = vmul.f32 %v7526_v15, %v1646_v28  ;;  %v1465_v43 = vmul.f32 0.0078125, %v1370_v59  ;;  %v1649_v8 = vmul.f32 %v6313_v45, %v7313_v6 }
 0x25c   : > { %v6315_v13 = vpop.eup %6314  ;;  %6326 = vtanh.f32 %v2149_v18  ;;  %v1960_v32 = vmul.f32 %v1896_v9, %v7570_v47  ;;  %v2023_v60 = vmul.f32 %v1959_v1, %v7563_v12  ;;  %v1528_v5 = vadd.f32 1e-05, %v1464_v44 }
 0x25d   : > { %v6317_v52 = vpop.eup %6316  ;;  %v1650_v54 = vmul.f32 %v6315_v13, %v7320_v48  ;;  %6328 = vtanh.f32 %v2150_v16  ;;  %v1372_v17 = vpop.xlane.xlu1 %1371  ;;  %v1529_v41 = vadd.f32 1e-05, %v1465_v43  ;;  %v7692_v62 = vadd.f32 %v7534_v21, %v1715_v33 }
 0x25e   : > { %v1651_v58 = vmul.f32 %v6317_v52, %v7328_v27  ;;  %v2024_v20 = vmul.f32 %v1960_v32, %v7570_v47  ;;  %v7695_v36 = vadd.f32 %v7534_v21, %v1716_v14  ;;  %v7698_v6 = vadd.f32 %v7534_v21, %v1713_v49  ;;  %v1374_v24 = vpop.xlane.xlu0 %1373 }
 0x25f   : > { %v2087_v48 = vadd.f32 %v2023_v60, %v7563_v12  ;;  %v7702_v3 = vmul.f32 0.5, %v7563_v12  ;;  %6330 = vrsqrt.f32 %v1528_v5  ;;  %v1466_v4 = vmul.f32 0.0078125, %v1372_v17 }
 0x260   : > { %v6319_v50 = vpop.eup %6318  ;;  %v2088_v27 = vadd.f32 %v2024_v20, %v7570_v47  ;;  %v7706_v55 = vadd.f32 %v7534_v21, %v1714_v63  ;;  %v1717_v33 = vmul.f32 %v7526_v15, %v1649_v8  ;;  %6332 = vrsqrt.f32 %v1529_v41 }
 0x261   : > { %v6321_v11 = vpop.eup %6320  ;;  %v2151_v28 = vmul.f32 0.7978846, %v2087_v48  ;;  %v1718_v19 = vmul.f32 %v7526_v15, %v1650_v54  ;;  %v1719_v31 = vmul.f32 %v7526_v15, %v1651_v58  ;;  %v1652_v12 = vmul.f32 %v6319_v50, %v7334_v42  ;;  %v1376_v58 = vpop.xlane.xlu1 %1375 }
 0x262   : > { %v2152_v14 = vmul.f32 0.7978846, %v2088_v27  ;;  %v7713_v61 = vmul.f32 0.5, %v7570_v47  ;;  %v1897_v22 = vmul.f32 0.044715, %v7604_v26  ;;  %v1653_v18 = vmul.f32 %v6321_v11, %v7342_v0 }
 0x263   : > { %6334 = vtanh.f32 %v2151_v28  ;;  %v1898_v59 = vmul.f32 0.044715, %v7609_v37  ;;  %v1530_v16 = vadd.f32 1e-05, %v1466_v4  ;;  %v1467_v9 = vmul.f32 0.0078125, %v1374_v24 }
 0x264   : > { %v6323_v45 = vpop.eup %6322  ;;  %6336 = vtanh.f32 %v2152_v14  ;;  %v7719_v49 = vadd.f32 %v7534_v21, %v1717_v33  ;;  %v7722_v42 = vmul.f32 0.5, %v7604_v26  ;;  %v1961_v47 = vmul.f32 %v1897_v22, %v7604_v26 }
 0x265   : > { %v6325_v13 = vpop.eup %6324  ;;  %v1962_v1 = vmul.f32 %v1898_v59, %v7609_v37  ;;  %v7727_v52 = vadd.f32 %v7534_v21, %v1718_v19  ;;  %v7730_v0 = vadd.f32 %v7534_v21, %v1719_v31  ;;  %v1720_v63 = vmul.f32 %v7526_v15, %v1652_v12  ;;  %v1378_v31 = vpop.xlane.xlu0 %1377 }
 0x266   : > { %v6327_v44 = vpop.eup %6326  ;;  %v7734_v32 = vmul.f32 0.5, %v7609_v37  ;;  %v2025_v54 = vmul.f32 %v1961_v47, %v7604_v26  ;;  %v1531_v17 = vadd.f32 1e-05, %v1467_v9  ;;  %v1721_v20 = vmul.f32 %v7526_v15, %v1653_v18 }
 0x267   : > { %v6329_v43 = vpop.eup %6328  ;;  %v2277_v8 = vadd.f32 1.0, %v6327_v44  ;;  %v2026_v60 = vmul.f32 %v1962_v1, %v7609_v37  ;;  %v1654_v5 = vmul.f32 %v6323_v45, %v7347_v29  ;;  %6338 = vrsqrt.f32 %v1530_v16 }
 0x268   : > { %v2278_v41 = vadd.f32 1.0, %v6329_v43  ;;  %v1655_v50 = vmul.f32 %v6325_v13, %v7355_v35  ;;  %v2089_v48 = vadd.f32 %v2025_v54, %v7604_v26  ;;  %v1899_v4 = vmul.f32 0.044715, %v7598_v2  ;;  %v10110_v13 = vld [vmem:[#allocation17_spill] sm:$0xff] }
 0x269   : > { %v2090_v27 = vadd.f32 %v2026_v60, %v7609_v37  ;;  %v6331_v11 = vpop.eup %6330  ;;  %v2341_v33 = vmul.f32 %v2277_v8, %v7621_v40  ;;  %v1900_v24 = vmul.f32 0.044715, %v7601_v51  ;;  %v1468_v19 = vmul.f32 0.0078125, %v1376_v58 }
 0x26a   : > { %v2342_v28 = vmul.f32 %v2278_v41, %v7643_v39  ;;  %v6333_v29 = vpop.eup %6332  ;;  %v2153_v12 = vmul.f32 0.7978846, %v2089_v48  ;;  %6340 = vrsqrt.f32 %v1531_v17  ;;  %v1963_v35 = vmul.f32 %v1899_v4, %v7598_v2 }
 0x26b   : > { %v2154_v14 = vmul.f32 0.7978846, %v2090_v27  ;;  %v1656_v37 = vmul.f32 %v6331_v11, %v7360_v38  ;;  %v1964_v22 = vmul.f32 %v1900_v24, %v7601_v51  ;;  %v1532_v59 = vadd.f32 1e-05, %v1468_v19  ;;  %v1380_v38 = vpop.xlane.xlu1 %1379 }
 0x26c   : > { %v2403_v26 = vpack.c.bf16 %v2342_v28, %v2341_v33  ;;  %v7751_v40 = vadd.f32 %v7534_v21, %v1720_v63  ;;  %6342 = vtanh.f32 %v2153_v12  ;;  %v2027_v39 = vmul.f32 %v1963_v35, %v7598_v2 }
 0x26d   : > { %v6335_v45 = vpop.eup %6334  ;;  %v1469_v18 = vmul.f32 0.0078125, %v1378_v31  ;;  %v1657_v47 = vmul.f32 %v6333_v29, %v10110_v13  ;;  %6344 = vtanh.f32 %v2154_v14  ;;  %v2028_v1 = vmul.f32 %v1964_v22, %v7601_v51 }
 0x26e   : > { %v6337_v16 = vpop.eup %6336  ;;  %5900 = vmatprep.mubr.bf16.mxu1 %v2403_v26  ;;  %v2279_v9 = vadd.f32 1.0, %v6335_v45  ;;  %v1722_v44 = vmul.f32 %v7526_v15, %v1654_v5  ;;  %v2091_v8 = vadd.f32 %v2027_v39, %v7598_v2  ;;  %6346 = vrsqrt.f32 %v1532_v59  ;;  %v10111_v26 = vld [vmem:[#allocation18_spill] sm:$0xff] }
 0x26f   : > { %v2280_v43 = vadd.f32 1.0, %v6337_v16  ;;  %v1723_v63 = vmul.f32 %v7526_v15, %v1655_v50  ;;  %v1724_v60 = vmul.f32 %v7526_v15, %v1656_v37  ;;  %v2092_v17 = vadd.f32 %v2028_v1, %v7601_v51  ;;  %v1384_v14 = vpop.xlane.xlu1 %1383 }
 0x270   : > { %v2343_v54 = vmul.f32 %v2279_v9, %v7702_v3  ;;  %v2155_v41 = vmul.f32 0.7978846, %v2091_v8  ;;  %v1533_v48 = vadd.f32 1e-05, %v1469_v18  ;;  %v1470_v27 = vmul.f32 0.0078125, %v1380_v38  ;;  %v1382_v3 = vpop.xlane.xlu0 %1381  ;;  %v10112_v8 = vld [vmem:[#allocation19_spill] sm:$0xff] }
 0x271   : > { %v2344_v58 = vmul.f32 %v2280_v43, %v7713_v61  ;;  %v6339_v4 = vpop.eup %6338  ;;  %v7764_v5 = vadd.f32 %v7534_v21, %v1721_v20  ;;  %v1725_v11 = vmul.f32 %v7526_v15, %v1657_v47  ;;  %v7768_v33 = vmul.f32 0.5, %v7598_v2 }
 0x272   : > { %v2156_v50 = vmul.f32 0.7978846, %v2092_v17  ;;  %v7771_v24 = vmul.f32 0.5, %v7601_v51  ;;  %6348 = vtanh.f32 %v2155_v41  ;;  %v1534_v61 = vadd.f32 1e-05, %v1470_v27 }
 0x273   : > { %v2404_v28 = vpack.c.bf16 %v2344_v58, %v2343_v54  ;;  %v7774_v19 = vadd.f32 %v7534_v21, %v1722_v44  ;;  %v1901_v20 = vmul.f32 0.044715, %v7633_v23  ;;  %v1902_v31 = vmul.f32 0.044715, %v7649_v25 }
 0x274   : > { %6350 = vtanh.f32 %v2156_v50  ;;  %v6341_v29 = vpop.eup %6340  ;;  %v7779_v2 = vadd.f32 %v7534_v21, %v1723_v63  ;;  %v7782_v12 = vadd.f32 %v7534_v21, %v1724_v60  ;;  %v1471_v51 = vmul.f32 0.0078125, %v1382_v3  ;;  %v1386_v17 = vpop.xlane.xlu0 %1385  ;;  %v10113_v3 = vld [vmem:[#allocation20_spill] sm:$0xff] }
 0x275   : > { %5901 = vmatmul.mubr.bf16.gmra.mrb[4].mxu1 %v2404_v28  ;;  %6352 = vrsqrt.f32 %v1533_v48  ;;  %v7785_v35 = vadd.f32 %v7534_v21, %v1725_v11  ;;  %v1658_v37 = vmul.f32 %v6339_v4, %v10111_v26  ;;  %v1965_v22 = vmul.f32 %v1901_v20, %v7633_v23  ;;  %v1388_v26 = vpop.xlane.xlu1 %1387 }
 0x276   : > { %v1966_v59 = vmul.f32 %v1902_v31, %v7649_v25  ;;  %v6343_v45 = vpop.eup %6342  ;;  %6354 = vrsqrt.f32 %v1534_v61  ;;  %v1535_v39 = vadd.f32 1e-05, %v1471_v51  ;;  %v1903_v18 = vmul.f32 0.044715, %v7618_v10 }
 0x277   : > { %v1904_v16 = vmul.f32 0.044715, %v7624_v57  ;;  %v6345_v9 = vpop.eup %6344  ;;  %v2281_v13 = vadd.f32 1.0, %v6343_v45  ;;  %v2029_v47 = vmul.f32 %v1965_v22, %v7633_v23  ;;  %v1472_v38 = vmul.f32 0.0078125, %v1384_v14 }
 0x278   : > { %v2030_v1 = vmul.f32 %v1966_v59, %v7649_v25  ;;  %v6347_v44 = vpop.eup %6346  ;;  %v2282_v43 = vadd.f32 1.0, %v6345_v9  ;;  %v1659_v63 = vmul.f32 %v6341_v29, %v10112_v8  ;;  %v1967_v54 = vmul.f32 %v1903_v18, %v7618_v10  ;;  %v1390_v8 = vpop.xlane.xlu0 %1389 }
 0x279   : > { %v1968_v60 = vmul.f32 %v1904_v16, %v7624_v57  ;;  %v2345_v58 = vmul.f32 %v2281_v13, %v7722_v42  ;;  %v2093_v41 = vadd.f32 %v2029_v47, %v7633_v23  ;;  %6356 = vrsqrt.f32 %v1535_v39 }
 0x27a   : > { %v2094_v48 = vadd.f32 %v2030_v1, %v7649_v25  ;;  %v2346_v27 = vmul.f32 %v2282_v43, %v7734_v32  ;;  %v2031_v4 = vmul.f32 %v1967_v54, %v7618_v10  ;;  %v1536_v50 = vadd.f32 1e-05, %v1472_v38 }
 0x27b   : > { %v2032_v11 = vmul.f32 %v1968_v60, %v7624_v57  ;;  %v1660_v28 = vmul.f32 %v6347_v44, %v10113_v3  ;;  %v2157_v61 = vmul.f32 0.7978846, %v2093_v41  ;;  %v1473_v31 = vmul.f32 0.0078125, %v1386_v17  ;;  %v10114_v60 = vld [vmem:[#allocation21_spill] sm:$0xff]  ;;  %v1392_v3 = vpop.xlane.xlu1 %1391 }
 0x27c   : > { %v2158_v20 = vmul.f32 0.7978846, %v2094_v48  ;;  %v6349_v29 = vpop.eup %6348  ;;  %v2405_v51 = vpack.c.bf16 %v2346_v27, %v2345_v58  ;;  %v2095_v42 = vadd.f32 %v2031_v4, %v7618_v10  ;;  %6358 = vrsqrt.f32 %v1536_v50  ;;  %v10115_v48 = vld [vmem:[#allocation22_spill] sm:$0xff] }
 0x27d   : > { %v2096_v14 = vadd.f32 %v2032_v11, %v7624_v57  ;;  %v1726_v32 = vmul.f32 %v7526_v15, %v1658_v37  ;;  %v2283_v59 = vadd.f32 1.0, %v6349_v29  ;;  %6360 = vtanh.f32 %v2157_v61 }
 0x27e   : > { %v6351_v22 = vpop.eup %6350  ;;  %v1537_v45 = vadd.f32 1e-05, %v1473_v31  ;;  %5904 = vmatprep.mubr.bf16.mxu1 %v2405_v51  ;;  %6362 = vtanh.f32 %v2158_v20  ;;  %v2159_v16 = vmul.f32 0.7978846, %v2095_v42  ;;  %v1727_v13 = vmul.f32 %v7526_v15, %v1659_v63 }
 0x27f   : > { %v6353_v39 = vpop.eup %6352  ;;  %v2284_v18 = vadd.f32 1.0, %v6351_v22  ;;  %v2160_v9 = vmul.f32 0.7978846, %v2096_v14  ;;  %v1837_v47 = vmul.f32 0.5, %v7633_v23  ;;  %v1474_v1 = vmul.f32 0.0078125, %v1388_v26 }
 0x280   : > { %6364 = vrsqrt.f32 %v1537_v45  ;;  %v6355_v38 = vpop.eup %6354  ;;  %v2347_v44 = vmul.f32 %v2283_v59, %v7768_v33  ;;  %v1728_v43 = vmul.f32 %v7526_v15, %v1660_v28  ;;  %v7813_v54 = vadd.f32 %v7534_v21, %v1726_v32  ;;  %v10116_v45 = vld [vmem:[#allocation23_spill] sm:$0xff] }
 0x281   : > { %v2348_v37 = vmul.f32 %v2284_v18, %v7771_v24  ;;  %6366 = vtanh.f32 %v2159_v16  ;;  %v1661_v17 = vmul.f32 %v6353_v39, %v10114_v60  ;;  %v1838_v63 = vmul.f32 0.5, %v7649_v25 }
 0x282   : > { %6368 = vtanh.f32 %v2160_v9  ;;  %v1839_v58 = vmul.f32 0.5, %v7618_v10  ;;  %v1905_v41 = vmul.f32 0.044715, %v7667_v46  ;;  %v1906_v33 = vmul.f32 0.044715, %v7677_v53 }
 0x283   : > { %v2406_v23 = vpack.c.bf16 %v2348_v37, %v2347_v44  ;;  %v6357_v24 = vpop.eup %6356  ;;  %v1662_v27 = vmul.f32 %v6355_v38, %v10115_v48  ;;  %v1840_v4 = vmul.f32 0.5, %v7624_v57  ;;  %v1538_v11 = vadd.f32 1e-05, %v1474_v1 }
 0x284   : > { %v1475_v50 = vmul.f32 0.0078125, %v1390_v8  ;;  %v7823_v28 = vadd.f32 %v7534_v21, %v1727_v13  ;;  %v7826_v25 = vadd.f32 %v7534_v21, %v1728_v43  ;;  %v1969_v10 = vmul.f32 %v1905_v41, %v7667_v46  ;;  %v10117_v43 = vld [vmem:[#allocation24_spill] sm:$0xff] }
 0x285   : > { %5905 = vmatmul.mubr.bf16.gmra.mrb[8].mxu1 %v2406_v23  ;;  %v1970_v61 = vmul.f32 %v1906_v33, %v7677_v53  ;;  %v1729_v20 = vmul.f32 %v7526_v15, %v1661_v17  ;;  %v7832_v31 = vmul.f32 0.5, %v7667_v46  ;;  %v1907_v29 = vmul.f32 0.044715, %v7653_v56  ;;  %v10118_v23 = vld [vmem:[#allocation25_spill] sm:$0xff] }
 0x286   : > { %v1539_v57 = vadd.f32 1e-05, %v1475_v50  ;;  %v6359_v51 = vpop.eup %6358  ;;  %v2033_v42 = vmul.f32 %v1969_v10, %v7667_v46  ;;  %v1908_v26 = vmul.f32 0.044715, %v7658_v7  ;;  %v1476_v22 = vmul.f32 0.0078125, %v1392_v3 }
 0x287   : > { %v2034_v14 = vmul.f32 %v1970_v61, %v7677_v53  ;;  %v6361_v32 = vpop.eup %6360  ;;  %v1730_v59 = vmul.f32 %v7526_v15, %v1662_v27  ;;  %v1663_v39 = vmul.f32 %v6357_v24, %v10116_v45  ;;  %6370 = vrsqrt.f32 %v1538_v11  ;;  %v1394_v27 = vpop.xlane.xlu0 %1393 }
 0x288   : > { %v1971_v18 = vmul.f32 %v1907_v29, %v7653_v56  ;;  %v6363_v16 = vpop.eup %6362  ;;  %v2285_v9 = vadd.f32 1.0, %v6361_v32  ;;  %v2097_v13 = vadd.f32 %v2033_v42, %v7667_v46  ;;  %v1972_v38 = vmul.f32 %v1908_v26, %v7658_v7 }
 0x289   : > { %v2098_v1 = vadd.f32 %v2034_v14, %v7677_v53  ;;  %v2286_v37 = vadd.f32 1.0, %v6363_v16  ;;  %v1664_v8 = vmul.f32 %v6359_v51, %v10117_v43  ;;  %6372 = vrsqrt.f32 %v1539_v57  ;;  %v1396_v51 = vpop.xlane.xlu1 %1395 }
 0x28a   : > { %v6365_v44 = vpop.eup %6364  ;;  %v2035_v60 = vmul.f32 %v1971_v18, %v7653_v56  ;;  %v2161_v33 = vmul.f32 0.7978846, %v2097_v13  ;;  %v1540_v48 = vadd.f32 1e-05, %v1476_v22  ;;  %v2349_v46 = vmul.f32 %v2285_v9, %v1837_v47 }
 0x28b   : > { %v6367_v17 = vpop.eup %6366  ;;  %v1665_v41 = vmul.f32 %v6365_v44, %v10118_v23  ;;  %v2162_v24 = vmul.f32 0.7978846, %v2098_v1  ;;  %v2350_v50 = vmul.f32 %v2286_v37, %v1838_v63  ;;  %v2036_v10 = vmul.f32 %v1972_v38, %v7658_v7  ;;  %v1398_v1 = vpop.xlane.xlu0 %1397 }
 0x28c   : > { %v6369_v11 = vpop.eup %6368  ;;  %v2287_v3 = vadd.f32 1.0, %v6367_v17  ;;  %v1731_v61 = vmul.f32 %v7526_v15, %v1663_v39  ;;  %6374 = vtanh.f32 %v2161_v33  ;;  %v2099_v57 = vadd.f32 %v2035_v60, %v7653_v56  ;;  %v10119_v17 = vld [vmem:[#allocation26_spill] sm:$0xff] }
 0x28d   : > { %v2288_v29 = vadd.f32 1.0, %v6369_v11  ;;  %v2407_v42 = vpack.c.bf16 %v2350_v50, %v2349_v46  ;;  %v1732_v14 = vmul.f32 %v7526_v15, %v1664_v8  ;;  %6376 = vtanh.f32 %v2162_v24  ;;  %v1400_v60 = vpop.xlane.xlu1 %1399  ;;  %v10120_v46 = vld [vmem:[#allocation27_spill] sm:$0xff] }
 0x28e   : > { %v2100_v26 = vadd.f32 %v2036_v10, %v7658_v7  ;;  %v2351_v22 = vmul.f32 %v2287_v3, %v1839_v58  ;;  %v1733_v47 = vmul.f32 %v7526_v15, %v1665_v41  ;;  %v2163_v63 = vmul.f32 0.7978846, %v2099_v57 }
 0x28f   : > { %v2352_v32 = vmul.f32 %v2288_v29, %v1840_v4  ;;  %5908 = vmatprep.mubr.bf16.mxu1 %v2407_v42  ;;  %6378 = vrsqrt.f32 %v1540_v48  ;;  %v1477_v39 = vmul.f32 0.0078125, %v1394_v27  ;;  %v1478_v18 = vmul.f32 0.0078125, %v1396_v51  ;;  %v1402_v29 = vpop.xlane.xlu0 %1401 }
 0x290   : > { %v2164_v45 = vmul.f32 0.7978846, %v2100_v26  ;;  %v7854_v16 = vadd.f32 %v7534_v21, %v1729_v20  ;;  %v1842_v13 = vmul.f32 0.5, %v7677_v53  ;;  %6380 = vtanh.f32 %v2163_v63  ;;  %v7867_v53 = vld [vmem:[%s9949_s5 + $0x2] ss:$0 sm:$0xff] }
 0x291   : > { %v2408_v9 = vpack.c.bf16 %v2352_v32, %v2351_v22  ;;  %v6371_v38 = vpop.eup %6370  ;;  %v7858_v58 = vadd.f32 %v7534_v21, %v1730_v59  ;;  %v1541_v15 = vadd.f32 1e-05, %v1477_v39  ;;  %v1542_v4 = vadd.f32 1e-05, %v1478_v18 }
 0x292   : > { %6382 = vtanh.f32 %v2164_v45  ;;  %v1843_v44 = vmul.f32 0.5, %v7653_v56  ;;  %v1844_v37 = vmul.f32 0.5, %v7658_v7  ;;  %v1909_v20 = vmul.f32 0.044715, %v7698_v6 }
 0x293   : > { %5909 = vmatmul.mubr.bf16.gmra.mrb[12].mxu1 %v2408_v9  ;;  %v1910_v43 = vmul.f32 0.044715, %v7706_v55  ;;  %v6373_v8 = vpop.eup %6372  ;;  %v7870_v21 = vadd.f32 %v7867_v53, %v1731_v61  ;;  %v7873_v59 = vadd.f32 %v7867_v53, %v1732_v14  ;;  %v7876_v56 = vadd.f32 %v7867_v53, %v1733_v47 }
 0x294   : > { %v1479_v7 = vmul.f32 0.0078125, %v1398_v1  ;;  %v1666_v23 = vmul.f32 %v6371_v38, %v10119_v17  ;;  %6384 = vrsqrt.f32 %v1541_v15  ;;  %v1973_v41 = vmul.f32 %v1909_v20, %v7698_v6  ;;  %v10121_v15 = vld [vmem:[#allocation28_spill] sm:$0xff] }
 0x295   : > { %v1974_v33 = vmul.f32 %v1910_v43, %v7706_v55  ;;  %6386 = vrsqrt.f32 %v1542_v4  ;;  %v1911_v48 = vmul.f32 0.044715, %v7692_v62  ;;  %v1912_v27 = vmul.f32 0.044715, %v7695_v36 }
 0x296   : > { %v1543_v24 = vadd.f32 1e-05, %v1479_v7  ;;  %v6375_v11 = vpop.eup %6374  ;;  %v1667_v50 = vmul.f32 %v6373_v8, %v10120_v46  ;;  %v2037_v3 = vmul.f32 %v1973_v41, %v7698_v6  ;;  %v1480_v61 = vmul.f32 0.0078125, %v1400_v60  ;;  %v1404_v8 = vpop.xlane.xlu1 %1403 }
 0x297   : > { %v2038_v10 = vmul.f32 %v1974_v33, %v7706_v55  ;;  %v6377_v57 = vpop.eup %6376  ;;  %v2289_v51 = vadd.f32 1.0, %v6375_v11  ;;  %v1975_v42 = vmul.f32 %v1911_v48, %v7692_v62  ;;  %v1976_v14 = vmul.f32 %v1912_v27, %v7695_v36 }
 0x298   : > { %6388 = vrsqrt.f32 %v1543_v24  ;;  %v2290_v26 = vadd.f32 1.0, %v6377_v57  ;;  %v2101_v22 = vadd.f32 %v2037_v3, %v7698_v6  ;;  %v1544_v47 = vadd.f32 1e-05, %v1480_v61 }
 0x299   : > { %v2102_v32 = vadd.f32 %v2038_v10, %v7706_v55  ;;  %v6379_v63 = vpop.eup %6378  ;;  %v2353_v45 = vmul.f32 %v2289_v51, %v7832_v31  ;;  %v2039_v39 = vmul.f32 %v1975_v42, %v7692_v62  ;;  %v2040_v18 = vmul.f32 %v1976_v14, %v7695_v36  ;;  %v7899_v31 = vld [vmem:[%s9949_s5 + $0x1] ss:$0 sm:$0xff]  ;;  %v1406_v14 = vpop.xlane.xlu0 %1405 }
 0x29a   : > { %v1481_v9 = vmul.f32 0.0078125, %v1402_v29  ;;  %v6381_v1 = vpop.eup %6380  ;;  %v2354_v38 = vmul.f32 %v2290_v26, %v1842_v13  ;;  %v1668_v4 = vmul.f32 %v6379_v63, %v10121_v15  ;;  %v2165_v20 = vmul.f32 0.7978846, %v2101_v22  ;;  %v10123_v63 = vld [vmem:[#allocation30_spill] sm:$0xff] }
 0x29b   : > { %v2166_v43 = vmul.f32 0.7978846, %v2102_v32  ;;  %v2291_v60 = vadd.f32 1.0, %v6381_v1  ;;  %v2103_v17 = vadd.f32 %v2039_v39, %v7692_v62  ;;  %v2104_v41 = vadd.f32 %v2040_v18, %v7695_v36  ;;  %v10122_v32 = vld [vmem:[#allocation29_spill] sm:$0xff] }
 0x29c   : > { %v6383_v7 = vpop.eup %6382  ;;  %6390 = vrsqrt.f32 %v1544_v47  ;;  %v1734_v33 = vmul.f32 %v7899_v31, %v1666_v23  ;;  %v2409_v13 = vpack.c.bf16 %v2354_v38, %v2353_v45  ;;  %v7903_v48 = vmul.f32 0.5, %v7698_v6 }
 0x29d   : > { %v2292_v24 = vadd.f32 1.0, %v6383_v7  ;;  %6392 = vtanh.f32 %v2165_v20  ;;  %v2167_v27 = vmul.f32 0.7978846, %v2103_v17  ;;  %v2168_v11 = vmul.f32 0.7978846, %v2104_v41 }
 0x29e   : > { %6394 = vtanh.f32 %v2166_v43  ;;  %v6385_v46 = vpop.eup %6384  ;;  %5912 = vmatprep.mubr.bf16.mxu1 %v2409_v13  ;;  %v2355_v3 = vmul.f32 %v2291_v60, %v1843_v44  ;;  %v1846_v61 = vmul.f32 0.5, %v7706_v55  ;;  %v1545_v29 = vadd.f32 1e-05, %v1481_v9  ;;  %v1408_v44 = vpop.xlane.xlu1 %1407  ;;  %v10124_v13 = vld [vmem:[#allocation31_spill] sm:$0xff] }
 0x29f   : > { %v2356_v10 = vmul.f32 %v2292_v24, %v1844_v37  ;;  %v6387_v57 = vpop.eup %6386  ;;  %v1735_v51 = vmul.f32 %v7899_v31, %v1667_v50  ;;  %v1736_v23 = vmul.f32 %v7899_v31, %v1668_v4  ;;  %6396 = vtanh.f32 %v2167_v27 }
 0x2a0   : > { %v1482_v42 = vmul.f32 0.0078125, %v1404_v8  ;;  %v7909_v6 = vadd.f32 %v7867_v53, %v1734_v33  ;;  %v1847_v22 = vmul.f32 0.5, %v7692_v62  ;;  %6398 = vtanh.f32 %v2168_v11 }
 0x2a1   : > { %v2410_v26 = vpack.c.bf16 %v2356_v10, %v2355_v3  ;;  %v1669_v55 = vmul.f32 %v6385_v46, %v10122_v32  ;;  %6400 = vrsqrt.f32 %v1545_v29  ;;  %v1913_v50 = vmul.f32 0.044715, %v7719_v49  ;;  %v1410_v46 = vpop.xlane.xlu0 %1409  ;;  %v10125_v29 = vld [vmem:[#allocation32_spill] sm:$0xff] }
 0x2a2   : > { %v6389_v37 = vpop.eup %6388  ;;  %v1546_v47 = vadd.f32 1e-05, %v1482_v42  ;;  %v1670_v45 = vmul.f32 %v6387_v57, %v10123_v63  ;;  %v1848_v39 = vmul.f32 0.5, %v7695_v36  ;;  %v1914_v18 = vmul.f32 0.044715, %v7727_v52 }
 0x2a3   : > { %5913 = vmatmul.mubr.bf16.gmra.mrb[16].mxu1 %v2410_v26  ;;  %v1483_v9 = vmul.f32 0.0078125, %v1406_v14  ;;  %v7918_v1 = vadd.f32 %v7867_v53, %v1735_v51  ;;  %v7921_v62 = vadd.f32 %v7867_v53, %v1736_v23  ;;  %v1977_v38 = vmul.f32 %v1913_v50, %v7719_v49 }
 0x2a4   : > { %v1484_v15 = vmul.f32 0.0078125, %v1408_v44  ;;  %6402 = vrsqrt.f32 %v1546_v47  ;;  %v7925_v4 = vmul.f32 0.5, %v7719_v49  ;;  %v1978_v20 = vmul.f32 %v1914_v18, %v7727_v52 }
 0x2a5   : > { %v1547_v43 = vadd.f32 1e-05, %v1483_v9  ;;  %v1737_v8 = vmul.f32 %v7899_v31, %v1669_v55  ;;  %v2041_v7 = vmul.f32 %v1977_v38, %v7719_v49  ;;  %v1915_v17 = vmul.f32 0.044715, %v7730_v0 }
 0x2a6   : > { %v6391_v36 = vpop.eup %6390  ;;  %v1548_v60 = vadd.f32 1e-05, %v1484_v15  ;;  %v1738_v33 = vmul.f32 %v7899_v31, %v1670_v45  ;;  %v1671_v24 = vmul.f32 %v6389_v37, %v10124_v13  ;;  %v7934_v27 = vmul.f32 0.5, %v7727_v52  ;;  %v1412_v15 = vpop.xlane.xlu1 %1411 }
 0x2a7   : > { %v6393_v41 = vpop.eup %6392  ;;  %v2042_v11 = vmul.f32 %v1978_v20, %v7727_v52  ;;  %v1672_v57 = vmul.f32 %v6391_v36, %v10125_v29  ;;  %v2105_v51 = vadd.f32 %v2041_v7, %v7719_v49  ;;  %v1916_v23 = vmul.f32 0.044715, %v7751_v40  ;;  %v10126_v36 = vld [vmem:[#allocation4_spill] sm:$0xff] }
 0x2a8   : > { %v6395_v3 = vpop.eup %6394  ;;  %v2293_v10 = vadd.f32 1.0, %v6393_v41  ;;  %6404 = vrsqrt.f32 %v1547_v43  ;;  %v1979_v26 = vmul.f32 %v1915_v17, %v7730_v0  ;;  %v1485_v55 = vmul.f32 0.0078125, %v1410_v46 }
 0x2a9   : > { %v2294_v42 = vadd.f32 1.0, %v6395_v3  ;;  %v2106_v14 = vadd.f32 %v2042_v11, %v7727_v52  ;;  %v6397_v44 = vpop.eup %6396  ;;  %v2169_v37 = vmul.f32 0.7978846, %v2105_v51  ;;  %6406 = vrsqrt.f32 %v1548_v60 }
 0x2aa   : > { %v1980_v32 = vmul.f32 %v1916_v23, %v7751_v40  ;;  %v6399_v47 = vpop.eup %6398  ;;  %v2357_v50 = vmul.f32 %v2293_v10, %v7903_v48  ;;  %v2295_v45 = vadd.f32 1.0, %v6397_v44  ;;  %v2043_v52 = vmul.f32 %v1979_v26, %v7730_v0  ;;  %v1416_v44 = vpop.xlane.xlu1 %1415 }
 0x2ab   : > { %v2358_v63 = vmul.f32 %v2294_v42, %v1846_v61  ;;  %v2170_v49 = vmul.f32 0.7978846, %v2106_v14  ;;  %v6401_v18 = vpop.eup %6400  ;;  %v2296_v9 = vadd.f32 1.0, %v6399_v47  ;;  %6408 = vtanh.f32 %v2169_v37  ;;  %v10127_v14 = vld [vmem:[#allocation5_spill] sm:$0xff] }
 0x2ac   : > { %v2044_v38 = vmul.f32 %v1980_v32, %v7751_v40  ;;  %v2359_v43 = vmul.f32 %v2295_v45, %v1847_v22  ;;  %v1673_v7 = vmul.f32 %v6401_v18, %v10126_v36  ;;  %v2107_v17 = vadd.f32 %v2043_v52, %v7730_v0 }
 0x2ad   : > { %v2411_v20 = vpack.c.bf16 %v2358_v63, %v2357_v50  ;;  %6410 = vtanh.f32 %v2170_v49  ;;  %v2360_v60 = vmul.f32 %v2296_v9, %v1848_v39  ;;  %v1549_v61 = vadd.f32 1e-05, %v1485_v55  ;;  %v1414_v39 = vpop.xlane.xlu0 %1413 }
 0x2ae   : > { %v2108_v48 = vadd.f32 %v2044_v38, %v7751_v40  ;;  %v6403_v41 = vpop.eup %6402  ;;  %v7950_v13 = vadd.f32 %v7867_v53, %v1737_v8  ;;  %v1739_v11 = vmul.f32 %v7899_v31, %v1671_v24  ;;  %v1740_v46 = vmul.f32 %v7899_v31, %v1672_v57 }
 0x2af   : > { %5916 = vmatprep.mubr.bf16.mxu1 %v2411_v20  ;;  %v1486_v3 = vmul.f32 0.0078125, %v1412_v15  ;;  %v2412_v22 = vpack.c.bf16 %v2360_v60, %v2359_v43  ;;  %v2171_v10 = vmul.f32 0.7978846, %v2107_v17  ;;  %6412 = vrsqrt.f32 %v1549_v61  ;;  %v10128_v60 = vld [vmem:[#allocation2_spill] sm:$0xff] }
 0x2b0   : > { %v2172_v29 = vmul.f32 0.7978846, %v2108_v48  ;;  %v7955_v51 = vadd.f32 %v7867_v53, %v1738_v33  ;;  %v1741_v23 = vmul.f32 %v7899_v31, %v1673_v7  ;;  %v7959_v42 = vmul.f32 0.5, %v7730_v0  ;;  %v10129_v48 = vld [vmem:[#allocation3_spill] sm:$0xff] }
 0x2b1   : > { %v1550_v8 = vadd.f32 1e-05, %v1486_v3  ;;  %5917 = vmatmul.mubr.bf16.gmra.mrb[20].mxu1 %v2412_v22  ;;  %v1674_v24 = vmul.f32 %v6403_v41, %v10127_v14  ;;  %6414 = vtanh.f32 %v2171_v10  ;;  %v1917_v57 = vmul.f32 0.044715, %v7764_v5  ;;  %v1418_v43 = vpop.xlane.xlu0 %1417  ;;  %v1420_v10 = vpop.xlane.xlu1 %1419 }
 0x2b2   : > { %v1918_v26 = vmul.f32 0.044715, %v7774_v19  ;;  %v6405_v37 = vpop.eup %6404  ;;  %v7965_v32 = vadd.f32 %v7867_v53, %v1739_v11  ;;  %v7968_v33 = vmul.f32 0.5, %v7751_v40  ;;  %6416 = vtanh.f32 %v2172_v29 }
 0x2b3   : > { %v1487_v0 = vmul.f32 0.0078125, %v1414_v39  ;;  %v6407_v55 = vpop.eup %6406  ;;  %v7971_v47 = vadd.f32 %v7867_v53, %v1740_v46  ;;  %6418 = vrsqrt.f32 %v1550_v8  ;;  %v1981_v50 = vmul.f32 %v1917_v57, %v7764_v5 }
 0x2b4   : > { %v1982_v63 = vmul.f32 %v1918_v26, %v7774_v19  ;;  %v7976_v45 = vadd.f32 %v7867_v53, %v1741_v23  ;;  %v7979_v49 = vmul.f32 0.5, %v7764_v5  ;;  %v1488_v40 = vmul.f32 0.0078125, %v1416_v44 }
 0x2b5   : > { %v1551_v18 = vadd.f32 1e-05, %v1487_v0  ;;  %v6409_v9 = vpop.eup %6408  ;;  %v1742_v52 = vmul.f32 %v7899_v31, %v1674_v24  ;;  %v7983_v38 = vmul.f32 0.5, %v7774_v19  ;;  %v2045_v15 = vmul.f32 %v1981_v50, %v7764_v5 }
 0x2b6   : > { %v2046_v20 = vmul.f32 %v1982_v63, %v7774_v19  ;;  %v2297_v7 = vadd.f32 1.0, %v6409_v9  ;;  %v1675_v17 = vmul.f32 %v6405_v37, %v10128_v60  ;;  %v1676_v61 = vmul.f32 %v6407_v55, %v10129_v48 }
 0x2b7   : > { %v6411_v36 = vpop.eup %6410  ;;  %v1552_v41 = vadd.f32 1e-05, %v1488_v40  ;;  %v2109_v46 = vadd.f32 %v2045_v15, %v7764_v5  ;;  %v1919_v22 = vmul.f32 0.044715, %v7779_v2  ;;  %6420 = vrsqrt.f32 %v1551_v18 }
 0x2b8   : > { %v2298_v11 = vadd.f32 1.0, %v6411_v36  ;;  %v2110_v3 = vadd.f32 %v2046_v20, %v7774_v19  ;;  %v2361_v29 = vmul.f32 %v2297_v7, %v7925_v4  ;;  %v1920_v39 = vmul.f32 0.044715, %v7782_v12  ;;  %v10131_v7 = vld [vmem:[#allocation9_spill] sm:$0xff] }
 0x2b9   : > { %v1489_v23 = vmul.f32 0.0078125, %v1418_v43  ;;  %v6413_v8 = vpop.eup %6412  ;;  %v2173_v24 = vmul.f32 0.7978846, %v2109_v46  ;;  %v1983_v26 = vmul.f32 %v1919_v22, %v7779_v2  ;;  %6422 = vrsqrt.f32 %v1552_v41  ;;  %v1422_v41 = vpop.xlane.xlu0 %1421 }
 0x2ba   : > { %v2362_v14 = vmul.f32 %v2298_v11, %v7934_v27  ;;  %v2174_v57 = vmul.f32 0.7978846, %v2110_v3  ;;  %v1984_v5 = vmul.f32 %v1920_v39, %v7782_v12  ;;  %v1490_v44 = vmul.f32 0.0078125, %v1420_v10  ;;  %v10130_v27 = vld [vmem:[#allocation8_spill] sm:$0xff] }
 0x2bb   : > { %v1553_v19 = vadd.f32 1e-05, %v1489_v23  ;;  %v6415_v37 = vpop.eup %6414  ;;  %v7998_v0 = vadd.f32 %v7867_v53, %v1742_v52  ;;  %6424 = vtanh.f32 %v2173_v24  ;;  %v2047_v55 = vmul.f32 %v1983_v26, %v7779_v2 }
 0x2bc   : > { %v2413_v4 = vpack.c.bf16 %v2362_v14, %v2361_v29  ;;  %v6417_v50 = vpop.eup %6416  ;;  %v2299_v63 = vadd.f32 1.0, %v6415_v37  ;;  %v1677_v18 = vmul.f32 %v6413_v8, %v10130_v27  ;;  %6426 = vtanh.f32 %v2174_v57  ;;  %v1424_v8 = vpop.xlane.xlu1 %1423 }
 0x2bd   : > { %v2048_v40 = vmul.f32 %v1984_v5, %v7782_v12  ;;  %v6419_v9 = vpop.eup %6418  ;;  %v2300_v15 = vadd.f32 1.0, %v6417_v50  ;;  %v2111_v20 = vadd.f32 %v2047_v55, %v7779_v2  ;;  %6428 = vrsqrt.f32 %v1553_v19 }
 0x2be   : > { %5920 = vmatprep.mubr.bf16.mxu1 %v2413_v4  ;;  %v1554_v43 = vadd.f32 1e-05, %v1490_v44  ;;  %v1743_v52 = vmul.f32 %v7899_v31, %v1675_v17  ;;  %v1744_v36 = vmul.f32 %v7899_v31, %v1676_v61  ;;  %v1678_v60 = vmul.f32 %v6419_v9, %v10131_v7 }
 0x2bf   : > { %v2112_v48 = vadd.f32 %v2048_v40, %v7782_v12  ;;  %v2363_v11 = vmul.f32 %v2299_v63, %v7959_v42  ;;  %v2364_v46 = vmul.f32 %v2300_v15, %v7968_v33  ;;  %v2175_v3 = vmul.f32 0.7978846, %v2111_v20 }
 0x2c0   : > { %6430 = vrsqrt.f32 %v1554_v43  ;;  %v1745_v22 = vmul.f32 %v7899_v31, %v1677_v18  ;;  %v1921_v29 = vmul.f32 0.044715, %v7785_v35  ;;  %v1922_v17 = vmul.f32 0.044715, %v7813_v54  ;;  %v10132_v18 = vld [vmem:[#allocation6_spill] sm:$0xff] }
 0x2c1   : > { %v2176_v10 = vmul.f32 0.7978846, %v2112_v48  ;;  %v2414_v39 = vpack.c.bf16 %v2364_v46, %v2363_v11  ;;  %v1746_v61 = vmul.f32 %v7899_v31, %v1678_v60  ;;  %6432 = vtanh.f32 %v2175_v3  ;;  %v6421_v14 = vpop.eup %6420  ;;  %v10133_v48 = vld [vmem:[#allocation7_spill] sm:$0xff]  ;;  %v1428_v46 = vpop.xlane.xlu1 %1427 }
 0x2c2   : > { %v1491_v23 = vmul.f32 0.0078125, %v1422_v41  ;;  %v1855_v42 = vmul.f32 0.5, %v7779_v2  ;;  %v1985_v33 = vmul.f32 %v1921_v29, %v7785_v35  ;;  %v1986_v24 = vmul.f32 %v1922_v17, %v7813_v54 }
 0x2c3   : > { %6434 = vtanh.f32 %v2176_v10  ;;  %v8018_v57 = vadd.f32 %v7867_v53, %v1743_v52  ;;  %v8021_v26 = vadd.f32 %v7867_v53, %v1744_v36  ;;  %5921 = vmatmul.mubr.bf16.gmra.mrb[24].mxu1 %v2414_v39  ;;  %v1856_v5 = vmul.f32 0.5, %v7782_v12  ;;  %v6423_v44 = vpop.eup %6422  ;;  %v1426_v36 = vpop.xlane.xlu0 %1425 }
 0x2c4   : > { %v1555_v19 = vadd.f32 1e-05, %v1491_v23  ;;  %v8025_v37 = vmul.f32 0.5, %v7785_v35  ;;  %v2049_v2 = vmul.f32 %v1985_v33, %v7785_v35  ;;  %v2050_v4 = vmul.f32 %v1986_v24, %v7813_v54  ;;  %v10134_v23 = vld [vmem:[#allocation12_spill] sm:$0xff] }
 0x2c5   : > { %v1492_v55 = vmul.f32 0.0078125, %v1424_v8  ;;  %v6425_v50 = vpop.eup %6424  ;;  %v8030_v63 = vadd.f32 %v7867_v53, %v1745_v22  ;;  %v8033_v27 = vadd.f32 %v7867_v53, %v1746_v61  ;;  %v1679_v40 = vmul.f32 %v6421_v14, %v10132_v18  ;;  %v10135_v14 = vld [vmem:[#allocation13_spill] sm:$0xff] }
 0x2c6   : > { %v8037_v12 = vmul.f32 0.5, %v7813_v54  ;;  %v6427_v9 = vpop.eup %6426  ;;  %v2301_v15 = vadd.f32 1.0, %v6425_v50  ;;  %v2113_v20 = vadd.f32 %v2049_v2, %v7785_v35  ;;  %v2114_v43 = vadd.f32 %v2050_v4, %v7813_v54 }
 0x2c7   : > { %v1923_v52 = vmul.f32 0.044715, %v7823_v28  ;;  %v6429_v7 = vpop.eup %6428  ;;  %v2302_v60 = vadd.f32 1.0, %v6427_v9  ;;  %v1680_v41 = vmul.f32 %v6423_v44, %v10133_v48  ;;  %6436 = vrsqrt.f32 %v1555_v19 }
 0x2c8   : > { %v1924_v11 = vmul.f32 0.044715, %v7826_v25  ;;  %v2365_v3 = vmul.f32 %v2301_v15, %v7979_v49  ;;  %v2177_v22 = vmul.f32 0.7978846, %v2113_v20  ;;  %v2178_v10 = vmul.f32 0.7978846, %v2114_v43 }
 0x2c9   : > { %v1556_v29 = vadd.f32 1e-05, %v1492_v55  ;;  %v2366_v35 = vmul.f32 %v2302_v60, %v7983_v38  ;;  %v1987_v54 = vmul.f32 %v1923_v52, %v7823_v28  ;;  %v1493_v61 = vmul.f32 0.0078125, %v1426_v36 }
 0x2ca   : > { %v6431_v17 = vpop.eup %6430  ;;  %v1988_v39 = vmul.f32 %v1924_v11, %v7826_v25  ;;  %v1681_v8 = vmul.f32 %v6429_v7, %v10134_v23  ;;  %6438 = vtanh.f32 %v2177_v22  ;;  %v1494_v24 = vmul.f32 0.0078125, %v1428_v46 }
 0x2cb   : > { %v1682_v33 = vmul.f32 %v6431_v17, %v10135_v14  ;;  %v6433_v19 = vpop.eup %6432  ;;  %v2415_v44 = vpack.c.bf16 %v2366_v35, %v2365_v3  ;;  %6440 = vtanh.f32 %v2178_v10  ;;  %v2051_v49 = vmul.f32 %v1987_v54, %v7823_v28 }
 0x2cc   : > { %v2052_v2 = vmul.f32 %v1988_v39, %v7826_v25  ;;  %v1747_v38 = vmul.f32 %v7899_v31, %v1679_v40  ;;  %v2303_v55 = vadd.f32 1.0, %v6433_v19  ;;  %6442 = vrsqrt.f32 %v1556_v29 }
 0x2cd   : > { %v6435_v4 = vpop.eup %6434  ;;  %v1557_v50 = vadd.f32 1e-05, %v1493_v61  ;;  %5924 = vmatprep.mubr.bf16.mxu1 %v2415_v44  ;;  %v2115_v9 = vadd.f32 %v2051_v49, %v7823_v28  ;;  %v1558_v20 = vadd.f32 1e-05, %v1494_v24  ;;  %v1748_v43 = vmul.f32 %v7899_v31, %v1680_v41  ;;  %v10136_v61 = vld [vmem:[#allocation10_spill] sm:$0xff] }
 0x2ce   : > { %v2304_v18 = vadd.f32 1.0, %v6435_v4  ;;  %v2116_v15 = vadd.f32 %v2052_v2, %v7826_v25  ;;  %v2367_v52 = vmul.f32 %v2303_v55, %v1855_v42  ;;  %v1749_v36 = vmul.f32 %v7899_v31, %v1681_v8 }
 0x2cf   : > { %v1750_v7 = vmul.f32 %v7899_v31, %v1682_v33  ;;  %v2179_v48 = vmul.f32 0.7978846, %v2115_v9  ;;  %6444 = vrsqrt.f32 %v1557_v50  ;;  %v8059_v11 = vmul.f32 0.5, %v7823_v28 }
 0x2d0   : > { %v2368_v60 = vmul.f32 %v2304_v18, %v1856_v5  ;;  %v2180_v40 = vmul.f32 0.7978846, %v2116_v15  ;;  %6446 = vrsqrt.f32 %v1558_v20  ;;  %v1925_v46 = vmul.f32 0.044715, %v7854_v16 }
 0x2d1   : > { %v1926_v3 = vmul.f32 0.044715, %v7858_v58  ;;  %v6437_v22 = vpop.eup %6436  ;;  %v8064_v41 = vadd.f32 %v7867_v53, %v1747_v38  ;;  %v8067_v10 = vmul.f32 0.5, %v7826_v25  ;;  %6448 = vtanh.f32 %v2179_v48 }
 0x2d2   : > { %v2416_v42 = vpack.c.bf16 %v2368_v60, %v2367_v52  ;;  %v8070_v5 = vadd.f32 %v7867_v53, %v1748_v43  ;;  %v8073_v28 = vadd.f32 %v7867_v53, %v1749_v36  ;;  %6450 = vtanh.f32 %v2180_v40 }
 0x2d3   : > { %v1989_v29 = vmul.f32 %v1925_v46, %v7854_v16  ;;  %v8077_v17 = vadd.f32 %v7867_v53, %v1750_v7  ;;  %v1990_v35 = vmul.f32 %v1926_v3, %v7858_v58  ;;  %v1927_v54 = vmul.f32 0.044715, %v7870_v21 }
 0x2d4   : > { %5925 = vmatmul.mubr.bf16.gmra.mrb[28].mxu1 %v2416_v42  ;;  %v1928_v25 = vmul.f32 0.044715, %v7873_v59  ;;  %v6439_v39 = vpop.eup %6438  ;;  %v1683_v23 = vmul.f32 %v6437_v22, %v10136_v61  ;;  %v8084_v8 = vmul.f32 0.5, %v7854_v16  ;;  %v8087_v14 = vmul.f32 0.5, %v7858_v58  ;;  %v10137_v22 = vld [vmem:[#allocation11_spill] sm:$0xff] }
 0x2d5   : > { %v2053_v33 = vmul.f32 %v1989_v29, %v7854_v16  ;;  %v6441_v24 = vpop.eup %6440  ;;  %v2305_v19 = vadd.f32 1.0, %v6439_v39  ;;  %v2054_v44 = vmul.f32 %v1990_v35, %v7858_v58  ;;  %v1991_v49 = vmul.f32 %v1927_v54, %v7870_v21 }
 0x2d6   : > { %v1992_v2 = vmul.f32 %v1928_v25, %v7873_v59  ;;  %v6443_v4 = vpop.eup %6442  ;;  %v2306_v38 = vadd.f32 1.0, %v6441_v24  ;;  %v8095_v50 = vmul.f32 0.5, %v7870_v21  ;;  %v1929_v18 = vmul.f32 0.044715, %v7876_v56 }
 0x2d7   : > { %v2117_v55 = vadd.f32 %v2053_v33, %v7854_v16  ;;  %v2369_v9 = vmul.f32 %v2305_v19, %v8025_v37  ;;  %v2118_v15 = vadd.f32 %v2054_v44, %v7858_v58  ;;  %v2055_v20 = vmul.f32 %v1991_v49, %v7870_v21 }
 0x2d8   : > { %v2056_v43 = vmul.f32 %v1992_v2, %v7873_v59  ;;  %v2370_v52 = vmul.f32 %v2306_v38, %v8037_v12  ;;  %v1930_v7 = vmul.f32 0.044715, %v7909_v6  ;;  %v1993_v16 = vmul.f32 %v1929_v18, %v7876_v56  ;;  %v10139_v2 = vld [vmem:[#allocation15_spill] sm:$0xff] }
 0x2d9   : > { %v2181_v36 = vmul.f32 0.7978846, %v2117_v55  ;;  %v6445_v60 = vpop.eup %6444  ;;  %v1751_v48 = vmul.f32 %v7899_v31, %v1683_v23  ;;  %v2182_v40 = vmul.f32 0.7978846, %v2118_v15  ;;  %v2119_v46 = vadd.f32 %v2055_v20, %v7870_v21  ;;  %v10138_v21 = vld [vmem:[#allocation14_spill] sm:$0xff] }
 0x2da   : > { %v2120_v37 = vadd.f32 %v2056_v43, %v7873_v59  ;;  %v6447_v58 = vpop.eup %6446  ;;  %v2417_v3 = vpack.c.bf16 %v2370_v52, %v2369_v9  ;;  %v1684_v42 = vmul.f32 %v6443_v4, %v10137_v22  ;;  %v1994_v12 = vmul.f32 %v1930_v7, %v7909_v6 }
 0x2db   : > { %6452 = vtanh.f32 %v2181_v36  ;;  %v6449_v29 = vpop.eup %6448  ;;  %v8111_v35 = vmul.f32 0.5, %v7873_v59  ;;  %v2183_v54 = vmul.f32 0.7978846, %v2119_v46  ;;  %v1685_v23 = vmul.f32 %v6445_v60, %v10138_v21 }
 0x2dc   : > { %6454 = vtanh.f32 %v2182_v40  ;;  %v2184_v25 = vmul.f32 0.7978846, %v2120_v37  ;;  %v6451_v39 = vpop.eup %6450  ;;  %5928 = vmatprep.mubr.bf16.mxu1 %v2417_v3  ;;  %v2307_v61 = vadd.f32 1.0, %v6449_v29  ;;  %v2057_v33 = vmul.f32 %v1993_v16, %v7876_v56 }
 0x2dd   : > { %v2058_v24 = vmul.f32 %v1994_v12, %v7909_v6  ;;  %v8117_v19 = vadd.f32 %v7867_v53, %v1751_v48  ;;  %v2308_v44 = vadd.f32 1.0, %v6451_v39  ;;  %6456 = vtanh.f32 %v2183_v54 }
 0x2de   : > { %v8120_v49 = vmul.f32 0.5, %v7876_v56  ;;  %v1752_v59 = vmul.f32 %v7899_v31, %v1684_v42  ;;  %v1686_v4 = vmul.f32 %v6447_v58, %v10139_v2  ;;  %6458 = vtanh.f32 %v2184_v25 }
 0x2df   : > { %v2121_v38 = vadd.f32 %v2057_v33, %v7876_v56  ;;  %v2371_v55 = vmul.f32 %v2307_v61, %v8059_v11  ;;  %v2372_v18 = vmul.f32 %v2308_v44, %v8067_v10  ;;  %v2122_v9 = vadd.f32 %v2058_v24, %v7909_v6 }
 0x2e0   : > { %v1931_v15 = vmul.f32 0.044715, %v7918_v1  ;;  %v1753_v20 = vmul.f32 %v7899_v31, %v1685_v23  ;;  %v8131_v43 = vmul.f32 0.5, %v7909_v6  ;;  %v1932_v36 = vmul.f32 0.044715, %v7921_v62 }
 0x2e1   : > { %v2185_v52 = vmul.f32 0.7978846, %v2121_v38  ;;  %v2418_v7 = vpack.c.bf16 %v2372_v18, %v2371_v55  ;;  %v2186_v16 = vmul.f32 0.7978846, %v2122_v9  ;;  %v1933_v11 = vmul.f32 0.044715, %v7950_v13 }
 0x2e2   : > { %v1995_v56 = vmul.f32 %v1931_v15, %v7918_v1  ;;  %v8137_v10 = vadd.f32 %v7867_v53, %v1752_v59  ;;  %v1996_v60 = vmul.f32 %v1932_v36, %v7921_v62  ;;  %v1934_v48 = vmul.f32 0.044715, %v7955_v51 }
 0x2e3   : > { %6460 = vtanh.f32 %v2185_v52  ;;  %5929 = vmatmul.mubr.bf16.gmra.mrb[32].mxu1 %v2418_v7  ;;  %v1754_v6 = vmul.f32 %v7899_v31, %v1686_v4  ;;  %v1997_v46 = vmul.f32 %v1933_v11, %v7950_v13  ;;  %v1935_v22 = vmul.f32 0.044715, %v7965_v32 }
 0x2e4   : > { %6462 = vtanh.f32 %v2186_v16  ;;  %v2059_v40 = vmul.f32 %v1995_v56, %v7918_v1  ;;  %v2060_v58 = vmul.f32 %v1996_v60, %v7921_v62  ;;  %v1998_v3 = vmul.f32 %v1934_v48, %v7955_v51 }
 0x2e5   : > { %v6453_v37 = vpop.eup %6452  ;;  %v1936_v42 = vmul.f32 0.044715, %v7971_v47  ;;  %v8149_v29 = vadd.f32 %v7867_v53, %v1753_v20  ;;  %v2061_v25 = vmul.f32 %v1997_v46, %v7950_v13  ;;  %v1999_v23 = vmul.f32 %v1935_v22, %v7965_v32 }
 0x2e6   : > { %v6455_v12 = vpop.eup %6454  ;;  %v2309_v54 = vadd.f32 1.0, %v6453_v37  ;;  %v2123_v31 = vadd.f32 %v2059_v40, %v7918_v1  ;;  %v2124_v61 = vadd.f32 %v2060_v58, %v7921_v62  ;;  %v2062_v21 = vmul.f32 %v1998_v3, %v7955_v51 }
 0x2e7   : > { %v2310_v39 = vadd.f32 1.0, %v6455_v12  ;;  %v6457_v33 = vpop.eup %6456  ;;  %v2125_v59 = vadd.f32 %v2061_v25, %v7950_v13  ;;  %v2000_v2 = vmul.f32 %v1936_v42, %v7971_v47  ;;  %v2063_v52 = vmul.f32 %v1999_v23, %v7965_v32 }
 0x2e8   : > { %v2373_v24 = vmul.f32 %v2309_v54, %v8084_v8  ;;  %v2187_v44 = vmul.f32 0.7978846, %v2123_v31  ;;  %v6459_v4 = vpop.eup %6458  ;;  %v2311_v55 = vadd.f32 1.0, %v6457_v33  ;;  %v2188_v18 = vmul.f32 0.7978846, %v2124_v61 }
 0x2e9   : > { %v2374_v38 = vmul.f32 %v2310_v39, %v8087_v14  ;;  %v2126_v9 = vadd.f32 %v2062_v21, %v7955_v51  ;;  %v2312_v15 = vadd.f32 1.0, %v6459_v4  ;;  %v2189_v20 = vmul.f32 0.7978846, %v2125_v59 }
 0x2ea   : > { %6464 = vtanh.f32 %v2187_v44  ;;  %v2375_v8 = vmul.f32 %v2311_v55, %v8095_v50  ;;  %v2064_v56 = vmul.f32 %v2000_v2, %v7971_v47  ;;  %v2127_v14 = vadd.f32 %v2063_v52, %v7965_v32 }
 0x2eb   : > { %v2419_v36 = vpack.c.bf16 %v2374_v38, %v2373_v24  ;;  %6466 = vtanh.f32 %v2188_v18  ;;  %v2190_v7 = vmul.f32 0.7978846, %v2126_v9  ;;  %v2376_v16 = vmul.f32 %v2312_v15, %v8111_v35 }
 0x2ec   : > { %6468 = vtanh.f32 %v2189_v20  ;;  %v1867_v60 = vmul.f32 0.5, %v7918_v1  ;;  %v1937_v48 = vmul.f32 0.044715, %v7976_v45  ;;  %v1938_v40 = vmul.f32 0.044715, %v7998_v0 }
 0x2ed   : > { %v6461_v11 = vpop.eup %6460  ;;  %5932 = vmatprep.mubr.bf16.mxu1 %v2419_v36  ;;  %6470 = vtanh.f32 %v2190_v7  ;;  %v2420_v50 = vpack.c.bf16 %v2376_v16, %v2375_v8  ;;  %v2128_v58 = vadd.f32 %v2064_v56, %v7971_v47  ;;  %v2191_v35 = vmul.f32 0.7978846, %v2127_v14 }
 0x2ee   : > { %v6463_v46 = vpop.eup %6462  ;;  %v2313_v37 = vadd.f32 1.0, %v6461_v11  ;;  %v8171_v3 = vadd.f32 %v7867_v53, %v1754_v6  ;;  %v2001_v42 = vmul.f32 %v1937_v48, %v7976_v45  ;;  %v2002_v12 = vmul.f32 %v1938_v40, %v7998_v0 }
 0x2ef   : > { %v2314_v22 = vadd.f32 1.0, %v6463_v46  ;;  %5933 = vmatmul.mubr.bf16.gmra.mrb[36].mxu1 %v2420_v50  ;;  %v1868_v54 = vmul.f32 0.5, %v7921_v62  ;;  %v2192_v31 = vmul.f32 0.7978846, %v2128_v58  ;;  %6472 = vtanh.f32 %v2191_v35 }
 0x2f0   : > { %v2377_v1 = vmul.f32 %v2313_v37, %v8120_v49  ;;  %v2065_v39 = vmul.f32 %v2001_v42, %v7976_v45  ;;  %v2066_v61 = vmul.f32 %v2002_v12, %v7998_v0  ;;  %v1939_v53 = vmul.f32 0.044715, %v8018_v57 }
 0x2f1   : > { %v2378_v25 = vmul.f32 %v2314_v22, %v8131_v43  ;;  %v1869_v6 = vmul.f32 0.5, %v7950_v13  ;;  %v1870_v21 = vmul.f32 0.5, %v7955_v51  ;;  %6474 = vtanh.f32 %v2192_v31 }
 0x2f2   : > { %v1940_v23 = vmul.f32 0.044715, %v8021_v26  ;;  %v2129_v62 = vadd.f32 %v2065_v39, %v7976_v45  ;;  %v2130_v33 = vadd.f32 %v2066_v61, %v7998_v0  ;;  %v2003_v43 = vmul.f32 %v1939_v53, %v8018_v57 }
 0x2f3   : > { %v2421_v49 = vpack.c.bf16 %v2378_v25, %v2377_v1  ;;  %v1871_v44 = vmul.f32 0.5, %v7965_v32  ;;  %v1941_v2 = vmul.f32 0.044715, %v8030_v63  ;;  %v1942_v13 = vmul.f32 0.044715, %v8033_v27 }
 0x2f4   : > { %v6465_v24 = vpop.eup %6464  ;;  %v2004_v59 = vmul.f32 %v1940_v23, %v8021_v26  ;;  %v2193_v38 = vmul.f32 0.7978846, %v2129_v62  ;;  %v2194_v55 = vmul.f32 0.7978846, %v2130_v33  ;;  %v2067_v18 = vmul.f32 %v2003_v43, %v8018_v57 }
 0x2f5   : > { %v6467_v51 = vpop.eup %6466  ;;  %5936 = vmatprep.mubr.bf16.mxu1 %v2421_v49  ;;  %v2315_v4 = vadd.f32 1.0, %v6465_v24  ;;  %v2005_v52 = vmul.f32 %v1941_v2, %v8030_v63  ;;  %v2006_v32 = vmul.f32 %v1942_v13, %v8033_v27  ;;  %v1872_v48 = vmul.f32 0.5, %v7971_v47 }
 0x2f6   : > { %v6469_v9 = vpop.eup %6468  ;;  %v2316_v15 = vadd.f32 1.0, %v6467_v51  ;;  %v2068_v20 = vmul.f32 %v2004_v59, %v8021_v26  ;;  %6476 = vtanh.f32 %v2193_v38  ;;  %v2131_v16 = vadd.f32 %v2067_v18, %v8018_v57 }
 0x2f7   : > { %v6471_v36 = vpop.eup %6470  ;;  %v2379_v8 = vmul.f32 %v2315_v4, %v1867_v60  ;;  %v2317_v7 = vadd.f32 1.0, %v6469_v9  ;;  %6478 = vtanh.f32 %v2194_v55  ;;  %v2069_v46 = vmul.f32 %v2005_v52, %v8030_v63 }
 0x2f8   : > { %v2380_v56 = vmul.f32 %v2316_v15, %v1868_v54  ;;  %v2318_v14 = vadd.f32 1.0, %v6471_v36  ;;  %v2132_v11 = vadd.f32 %v2068_v20, %v8021_v26  ;;  %v2195_v40 = vmul.f32 0.7978846, %v2131_v16 }
 0x2f9   : > { %v2070_v50 = vmul.f32 %v2006_v32, %v8033_v27  ;;  %v6473_v37 = vpop.eup %6472  ;;  %v2381_v35 = vmul.f32 %v2317_v7, %v1869_v6  ;;  %v2133_v12 = vadd.f32 %v2069_v46, %v8030_v63  ;;  %v1943_v47 = vmul.f32 0.044715, %v8064_v41 }
 0x2fa   : > { %v2422_v58 = vpack.c.bf16 %v2380_v56, %v2379_v8  ;;  %v2382_v60 = vmul.f32 %v2318_v14, %v1870_v21  ;;  %v2196_v22 = vmul.f32 0.7978846, %v2132_v11  ;;  %v2319_v42 = vadd.f32 1.0, %v6473_v37 }
 0x2fb   : > { %6480 = vtanh.f32 %v2195_v40  ;;  %v2134_v1 = vadd.f32 %v2070_v50, %v8033_v27  ;;  %v6475_v54 = vpop.eup %6474  ;;  %v1944_v25 = vmul.f32 0.044715, %v8070_v5  ;;  %v1873_v61 = vmul.f32 0.5, %v7976_v45 }
 0x2fc   : > { %5937 = vmatmul.mubr.bf16.gmra.mrb[40].mxu1 %v2422_v58  ;;  %v2423_v31 = vpack.c.bf16 %v2382_v60, %v2381_v35  ;;  %6482 = vtanh.f32 %v2196_v22  ;;  %v2320_v39 = vadd.f32 1.0, %v6475_v54  ;;  %v2197_v53 = vmul.f32 0.7978846, %v2133_v12 }
 0x2fd   : > { %v2198_v6 = vmul.f32 0.7978846, %v2134_v1  ;;  %v2383_v21 = vmul.f32 %v2319_v42, %v1871_v44  ;;  %v1874_v23 = vmul.f32 0.5, %v7998_v0  ;;  %v2007_v49 = vmul.f32 %v1943_v47, %v8064_v41 }
 0x2fe   : > { %5940 = vmatprep.mubr.bf16.mxu1 %v2423_v31  ;;  %v2008_v62 = vmul.f32 %v1944_v25, %v8070_v5  ;;  %v2384_v33 = vmul.f32 %v2320_v39, %v1872_v48  ;;  %6484 = vtanh.f32 %v2197_v53  ;;  %v1945_v43 = vmul.f32 0.044715, %v8073_v28  ;;  %v1430_v25 = vpop.xlane.xlu0 %1429 }
 0x2ff   : > { %v1946_v24 = vmul.f32 0.044715, %v8077_v17  ;;  %v1875_v59 = vmul.f32 0.5, %v8018_v57  ;;  %6486 = vtanh.f32 %v2198_v6  ;;  %v2071_v45 = vmul.f32 %v2007_v49, %v8064_v41 }
 0x300   : > { %v2072_v2 = vmul.f32 %v2008_v62, %v8070_v5  ;;  %v6477_v44 = vpop.eup %6476  ;;  %v2424_v13 = vpack.c.bf16 %v2384_v33, %v2383_v21  ;;  %v1876_v0 = vmul.f32 0.5, %v8021_v26  ;;  %v2009_v51 = vmul.f32 %v1945_v43, %v8073_v28 }
 0x301   : > { %v2010_v4 = vmul.f32 %v1946_v24, %v8077_v17  ;;  %v6479_v38 = vpop.eup %6478  ;;  %v2321_v55 = vadd.f32 1.0, %v6477_v44  ;;  %v2135_v18 = vadd.f32 %v2071_v45, %v8064_v41  ;;  %v1947_v57 = vmul.f32 0.044715, %v8117_v19 }
 0x302   : > { %v2136_v9 = vadd.f32 %v2072_v2, %v8070_v5  ;;  %v2322_v15 = vadd.f32 1.0, %v6479_v38  ;;  %v2073_v20 = vmul.f32 %v2009_v51, %v8073_v28  ;;  %v1948_v32 = vmul.f32 0.044715, %v8137_v10 }
 0x303   : > { %v2074_v52 = vmul.f32 %v2010_v4, %v8077_v17  ;;  %v2385_v26 = vmul.f32 %v2321_v55, %v1873_v61  ;;  %v2199_v36 = vmul.f32 0.7978846, %v2135_v18  ;;  %v2011_v7 = vmul.f32 %v1947_v57, %v8117_v19 }
 0x304   : > { %5941 = vmatmul.mubr.bf16.gmra.mrb[44].mxu1 %v2424_v13  ;;  %v2200_v8 = vmul.f32 0.7978846, %v2136_v9  ;;  %v2386_v56 = vmul.f32 %v2322_v15, %v1874_v23  ;;  %v2137_v14 = vadd.f32 %v2073_v20, %v8073_v28  ;;  %v2012_v48 = vmul.f32 %v1948_v32, %v8137_v10 }
 0x305   : > { %v6481_v16 = vpop.eup %6480  ;;  %v2138_v11 = vadd.f32 %v2074_v52, %v8077_v17  ;;  %v1877_v50 = vmul.f32 0.5, %v8030_v63  ;;  %6488 = vtanh.f32 %v2199_v36  ;;  %v2075_v37 = vmul.f32 %v2011_v7, %v8117_v19 }
 0x306   : > { %v6483_v40 = vpop.eup %6482  ;;  %v2323_v46 = vadd.f32 1.0, %v6481_v16  ;;  %v2425_v58 = vpack.c.bf16 %v2386_v56, %v2385_v26  ;;  %6490 = vtanh.f32 %v2200_v8  ;;  %v2201_v60 = vmul.f32 0.7978846, %v2137_v14 }
 0x307   : > { %v2324_v35 = vadd.f32 1.0, %v6483_v40  ;;  %v1878_v22 = vmul.f32 0.5, %v8033_v27  ;;  %v2202_v42 = vmul.f32 0.7978846, %v2138_v11  ;;  %v2076_v12 = vmul.f32 %v2012_v48, %v8137_v10  ;;  %v1432_v27 = vpop.xlane.xlu1 %1431 }
 0x308   : > { %v2139_v1 = vadd.f32 %v2075_v37, %v8117_v19  ;;  %v6485_v54 = vpop.eup %6484  ;;  %5944 = vmatprep.mubr.bf16.mxu1 %v2425_v58  ;;  %v2387_v31 = vmul.f32 %v2323_v46, %v1875_v59  ;;  %6492 = vtanh.f32 %v2201_v60  ;;  %v1949_v63 = vmul.f32 0.044715, %v8149_v29 }
 0x309   : > { %v2388_v47 = vmul.f32 %v2324_v35, %v1876_v0  ;;  %v6487_v39 = vpop.eup %6486  ;;  %v2325_v61 = vadd.f32 1.0, %v6485_v54  ;;  %6494 = vtanh.f32 %v2202_v42  ;;  %v2140_v53 = vadd.f32 %v2076_v12, %v8137_v10 }
 0x30a   : > { %v2203_v6 = vmul.f32 0.7978846, %v2139_v1  ;;  %v2326_v23 = vadd.f32 1.0, %v6487_v39  ;;  %v1950_v49 = vmul.f32 0.044715, %v8171_v3  ;;  %v2013_v62 = vmul.f32 %v1949_v63, %v8149_v29 }
 0x30b   : > { %v2426_v21 = vpack.c.bf16 %v2388_v47, %v2387_v31  ;;  %v2389_v33 = vmul.f32 %v2325_v61, %v1877_v50  ;;  %v2204_v43 = vmul.f32 0.7978846, %v2140_v53  ;;  %v1495_v24 = vmul.f32 0.0078125, %v1430_v25  ;;  %v6770_v63 = vld [vmem:[%s9949_s5 + $0x1] ss:$0 sm:$0xff] }
 0x30c   : > { %6496 = vtanh.f32 %v2203_v6  ;;  %v2390_v59 = vmul.f32 %v2326_v23, %v1878_v22  ;;  %v2014_v45 = vmul.f32 %v1950_v49, %v8171_v3  ;;  %v2077_v2 = vmul.f32 %v2013_v62, %v8149_v29  ;;  %v6771_v61 = vld [vmem:[%s9949_s5 + $0x2] ss:$0 sm:$0xff] }
 0x30d   : > { %5945 = vmatmul.mubr.bf16.gmra.mrb[48].mxu1 %v2426_v21  ;;  %v1496_v44 = vmul.f32 0.0078125, %v1432_v27  ;;  %6498 = vtanh.f32 %v2204_v43  ;;  %v1559_v13 = vadd.f32 1e-05, %v1495_v24  ;;  %v1879_v20 = vmul.f32 0.5, %v8064_v41 }
 0x30e   : > { %v2427_v0 = vpack.c.bf16 %v2390_v59, %v2389_v33  ;;  %v2078_v51 = vmul.f32 %v2014_v45, %v8171_v3  ;;  %v2141_v4 = vadd.f32 %v2077_v2, %v8149_v29  ;;  %v1880_v52 = vmul.f32 0.5, %v8070_v5 }
 0x30f   : > { %v1560_v38 = vadd.f32 1e-05, %v1496_v44  ;;  %v6489_v55 = vpop.eup %6488  ;;  %6500 = vrsqrt.f32 %v1559_v13  ;;  %v1881_v14 = vmul.f32 0.5, %v8073_v28  ;;  %v1882_v11 = vmul.f32 0.5, %v8077_v17 }
 0x310   : > { %v6491_v18 = vpop.eup %6490  ;;  %5948 = vmatprep.mubr.bf16.mxu1 %v2427_v0  ;;  %v2327_v9 = vadd.f32 1.0, %v6489_v55  ;;  %v2142_v57 = vadd.f32 %v2078_v51, %v8171_v3  ;;  %v2205_v15 = vmul.f32 0.7978846, %v2141_v4  ;;  %v1883_v35 = vmul.f32 0.5, %v8117_v19 }
 0x311   : > { %6502 = vrsqrt.f32 %v1560_v38  ;;  %v2328_v32 = vadd.f32 1.0, %v6491_v18  ;;  %v1884_v60 = vmul.f32 0.5, %v8137_v10 }
 0x312   : > { %v6493_v26 = vpop.eup %6492  ;;  %v2206_v36 = vmul.f32 0.7978846, %v2142_v57  ;;  %6504 = vtanh.f32 %v2205_v15  ;;  %v2391_v7 = vmul.f32 %v2327_v9, %v1879_v20 }
 0x313   : > { %v6495_v8 = vpop.eup %6494  ;;  %v2392_v16 = vmul.f32 %v2328_v32, %v1880_v52  ;;  %v2329_v56 = vadd.f32 1.0, %v6493_v26 }
 0x314   : > { %v2330_v48 = vadd.f32 1.0, %v6495_v8  ;;  %6506 = vtanh.f32 %v2206_v36 }
 0x315   : > { %v2428_v46 = vpack.c.bf16 %v2392_v16, %v2391_v7  ;;  %v2393_v50 = vmul.f32 %v2329_v56, %v1881_v14 }
 0x316   : > { %v6497_v40 = vpop.eup %6496  ;;  %v2394_v41 = vmul.f32 %v2330_v48, %v1882_v11 }
 0x317   : > { %v2331_v37 = vadd.f32 1.0, %v6497_v40  ;;  %v6499_v5 = vpop.eup %6498  ;;  %5949 = vmatmul.mubr.bf16.gmra.mrb[52].mxu1 %v2428_v46 }
 0x318   : > { %v2429_v58 = vpack.c.bf16 %v2394_v41, %v2393_v50  ;;  %v2332_v22 = vadd.f32 1.0, %v6499_v5 }
 0x319   : > { %v6501_v42 = vpop.eup %6500  ;;  %v2395_v28 = vmul.f32 %v2331_v37, %v1883_v35 }
 0x31a   : > { %5952 = vmatprep.mubr.bf16.mxu1 %v2429_v58  ;;  %v2396_v17 = vmul.f32 %v2332_v22, %v1884_v60  ;;  %v1687_v1 = vmul.f32 %v6501_v42, %v7615_v34  ;;  %v1885_v34 = vmul.f32 0.5, %v8149_v29  ;;  %v8259_v29 = vld [vmem:[%s9949_s5 + $0x3] ss:$0 sm:$0xff] }
 0x31b   : > { %v6503_v12 = vpop.eup %6502 }
 0x31c   : > { %v1688_v54 = vmul.f32 %v6503_v12, %v7630_v30  ;;  %v6505_v31 = vpop.eup %6504  ;;  %v2430_v47 = vpack.c.bf16 %v2396_v17, %v2395_v28  ;;  %v1755_v25 = vmul.f32 %v6770_v63, %v1687_v1  ;;  %v1886_v30 = vmul.f32 0.5, %v8171_v3 }
 0x31d   : > { %v2333_v19 = vadd.f32 1.0, %v6505_v31 }
 0x31e   : > { %v1756_v39 = vmul.f32 %v6770_v63, %v1688_v54  ;;  %v6507_v10 = vpop.eup %6506  ;;  %v1823_v53 = vadd.f32 %v6771_v61, %v1755_v25 }
 0x31f   : > { %5953 = vmatmul.mubr.bf16.gmra.mrb[56].mxu1 %v2430_v47  ;;  %v2334_v6 = vadd.f32 1.0, %v6507_v10  ;;  %v2397_v23 = vmul.f32 %v2333_v19, %v1885_v34 }
 0x320   : > { %v1824_v27 = vadd.f32 %v6771_v61, %v1756_v39  ;;  %v1951_v21 = vmul.f32 0.044715, %v1823_v53  ;;  %v1887_v32 = vmul.f32 0.5, %v1823_v53 }
 0x321   : > { %v2398_v49 = vmul.f32 %v2334_v6, %v1886_v30 }
 0x322   : > { %v1952_v62 = vmul.f32 0.044715, %v1824_v27  ;;  %v2015_v33 = vmul.f32 %v1951_v21, %v1823_v53  ;;  %v1888_v26 = vmul.f32 0.5, %v1824_v27 }
 0x323   : > { %v2431_v43 = vpack.c.bf16 %v2398_v49, %v2397_v23 }
 0x324   : > { %v2016_v24 = vmul.f32 %v1952_v62, %v1824_v27  ;;  %v2079_v59 = vmul.f32 %v2015_v33, %v1823_v53 }
 0x325   : > { %5956 = vmatprep.mubr.bf16.mxu1 %v2431_v43 }
 0x326   : > { %v2080_v45 = vmul.f32 %v2016_v24, %v1824_v27  ;;  %v2143_v2 = vadd.f32 %v2079_v59, %v1823_v53 }
 0x328   : > { %v2144_v44 = vadd.f32 %v2080_v45, %v1824_v27  ;;  %v2207_v13 = vmul.f32 0.7978846, %v2143_v2 }
 0x32a   : > { %v2208_v0 = vmul.f32 0.7978846, %v2144_v44  ;;  %6508 = vtanh.f32 %v2207_v13 }
 0x32c   : > { %6510 = vtanh.f32 %v2208_v0  ;;  %v5898_v3 = vpop.f32.mrb[0].mxu1 }
 0x32d   : > { %v8262_v51 = vadd.f32 %v5898_v3, %v8259_v29  ;;  %v2535_v4 = vpop.f32.mrb[1].mxu1 }
 0x32e   : > { %v5899_v38 = vpop.f32.mrb[2].mxu1  ;;  %v8269_v9 = vadd.f32 %v8259_v29, %v2535_v4 }
 0x32f   : > { %v8265_v55 = vadd.f32 %v5899_v38, %v8259_v29  ;;  %v2538_v18 = vpop.f32.mrb[3].mxu1  ;;  %2794 = vadd.xlane.f32.xlu0 %v8262_v51 }
 0x330   : > { %v8273_v57 = vadd.f32 %v8259_v29, %v2538_v18 }
 0x331   : > { %2796 = vadd.xlane.f32.xlu1 %v8265_v55 }
 0x333   : > { %2790 = vadd.xlane.f32.xlu0 %v8269_v9 }
 0x334   : > { %v6509_v15 = vpop.eup %6508 }
 0x335   : > { %2792 = vadd.xlane.f32.xlu1 %v8273_v57  ;;  %v2335_v52 = vadd.f32 1.0, %v6509_v15 }
 0x336   : > { %v6511_v20 = vpop.eup %6510 }
 0x337   : > { %v2336_v36 = vadd.f32 1.0, %v6511_v20  ;;  %v2399_v8 = vmul.f32 %v2335_v52, %v1887_v32 }
 0x339   : > { %v2400_v7 = vmul.f32 %v2336_v36, %v1888_v26 }
 0x33b   : > { %v2432_v16 = vpack.c.bf16 %v2400_v7, %v2399_v8 }
 0x33d   : > { %5957 = vmatmul.mubr.bf16.gmra.mrb[60].mxu1 %v2432_v16 }
 0x348   : > { %v5902_v56 = vpop.f32.mrb[4].mxu1 }
 0x349   : > { %v8278_v14 = vadd.f32 %v5902_v56, %v8259_v29  ;;  %v2551_v11 = vpop.f32.mrb[5].mxu1 }
 0x34a   : > { %v5903_v48 = vpop.f32.mrb[6].mxu1  ;;  %v8285_v50 = vadd.f32 %v8259_v29, %v2551_v11 }
 0x34b   : > { %v8281_v40 = vadd.f32 %v5903_v48, %v8259_v29  ;;  %v2554_v46 = vpop.f32.mrb[7].mxu1  ;;  %2802 = vadd.xlane.f32.xlu0 %v8278_v14 }
 0x34c   : > { %v8289_v41 = vadd.f32 %v8259_v29, %v2554_v46 }
 0x34d   : > { %2804 = vadd.xlane.f32.xlu1 %v8281_v40 }
 0x34f   : > { %2798 = vadd.xlane.f32.xlu0 %v8285_v50 }
 0x351   : > { %2800 = vadd.xlane.f32.xlu1 %v8289_v41 }
 0x358   : > { %v5906_v37 = vpop.f32.mrb[8].mxu1 }
 0x359   : > { %v8294_v5 = vadd.f32 %v5906_v37, %v8259_v29  ;;  %v2567_v58 = vpop.f32.mrb[9].mxu1 }
 0x35a   : > { %v5907_v35 = vpop.f32.mrb[10].mxu1  ;;  %v8301_v42 = vadd.f32 %v8259_v29, %v2567_v58 }
 0x35b   : > { %v8297_v60 = vadd.f32 %v5907_v35, %v8259_v29  ;;  %v2570_v22 = vpop.f32.mrb[11].mxu1  ;;  %2810 = vadd.xlane.f32.xlu0 %v8294_v5 }
 0x35c   : > { %v8305_v12 = vadd.f32 %v8259_v29, %v2570_v22 }
 0x35d   : > { %2812 = vadd.xlane.f32.xlu1 %v8297_v60 }
 0x35f   : > { %2806 = vadd.xlane.f32.xlu0 %v8301_v42 }
 0x361   : > { %2808 = vadd.xlane.f32.xlu1 %v8305_v12 }
 0x366   : > { %v5910_v28 = vpop.f32.mrb[12].mxu1 }
 0x367   : > { %v8310_v17 = vadd.f32 %v5910_v28, %v8259_v29  ;;  %v2583_v1 = vpop.f32.mrb[13].mxu1 }
 0x368   : > { %v5911_v54 = vpop.f32.mrb[14].mxu1  ;;  %v8317_v63 = vadd.f32 %v8259_v29, %v2583_v1 }
 0x369   : > { %v8313_v31 = vadd.f32 %v5911_v54, %v8259_v29  ;;  %v2586_v47 = vpop.f32.mrb[15].mxu1  ;;  %2818 = vadd.xlane.f32.xlu0 %v8310_v17 }
 0x36a   : > { %v8321_v25 = vadd.f32 %v8259_v29, %v2586_v47 }
 0x36b   : > { %2820 = vadd.xlane.f32.xlu1 %v8313_v31 }
 0x36d   : > { %2814 = vadd.xlane.f32.xlu0 %v8317_v63 }
 0x36f   : > { %2816 = vadd.xlane.f32.xlu1 %v8321_v25 }
 0x376   : > { %v5914_v19 = vpop.f32.mrb[16].mxu1 }
 0x377   : > { %v8326_v39 = vadd.f32 %v5914_v19, %v8259_v29  ;;  %v2599_v10 = vpop.f32.mrb[17].mxu1 }
 0x378   : > { %v5915_v61 = vpop.f32.mrb[18].mxu1  ;;  %v8333_v30 = vadd.f32 %v8259_v29, %v2599_v10 }
 0x379   : > { %v8329_v53 = vadd.f32 %v5915_v61, %v8259_v29  ;;  %v2602_v34 = vpop.f32.mrb[19].mxu1  ;;  %2826 = vadd.xlane.f32.xlu0 %v8326_v39 }
 0x37a   : > { %v8337_v6 = vadd.f32 %v8259_v29, %v2602_v34 }
 0x37b   : > { %2828 = vadd.xlane.f32.xlu1 %v8329_v53 }
 0x37d   : > { %2822 = vadd.xlane.f32.xlu0 %v8333_v30 }
 0x37f   : > { %2824 = vadd.xlane.f32.xlu1 %v8337_v6 }
 0x384   : > { %v5918_v27 = vpop.f32.mrb[20].mxu1 }
 0x385   : > { %v8342_v21 = vadd.f32 %v5918_v27, %v8259_v29  ;;  %v2615_v23 = vpop.f32.mrb[21].mxu1 }
 0x386   : > { %v5919_v49 = vpop.f32.mrb[22].mxu1  ;;  %v8349_v43 = vadd.f32 %v8259_v29, %v2615_v23 }
 0x387   : > { %v8345_v62 = vadd.f32 %v5919_v49, %v8259_v29  ;;  %v2618_v33 = vpop.f32.mrb[23].mxu1  ;;  %2834 = vadd.xlane.f32.xlu0 %v8342_v21 }
 0x388   : > { %v8353_v24 = vadd.f32 %v8259_v29, %v2618_v33 }
 0x389   : > { %2836 = vadd.xlane.f32.xlu1 %v8345_v62 }
 0x38b   : > { %2830 = vadd.xlane.f32.xlu0 %v8349_v43 }
 0x38d   : > { %2832 = vadd.xlane.f32.xlu1 %v8353_v24 }
 0x396   : > { %v5922_v59 = vpop.f32.mrb[24].mxu1 }
 0x397   : > { %v8358_v45 = vadd.f32 %v5922_v59, %v8259_v29  ;;  %v2631_v2 = vpop.f32.mrb[25].mxu1 }
 0x398   : > { %v5923_v44 = vpop.f32.mrb[26].mxu1  ;;  %v8365_v3 = vadd.f32 %v8259_v29, %v2631_v2 }
 0x399   : > { %v8361_v13 = vadd.f32 %v5923_v44, %v8259_v29  ;;  %2842 = vadd.xlane.f32.xlu0 %v8358_v45  ;;  %v2634_v0 = vpop.f32.mrb[27].mxu1 }
 0x39a   : > { %v8369_v4 = vadd.f32 %v8259_v29, %v2634_v0 }
 0x39b   : > { %2844 = vadd.xlane.f32.xlu1 %v8361_v13 }
 0x39d   : > { %2838 = vadd.xlane.f32.xlu0 %v8365_v3 }
 0x39f   : > { %2840 = vadd.xlane.f32.xlu1 %v8369_v4 }
 0x3a7   : > { %v5926_v38 = vpop.f32.mrb[28].mxu1 }
 0x3a8   : > { %v8374_v18 = vadd.f32 %v5926_v38, %v8259_v29  ;;  %v2647_v15 = vpop.f32.mrb[29].mxu1 }
 0x3a9   : > { %v5927_v20 = vpop.f32.mrb[30].mxu1  ;;  %v8381_v26 = vadd.f32 %v8259_v29, %v2647_v15 }
 0x3aa   : > { %v8377_v52 = vadd.f32 %v5927_v20, %v8259_v29  ;;  %2850 = vadd.xlane.f32.xlu0 %v8374_v18  ;;  %v2650_v32 = vpop.f32.mrb[31].mxu1 }
 0x3ab   : > { %v8385_v36 = vadd.f32 %v8259_v29, %v2650_v32 }
 0x3ac   : > { %2852 = vadd.xlane.f32.xlu1 %v8377_v52 }
 0x3ae   : > { %2846 = vadd.xlane.f32.xlu0 %v8381_v26 }
 0x3b0   : > { %2848 = vadd.xlane.f32.xlu1 %v8385_v36 }
 0x3b6   : > { %v5930_v8 = vpop.f32.mrb[32].mxu1 }
 0x3b7   : > { %v8390_v7 = vadd.f32 %v5930_v8, %v8259_v29  ;;  %v2663_v16 = vpop.f32.mrb[33].mxu1 }
 0x3b8   : > { %v5931_v56 = vpop.f32.mrb[34].mxu1  ;;  %v8397_v46 = vadd.f32 %v8259_v29, %v2663_v16 }
 0x3b9   : > { %v8393_v11 = vadd.f32 %v5931_v56, %v8259_v29  ;;  %2858 = vadd.xlane.f32.xlu0 %v8390_v7  ;;  %v2666_v48 = vpop.f32.mrb[35].mxu1 }
 0x3ba   : > { %v8401_v37 = vadd.f32 %v8259_v29, %v2666_v48 }
 0x3bb   : > { %2860 = vadd.xlane.f32.xlu1 %v8393_v11 }
 0x3bd   : > { %2854 = vadd.xlane.f32.xlu0 %v8397_v46 }
 0x3bf   : > { %2856 = vadd.xlane.f32.xlu1 %v8401_v37 }
 0x3c2   : > { %v5934_v58 = vpop.f32.mrb[36].mxu1 }
 0x3c3   : > { %v8406_v35 = vadd.f32 %v5934_v58, %v8259_v29  ;;  %v2679_v22 = vpop.f32.mrb[37].mxu1 }
 0x3c4   : > { %v5935_v28 = vpop.f32.mrb[38].mxu1  ;;  %v8413_v47 = vadd.f32 %v8259_v29, %v2679_v22 }
 0x3c5   : > { %10140 = vst [vmem:[#allocation16_spill] sm:$0xff] %v8406_v35  ;;  %v8409_v1 = vadd.f32 %v5935_v28, %v8259_v29  ;;  %2866 = vadd.xlane.f32.xlu0 %v8406_v35  ;;  %v2682_v54 = vpop.f32.mrb[39].mxu1 }
 0x3c6   : > { %v8417_v19 = vadd.f32 %v8259_v29, %v2682_v54 }
 0x3c7   : > { %10141 = vst [vmem:[#allocation17_spill] sm:$0xff] %v8409_v1  ;;  %2868 = vadd.xlane.f32.xlu1 %v8409_v1 }
 0x3c8   : > { %10142 = vst [vmem:[#allocation18_spill] sm:$0xff] %v8417_v19 }
 0x3c9   : > { %2862 = vadd.xlane.f32.xlu0 %v8413_v47 }
 0x3cb   : > { %2864 = vadd.xlane.f32.xlu1 %v8417_v19 }
 0x3cf   : > { %v5938_v10 = vpop.f32.mrb[40].mxu1 }
 0x3d0   : > { %v8422_v61 = vadd.f32 %v5938_v10, %v8259_v29  ;;  %v2695_v34 = vpop.f32.mrb[41].mxu1 }
 0x3d1   : > { %v5939_v27 = vpop.f32.mrb[42].mxu1  ;;  %v8429_v33 = vadd.f32 %v8259_v29, %v2695_v34  ;;  %v2795_v34 = vpop.xlane.xlu0 %2794 }
 0x3d2   : > { %10143 = vst [vmem:[#allocation19_spill] sm:$0xff] %v8422_v61  ;;  %v8425_v23 = vadd.f32 %v5939_v27, %v8259_v29  ;;  %2874 = vadd.xlane.f32.xlu0 %v8422_v61  ;;  %v2698_v49 = vpop.f32.mrb[43].mxu1 }
 0x3d3   : > { %10145 = vst [vmem:[#allocation21_spill] sm:$0xff] %v8429_v33  ;;  %v8433_v59 = vadd.f32 %v8259_v29, %v2698_v49  ;;  %v2797_v49 = vpop.xlane.xlu1 %2796 }
 0x3d4   : > { %10144 = vst [vmem:[#allocation20_spill] sm:$0xff] %v8425_v23  ;;  %2876 = vadd.xlane.f32.xlu1 %v8425_v23 }
 0x3d5   : > { %10146 = vst [vmem:[#allocation22_spill] sm:$0xff] %v8433_v59 }
 0x3d6   : > { %2870 = vadd.xlane.f32.xlu0 %v8429_v33 }
 0x3d7   : > { %v5942_v2 = vpop.f32.mrb[44].mxu1 }
 0x3d8   : > { %v8437_v44 = vadd.f32 %v5942_v2, %v8259_v29  ;;  %2872 = vadd.xlane.f32.xlu1 %v8433_v59  ;;  %v2711_v0 = vpop.f32.mrb[45].mxu1 }
 0x3d9   : > { %v5943_v38 = vpop.f32.mrb[46].mxu1  ;;  %v8445_v32 = vadd.f32 %v8259_v29, %v2711_v0 }
 0x3da   : > { %10147 = vst [vmem:[#allocation23_spill] sm:$0xff] %v8437_v44  ;;  %v8441_v15 = vadd.f32 %v5943_v38, %v8259_v29  ;;  %2882 = vadd.xlane.f32.xlu0 %v8437_v44  ;;  %v2714_v20 = vpop.f32.mrb[47].mxu1 }
 0x3db   : > { %10149 = vst [vmem:[#allocation25_spill] sm:$0xff] %v8445_v32  ;;  %v8449_v8 = vadd.f32 %v8259_v29, %v2714_v20 }
 0x3dc   : > { %10148 = vst [vmem:[#allocation24_spill] sm:$0xff] %v8441_v15  ;;  %2884 = vadd.xlane.f32.xlu1 %v8441_v15 }
 0x3dd   : > { %10150 = vst [vmem:[#allocation26_spill] sm:$0xff] %v8449_v8 }
 0x3de   : > { %2878 = vadd.xlane.f32.xlu0 %v8445_v32  ;;  %v2920_v32 = vmul.f32 0.0078125, %v2795_v34 }
 0x3e0   : > { %v5946_v16 = vpop.f32.mrb[48].mxu1  ;;  %2880 = vadd.xlane.f32.xlu1 %v8449_v8 }
 0x3e1   : > { %v8454_v56 = vadd.f32 %v5946_v16, %v8259_v29  ;;  %v2727_v48 = vpop.f32.mrb[49].mxu1 }
 0x3e2   : > { %v5947_v58 = vpop.f32.mrb[50].mxu1  ;;  %v8461_v54 = vadd.f32 %v8259_v29, %v2727_v48  ;;  %v2791_v48 = vpop.xlane.xlu0 %2790 }
 0x3e3   : > { %10151 = vst [vmem:[#allocation27_spill] sm:$0xff] %v8454_v56  ;;  %v8457_v22 = vadd.f32 %v5947_v58, %v8259_v29  ;;  %2890 = vadd.xlane.f32.xlu0 %v8454_v56  ;;  %v2730_v28 = vpop.f32.mrb[51].mxu1  ;;  %v2918_v59 = vmul.f32 0.0078125, %v2791_v48 }
 0x3e4   : > { %10153 = vst [vmem:[#allocation29_spill] sm:$0xff] %v8461_v54  ;;  %v8465_v10 = vadd.f32 %v8259_v29, %v2730_v28  ;;  %v2793_v28 = vpop.xlane.xlu1 %2792 }
 0x3e5   : > { %10152 = vst [vmem:[#allocation28_spill] sm:$0xff] %v8457_v22  ;;  %2892 = vadd.xlane.f32.xlu1 %v8457_v22  ;;  %v2919_v34 = vmul.f32 0.0078125, %v2793_v28 }
 0x3e6   : > { %10154 = vst [vmem:[#allocation30_spill] sm:$0xff] %v8465_v10 }
 0x3e7   : > { %2886 = vadd.xlane.f32.xlu0 %v8461_v54 }
 0x3e8   : > { %v2805_v54 = vpop.xlane.xlu1 %2804 }
 0x3e9   : > { %2888 = vadd.xlane.f32.xlu1 %v8465_v10  ;;  %v2803_v10 = vpop.xlane.xlu0 %2802 }
 0x3ea   : > { %v5950_v27 = vpop.f32.mrb[52].mxu1 }
 0x3eb   : > { %v8470_v2 = vadd.f32 %v5950_v27, %v8259_v29  ;;  %v2743_v0 = vpop.f32.mrb[53].mxu1 }
 0x3ec   : > { %v5951_v38 = vpop.f32.mrb[54].mxu1  ;;  %v8477_v58 = vadd.f32 %v8259_v29, %v2743_v0 }
 0x3ed   : > { %10155 = vst [vmem:[#allocation31_spill] sm:$0xff] %v8470_v2  ;;  %v8473_v20 = vadd.f32 %v5951_v38, %v8259_v29  ;;  %2898 = vadd.xlane.f32.xlu0 %v8470_v2  ;;  %v2746_v16 = vpop.f32.mrb[55].mxu1 }
 0x3ee   : > { %10157 = vst [vmem:[#allocation4_spill] sm:$0xff] %v8477_v58  ;;  %v8481_v22 = vadd.f32 %v8259_v29, %v2746_v16 }
 0x3ef   : > { %10156 = vst [vmem:[#allocation32_spill] sm:$0xff] %v8473_v20  ;;  %2900 = vadd.xlane.f32.xlu1 %v8473_v20 }
 0x3f0   : > { %10158 = vst [vmem:[#allocation5_spill] sm:$0xff] %v8481_v22 }
 0x3f1   : > { %2894 = vadd.xlane.f32.xlu0 %v8477_v58  ;;  %v2801_v58 = vpop.xlane.xlu1 %2800 }
 0x3f2   : > { %v5954_v27 = vpop.f32.mrb[56].mxu1 }
 0x3f3   : > { %v8485_v56 = vadd.f32 %v5954_v27, %v8259_v29  ;;  %2896 = vadd.xlane.f32.xlu1 %v8481_v22  ;;  %v2759_v38 = vpop.f32.mrb[57].mxu1  ;;  %v2799_v22 = vpop.xlane.xlu0 %2798 }
 0x3f4   : > { %v5955_v2 = vpop.f32.mrb[58].mxu1  ;;  %v8493_v16 = vadd.f32 %v8259_v29, %v2759_v38  ;;  %v2921_v38 = vmul.f32 0.0078125, %v2797_v49 }
 0x3f5   : > { %10159 = vst [vmem:[#allocation2_spill] sm:$0xff] %v8485_v56  ;;  %v8489_v0 = vadd.f32 %v5955_v2, %v8259_v29  ;;  %2906 = vadd.xlane.f32.xlu0 %v8485_v56  ;;  %v2762_v20 = vpop.f32.mrb[59].mxu1  ;;  %v2813_v15 = vpop.xlane.xlu1 %2812 }
 0x3f6   : > { %10161 = vst [vmem:[#allocation8_spill] sm:$0xff] %v8493_v16  ;;  %v8497_v27 = vadd.f32 %v8259_v29, %v2762_v20  ;;  %v8504_v20 = vsub.f32 %v8262_v51, %v2920_v32  ;;  %v8512_v35 = vsub.f32 %v8265_v55, %v2921_v38  ;;  %v8519_v51 = vsub.f32 %v8269_v9, %v2918_v59 }
 0x3f7   : > { %10160 = vst [vmem:[#allocation3_spill] sm:$0xff] %v8489_v0  ;;  %2908 = vadd.xlane.f32.xlu1 %v8489_v0  ;;  %v2811_v2 = vpop.xlane.xlu0 %2810  ;;  %v2924_v32 = vmul.f32 0.0078125, %v2803_v10  ;;  %v2925_v55 = vmul.f32 0.0078125, %v2805_v54  ;;  %v2922_v9 = vmul.f32 0.0078125, %v2799_v22 }
 0x3f8   : > { %10162 = vst [vmem:[#allocation9_spill] sm:$0xff] %v8497_v27  ;;  %10163 = vst [vmem:[#allocation6_spill] sm:$0xff] %v8504_v20  ;;  %v3048_v48 = vmul.f32 %v8504_v20, %v8504_v20  ;;  %v3046_v59 = vmul.f32 %v8519_v51, %v8519_v51 }
 0x3f9   : > { %2902 = vadd.xlane.f32.xlu0 %v8493_v16  ;;  %v2809_v56 = vpop.xlane.xlu1 %2808  ;;  %v8530_v38 = vsub.f32 %v8278_v14, %v2924_v32  ;;  %v8535_v20 = vsub.f32 %v8281_v40, %v2925_v55 }
 0x3fb   : > { %2904 = vadd.xlane.f32.xlu1 %v8497_v27  ;;  %v2807_v44 = vpop.xlane.xlu0 %2806  ;;  %v3052_v14 = vmul.f32 %v8530_v38, %v8530_v38  ;;  %v3053_v40 = vmul.f32 %v8535_v20, %v8535_v20 }
 0x3fd   : > { %v2821_v23 = vpop.xlane.xlu1 %2820 }
 0x3ff   : > { %v2819_v8 = vpop.xlane.xlu0 %2818 }
 0x401   : > { %v2817_v19 = vpop.xlane.xlu1 %2816 }
 0x403   : > { %v2815_v33 = vpop.xlane.xlu0 %2814 }
 0x407   : > { %v2827_v28 = vpop.xlane.xlu0 %2826 }
 0x408   : > { %v2829_v10 = vpop.xlane.xlu1 %2828 }
 0x40b   : > { %v2823_v22 = vpop.xlane.xlu0 %2822 }
 0x410   : > { %v8501_v61 = vpop.f32.mrb[60].mxu1 }
 0x411   : > { %v2775_v0 = vpop.f32.mrb[61].mxu1 }
 0x412   : > { %v8507_v16 = vadd.f32 %v8259_v29, %v2775_v0  ;;  %v8509_v27 = vpop.f32.mrb[62].mxu1  ;;  %v8525_v0 = vsub.f32 %v8273_v57, %v2919_v34  ;;  %v2923_v57 = vmul.f32 0.0078125, %v2801_v58  ;;  %v8540_v34 = vsub.f32 %v8285_v50, %v2922_v9  ;;  %v2825_v58 = vpop.xlane.xlu1 %2824 }
 0x413   : > { %v2778_v1 = vpop.f32.mrb[63].mxu1  ;;  %v2926_v50 = vmul.f32 0.0078125, %v2807_v44  ;;  %v2932_v44 = vmul.f32 0.0078125, %v2819_v8 }
 0x414   : > { %v8515_v49 = vadd.f32 %v8259_v29, %v2778_v1  ;;  %2910 = vadd.xlane.f32.xlu0 %v8507_v16  ;;  %v3049_v1 = vmul.f32 %v8512_v35, %v8512_v35  ;;  %v3047_v54 = vmul.f32 %v8525_v0, %v8525_v0  ;;  %v8545_v32 = vsub.f32 %v8289_v41, %v2923_v57  ;;  %v2835_v57 = vpop.xlane.xlu0 %2834 }
 0x416   : > { %2912 = vadd.xlane.f32.xlu1 %v8515_v49  ;;  %v3051_v41 = vmul.f32 %v8545_v32, %v8545_v32 }
 0x418   : > { %3114 = vadd.xlane.f32.xlu0 %v3048_v48  ;;  %v2928_v48 = vmul.f32 0.0078125, %v2811_v2  ;;  %v3050_v2 = vmul.f32 %v8540_v34, %v8540_v34 }
 0x41a   : > { %3116 = vadd.xlane.f32.xlu1 %v3049_v1  ;;  %v2929_v1 = vmul.f32 0.0078125, %v2813_v15  ;;  %v8550_v55 = vsub.f32 %v8294_v5, %v2928_v48  ;;  %v6248_v15 = vld [vmem:[%s9948_s4] sm:$0xff]   ;;  %v8563_v5 = vsub.f32 %v8301_v42, %v2926_v50  ;;  %v2933_v48 = vmul.f32 0.0078125, %v2821_v23 }
 0x41b   : > { %5960 = vmatprep.subr.bf16.mxu0 %v6248_v15  ;;  %v2930_v42 = vmul.f32 0.0078125, %v2815_v33 }
 0x41c   : > { %3110 = vadd.xlane.f32.xlu0 %v3046_v59  ;;  %v8555_v9 = vsub.f32 %v8297_v60, %v2929_v1  ;;  %v2927_v59 = vmul.f32 0.0078125, %v2809_v56  ;;  %v2837_v60 = vpop.xlane.xlu1 %2836  ;;  %5961 = vmatpush3.bf16.msra.mxu0 %v6248_v15  ;;  %v8573_v1 = vsub.f32 %v8310_v17, %v2932_v44  ;;  %v3054_v8 = vmul.f32 %v8563_v5, %v8563_v5 }
 0x41d   : > { %v8578_v50 = vsub.f32 %v8313_v31, %v2933_v48  ;;  %v2936_v17 = vmul.f32 0.0078125, %v2827_v28  ;;  %v2937_v31 = vmul.f32 0.0078125, %v2829_v10 }
 0x41e   : > { %3112 = vadd.xlane.f32.xlu1 %v3047_v54  ;;  %v3056_v54 = vmul.f32 %v8550_v55, %v8550_v55  ;;  %v8568_v56 = vsub.f32 %v8305_v12, %v2927_v59  ;;  %v8583_v59 = vsub.f32 %v8317_v63, %v2930_v42  ;;  %v3060_v33 = vmul.f32 %v8573_v1, %v8573_v1 }
 0x41f   : > { %v2934_v63 = vmul.f32 0.0078125, %v2823_v22  ;;  %v8598_v48 = vsub.f32 %v8329_v53, %v2937_v31  ;;  %v2941_v53 = vmul.f32 0.0078125, %v2837_v60 }
 0x420   : > { %3122 = vadd.xlane.f32.xlu0 %v3052_v14  ;;  %v3057_v14 = vmul.f32 %v8555_v9, %v8555_v9  ;;  %v3055_v12 = vmul.f32 %v8568_v56, %v8568_v56  ;;  %v2833_v23 = vpop.xlane.xlu1 %2832  ;;  %v3058_v28 = vmul.f32 %v8583_v59, %v8583_v59 }
 0x421   : > { %v8603_v42 = vsub.f32 %v8333_v30, %v2934_v63  ;;  %v2939_v31 = vmul.f32 0.0078125, %v2833_v23 }
 0x422   : > { %3124 = vadd.xlane.f32.xlu1 %v3053_v40  ;;  %v2831_v40 = vpop.xlane.xlu0 %2830 }
 0x423   : > { %v3062_v30 = vmul.f32 %v8603_v42, %v8603_v42 }
 0x424   : > { %3118 = vadd.xlane.f32.xlu0 %v3050_v2  ;;  %v2931_v2 = vmul.f32 0.0078125, %v2817_v19  ;;  %v3061_v19 = vmul.f32 %v8578_v50, %v8578_v50 }
 0x426   : > { %3120 = vadd.xlane.f32.xlu1 %v3051_v41  ;;  %v2843_v41 = vpop.xlane.xlu0 %2842  ;;  %v8588_v15 = vsub.f32 %v8321_v25, %v2931_v2 }
 0x428   : > { %3130 = vadd.xlane.f32.xlu0 %v3056_v54  ;;  %v2845_v44 = vpop.xlane.xlu1 %2844  ;;  %v8593_v54 = vsub.f32 %v8326_v39, %v2936_v17  ;;  %v3059_v25 = vmul.f32 %v8588_v15, %v8588_v15  ;;  %v2938_v17 = vmul.f32 0.0078125, %v2831_v40  ;;  %v8628_v40 = vsub.f32 %v8353_v24, %v2939_v31  ;;  %v6249_v24 = vld [vmem:[%s9948_s4 + $0x8] sm:$0xff]  }
 0x429   : > { %5962 = vmatprep.subr.bf16.mxu0 %v6249_v24 }
 0x42a   : > { %3132 = vadd.xlane.f32.xlu1 %v3057_v14  ;;  %v2935_v14 = vmul.f32 0.0078125, %v2825_v58  ;;  %v2839_v10 = vpop.xlane.xlu0 %2838  ;;  %v3064_v39 = vmul.f32 %v8593_v54, %v8593_v54  ;;  %v3065_v58 = vmul.f32 %v8598_v48, %v8598_v48  ;;  %5963 = vmatpush3.bf16.msra.mxu0 %v6249_v24 }
 0x42b   : > { %v2942_v63 = vmul.f32 0.0078125, %v2839_v10 }
 0x42c   : > { %3126 = vadd.xlane.f32.xlu0 %v3054_v8  ;;  %v2940_v8 = vmul.f32 0.0078125, %v2835_v57  ;;  %v2841_v22 = vpop.xlane.xlu1 %2840  ;;  %v8608_v2 = vsub.f32 %v8337_v6, %v2935_v14 }
 0x42d   : > { %v8644_v10 = vsub.f32 %v8365_v3, %v2942_v63 }
 0x42e   : > { %3128 = vadd.xlane.f32.xlu1 %v3055_v12  ;;  %v8613_v12 = vsub.f32 %v8342_v21, %v2940_v8  ;;  %v3063_v6 = vmul.f32 %v8608_v2, %v8608_v2  ;;  %v8641_v8 = vadd.f32 %v8501_v61, %v8259_v29 }
 0x430   : > { %3138 = vadd.xlane.f32.xlu0 %v3060_v33  ;;  %v8618_v33 = vsub.f32 %v8345_v62, %v2941_v53  ;;  %v3068_v21 = vmul.f32 %v8613_v12, %v8613_v12 }
 0x432   : > { %3140 = vadd.xlane.f32.xlu1 %v3061_v19  ;;  %v8623_v19 = vsub.f32 %v8349_v43, %v2938_v17  ;;  %v3069_v62 = vmul.f32 %v8618_v33, %v8618_v33  ;;  %v2943_v43 = vmul.f32 0.0078125, %v2841_v22  ;;  %v8648_v22 = vadd.f32 %v8509_v27, %v8259_v29 }
 0x434   : > { %3134 = vadd.xlane.f32.xlu0 %v3058_v28  ;;  %v3066_v28 = vmul.f32 %v8623_v19, %v8623_v19  ;;  %v8651_v17 = vsub.f32 %v8369_v4, %v2943_v43 }
 0x436   : > { %3136 = vadd.xlane.f32.xlu1 %v3059_v25  ;;  %v3067_v25 = vmul.f32 %v8628_v40, %v8628_v40  ;;  %v3071_v4 = vmul.f32 %v8651_v17, %v8651_v17 }
 0x437   : > { %v2851_v57 = vpop.xlane.xlu0 %2850 }
 0x438   : > { %3146 = vadd.xlane.f32.xlu0 %v3064_v39  ;;  %v2944_v39 = vmul.f32 0.0078125, %v2843_v41  ;;  %v2948_v31 = vmul.f32 0.0078125, %v2851_v57 }
 0x439   : > { %v2853_v60 = vpop.xlane.xlu1 %2852 }
 0x43a   : > { %3148 = vadd.xlane.f32.xlu1 %v3065_v58  ;;  %v2945_v58 = vmul.f32 0.0078125, %v2845_v44  ;;  %v8655_v41 = vsub.f32 %v8358_v45, %v2944_v39  ;;  %v8676_v63 = vsub.f32 %v8374_v18, %v2948_v31  ;;  %v6250_v18 = vld [vmem:[%s9948_s4 + $0x10] sm:$0xff]  }
 0x43b   : > { %v2847_v23 = vpop.xlane.xlu0 %2846  ;;  %5964 = vmatprep.subr.bf16.mxu0 %v6250_v18 }
 0x43c   : > { %3142 = vadd.xlane.f32.xlu0 %v3062_v30  ;;  %v2946_v3 = vmul.f32 0.0078125, %v2847_v23  ;;  %v3070_v30 = vmul.f32 %v8644_v10, %v8644_v10  ;;  %v8661_v29 = vsub.f32 %v8361_v13, %v2945_v58  ;;  %v3072_v45 = vmul.f32 %v8655_v41, %v8655_v41  ;;  %5965 = vmatpush3.bf16.msra.mxu0 %v6250_v18 }
 0x43d   : > { %v2849_v14 = vpop.xlane.xlu1 %2848  ;;  %v3076_v39 = vmul.f32 %v8676_v63, %v8676_v63 }
 0x43e   : > { %3144 = vadd.xlane.f32.xlu1 %v3063_v6  ;;  %v2947_v27 = vmul.f32 0.0078125, %v2849_v14  ;;  %v8666_v6 = vsub.f32 %v8381_v26, %v2946_v3  ;;  %v3073_v13 = vmul.f32 %v8661_v29, %v8661_v29 }
 0x440   : > { %3154 = vadd.xlane.f32.xlu0 %v3068_v21  ;;  %v8671_v23 = vsub.f32 %v8385_v36, %v2947_v27  ;;  %v3074_v26 = vmul.f32 %v8666_v6, %v8666_v6 }
 0x442   : > { %3156 = vadd.xlane.f32.xlu1 %v3069_v62  ;;  %v2949_v62 = vmul.f32 0.0078125, %v2853_v60  ;;  %v3075_v36 = vmul.f32 %v8671_v23, %v8671_v23 }
 0x444   : > { %3150 = vadd.xlane.f32.xlu0 %v3066_v28  ;;  %v8681_v14 = vsub.f32 %v8377_v52, %v2949_v62 }
 0x446   : > { %3152 = vadd.xlane.f32.xlu1 %v3067_v25  ;;  %v2859_v53 = vpop.xlane.xlu0 %2858 }
 0x447   : > { %v2952_v25 = vmul.f32 0.0078125, %v2859_v53 }
 0x448   : > { %2914 = vadd.xlane.f32.xlu0 %v8641_v8  ;;  %v2861_v61 = vpop.xlane.xlu1 %2860 }
 0x449   : > { %v2953_v58 = vmul.f32 0.0078125, %v2861_v61  ;;  %v8699_v53 = vsub.f32 %v8390_v7, %v2952_v25  ;;  %v6251_v61 = vld [vmem:[%s9948_s4 + $0x18] sm:$0xff]  }
 0x44a   : > { %2916 = vadd.xlane.f32.xlu1 %v8648_v22  ;;  %v2855_v44 = vpop.xlane.xlu0 %2854  ;;  %5966 = vmatprep.subr.bf16.mxu0 %v6251_v61 }
 0x44b   : > { %v2950_v57 = vmul.f32 0.0078125, %v2855_v44  ;;  %10164 = vst [vmem:[#allocation7_spill] sm:$0xff] %v8699_v53  ;;  %5967 = vmatpush3.bf16.msra.mxu0 %v6251_v61 }
 0x44c   : > { %3158 = vadd.xlane.f32.xlu0 %v3070_v30  ;;  %v2857_v21 = vpop.xlane.xlu1 %2856  ;;  %v3077_v30 = vmul.f32 %v8681_v14, %v8681_v14 }
 0x44d   : > { %v2951_v60 = vmul.f32 0.0078125, %v2857_v21  ;;  %v8689_v24 = vsub.f32 %v8397_v46, %v2950_v57  ;;  %v3080_v21 = vmul.f32 %v8699_v53, %v8699_v53  ;;  %v10167_v57 = vld [vmem:[#allocation18_spill] sm:$0xff] }
 0x44e   : > { %3160 = vadd.xlane.f32.xlu1 %v3071_v4 }
 0x44f   : > { %v8694_v3 = vsub.f32 %v8401_v37, %v2951_v60  ;;  %v3078_v4 = vmul.f32 %v8689_v24, %v8689_v24  ;;  %v8707_v37 = vsub.f32 %v8393_v11, %v2953_v58  ;;  %v6252_v11 = vld [vmem:[%s9948_s4 + $0x20] sm:$0xff]   ;;  %v10169_v60 = vld [vmem:[#allocation16_spill] sm:$0xff] }
 0x450   : > { %3162 = vadd.xlane.f32.xlu0 %v3072_v45  ;;  %5968 = vmatprep.subr.bf16.mxu0 %v6252_v11 }
 0x451   : > { %10165 = vst [vmem:[#allocation12_spill] sm:$0xff] %v8707_v37  ;;  %v3079_v31 = vmul.f32 %v8694_v3, %v8694_v3  ;;  %5969 = vmatpush3.bf16.msra.mxu0 %v6252_v11  ;;  %v6255_v11 = vld [vmem:[%s9948_s4 + $0x38] sm:$0xff]  }
 0x452   : > { %3164 = vadd.xlane.f32.xlu1 %v3073_v13  ;;  %v2867_v28 = vpop.xlane.xlu0 %2866 }
 0x453   : > { %v2956_v7 = vmul.f32 0.0078125, %v2867_v28  ;;  %v3081_v28 = vmul.f32 %v8707_v37, %v8707_v37 }
 0x454   : > { %3166 = vadd.xlane.f32.xlu0 %v3074_v26  ;;  %v2869_v43 = vpop.xlane.xlu1 %2868 }
 0x455   : > { %v2957_v13 = vmul.f32 0.0078125, %v2869_v43  ;;  %v6253_v43 = vld [vmem:[%s9948_s4 + $0x28] sm:$0xff]  }
 0x456   : > { %3168 = vadd.xlane.f32.xlu1 %v3075_v36  ;;  %v2863_v52 = vpop.xlane.xlu0 %2862  ;;  %v8725_v36 = vsub.f32 %v10169_v60, %v2956_v7  ;;  %5970 = vmatprep.subr.bf16.mxu0 %v6253_v43 }
 0x457   : > { %v2954_v46 = vmul.f32 0.0078125, %v2863_v52  ;;  %5971 = vmatpush3.bf16.msra.mxu0 %v6253_v43 }
 0x458   : > { %3170 = vadd.xlane.f32.xlu0 %v3076_v39  ;;  %v2865_v27 = vpop.xlane.xlu1 %2864  ;;  %10170 = vst [vmem:[#allocation11_spill] sm:$0xff] %v8725_v36  ;;  %v10171_v39 = vld [vmem:[#allocation17_spill] sm:$0xff] }
 0x459   : > { %v2955_v44 = vmul.f32 0.0078125, %v2865_v27  ;;  %v8712_v45 = vsub.f32 %v8413_v47, %v2954_v46  ;;  %v8733_v52 = vsub.f32 %v10171_v39, %v2957_v13 }
 0x45a   : > { %3172 = vadd.xlane.f32.xlu1 %v3077_v30 }
 0x45b   : > { %10166 = vst [vmem:[#allocation13_spill] sm:$0xff] %v8712_v45  ;;  %v8720_v26 = vsub.f32 %v10167_v57, %v2955_v44  ;;  %v3082_v18 = vmul.f32 %v8712_v45, %v8712_v45  ;;  %10172 = vst [vmem:[#allocation14_spill] sm:$0xff] %v8733_v52 }
 0x45c   : > { %3174 = vadd.xlane.f32.xlu0 %v3078_v4  ;;  %v10173_v4 = vld [vmem:[#allocation21_spill] sm:$0xff] }
 0x45d   : > { %10168 = vst [vmem:[#allocation10_spill] sm:$0xff] %v8720_v26  ;;  %v3083_v30 = vmul.f32 %v8720_v26, %v8720_v26 }
 0x45e   : > { %3176 = vadd.xlane.f32.xlu1 %v3079_v31  ;;  %v3084_v31 = vmul.f32 %v8725_v36, %v8725_v36 }
 0x45f   : > { %v2875_v62 = vpop.xlane.xlu0 %2874 }
 0x460   : > { %3178 = vadd.xlane.f32.xlu0 %v3080_v21  ;;  %v2960_v46 = vmul.f32 0.0078125, %v2875_v62  ;;  %v6254_v21 = vld [vmem:[%s9948_s4 + $0x30] sm:$0xff]   ;;  %v10175_v62 = vld [vmem:[#allocation22_spill] sm:$0xff] }
 0x461   : > { %v2877_v47 = vpop.xlane.xlu1 %2876  ;;  %5972 = vmatprep.subr.bf16.mxu0 %v6254_v21 }
 0x462   : > { %3180 = vadd.xlane.f32.xlu1 %v3081_v28  ;;  %v2961_v13 = vmul.f32 0.0078125, %v2877_v47  ;;  %v3085_v28 = vmul.f32 %v8733_v52, %v8733_v52  ;;  %5973 = vmatpush3.bf16.msra.mxu0 %v6254_v21  ;;  %v10179_v47 = vld [vmem:[#allocation20_spill] sm:$0xff] }
 0x463   : > { %v2871_v25 = vpop.xlane.xlu0 %2870  ;;  %5974 = vmatprep.subr.bf16.mxu0 %v6255_v11 }
 0x464   : > { %v2958_v58 = vmul.f32 0.0078125, %v2871_v25  ;;  %3182 = vadd.xlane.f32.xlu0 %v3082_v18  ;;  %v10177_v18 = vld [vmem:[#allocation19_spill] sm:$0xff] }
 0x465   : > { %v2873_v27 = vpop.xlane.xlu1 %2872  ;;  %v8754_v25 = vsub.f32 %v10177_v18, %v2960_v46  ;;  %v10183_v18 = vld [vmem:[#allocation26_spill] sm:$0xff] }
 0x466   : > { %v8738_v61 = vsub.f32 %v10173_v4, %v2958_v58  ;;  %v2959_v44 = vmul.f32 0.0078125, %v2873_v27  ;;  %3184 = vadd.xlane.f32.xlu1 %v3083_v30  ;;  %v8759_v58 = vsub.f32 %v10179_v47, %v2961_v13  ;;  %5975 = vmatpush3.bf16.msra.mxu0 %v6255_v11  ;;  %v10185_v47 = vld [vmem:[#allocation23_spill] sm:$0xff] }
 0x467   : > { %v2883_v7 = vpop.xlane.xlu0 %2882  ;;  %10178 = vst [vmem:[#allocation16_spill] sm:$0xff] %v8754_v25  ;;  %v3088_v21 = vmul.f32 %v8754_v25, %v8754_v25 }
 0x468   : > { %10174 = vst [vmem:[#allocation15_spill] sm:$0xff] %v8738_v61  ;;  %v8749_v57 = vsub.f32 %v10175_v62, %v2959_v44  ;;  %3186 = vadd.xlane.f32.xlu0 %v3084_v31  ;;  %v3086_v43 = vmul.f32 %v8738_v61, %v8738_v61  ;;  %10180 = vst [vmem:[#allocation17_spill] sm:$0xff] %v8759_v58  ;;  %v2964_v44 = vmul.f32 0.0078125, %v2883_v7  ;;  %v10181_v31 = vld [vmem:[#allocation25_spill] sm:$0xff] }
 0x469   : > { %v2885_v60 = vpop.xlane.xlu1 %2884 }
 0x46a   : > { %10176 = vst [vmem:[#allocation18_spill] sm:$0xff] %v8749_v57  ;;  %3188 = vadd.xlane.f32.xlu1 %v3085_v28  ;;  %v3087_v27 = vmul.f32 %v8749_v57, %v8749_v57  ;;  %v2965_v28 = vmul.f32 0.0078125, %v2885_v60  ;;  %v8774_v7 = vsub.f32 %v10185_v47, %v2964_v44  ;;  %v10189_v47 = vld [vmem:[#allocation29_spill] sm:$0xff] }
 0x46b   : > { %v2879_v39 = vpop.xlane.xlu0 %2878 }
 0x46c   : > { %v2962_v30 = vmul.f32 0.0078125, %v2879_v39  ;;  %3190 = vadd.xlane.f32.xlu0 %v3086_v43  ;;  %v3089_v43 = vmul.f32 %v8759_v58, %v8759_v58  ;;  %10186 = vst [vmem:[#allocation19_spill] sm:$0xff] %v8774_v7  ;;  %v3092_v44 = vmul.f32 %v8774_v7, %v8774_v7  ;;  %v10195_v7 = vld [vmem:[#allocation28_spill] sm:$0xff] }
 0x46d   : > { %v2881_v4 = vpop.xlane.xlu1 %2880 }
 0x46e   : > { %v8764_v46 = vsub.f32 %v10181_v31, %v2962_v30  ;;  %v2963_v62 = vmul.f32 0.0078125, %v2881_v4  ;;  %3192 = vadd.xlane.f32.xlu1 %v3087_v27  ;;  %v10187_v4 = vld [vmem:[#allocation24_spill] sm:$0xff] }
 0x46f   : > { %v8779_v31 = vsub.f32 %v10187_v4, %v2965_v28 }
 0x470   : > { %10182 = vst [vmem:[#allocation21_spill] sm:$0xff] %v8764_v46  ;;  %v8769_v13 = vsub.f32 %v10183_v18, %v2963_v62  ;;  %v2891_v39 = vpop.xlane.xlu0 %2890  ;;  %3194 = vadd.xlane.f32.xlu0 %v3088_v21  ;;  %v3090_v27 = vmul.f32 %v8764_v46, %v8764_v46 }
 0x471   : > { %10188 = vst [vmem:[#allocation20_spill] sm:$0xff] %v8779_v31  ;;  %v2968_v21 = vmul.f32 0.0078125, %v2891_v39  ;;  %v3093_v28 = vmul.f32 %v8779_v31, %v8779_v31  ;;  %v10201_v31 = vld [vmem:[#allocation5_spill] sm:$0xff] }
 0x472   : > { %10184 = vst [vmem:[#allocation22_spill] sm:$0xff] %v8769_v13  ;;  %v2893_v30 = vpop.xlane.xlu1 %2892  ;;  %3196 = vadd.xlane.f32.xlu1 %v3089_v43  ;;  %v3091_v60 = vmul.f32 %v8769_v13, %v8769_v13  ;;  %v10193_v13 = vld [vmem:[#allocation27_spill] sm:$0xff] }
 0x473   : > { %v2969_v46 = vmul.f32 0.0078125, %v2893_v30 }
 0x474   : > { %v2887_v11 = vpop.xlane.xlu0 %2886  ;;  %3198 = vadd.xlane.f32.xlu0 %v3090_v27  ;;  %v10191_v27 = vld [vmem:[#allocation30_spill] sm:$0xff] }
 0x475   : > { %v2966_v62 = vmul.f32 0.0078125, %v2887_v11  ;;  %v8794_v11 = vsub.f32 %v10193_v13, %v2968_v21 }
 0x476   : > { %v2889_v18 = vpop.xlane.xlu1 %2888  ;;  %3200 = vadd.xlane.f32.xlu1 %v3091_v60 }
 0x477   : > { %v8786_v43 = vsub.f32 %v10189_v47, %v2966_v62  ;;  %v2967_v58 = vmul.f32 0.0078125, %v2889_v18  ;;  %10194 = vst [vmem:[#allocation23_spill] sm:$0xff] %v8794_v11  ;;  %v8799_v62 = vsub.f32 %v10195_v7, %v2969_v46  ;;  %v10197_v46 = vld [vmem:[#allocation4_spill] sm:$0xff] }
 0x478   : > { %3202 = vadd.xlane.f32.xlu0 %v3092_v44 }
 0x479   : > { %10190 = vst [vmem:[#allocation25_spill] sm:$0xff] %v8786_v43  ;;  %v8791_v4 = vsub.f32 %v10191_v27, %v2967_v58  ;;  %v3094_v39 = vmul.f32 %v8786_v43, %v8786_v43  ;;  %10196 = vst [vmem:[#allocation24_spill] sm:$0xff] %v8799_v62  ;;  %v3096_v58 = vmul.f32 %v8794_v11, %v8794_v11  ;;  %v10199_v43 = vld [vmem:[#allocation31_spill] sm:$0xff] }
 0x47a   : > { %3204 = vadd.xlane.f32.xlu1 %v3093_v28  ;;  %v2899_v60 = vpop.xlane.xlu0 %2898  ;;  %v3097_v47 = vmul.f32 %v8799_v62, %v8799_v62 }
 0x47b   : > { %10192 = vst [vmem:[#allocation26_spill] sm:$0xff] %v8791_v4  ;;  %v3095_v30 = vmul.f32 %v8791_v4, %v8791_v4  ;;  %v2972_v13 = vmul.f32 0.0078125, %v2899_v60 }
 0x47c   : > { %3206 = vadd.xlane.f32.xlu0 %v3094_v39  ;;  %v2901_v18 = vpop.xlane.xlu1 %2900 }
 0x47d   : > { %v2973_v27 = vmul.f32 0.0078125, %v2901_v18 }
 0x47e   : > { %3208 = vadd.xlane.f32.xlu1 %v3095_v30  ;;  %v2895_v44 = vpop.xlane.xlu0 %2894  ;;  %v8811_v30 = vsub.f32 %v10199_v43, %v2972_v13 }
 0x47f   : > { %v2970_v21 = vmul.f32 0.0078125, %v2895_v44  ;;  %v10203_v44 = vld [vmem:[#allocation32_spill] sm:$0xff] }
 0x480   : > { %3210 = vadd.xlane.f32.xlu0 %v3096_v58  ;;  %v2897_v28 = vpop.xlane.xlu1 %2896  ;;  %10200 = vst [vmem:[#allocation30_spill] sm:$0xff] %v8811_v30  ;;  %v8819_v62 = vsub.f32 %v10203_v44, %v2973_v27  ;;  %v3100_v43 = vmul.f32 %v8811_v30, %v8811_v30 }
 0x481   : > { %v8808_v7 = vsub.f32 %v10197_v46, %v2970_v21  ;;  %v2971_v39 = vmul.f32 0.0078125, %v2897_v28  ;;  %v10205_v46 = vld [vmem:[#allocation8_spill] sm:$0xff] }
 0x482   : > { %3212 = vadd.xlane.f32.xlu1 %v3097_v47  ;;  %v2907_v4 = vpop.xlane.xlu0 %2906  ;;  %10204 = vst [vmem:[#allocation28_spill] sm:$0xff] %v8819_v62  ;;  %v3101_v27 = vmul.f32 %v8819_v62, %v8819_v62 }
 0x483   : > { %10198 = vst [vmem:[#allocation29_spill] sm:$0xff] %v8808_v7  ;;  %v8814_v11 = vsub.f32 %v10201_v31, %v2971_v39  ;;  %v3098_v60 = vmul.f32 %v8808_v7, %v8808_v7  ;;  %v2976_v47 = vmul.f32 0.0078125, %v2907_v4 }
 0x484   : > { %v2909_v58 = vpop.xlane.xlu1 %2908 }
 0x485   : > { %10202 = vst [vmem:[#allocation27_spill] sm:$0xff] %v8814_v11  ;;  %3214 = vadd.xlane.f32.xlu0 %v3098_v60  ;;  %v3099_v18 = vmul.f32 %v8814_v11, %v8814_v11  ;;  %v2977_v13 = vmul.f32 0.0078125, %v2909_v58  ;;  %v10207_v60 = vld [vmem:[#allocation2_spill] sm:$0xff]  ;;  %v10209_v11 = vld [vmem:[#allocation9_spill] sm:$0xff] }
 0x486   : > { %v2903_v21 = vpop.xlane.xlu0 %2902  ;;  %v8831_v44 = vsub.f32 %v10207_v60, %v2976_v47 }
 0x487   : > { %v2974_v28 = vmul.f32 0.0078125, %v2903_v21  ;;  %3216 = vadd.xlane.f32.xlu1 %v3099_v18  ;;  %v10211_v21 = vld [vmem:[#allocation3_spill] sm:$0xff] }
 0x488   : > { %v2905_v31 = vpop.xlane.xlu1 %2904  ;;  %10208 = vst [vmem:[#allocation31_spill] sm:$0xff] %v8831_v44  ;;  %v8839_v58 = vsub.f32 %v10211_v21, %v2977_v13 }
 0x489   : > { %v8826_v39 = vsub.f32 %v10205_v46, %v2974_v28  ;;  %v2975_v7 = vmul.f32 0.0078125, %v2905_v31  ;;  %3218 = vadd.xlane.f32.xlu0 %v3100_v43  ;;  %v3104_v43 = vmul.f32 %v8831_v44, %v8831_v44 }
 0x48a   : > { %10212 = vst [vmem:[#allocation32_spill] sm:$0xff] %v8839_v58 }
 0x48b   : > { %10206 = vst [vmem:[#allocation4_spill] sm:$0xff] %v8826_v39  ;;  %v8834_v4 = vsub.f32 %v10209_v11, %v2975_v7  ;;  %3220 = vadd.xlane.f32.xlu1 %v3101_v27  ;;  %v3102_v18 = vmul.f32 %v8826_v39, %v8826_v39  ;;  %v3105_v11 = vmul.f32 %v8839_v58, %v8839_v58 }
 0x48d   : > { %10210 = vst [vmem:[#allocation5_spill] sm:$0xff] %v8834_v4  ;;  %3222 = vadd.xlane.f32.xlu0 %v3102_v18  ;;  %v3103_v28 = vmul.f32 %v8834_v4, %v8834_v4 }
 0x48f   : > { %3224 = vadd.xlane.f32.xlu1 %v3103_v28 }
 0x491   : > { %3226 = vadd.xlane.f32.xlu0 %v3104_v43 }
 0x493   : > { %3228 = vadd.xlane.f32.xlu1 %v3105_v11 }
 0x4a1   : > { %v2911_v7 = vpop.xlane.xlu0 %2910 }
 0x4a2   : > { %v2978_v47 = vmul.f32 0.0078125, %v2911_v7 }
 0x4a3   : > { %v2913_v31 = vpop.xlane.xlu1 %2912 }
 0x4a4   : > { %v8848_v46 = vsub.f32 %v8507_v16, %v2978_v47  ;;  %v2979_v13 = vmul.f32 0.0078125, %v2913_v31 }
 0x4a5   : > { %v3115_v27 = vpop.xlane.xlu0 %3114 }
 0x4a6   : > { %10213 = vst [vmem:[#allocation8_spill] sm:$0xff] %v8848_v46  ;;  %v8851_v60 = vsub.f32 %v8515_v49, %v2979_v13  ;;  %v3240_v18 = vmul.f32 0.0078125, %v3115_v27  ;;  %v3106_v21 = vmul.f32 %v8848_v46, %v8848_v46 }
 0x4a7   : > { %v3117_v28 = vpop.xlane.xlu1 %3116 }
 0x4a8   : > { %10214 = vst [vmem:[#allocation2_spill] sm:$0xff] %v8851_v60  ;;  %v3304_v43 = vadd.f32 1e-05, %v3240_v18  ;;  %v3241_v44 = vmul.f32 0.0078125, %v3117_v28  ;;  %3230 = vadd.xlane.f32.xlu0 %v3106_v21  ;;  %v3107_v11 = vmul.f32 %v8851_v60, %v8851_v60 }
 0x4a9   : > { %v3111_v7 = vpop.xlane.xlu0 %3110 }
 0x4aa   : > { %6512 = vrsqrt.f32 %v3304_v43  ;;  %v3305_v16 = vadd.f32 1e-05, %v3241_v44  ;;  %v3238_v47 = vmul.f32 0.0078125, %v3111_v7  ;;  %3232 = vadd.xlane.f32.xlu1 %v3107_v11  ;;  %v8860_v11 = vld [vmem:[%s9949_s5 + $0x4] ss:$0 sm:$0xff] }
 0x4ab   : > { %v3113_v31 = vpop.xlane.xlu1 %3112 }
 0x4ac   : > { %6514 = vrsqrt.f32 %v3305_v16  ;;  %v3302_v49 = vadd.f32 1e-05, %v3238_v47  ;;  %v3239_v13 = vmul.f32 0.0078125, %v3113_v31  ;;  %v10215_v47 = vld [vmem:[#allocation6_spill] sm:$0xff] }
 0x4ad   : > { %v3123_v27 = vpop.xlane.xlu0 %3122 }
 0x4ae   : > { %6516 = vrsqrt.f32 %v3302_v49  ;;  %v3303_v58 = vadd.f32 1e-05, %v3239_v13  ;;  %v3244_v46 = vmul.f32 0.0078125, %v3123_v27 }
 0x4af   : > { %v3125_v4 = vpop.xlane.xlu1 %3124 }
 0x4b0   : > { %6518 = vrsqrt.f32 %v3303_v58  ;;  %v3308_v18 = vadd.f32 1e-05, %v3244_v46  ;;  %v3245_v21 = vmul.f32 0.0078125, %v3125_v4 }
 0x4b1   : > { %v3119_v28 = vpop.xlane.xlu0 %3118 }
 0x4b2   : > { %6520 = vrsqrt.f32 %v3308_v18  ;;  %v3309_v60 = vadd.f32 1e-05, %v3245_v21  ;;  %v3242_v39 = vmul.f32 0.0078125, %v3119_v28  ;;  %v8868_v28 = vld [vmem:[%s9949_s5 + $0x5] ss:$0 sm:$0xff] }
 0x4b3   : > { %v3121_v43 = vpop.xlane.xlu1 %3120 }
 0x4b4   : > { %v6513_v44 = vpop.eup %6512  ;;  %6522 = vrsqrt.f32 %v3309_v60  ;;  %v3306_v7 = vadd.f32 1e-05, %v3242_v39  ;;  %v3243_v16 = vmul.f32 0.0078125, %v3121_v43 }
 0x4b5   : > { %v3432_v31 = vmul.f32 %v6513_v44, %v10215_v47  ;;  %v3131_v49 = vpop.xlane.xlu0 %3130 }
 0x4b6   : > { %v6515_v58 = vpop.eup %6514  ;;  %6524 = vrsqrt.f32 %v3306_v7  ;;  %v3307_v4 = vadd.f32 1e-05, %v3243_v16  ;;  %v3248_v46 = vmul.f32 0.0078125, %v3131_v49 }
 0x4b7   : > { %v3500_v13 = vmul.f32 %v8860_v11, %v3432_v31  ;;  %v3433_v27 = vmul.f32 %v6515_v58, %v8512_v35  ;;  %v3133_v18 = vpop.xlane.xlu1 %3132 }
 0x4b8   : > { %v6517_v21 = vpop.eup %6516  ;;  %6526 = vrsqrt.f32 %v3307_v4  ;;  %v3312_v39 = vadd.f32 1e-05, %v3248_v46  ;;  %v3249_v60 = vmul.f32 0.0078125, %v3133_v18 }
 0x4b9   : > { %v3501_v43 = vmul.f32 %v8860_v11, %v3433_v27  ;;  %v3430_v44 = vmul.f32 %v6517_v21, %v8519_v51  ;;  %v3127_v7 = vpop.xlane.xlu0 %3126  ;;  %v8873_v35 = vadd.f32 %v8868_v28, %v3500_v13 }
 0x4ba   : > { %v6519_v16 = vpop.eup %6518  ;;  %6528 = vrsqrt.f32 %v3312_v39  ;;  %v3313_v47 = vadd.f32 1e-05, %v3249_v60  ;;  %v3246_v31 = vmul.f32 0.0078125, %v3127_v7 }
 0x4bb   : > { %v3498_v49 = vmul.f32 %v8860_v11, %v3430_v44  ;;  %v3431_v58 = vmul.f32 %v6519_v16, %v8525_v0  ;;  %v3129_v62 = vpop.xlane.xlu1 %3128  ;;  %v8878_v27 = vadd.f32 %v8868_v28, %v3501_v43 }
 0x4bc   : > { %v6521_v4 = vpop.eup %6520  ;;  %6530 = vrsqrt.f32 %v3313_v47  ;;  %v3310_v46 = vadd.f32 1e-05, %v3246_v31  ;;  %v3247_v18 = vmul.f32 0.0078125, %v3129_v62  ;;  %v8885_v47 = vmul.f32 0.5, %v8873_v35 }
 0x4bd   : > { %v3566_v51 = vadd.f32 %v8868_v28, %v3498_v49  ;;  %v3499_v21 = vmul.f32 %v8860_v11, %v3431_v58  ;;  %v3436_v39 = vmul.f32 %v6521_v4, %v8530_v38  ;;  %v3139_v13 = vpop.xlane.xlu0 %3138 }
 0x4be   : > { %v6523_v60 = vpop.eup %6522  ;;  %6532 = vrsqrt.f32 %v3310_v46  ;;  %v3311_v44 = vadd.f32 1e-05, %v3247_v18  ;;  %v3252_v7 = vmul.f32 0.0078125, %v3139_v13  ;;  %v8890_v46 = vmul.f32 0.5, %v8878_v27 }
 0x4bf   : > { %v3567_v0 = vadd.f32 %v8868_v28, %v3499_v21  ;;  %v3141_v16 = vpop.xlane.xlu1 %3140  ;;  %v3694_v49 = vmul.f32 0.044715, %v3566_v51  ;;  %v3504_v58 = vmul.f32 %v8860_v11, %v3436_v39  ;;  %v3437_v38 = vmul.f32 %v6523_v60, %v8535_v20 }
 0x4c0   : > { %v6525_v62 = vpop.eup %6524  ;;  %6534 = vrsqrt.f32 %v3311_v44  ;;  %v3316_v43 = vadd.f32 1e-05, %v3252_v7  ;;  %v3253_v31 = vmul.f32 0.0078125, %v3141_v16  ;;  %v3696_v18 = vmul.f32 0.044715, %v8873_v35 }
 0x4c1   : > { %v3135_v4 = vpop.xlane.xlu0 %3134  ;;  %v3695_v25 = vmul.f32 0.044715, %v3567_v0  ;;  %v3434_v44 = vmul.f32 %v6525_v62, %v8540_v34  ;;  %v8894_v16 = vmul.f32 0.5, %v3566_v51  ;;  %v3758_v57 = vmul.f32 %v3694_v49, %v3566_v51 }
 0x4c2   : > { %v6527_v21 = vpop.eup %6526  ;;  %6536 = vrsqrt.f32 %v3316_v43  ;;  %v3317_v13 = vadd.f32 1e-05, %v3253_v31  ;;  %v3250_v30 = vmul.f32 0.0078125, %v3135_v4  ;;  %v3697_v39 = vmul.f32 0.044715, %v8878_v27 }
 0x4c3   : > { %v3137_v7 = vpop.xlane.xlu1 %3136  ;;  %v3759_v52 = vmul.f32 %v3695_v25, %v3567_v0  ;;  %v8898_v36 = vadd.f32 %v8868_v28, %v3504_v58  ;;  %v3505_v43 = vmul.f32 %v8860_v11, %v3437_v38  ;;  %v3435_v31 = vmul.f32 %v6527_v21, %v8545_v32 }
 0x4c4   : > { %v6529_v20 = vpop.eup %6528  ;;  %6538 = vrsqrt.f32 %v3317_v13  ;;  %v3314_v60 = vadd.f32 1e-05, %v3250_v30  ;;  %v3251_v61 = vmul.f32 0.0078125, %v3137_v7  ;;  %v3822_v34 = vmul.f32 %v3758_v57, %v3566_v51 }
 0x4c5   : > { %v3147_v4 = vpop.xlane.xlu0 %3146  ;;  %v3823_v45 = vmul.f32 %v3759_v52, %v3567_v0  ;;  %v3502_v37 = vmul.f32 %v8860_v11, %v3434_v44  ;;  %v3440_v30 = vmul.f32 %v6529_v20, %v8550_v55  ;;  %v8904_v25 = vmul.f32 0.5, %v3567_v0 }
 0x4c6   : > { %v6531_v62 = vpop.eup %6530  ;;  %6540 = vrsqrt.f32 %v3314_v60  ;;  %v3315_v26 = vadd.f32 1e-05, %v3251_v61  ;;  %v3256_v49 = vmul.f32 0.0078125, %v3147_v4  ;;  %v3886_v58 = vadd.f32 %v3822_v34, %v3566_v51 }
 0x4c7   : > { %v3149_v13 = vpop.xlane.xlu1 %3148  ;;  %v3887_v32 = vadd.f32 %v3823_v45, %v3567_v0  ;;  %v8907_v57 = vadd.f32 %v8868_v28, %v3505_v43  ;;  %v3503_v61 = vmul.f32 %v8860_v11, %v3435_v31  ;;  %v3441_v52 = vmul.f32 %v6531_v62, %v8555_v9 }
 0x4c8   : > { %v6533_v7 = vpop.eup %6532  ;;  %6542 = vrsqrt.f32 %v3315_v26  ;;  %v3320_v38 = vadd.f32 1e-05, %v3256_v49  ;;  %v3257_v53 = vmul.f32 0.0078125, %v3149_v13  ;;  %v3950_v44 = vmul.f32 0.7978846, %v3886_v58 }
 0x4c9   : > { %v3143_v21 = vpop.xlane.xlu0 %3142  ;;  %v3951_v4 = vmul.f32 0.7978846, %v3887_v32  ;;  %v8912_v51 = vadd.f32 %v8868_v28, %v3502_v37  ;;  %v3508_v26 = vmul.f32 %v8860_v11, %v3440_v30  ;;  %v3438_v45 = vmul.f32 %v6533_v7, %v8563_v5 }
 0x4ca   : > { %v6535_v60 = vpop.eup %6534  ;;  %6544 = vrsqrt.f32 %v3320_v38  ;;  %v3321_v55 = vadd.f32 1e-05, %v3257_v53  ;;  %v3254_v20 = vmul.f32 0.0078125, %v3143_v21  ;;  %v3760_v34 = vmul.f32 %v3696_v18, %v8873_v35 }
 0x4cb   : > { %v3145_v0 = vpop.xlane.xlu1 %3144  ;;  %6546 = vtanh.f32 %v3950_v44  ;;  %v8918_v62 = vadd.f32 %v8868_v28, %v3503_v61  ;;  %v3509_v53 = vmul.f32 %v8860_v11, %v3441_v52  ;;  %v3439_v37 = vmul.f32 %v6535_v60, %v8568_v56 }
 0x4cc   : > { %v6537_v43 = vpop.eup %6536  ;;  %6548 = vrsqrt.f32 %v3321_v55  ;;  %v3318_v31 = vadd.f32 1e-05, %v3254_v20  ;;  %v3255_v9 = vmul.f32 0.0078125, %v3145_v0  ;;  %v3761_v58 = vmul.f32 %v3697_v39, %v8878_v27 }
 0x4cd   : > { %v3155_v49 = vpop.xlane.xlu0 %3154  ;;  %6550 = vtanh.f32 %v3951_v4  ;;  %v8924_v7 = vadd.f32 %v8868_v28, %v3508_v26  ;;  %v3506_v18 = vmul.f32 %v8860_v11, %v3438_v45  ;;  %v3444_v38 = vmul.f32 %v6537_v43, %v8573_v1 }
 0x4ce   : > { %v6539_v30 = vpop.eup %6538  ;;  %6552 = vrsqrt.f32 %v3318_v31  ;;  %v3319_v5 = vadd.f32 1e-05, %v3255_v9  ;;  %v3260_v13 = vmul.f32 0.0078125, %v3155_v49  ;;  %v3824_v61 = vmul.f32 %v3760_v34, %v8873_v35 }
 0x4cf   : > { %v3157_v32 = vpop.xlane.xlu1 %3156  ;;  %v3825_v44 = vmul.f32 %v3761_v58, %v8878_v27  ;;  %v8931_v60 = vadd.f32 %v8868_v28, %v3509_v53  ;;  %v3507_v39 = vmul.f32 %v8860_v11, %v3439_v37  ;;  %v3445_v55 = vmul.f32 %v6539_v30, %v8578_v50 }
 0x4d0   : > { %v6541_v52 = vpop.eup %6540  ;;  %6554 = vrsqrt.f32 %v3319_v5  ;;  %v3324_v56 = vadd.f32 1e-05, %v3260_v13  ;;  %v3261_v21 = vmul.f32 0.0078125, %v3157_v32  ;;  %v3888_v4 = vadd.f32 %v3824_v61, %v8873_v35 }
 0x4d1   : > { %v3151_v20 = vpop.xlane.xlu0 %3150  ;;  %v3889_v0 = vadd.f32 %v3825_v44, %v8878_v27  ;;  %v8938_v43 = vadd.f32 %v8868_v28, %v3506_v18  ;;  %v3512_v31 = vmul.f32 %v8860_v11, %v3444_v38  ;;  %v3442_v9 = vmul.f32 %v6541_v52, %v8583_v59 }
 0x4d2   : > { %v6543_v1 = vpop.eup %6542  ;;  %6556 = vrsqrt.f32 %v3324_v56  ;;  %v3325_v26 = vadd.f32 1e-05, %v3261_v21  ;;  %v3258_v45 = vmul.f32 0.0078125, %v3151_v20  ;;  %v3952_v53 = vmul.f32 0.7978846, %v3888_v4 }
 0x4d3   : > { %v3153_v34 = vpop.xlane.xlu1 %3152  ;;  %v3953_v35 = vmul.f32 0.7978846, %v3889_v0  ;;  %v8943_v5 = vadd.f32 %v8868_v28, %v3507_v39  ;;  %v3513_v27 = vmul.f32 %v8860_v11, %v3445_v55  ;;  %v3443_v13 = vmul.f32 %v6543_v1, %v8588_v15 }
 0x4d4   : > { %v6545_v37 = vpop.eup %6544  ;;  %6558 = vrsqrt.f32 %v3325_v26  ;;  %v3322_v50 = vadd.f32 1e-05, %v3258_v45  ;;  %v3259_v49 = vmul.f32 0.0078125, %v3153_v34  ;;  %v3510_v52 = vmul.f32 %v8860_v11, %v3442_v9 }
 0x4d5   : > { %v6547_v30 = vpop.eup %6546  ;;  %v2915_v58 = vpop.xlane.xlu0 %2914  ;;  %6560 = vtanh.f32 %v3952_v53  ;;  %v3448_v56 = vmul.f32 %v6545_v37, %v8593_v54  ;;  %v8951_v55 = vadd.f32 %v8868_v28, %v3512_v31  ;;  %v3511_v1 = vmul.f32 %v8860_v11, %v3443_v13 }
 0x4d6   : > { %v6549_v18 = vpop.eup %6548  ;;  %6562 = vrsqrt.f32 %v3322_v50  ;;  %v3323_v59 = vadd.f32 1e-05, %v3259_v49  ;;  %v2980_v38 = vmul.f32 0.0078125, %v2915_v58  ;;  %v4078_v32 = vadd.f32 1.0, %v6547_v30 }
 0x4d7   : > { %v6551_v61 = vpop.eup %6550  ;;  %v3449_v21 = vmul.f32 %v6549_v18, %v8598_v48  ;;  %v2917_v44 = vpop.xlane.xlu1 %2916  ;;  %6564 = vtanh.f32 %v3953_v35  ;;  %v8966_v34 = vadd.f32 %v8868_v28, %v3513_v27  ;;  %v8969_v53 = vadd.f32 %v8868_v28, %v3510_v52 }
 0x4d8   : > { %v6553_v39 = vpop.eup %6552  ;;  %v8954_v15 = vsub.f32 %v8641_v8, %v2980_v38  ;;  %v2981_v20 = vmul.f32 0.0078125, %v2917_v44  ;;  %v4079_v4 = vadd.f32 1.0, %v6551_v61  ;;  %6566 = vrsqrt.f32 %v3323_v59 }
 0x4d9   : > { %v3446_v26 = vmul.f32 %v6553_v39, %v8603_v42  ;;  %v3159_v45 = vpop.xlane.xlu0 %3158  ;;  %v4142_v54 = vmul.f32 %v4078_v32, %v8894_v16  ;;  %v3516_v42 = vmul.f32 %v8860_v11, %v3448_v56  ;;  %v3517_v16 = vmul.f32 %v8860_v11, %v3449_v21 }
 0x4da   : > { %v6555_v48 = vpop.eup %6554  ;;  %v8960_v0 = vsub.f32 %v8648_v22, %v2981_v20  ;;  %v3262_v9 = vmul.f32 0.0078125, %v3159_v45  ;;  %v4143_v31 = vmul.f32 %v4079_v4, %v8904_v25  ;;  %v3108_v8 = vmul.f32 %v8954_v15, %v8954_v15 }
 0x4db   : > { %v3161_v37 = vpop.xlane.xlu1 %3160  ;;  %v8976_v30 = vadd.f32 %v8868_v28, %v3511_v1  ;;  %v3514_v27 = vmul.f32 %v8860_v11, %v3446_v26  ;;  %v3447_v13 = vmul.f32 %v6555_v48, %v8608_v2  ;;  %v3698_v61 = vmul.f32 0.044715, %v8912_v51 }
 0x4dc   : > { %v6557_v50 = vpop.eup %6556  ;;  %v3326_v22 = vadd.f32 1e-05, %v3262_v9  ;;  %v3263_v49 = vmul.f32 0.0078125, %v3161_v37  ;;  %v4206_v35 = vpack.c.bf16 %v4143_v31, %v4142_v54  ;;  %3234 = vadd.xlane.f32.xlu0 %v3108_v8  ;;  %v3109_v25 = vmul.f32 %v8960_v0, %v8960_v0 }
 0x4dd   : > { %v3452_v58 = vmul.f32 %v6557_v50, %v8613_v12  ;;  %v3163_v18 = vpop.xlane.xlu0 %3162  ;;  %v8983_v56 = vadd.f32 %v8868_v28, %v3516_v42  ;;  %v8986_v21 = vadd.f32 %v8868_v28, %v3517_v16  ;;  %v3699_v12 = vmul.f32 0.044715, %v8918_v62 }
 0x4de   : > { %v6559_v59 = vpop.eup %6558  ;;  %6568 = vrsqrt.f32 %v3326_v22  ;;  %v3327_v38 = vadd.f32 1e-05, %v3263_v49  ;;  %5976 = vmatprep.mubr.bf16.mxu0 %v4206_v35  ;;  %v3264_v32 = vmul.f32 0.0078125, %v3163_v18  ;;  %3236 = vadd.xlane.f32.xlu1 %v3109_v25  ;;  %v8991_v45 = vadd.f32 %v8868_v28, %v3514_v27 }
 0x4df   : > { %v6561_v52 = vpop.eup %6560  ;;  %v3453_v2 = vmul.f32 %v6559_v59, %v8618_v33  ;;  %v3165_v44 = vpop.xlane.xlu1 %3164  ;;  %v3515_v54 = vmul.f32 %v8860_v11, %v3447_v13  ;;  %v8995_v9 = vmul.f32 0.5, %v8912_v51  ;;  %v3762_v33 = vmul.f32 %v3698_v61, %v8912_v51 }
 0x4e0   : > { %v6563_v39 = vpop.eup %6562  ;;  %6570 = vrsqrt.f32 %v3327_v38  ;;  %v4080_v20 = vadd.f32 1.0, %v6561_v52  ;;  %v3328_v4 = vadd.f32 1e-05, %v3264_v32  ;;  %v3265_v1 = vmul.f32 0.0078125, %v3165_v44 }
 0x4e1   : > { %v6565_v26 = vpop.eup %6564  ;;  %v3167_v48 = vpop.xlane.xlu0 %3166  ;;  %v3520_v31 = vmul.f32 %v8860_v11, %v3452_v58  ;;  %v3521_v37 = vmul.f32 %v8860_v11, %v3453_v2  ;;  %v3450_v50 = vmul.f32 %v6563_v39, %v8623_v19  ;;  %v3763_v13 = vmul.f32 %v3699_v12, %v8918_v62 }
 0x4e2   : > { %v4081_v8 = vadd.f32 1.0, %v6565_v26  ;;  %6572 = vrsqrt.f32 %v3328_v4  ;;  %v3329_v42 = vadd.f32 1e-05, %v3265_v1  ;;  %v6567_v16 = vpop.eup %6566  ;;  %v4144_v22 = vmul.f32 %v4080_v20, %v8885_v47 }
 0x4e3   : > { %v3266_v49 = vmul.f32 0.0078125, %v3167_v48  ;;  %v3169_v35 = vpop.xlane.xlu1 %3168  ;;  %v9005_v58 = vadd.f32 %v8868_v28, %v3515_v54  ;;  %v9008_v59 = vmul.f32 0.5, %v8918_v62  ;;  %v3826_v38 = vmul.f32 %v3762_v33, %v8912_v51 }
 0x4e4   : > { %v4145_v25 = vmul.f32 %v4081_v8, %v8890_v46  ;;  %6574 = vrsqrt.f32 %v3329_v42  ;;  %v3267_v27 = vmul.f32 0.0078125, %v3169_v35  ;;  %v9012_v47 = vadd.f32 %v8868_v28, %v3520_v31 }
 0x4e5   : > { %v3330_v18 = vadd.f32 1e-05, %v3266_v49  ;;  %v3171_v19 = vpop.xlane.xlu0 %3170  ;;  %v3827_v46 = vmul.f32 %v3763_v13, %v8918_v62  ;;  %v9016_v52 = vadd.f32 %v8868_v28, %v3521_v37  ;;  %v3518_v2 = vmul.f32 %v8860_v11, %v3450_v50 }
 0x4e6   : > { %v4207_v32 = vpack.c.bf16 %v4145_v25, %v4144_v22  ;;  %v3331_v61 = vadd.f32 1e-05, %v3267_v27  ;;  %v3451_v44 = vmul.f32 %v6567_v16, %v8628_v40  ;;  %v3890_v12 = vadd.f32 %v3826_v38, %v8912_v51 }
 0x4e7   : > { %v3173_v39 = vpop.xlane.xlu1 %3172  ;;  %6576 = vrsqrt.f32 %v3330_v18  ;;  %v3891_v4 = vadd.f32 %v3827_v46, %v8918_v62  ;;  %v3700_v1 = vmul.f32 0.044715, %v8898_v36  ;;  %v3701_v26 = vmul.f32 0.044715, %v8907_v57 }
 0x4e8   : > { %v6569_v20 = vpop.eup %6568  ;;  %5977 = vmatmul.mubr.bf16.vlgmr.msra.gmra.mrb[64].mxu0 %v4207_v32  ;;  %6578 = vrsqrt.f32 %v3331_v61  ;;  %v3954_v54 = vmul.f32 0.7978846, %v3890_v12  ;;  %v3268_v48 = vmul.f32 0.0078125, %v3171_v19  ;;  %v3269_v33 = vmul.f32 0.0078125, %v3173_v39 }
 0x4e9   : > { %v3175_v31 = vpop.xlane.xlu0 %3174  ;;  %v3955_v42 = vmul.f32 0.7978846, %v3891_v4  ;;  %v3764_v40 = vmul.f32 %v3700_v1, %v8898_v36  ;;  %v3765_v51 = vmul.f32 %v3701_v26, %v8907_v57  ;;  %v3454_v37 = vmul.f32 %v6569_v20, %v8644_v10 }
 0x4ea   : > { %v6571_v8 = vpop.eup %6570  ;;  %v3270_v16 = vmul.f32 0.0078125, %v3175_v31  ;;  %6580 = vtanh.f32 %v3954_v54  ;;  %v3332_v50 = vadd.f32 1e-05, %v3268_v48  ;;  %v3333_v25 = vadd.f32 1e-05, %v3269_v33 }
 0x4eb   : > { %v3455_v62 = vmul.f32 %v6571_v8, %v8651_v17  ;;  %6582 = vtanh.f32 %v3955_v42  ;;  %v3828_v49 = vmul.f32 %v3764_v40, %v8898_v36  ;;  %v3829_v35 = vmul.f32 %v3765_v51, %v8907_v57  ;;  %v3177_v27 = vpop.xlane.xlu1 %3176 }
 0x4ec   : > { %v6573_v22 = vpop.eup %6572  ;;  %v9031_v13 = vadd.f32 %v8868_v28, %v3518_v2  ;;  %v3519_v18 = vmul.f32 %v8860_v11, %v3451_v44  ;;  %6584 = vrsqrt.f32 %v3332_v50  ;;  %v3334_v32 = vadd.f32 1e-05, %v3270_v16 }
 0x4ed   : > { %v3456_v38 = vmul.f32 %v6573_v22, %v8655_v41  ;;  %v3892_v17 = vadd.f32 %v3828_v49, %v8898_v36  ;;  %v3893_v19 = vadd.f32 %v3829_v35, %v8907_v57  ;;  %6586 = vrsqrt.f32 %v3333_v25 }
 0x4ee   : > { %v6575_v10 = vpop.eup %6574  ;;  %v3522_v61 = vmul.f32 %v8860_v11, %v3454_v37  ;;  %v3523_v46 = vmul.f32 %v8860_v11, %v3455_v62  ;;  %v3271_v2 = vmul.f32 0.0078125, %v3177_v27  ;;  %6588 = vrsqrt.f32 %v3334_v32  ;;  %v3179_v37 = vpop.xlane.xlu0 %3178 }
 0x4ef   : > { %v3457_v12 = vmul.f32 %v6575_v10, %v8661_v29  ;;  %v3524_v39 = vmul.f32 %v8860_v11, %v3456_v38  ;;  %v3956_v44 = vmul.f32 0.7978846, %v3892_v17  ;;  %v3957_v20 = vmul.f32 0.7978846, %v3893_v19 }
 0x4f0   : > { %v9042_v41 = vadd.f32 %v8868_v28, %v3519_v18  ;;  %v9045_v4 = vmul.f32 0.5, %v8898_v36  ;;  %v9048_v1 = vmul.f32 0.5, %v8907_v57  ;;  %v3335_v26 = vadd.f32 1e-05, %v3271_v2 }
 0x4f1   : > { %v6577_v54 = vpop.eup %6576  ;;  %v3525_v48 = vmul.f32 %v8860_v11, %v3457_v12  ;;  %6590 = vtanh.f32 %v3956_v44  ;;  %v3702_v29 = vmul.f32 0.044715, %v8938_v43  ;;  %v3703_v33 = vmul.f32 0.044715, %v8943_v5 }
 0x4f2   : > { %v6579_v31 = vpop.eup %6578  ;;  %v9054_v8 = vadd.f32 %v8868_v28, %v3522_v61  ;;  %v9057_v42 = vadd.f32 %v8868_v28, %v3523_v46  ;;  %6592 = vtanh.f32 %v3957_v20  ;;  %v9060_v36 = vmul.f32 0.5, %v8938_v43  ;;  %v3181_v61 = vpop.xlane.xlu1 %3180 }
 0x4f3   : > { %v9063_v57 = vadd.f32 %v8868_v28, %v3524_v39  ;;  %v9066_v40 = vmul.f32 0.5, %v8943_v5  ;;  %v3766_v51 = vmul.f32 %v3702_v29, %v8938_v43  ;;  %v3767_v16 = vmul.f32 %v3703_v33, %v8943_v5 }
 0x4f4   : > { %v6581_v62 = vpop.eup %6580  ;;  %v3458_v50 = vmul.f32 %v6577_v54, %v8666_v6  ;;  %6594 = vrsqrt.f32 %v3335_v26  ;;  %v3704_v22 = vmul.f32 0.044715, %v8924_v7  ;;  %v3705_v49 = vmul.f32 0.044715, %v8931_v60 }
 0x4f5   : > { %v6583_v35 = vpop.eup %6582  ;;  %v9074_v25 = vadd.f32 %v8868_v28, %v3525_v48  ;;  %v4082_v27 = vadd.f32 1.0, %v6581_v62  ;;  %v3830_v18 = vmul.f32 %v3766_v51, %v8938_v43  ;;  %v3831_v38 = vmul.f32 %v3767_v16, %v8943_v5 }
 0x4f6   : > { %v6585_v10 = vpop.eup %6584  ;;  %v3459_v17 = vmul.f32 %v6579_v31, %v8671_v23  ;;  %v4083_v19 = vadd.f32 1.0, %v6583_v35  ;;  %v3768_v6 = vmul.f32 %v3704_v22, %v8924_v7  ;;  %v3769_v32 = vmul.f32 %v3705_v49, %v8931_v60 }
 0x4f7   : > { %v6587_v46 = vpop.eup %6586  ;;  %v4146_v12 = vmul.f32 %v4082_v27, %v8995_v9  ;;  %v3894_v2 = vadd.f32 %v3830_v18, %v8938_v43  ;;  %v3895_v39 = vadd.f32 %v3831_v38, %v8943_v5  ;;  %v9085_v44 = vmul.f32 0.5, %v8924_v7  ;;  %v3183_v43 = vpop.xlane.xlu0 %3182 }
 0x4f8   : > { %v4147_v20 = vmul.f32 %v4083_v19, %v9008_v59  ;;  %v3460_v23 = vmul.f32 %v6585_v10, %v8676_v63  ;;  %v3832_v26 = vmul.f32 %v3768_v6, %v8924_v7  ;;  %v3833_v54 = vmul.f32 %v3769_v32, %v8931_v60  ;;  %v6589_v48 = vpop.eup %6588 }
 0x4f9   : > { %v3526_v29 = vmul.f32 %v8860_v11, %v3458_v50  ;;  %v3958_v33 = vmul.f32 0.7978846, %v3894_v2  ;;  %v3959_v9 = vmul.f32 0.7978846, %v3895_v39  ;;  %v3272_v31 = vmul.f32 0.0078125, %v3179_v37 }
 0x4fa   : > { %v4208_v51 = vpack.c.bf16 %v4147_v20, %v4146_v12  ;;  %v3461_v5 = vmul.f32 %v6587_v46, %v8681_v14  ;;  %v3462_v16 = vmul.f32 %v6589_v48, %v8689_v24  ;;  %v3896_v59 = vadd.f32 %v3832_v26, %v8924_v7  ;;  %v3185_v14 = vpop.xlane.xlu1 %3184 }
 0x4fb   : > { %v6591_v62 = vpop.eup %6590  ;;  %v3527_v63 = vmul.f32 %v8860_v11, %v3459_v17  ;;  %6596 = vtanh.f32 %v3958_v33  ;;  %v3897_v22 = vadd.f32 %v3833_v54, %v8931_v60  ;;  %v3336_v49 = vadd.f32 1e-05, %v3272_v31 }
 0x4fc   : > { %v6593_v35 = vpop.eup %6592  ;;  %5980 = vmatprep.mubr.bf16.mxu0 %v4208_v51  ;;  %v4084_v50 = vadd.f32 1.0, %v6591_v62  ;;  %v3528_v37 = vmul.f32 %v8860_v11, %v3460_v23  ;;  %6598 = vtanh.f32 %v3959_v9  ;;  %v9099_v27 = vmul.f32 0.5, %v8931_v60  ;;  %v3187_v60 = vpop.xlane.xlu0 %3186 }
 0x4fd   : > { %v4085_v24 = vadd.f32 1.0, %v6593_v35  ;;  %v3960_v18 = vmul.f32 0.7978846, %v3896_v59  ;;  %v3961_v7 = vmul.f32 0.7978846, %v3897_v22  ;;  %6600 = vrsqrt.f32 %v3336_v49 }
 0x4fe   : > { %v6595_v38 = vpop.eup %6594  ;;  %v4148_v10 = vmul.f32 %v4084_v50, %v9045_v4  ;;  %v3529_v17 = vmul.f32 %v8860_v11, %v3461_v5  ;;  %v3530_v19 = vmul.f32 %v8860_v11, %v3462_v16  ;;  %v3273_v6 = vmul.f32 0.0078125, %v3181_v61  ;;  %v3189_v51 = vpop.xlane.xlu1 %3188 }
 0x4ff   : > { %v4149_v32 = vmul.f32 %v4085_v24, %v9048_v1  ;;  %6602 = vtanh.f32 %v3960_v18  ;;  %v3274_v46 = vmul.f32 0.0078125, %v3183_v43  ;;  %v3275_v12 = vmul.f32 0.0078125, %v3185_v14 }
 0x500   : > { %v9106_v2 = vadd.f32 %v8868_v28, %v3526_v29  ;;  %v9109_v39 = vadd.f32 %v8868_v28, %v3527_v63  ;;  %6604 = vtanh.f32 %v3961_v7  ;;  %v3337_v20 = vadd.f32 1e-05, %v3273_v6  ;;  %v3191_v22 = vpop.xlane.xlu0 %3190 }
 0x501   : > { %v4209_v4 = vpack.c.bf16 %v4149_v32, %v4148_v10  ;;  %v3463_v23 = vmul.f32 %v6595_v38, %v8694_v3  ;;  %v3338_v26 = vadd.f32 1e-05, %v3274_v46  ;;  %v3339_v54 = vadd.f32 1e-05, %v3275_v12 }
 0x502   : > { %v9113_v61 = vadd.f32 %v8868_v28, %v3528_v37  ;;  %6606 = vrsqrt.f32 %v3337_v20  ;;  %v3706_v1 = vmul.f32 0.044715, %v8969_v53  ;;  %v3707_v48 = vmul.f32 0.044715, %v8976_v30 }
 0x503   : > { %5981 = vmatmul.mubr.bf16.gmra.mrb[68].mxu0 %v4209_v4  ;;  %v9118_v29 = vadd.f32 %v8868_v28, %v3529_v17  ;;  %v9121_v33 = vadd.f32 %v8868_v28, %v3530_v19  ;;  %6608 = vrsqrt.f32 %v3338_v26  ;;  %v3708_v3 = vmul.f32 0.044715, %v8951_v55  ;;  %v10216_v26 = vld [vmem:[#allocation7_spill] sm:$0xff] }
 0x504   : > { %6610 = vrsqrt.f32 %v3339_v54  ;;  %v3770_v9 = vmul.f32 %v3706_v1, %v8969_v53  ;;  %v3771_v31 = vmul.f32 %v3707_v48, %v8976_v30  ;;  %v3709_v43 = vmul.f32 0.044715, %v8966_v34 }
 0x505   : > { %v6597_v5 = vpop.eup %6596  ;;  %v3531_v16 = vmul.f32 %v8860_v11, %v3463_v23  ;;  %v9129_v59 = vmul.f32 0.5, %v8969_v53  ;;  %v3772_v62 = vmul.f32 %v3708_v3, %v8951_v55  ;;  %v3276_v63 = vmul.f32 0.0078125, %v3187_v60 }
 0x506   : > { %v6599_v49 = vpop.eup %6598  ;;  %v4086_v35 = vadd.f32 1.0, %v6597_v5  ;;  %v3834_v50 = vmul.f32 %v3770_v9, %v8969_v53  ;;  %v3835_v37 = vmul.f32 %v3771_v31, %v8976_v30  ;;  %v3773_v14 = vmul.f32 %v3709_v43, %v8966_v34  ;;  %v3193_v31 = vpop.xlane.xlu1 %3192 }
 0x507   : > { %v6601_v24 = vpop.eup %6600  ;;  %v4087_v18 = vadd.f32 1.0, %v6599_v49  ;;  %v3836_v7 = vmul.f32 %v3772_v62, %v8951_v55  ;;  %v3340_v38 = vadd.f32 1e-05, %v3276_v63  ;;  %v3277_v10 = vmul.f32 0.0078125, %v3189_v51 }
 0x508   : > { %v4150_v17 = vmul.f32 %v4086_v35, %v9060_v36  ;;  %v3898_v19 = vadd.f32 %v3834_v50, %v8969_v53  ;;  %v3899_v6 = vadd.f32 %v3835_v37, %v8976_v30  ;;  %v3278_v32 = vmul.f32 0.0078125, %v3191_v22  ;;  %v10217_v22 = vld [vmem:[#allocation12_spill] sm:$0xff]  ;;  %v3195_v50 = vpop.xlane.xlu0 %3194 }
 0x509   : > { %v6603_v46 = vpop.eup %6602  ;;  %v4151_v12 = vmul.f32 %v4087_v18, %v9066_v40  ;;  %v3837_v60 = vmul.f32 %v3773_v14, %v8966_v34  ;;  %v3900_v20 = vadd.f32 %v3836_v7, %v8951_v55  ;;  %6612 = vrsqrt.f32 %v3340_v38  ;;  %v10218_v38 = vld [vmem:[#allocation13_spill] sm:$0xff] }
 0x50a   : > { %v6605_v4 = vpop.eup %6604  ;;  %v4088_v23 = vadd.f32 1.0, %v6603_v46  ;;  %v3464_v54 = vmul.f32 %v6601_v24, %v10216_v26  ;;  %v3962_v1 = vmul.f32 0.7978846, %v3898_v19  ;;  %v3963_v48 = vmul.f32 0.7978846, %v3899_v6  ;;  %v10219_v6 = vld [vmem:[#allocation10_spill] sm:$0xff] }
 0x50b   : > { %v4210_v36 = vpack.c.bf16 %v4151_v12, %v4150_v17  ;;  %v4089_v3 = vadd.f32 1.0, %v6605_v4  ;;  %v3901_v53 = vadd.f32 %v3837_v60, %v8966_v34  ;;  %v3964_v9 = vmul.f32 0.7978846, %v3900_v20 }
 0x50c   : > { %v6607_v43 = vpop.eup %6606  ;;  %v4152_v40 = vmul.f32 %v4088_v23, %v9085_v44  ;;  %6614 = vtanh.f32 %v3962_v1  ;;  %v3341_v51 = vadd.f32 1e-05, %v3277_v10  ;;  %v3342_v5 = vadd.f32 1e-05, %v3278_v32 }
 0x50d   : > { %v6609_v62 = vpop.eup %6608  ;;  %5984 = vmatprep.mubr.bf16.mxu0 %v4210_v36  ;;  %v4153_v63 = vmul.f32 %v4089_v3, %v9099_v27  ;;  %v3465_v49 = vmul.f32 %v6607_v43, %v10217_v22  ;;  %6616 = vtanh.f32 %v3963_v48  ;;  %v3965_v35 = vmul.f32 0.7978846, %v3901_v53 }
 0x50e   : > { %v6611_v37 = vpop.eup %6610  ;;  %v3532_v14 = vmul.f32 %v8860_v11, %v3464_v54  ;;  %v3643_v24 = vmul.f32 0.5, %v8976_v30  ;;  %6618 = vtanh.f32 %v3964_v9  ;;  %v3279_v18 = vmul.f32 0.0078125, %v3193_v31  ;;  %v3199_v54 = vpop.xlane.xlu0 %3198 }
 0x50f   : > { %v9150_v44 = vadd.f32 %v8868_v28, %v3531_v16  ;;  %v4211_v7 = vpack.c.bf16 %v4153_v63, %v4152_v40  ;;  %v3466_v10 = vmul.f32 %v6609_v62, %v10218_v38  ;;  %6620 = vtanh.f32 %v3965_v35  ;;  %v3197_v16 = vpop.xlane.xlu1 %3196 }
 0x510   : > { %v3533_v27 = vmul.f32 %v8860_v11, %v3465_v49  ;;  %v3644_v17 = vmul.f32 0.5, %v8951_v55  ;;  %6622 = vrsqrt.f32 %v3341_v51  ;;  %v3343_v19 = vadd.f32 1e-05, %v3279_v18  ;;  %v10220_v51 = vld [vmem:[#allocation11_spill] sm:$0xff] }
 0x511   : > { %5985 = vmatmul.mubr.bf16.gmra.mrb[72].mxu0 %v4211_v7  ;;  %v3467_v32 = vmul.f32 %v6611_v37, %v10219_v6  ;;  %v3645_v30 = vmul.f32 0.5, %v8966_v34  ;;  %6624 = vrsqrt.f32 %v3342_v5  ;;  %v3710_v46 = vmul.f32 0.044715, %v8991_v45 }
 0x512   : > { %v9159_v12 = vadd.f32 %v8868_v28, %v3532_v14  ;;  %6626 = vrsqrt.f32 %v3343_v19  ;;  %v9162_v60 = vmul.f32 0.5, %v8991_v45  ;;  %v3711_v55 = vmul.f32 0.044715, %v9005_v58 }
 0x513   : > { %v6613_v20 = vpop.eup %6612  ;;  %v3534_v4 = vmul.f32 %v8860_v11, %v3466_v10  ;;  %v9167_v23 = vmul.f32 0.5, %v9005_v58  ;;  %v3774_v34 = vmul.f32 %v3710_v46, %v8991_v45  ;;  %v3712_v26 = vmul.f32 0.044715, %v8983_v56  ;;  %v3201_v37 = vpop.xlane.xlu1 %3200 }
 0x514   : > { %v9172_v1 = vadd.f32 %v8868_v28, %v3533_v27  ;;  %v3775_v48 = vmul.f32 %v3711_v55, %v9005_v58  ;;  %v3713_v36 = vmul.f32 0.044715, %v8986_v21  ;;  %v3280_v3 = vmul.f32 0.0078125, %v3195_v50 }
 0x515   : > { %v3535_v53 = vmul.f32 %v8860_v11, %v3467_v32  ;;  %v3838_v9 = vmul.f32 %v3774_v34, %v8991_v45  ;;  %v3776_v31 = vmul.f32 %v3712_v26, %v8983_v56  ;;  %v3281_v43 = vmul.f32 0.0078125, %v3197_v16 }
 0x516   : > { %v6615_v40 = vpop.eup %6614  ;;  %v3468_v5 = vmul.f32 %v6613_v20, %v10220_v51  ;;  %v3839_v62 = vmul.f32 %v3775_v48, %v9005_v58  ;;  %v3777_v28 = vmul.f32 %v3713_v36, %v8986_v21  ;;  %v3282_v63 = vmul.f32 0.0078125, %v3199_v54  ;;  %v10221_v48 = vld [vmem:[#allocation14_spill] sm:$0xff] }
 0x517   : > { %v6617_v22 = vpop.eup %6616  ;;  %v4090_v49 = vadd.f32 1.0, %v6615_v40  ;;  %v3902_v35 = vadd.f32 %v3838_v9, %v8991_v45  ;;  %v3840_v50 = vmul.f32 %v3776_v31, %v8983_v56  ;;  %v3344_v11 = vadd.f32 1e-05, %v3280_v3  ;;  %v3203_v40 = vpop.xlane.xlu0 %3202 }
 0x518   : > { %v6619_v14 = vpop.eup %6618  ;;  %v4091_v18 = vadd.f32 1.0, %v6617_v22  ;;  %v3903_v7 = vadd.f32 %v3839_v62, %v9005_v58  ;;  %v3841_v38 = vmul.f32 %v3777_v28, %v8986_v21  ;;  %v3345_v10 = vadd.f32 1e-05, %v3281_v43  ;;  %v3205_v28 = vpop.xlane.xlu1 %3204 }
 0x519   : > { %v6621_v27 = vpop.eup %6620  ;;  %v4154_v19 = vmul.f32 %v4090_v49, %v9129_v59  ;;  %v4092_v6 = vadd.f32 1.0, %v6619_v14  ;;  %v3966_v32 = vmul.f32 0.7978846, %v3902_v35  ;;  %v3904_v46 = vadd.f32 %v3840_v50, %v8983_v56  ;;  %v10222_v59 = vld [vmem:[#allocation15_spill] sm:$0xff]  ;;  %v10223_v49 = vld [vmem:[#allocation18_spill] sm:$0xff] }
 0x51a   : > { %v6623_v16 = vpop.eup %6622  ;;  %v4155_v45 = vmul.f32 %v4091_v18, %v3643_v24  ;;  %v4093_v55 = vadd.f32 1.0, %v6621_v27  ;;  %v3967_v20 = vmul.f32 0.7978846, %v3903_v7  ;;  %v3905_v34 = vadd.f32 %v3841_v38, %v8986_v21  ;;  %v9194_v24 = vld [vmem:[%s9949_s5 + $0x4] ss:$0 sm:$0xff] }
 0x51b   : > { %v6625_v26 = vpop.eup %6624  ;;  %v4156_v54 = vmul.f32 %v4092_v6, %v3644_v17  ;;  %v3469_v58 = vmul.f32 %v6623_v16, %v10221_v48  ;;  %6628 = vtanh.f32 %v3966_v32  ;;  %v3968_v36 = vmul.f32 0.7978846, %v3904_v46  ;;  %v9202_v50 = vld [vmem:[%s9949_s5 + $0x5] ss:$0 sm:$0xff]  ;;  %v3207_v6 = vpop.xlane.xlu0 %3206 }
 0x51c   : > { %v6627_v3 = vpop.eup %6626  ;;  %v4212_v9 = vpack.c.bf16 %v4155_v45, %v4154_v19  ;;  %v4157_v31 = vmul.f32 %v4093_v55, %v3645_v30  ;;  %v3470_v43 = vmul.f32 %v6625_v26, %v10222_v59  ;;  %6630 = vtanh.f32 %v3967_v20  ;;  %v3209_v46 = vpop.xlane.xlu1 %3208 }
 0x51d   : > { %v3536_v51 = vmul.f32 %v9194_v24, %v3468_v5  ;;  %v3537_v17 = vmul.f32 %v9194_v24, %v3469_v58  ;;  %v3969_v62 = vmul.f32 0.7978846, %v3905_v34  ;;  %6632 = vtanh.f32 %v3968_v36 }
 0x51e   : > { %5988 = vmatprep.mubr.bf16.mxu0 %v4212_v9  ;;  %v4213_v22 = vpack.c.bf16 %v4157_v31, %v4156_v54  ;;  %v3471_v30 = vmul.f32 %v6627_v3, %v10223_v49  ;;  %6634 = vrsqrt.f32 %v3344_v11  ;;  %v3346_v35 = vadd.f32 1e-05, %v3282_v63 }
 0x51f   : > { %v9205_v14 = vadd.f32 %v9202_v50, %v3534_v4  ;;  %v3648_v5 = vmul.f32 0.5, %v8983_v56  ;;  %6636 = vtanh.f32 %v3969_v62  ;;  %v3283_v18 = vmul.f32 0.0078125, %v3201_v37 }
 0x520   : > { %v9209_v7 = vadd.f32 %v9202_v50, %v3535_v53  ;;  %5989 = vmatmul.mubr.bf16.gmra.mrb[76].mxu0 %v4213_v22  ;;  %v3538_v38 = vmul.f32 %v9194_v24, %v3470_v43  ;;  %v3649_v63 = vmul.f32 0.5, %v8986_v21  ;;  %6638 = vrsqrt.f32 %v3345_v10 }
 0x521   : > { %v9214_v11 = vadd.f32 %v9202_v50, %v3536_v51  ;;  %6640 = vrsqrt.f32 %v3346_v35  ;;  %v3347_v27 = vadd.f32 1e-05, %v3283_v18  ;;  %v3714_v4 = vmul.f32 0.044715, %v9031_v13 }
 0x522   : > { %v9218_v56 = vadd.f32 %v9202_v50, %v3537_v17  ;;  %v9221_v37 = vmul.f32 %v9194_v24, %v3471_v30  ;;  %v3715_v53 = vmul.f32 0.044715, %v9042_v41  ;;  %v3716_v19 = vmul.f32 0.044715, %v9012_v47 }
 0x523   : > { %6642 = vrsqrt.f32 %v3347_v27  ;;  %v3778_v21 = vmul.f32 %v3714_v4, %v9031_v13  ;;  %v3717_v10 = vmul.f32 0.044715, %v9016_v52  ;;  %v3284_v32 = vmul.f32 0.0078125, %v3203_v40 }
 0x524   : > { %v9228_v16 = vadd.f32 %v9202_v50, %v3538_v38  ;;  %v3779_v45 = vmul.f32 %v3715_v53, %v9042_v41  ;;  %v3780_v55 = vmul.f32 %v3716_v19, %v9012_v47  ;;  %v3285_v20 = vmul.f32 0.0078125, %v3205_v28 }
 0x525   : > { %v6629_v34 = vpop.eup %6628  ;;  %v3842_v26 = vmul.f32 %v3778_v21, %v9031_v13  ;;  %v3781_v54 = vmul.f32 %v3717_v10, %v9016_v52  ;;  %v3348_v48 = vadd.f32 1e-05, %v3284_v32  ;;  %v3286_v58 = vmul.f32 0.0078125, %v3207_v6  ;;  %v10224_v6 = vld [vmem:[#allocation16_spill] sm:$0xff] }
 0x526   : > { %v6631_v36 = vpop.eup %6630  ;;  %v4094_v3 = vadd.f32 1.0, %v6629_v34  ;;  %v3843_v9 = vmul.f32 %v3779_v45, %v9042_v41  ;;  %v3844_v31 = vmul.f32 %v3780_v55, %v9012_v47  ;;  %v3287_v59 = vmul.f32 0.0078125, %v3209_v46 }
 0x527   : > { %v6633_v43 = vpop.eup %6632  ;;  %v4095_v40 = vadd.f32 1.0, %v6631_v36  ;;  %v3906_v51 = vadd.f32 %v3842_v26, %v9031_v13  ;;  %v3845_v17 = vmul.f32 %v3781_v54, %v9016_v52  ;;  %v3349_v62 = vadd.f32 1e-05, %v3285_v20  ;;  %v10225_v20 = vld [vmem:[#allocation17_spill] sm:$0xff] }
 0x528   : > { %v6635_v28 = vpop.eup %6634  ;;  %v4096_v22 = vadd.f32 1.0, %v6633_v43  ;;  %v3907_v49 = vadd.f32 %v3843_v9, %v9042_v41  ;;  %v3908_v30 = vadd.f32 %v3844_v31, %v9012_v47  ;;  %6644 = vrsqrt.f32 %v3348_v48  ;;  %v10226_v54 = vld [vmem:[#allocation21_spill] sm:$0xff]  ;;  %v3211_v48 = vpop.xlane.xlu0 %3210 }
 0x529   : > { %v6637_v35 = vpop.eup %6636  ;;  %v4158_v18 = vmul.f32 %v4094_v3, %v9162_v60  ;;  %v4159_v38 = vmul.f32 %v4095_v40, %v9167_v23  ;;  %v3970_v27 = vmul.f32 0.7978846, %v3906_v51  ;;  %v3909_v4 = vadd.f32 %v3845_v17, %v9016_v52 }
 0x52a   : > { %v6639_v53 = vpop.eup %6638  ;;  %v4097_v19 = vadd.f32 1.0, %v6637_v35  ;;  %v3472_v21 = vmul.f32 %v6635_v28, %v10224_v6  ;;  %v3971_v10 = vmul.f32 0.7978846, %v3907_v49  ;;  %v3972_v32 = vmul.f32 0.7978846, %v3908_v30  ;;  %v3213_v28 = vpop.xlane.xlu1 %3212 }
 0x52b   : > { %v6641_v46 = vpop.eup %6640  ;;  %v4214_v45 = vpack.c.bf16 %v4159_v38, %v4158_v18  ;;  %v4160_v55 = vmul.f32 %v4096_v22, %v3648_v5  ;;  %v3473_v34 = vmul.f32 %v6639_v53, %v10225_v20  ;;  %6646 = vtanh.f32 %v3970_v27 }
 0x52c   : > { %v4161_v26 = vmul.f32 %v4097_v19, %v3649_v63  ;;  %v3474_v60 = vmul.f32 %v6641_v46, %v10226_v54  ;;  %6648 = vtanh.f32 %v3971_v10  ;;  %v3973_v23 = vmul.f32 0.7978846, %v3909_v4  ;;  %v3215_v38 = vpop.xlane.xlu0 %3214 }
 0x52d   : > { %v6643_v36 = vpop.eup %6642  ;;  %5992 = vmatprep.mubr.bf16.mxu0 %v4214_v45  ;;  %v3650_v3 = vmul.f32 0.5, %v9031_v13  ;;  %v3651_v9 = vmul.f32 0.5, %v9042_v41  ;;  %6650 = vtanh.f32 %v3972_v32  ;;  %v3350_v31 = vadd.f32 1e-05, %v3286_v58  ;;  %v10227_v13 = vld [vmem:[#allocation22_spill] sm:$0xff] }
 0x52e   : > { %v4215_v43 = vpack.c.bf16 %v4161_v26, %v4160_v55  ;;  %v3540_v5 = vmul.f32 %v9194_v24, %v3472_v21  ;;  %v3541_v40 = vmul.f32 %v9194_v24, %v3473_v34  ;;  %6652 = vtanh.f32 %v3973_v23  ;;  %v10228_v26 = vld [vmem:[#allocation19_spill] sm:$0xff] }
 0x52f   : > { %v9252_v63 = vadd.f32 %v9202_v50, %v9221_v37  ;;  %v3542_v51 = vmul.f32 %v9194_v24, %v3474_v60  ;;  %6654 = vrsqrt.f32 %v3349_v62  ;;  %v3351_v17 = vadd.f32 1e-05, %v3287_v59 }
 0x530   : > { %5993 = vmatmul.mubr.bf16.gmra.mrb[80].mxu0 %v4215_v43  ;;  %v3475_v41 = vmul.f32 %v6643_v36, %v10227_v13  ;;  %v3652_v58 = vmul.f32 0.5, %v9012_v47  ;;  %v3653_v22 = vmul.f32 0.5, %v9016_v52  ;;  %6656 = vrsqrt.f32 %v3350_v31 }
 0x531   : > { %6658 = vrsqrt.f32 %v3351_v17  ;;  %v3718_v49 = vmul.f32 0.044715, %v9054_v8  ;;  %v3719_v30 = vmul.f32 0.044715, %v9057_v42  ;;  %v3288_v37 = vmul.f32 0.0078125, %v3211_v48 }
 0x532   : > { %v6645_v35 = vpop.eup %6644  ;;  %v9261_v18 = vadd.f32 %v9202_v50, %v3540_v5  ;;  %v9264_v59 = vadd.f32 %v9202_v50, %v3541_v40  ;;  %v9267_v62 = vmul.f32 0.5, %v9054_v8  ;;  %v3289_v47 = vmul.f32 0.0078125, %v3213_v28 }
 0x533   : > { %v9270_v52 = vadd.f32 %v9202_v50, %v3542_v51  ;;  %v3782_v27 = vmul.f32 %v3718_v49, %v9054_v8  ;;  %v3783_v4 = vmul.f32 %v3719_v30, %v9057_v42  ;;  %v3352_v53 = vadd.f32 1e-05, %v3288_v37 }
 0x534   : > { %v3543_v19 = vmul.f32 %v9194_v24, %v3475_v41  ;;  %v3353_v6 = vadd.f32 1e-05, %v3289_v47  ;;  %v3720_v21 = vmul.f32 0.044715, %v9063_v57  ;;  %v3721_v10 = vmul.f32 0.044715, %v9074_v25 }
 0x535   : > { %v6647_v32 = vpop.eup %6646  ;;  %v3846_v46 = vmul.f32 %v3782_v27, %v9054_v8  ;;  %v3847_v45 = vmul.f32 %v3783_v4, %v9057_v42  ;;  %6660 = vrsqrt.f32 %v3352_v53  ;;  %v3290_v55 = vmul.f32 0.0078125, %v3215_v38  ;;  %v10229_v27 = vld [vmem:[#allocation20_spill] sm:$0xff] }
 0x536   : > { %v6649_v20 = vpop.eup %6648  ;;  %v4098_v34 = vadd.f32 1.0, %v6647_v32  ;;  %v3476_v54 = vmul.f32 %v6645_v35, %v10228_v26  ;;  %6662 = vrsqrt.f32 %v3353_v6  ;;  %v3784_v60 = vmul.f32 %v3720_v21, %v9063_v57  ;;  %v3217_v35 = vpop.xlane.xlu1 %3216 }
 0x537   : > { %v6651_v23 = vpop.eup %6650  ;;  %v4099_v48 = vadd.f32 1.0, %v6649_v20  ;;  %v3910_v36 = vadd.f32 %v3846_v46, %v9054_v8  ;;  %v3911_v31 = vadd.f32 %v3847_v45, %v9057_v42  ;;  %v3785_v43 = vmul.f32 %v3721_v10, %v9074_v25  ;;  %v10230_v10 = vld [vmem:[#allocation25_spill] sm:$0xff]  ;;  %v10231_v46 = vld [vmem:[#allocation26_spill] sm:$0xff] }
 0x538   : > { %v6653_v5 = vpop.eup %6652  ;;  %v4162_v40 = vmul.f32 %v4098_v34, %v3650_v3  ;;  %v4100_v51 = vadd.f32 1.0, %v6651_v23  ;;  %v3848_v17 = vmul.f32 %v3784_v60, %v9063_v57  ;;  %v3354_v28 = vadd.f32 1e-05, %v3290_v55 }
 0x539   : > { %v6655_v13 = vpop.eup %6654  ;;  %v4163_v41 = vmul.f32 %v4099_v48, %v3651_v9  ;;  %v4101_v49 = vadd.f32 1.0, %v6653_v5  ;;  %v3974_v30 = vmul.f32 0.7978846, %v3910_v36  ;;  %v3975_v37 = vmul.f32 0.7978846, %v3911_v31  ;;  %v3219_v48 = vpop.xlane.xlu0 %3218 }
 0x53a   : > { %v6657_v47 = vpop.eup %6656  ;;  %v4164_v38 = vmul.f32 %v4100_v51, %v3652_v58  ;;  %v3477_v8 = vmul.f32 %v6655_v13, %v10229_v27  ;;  %v3849_v4 = vmul.f32 %v3785_v43, %v9074_v25  ;;  %v3912_v53 = vadd.f32 %v3848_v17, %v9063_v57  ;;  %v3221_v5 = vpop.xlane.xlu1 %3220  ;;  %v10232_v27 = vld [vmem:[#allocation23_spill] sm:$0xff] }
 0x53b   : > { %v6659_v6 = vpop.eup %6658  ;;  %v4216_v3 = vpack.c.bf16 %v4163_v41, %v4162_v40  ;;  %v4165_v21 = vmul.f32 %v4101_v49, %v3653_v22  ;;  %v3478_v32 = vmul.f32 %v6657_v47, %v10230_v10  ;;  %6664 = vtanh.f32 %v3974_v30 }
 0x53c   : > { %v3544_v9 = vmul.f32 %v9194_v24, %v3476_v54  ;;  %v3479_v45 = vmul.f32 %v6659_v6, %v10231_v46  ;;  %6666 = vtanh.f32 %v3975_v37  ;;  %v3913_v55 = vadd.f32 %v3849_v4, %v9074_v25 }
 0x53d   : > { %5996 = vmatprep.mubr.bf16.mxu0 %v4216_v3  ;;  %v4217_v58 = vpack.c.bf16 %v4165_v21, %v4164_v38  ;;  %v3545_v20 = vmul.f32 %v9194_v24, %v3477_v8  ;;  %v3976_v34 = vmul.f32 0.7978846, %v3912_v53  ;;  %6668 = vrsqrt.f32 %v3354_v28  ;;  %v3223_v6 = vpop.xlane.xlu0 %3222  ;;  %v10233_v21 = vld [vmem:[#allocation24_spill] sm:$0xff] }
 0x53e   : > { %v3546_v26 = vmul.f32 %v9194_v24, %v3478_v32  ;;  %v3655_v22 = vmul.f32 0.5, %v9057_v42  ;;  %v3977_v60 = vmul.f32 0.7978846, %v3913_v55  ;;  %v3291_v23 = vmul.f32 0.0078125, %v3217_v35 }
 0x53f   : > { %v6661_v36 = vpop.eup %6660  ;;  %v9296_v54 = vadd.f32 %v9202_v50, %v3543_v19  ;;  %5997 = vmatmul.mubr.bf16.gmra.mrb[84].mxu0 %v4217_v58  ;;  %v3656_v31 = vmul.f32 0.5, %v9063_v57  ;;  %v9300_v43 = vmul.f32 0.5, %v9074_v25  ;;  %6670 = vtanh.f32 %v3976_v34 }
 0x540   : > { %v6663_v40 = vpop.eup %6662  ;;  %v9303_v51 = vadd.f32 %v9202_v50, %v3544_v9  ;;  %v3547_v42 = vmul.f32 %v9194_v24, %v3479_v45  ;;  %6672 = vtanh.f32 %v3977_v60  ;;  %v3355_v17 = vadd.f32 1e-05, %v3291_v23 }
 0x541   : > { %v9307_v28 = vadd.f32 %v9202_v50, %v3545_v20  ;;  %v3722_v19 = vmul.f32 0.044715, %v9106_v2  ;;  %v3723_v57 = vmul.f32 0.044715, %v9109_v39  ;;  %v3292_v13 = vmul.f32 0.0078125, %v3219_v48 }
 0x542   : > { %v9312_v25 = vadd.f32 %v9202_v50, %v3546_v26  ;;  %6674 = vrsqrt.f32 %v3355_v17  ;;  %v9315_v41 = vmul.f32 0.5, %v9106_v2  ;;  %v3293_v49 = vmul.f32 0.0078125, %v3221_v5 }
 0x543   : > { %v9318_v30 = vmul.f32 0.5, %v9109_v39  ;;  %v3786_v37 = vmul.f32 %v3722_v19, %v9106_v2  ;;  %v3787_v35 = vmul.f32 %v3723_v57, %v9109_v39  ;;  %v3356_v47 = vadd.f32 1e-05, %v3292_v13 }
 0x544   : > { %v9323_v38 = vadd.f32 %v9202_v50, %v3547_v42  ;;  %v3480_v8 = vmul.f32 %v6661_v36, %v10232_v27  ;;  %v3357_v4 = vadd.f32 1e-05, %v3293_v49  ;;  %v3724_v53 = vmul.f32 0.044715, %v9113_v61  ;;  %v3225_v42 = vpop.xlane.xlu1 %3224 }
 0x545   : > { %v6665_v3 = vpop.eup %6664  ;;  %v3481_v10 = vmul.f32 %v6663_v40, %v10233_v21  ;;  %v3850_v32 = vmul.f32 %v3786_v37, %v9106_v2  ;;  %v3851_v9 = vmul.f32 %v3787_v35, %v9109_v39  ;;  %6676 = vrsqrt.f32 %v3356_v47 }
 0x546   : > { %v6667_v46 = vpop.eup %6666  ;;  %v4102_v45 = vadd.f32 1.0, %v6665_v3  ;;  %6678 = vrsqrt.f32 %v3357_v4  ;;  %v3725_v55 = vmul.f32 0.044715, %v9118_v29  ;;  %v3788_v58 = vmul.f32 %v3724_v53, %v9113_v61 }
 0x547   : > { %v6669_v20 = vpop.eup %6668  ;;  %v4103_v34 = vadd.f32 1.0, %v6667_v46  ;;  %v3914_v26 = vadd.f32 %v3850_v32, %v9106_v2  ;;  %v3915_v60 = vadd.f32 %v3851_v9, %v9109_v39  ;;  %v3294_v23 = vmul.f32 0.0078125, %v3223_v6  ;;  %v10234_v2 = vld [vmem:[#allocation29_spill] sm:$0xff]  ;;  %v10235_v32 = vld [vmem:[#allocation27_spill] sm:$0xff] }
 0x548   : > { %v4166_v48 = vmul.f32 %v4102_v45, %v9267_v62  ;;  %v3548_v36 = vmul.f32 %v9194_v24, %v3480_v8  ;;  %v3789_v5 = vmul.f32 %v3725_v55, %v9118_v29  ;;  %v3852_v40 = vmul.f32 %v3788_v58, %v9113_v61  ;;  %v3227_v45 = vpop.xlane.xlu0 %3226 }
 0x549   : > { %v6671_v17 = vpop.eup %6670  ;;  %v4167_v19 = vmul.f32 %v4103_v34, %v3655_v22  ;;  %v3978_v57 = vmul.f32 0.7978846, %v3914_v26  ;;  %v3979_v13 = vmul.f32 0.7978846, %v3915_v60  ;;  %v3358_v49 = vadd.f32 1e-05, %v3294_v23 }
 0x54a   : > { %v6673_v37 = vpop.eup %6672  ;;  %v4104_v35 = vadd.f32 1.0, %v6671_v17  ;;  %v3482_v47 = vmul.f32 %v6669_v20, %v10234_v2  ;;  %v3853_v39 = vmul.f32 %v3789_v5, %v9118_v29  ;;  %v3916_v62 = vadd.f32 %v3852_v40, %v9113_v61  ;;  %v10236_v40 = vld [vmem:[#allocation30_spill] sm:$0xff] }
 0x54b   : > { %v4218_v27 = vpack.c.bf16 %v4167_v19, %v4166_v48  ;;  %v4105_v8 = vadd.f32 1.0, %v6673_v37  ;;  %6680 = vtanh.f32 %v3978_v57  ;;  %v3295_v4 = vmul.f32 0.0078125, %v3225_v42  ;;  %v10237_v19 = vld [vmem:[#allocation28_spill] sm:$0xff] }
 0x54c   : > { %v6675_v53 = vpop.eup %6674  ;;  %v4168_v6 = vmul.f32 %v4104_v35, %v3656_v31  ;;  %6682 = vtanh.f32 %v3979_v13  ;;  %v9342_v22 = vmul.f32 0.5, %v9113_v61  ;;  %v3917_v3 = vadd.f32 %v3853_v39, %v9118_v29 }
 0x54d   : > { %6000 = vmatprep.mubr.bf16.mxu0 %v4218_v27  ;;  %v4169_v21 = vmul.f32 %v4105_v8, %v9300_v43  ;;  %v3483_v9 = vmul.f32 %v6675_v53, %v10235_v32  ;;  %v3980_v46 = vmul.f32 0.7978846, %v3916_v62  ;;  %6684 = vrsqrt.f32 %v3358_v49  ;;  %v3229_v43 = vpop.xlane.xlu1 %3228 }
 0x54e   : > { %v9348_v55 = vadd.f32 %v9202_v50, %v3548_v36  ;;  %v3549_v58 = vmul.f32 %v9194_v24, %v3481_v10  ;;  %v3981_v31 = vmul.f32 0.7978846, %v3917_v3  ;;  %v3359_v20 = vadd.f32 1e-05, %v3295_v4 }
 0x54f   : > { %v6677_v34 = vpop.eup %6676  ;;  %v4219_v61 = vpack.c.bf16 %v4169_v21, %v4168_v6  ;;  %v3550_v26 = vmul.f32 %v9194_v24, %v3482_v47  ;;  %6686 = vtanh.f32 %v3980_v46  ;;  %v3726_v60 = vmul.f32 0.044715, %v9121_v33 }
 0x550   : > { %v6679_v23 = vpop.eup %6678  ;;  %v3661_v48 = vmul.f32 0.5, %v9118_v29  ;;  %6688 = vtanh.f32 %v3981_v31  ;;  %v3727_v5 = vmul.f32 0.044715, %v9150_v44  ;;  %v3296_v36 = vmul.f32 0.0078125, %v3227_v45 }
 0x551   : > { %6001 = vmatmul.mubr.bf16.gmra.mrb[88].mxu0 %v4219_v61  ;;  %v3551_v10 = vmul.f32 %v9194_v24, %v3483_v9  ;;  %v3484_v42 = vmul.f32 %v6677_v34, %v10236_v40  ;;  %6690 = vrsqrt.f32 %v3359_v20  ;;  %v3790_v17 = vmul.f32 %v3726_v60, %v9121_v33  ;;  %v10238_v40 = vld [vmem:[#allocation4_spill] sm:$0xff] }
 0x552   : > { %v3485_v57 = vmul.f32 %v6679_v23, %v10237_v19  ;;  %v3791_v13 = vmul.f32 %v3727_v5, %v9150_v44  ;;  %v3360_v49 = vadd.f32 1e-05, %v3296_v36  ;;  %v3297_v37 = vmul.f32 0.0078125, %v3229_v43 }
 0x553   : > { %v9361_v29 = vadd.f32 %v9202_v50, %v3549_v58  ;;  %v9364_v35 = vadd.f32 %v9202_v50, %v3550_v26  ;;  %v9367_v2 = vmul.f32 0.5, %v9121_v33  ;;  %v3854_v47 = vmul.f32 %v3790_v17, %v9121_v33 }
 0x554   : > { %v9371_v39 = vmul.f32 0.5, %v9150_v44  ;;  %v3855_v62 = vmul.f32 %v3791_v13, %v9150_v44  ;;  %6692 = vrsqrt.f32 %v3360_v49  ;;  %v3361_v27 = vadd.f32 1e-05, %v3297_v37  ;;  %v10239_v37 = vld [vmem:[#allocation5_spill] sm:$0xff] }
 0x555   : > { %v6681_v8 = vpop.eup %6680  ;;  %v9375_v4 = vadd.f32 %v9202_v50, %v3551_v10  ;;  %v3918_v53 = vadd.f32 %v3854_v47, %v9121_v33  ;;  %v3728_v6 = vmul.f32 0.044715, %v9159_v12  ;;  %v3729_v3 = vmul.f32 0.044715, %v9172_v1 }
 0x556   : > { %v6683_v21 = vpop.eup %6682  ;;  %v4106_v32 = vadd.f32 1.0, %v6681_v8  ;;  %v3552_v9 = vmul.f32 %v9194_v24, %v3484_v42  ;;  %v3553_v46 = vmul.f32 %v9194_v24, %v3485_v57  ;;  %v3919_v45 = vadd.f32 %v3855_v62, %v9150_v44 }
 0x557   : > { %v6685_v58 = vpop.eup %6684  ;;  %v4107_v31 = vadd.f32 1.0, %v6683_v21  ;;  %v3982_v20 = vmul.f32 0.7978846, %v3918_v53  ;;  %v3792_v34 = vmul.f32 %v3728_v6, %v9159_v12  ;;  %v3793_v61 = vmul.f32 %v3729_v3, %v9172_v1 }
 0x558   : > { %v4170_v33 = vmul.f32 %v4106_v32, %v9315_v41  ;;  %v3983_v26 = vmul.f32 0.7978846, %v3919_v45  ;;  %6694 = vrsqrt.f32 %v3361_v27  ;;  %v9387_v60 = vmul.f32 0.5, %v9159_v12 }
 0x559   : > { %v6687_v43 = vpop.eup %6686  ;;  %v4171_v23 = vmul.f32 %v4107_v31, %v9318_v30  ;;  %6696 = vtanh.f32 %v3982_v20  ;;  %v3856_v44 = vmul.f32 %v3792_v34, %v9159_v12  ;;  %v3857_v5 = vmul.f32 %v3793_v61, %v9172_v1 }
 0x55a   : > { %v6689_v36 = vpop.eup %6688  ;;  %v4108_v10 = vadd.f32 1.0, %v6687_v43  ;;  %v3486_v42 = vmul.f32 %v6685_v58, %v10238_v40  ;;  %6698 = vtanh.f32 %v3983_v26  ;;  %v3730_v41 = vmul.f32 0.044715, %v9205_v14 }
 0x55b   : > { %v6691_v17 = vpop.eup %6690  ;;  %v4220_v19 = vpack.c.bf16 %v4171_v23, %v4170_v33  ;;  %v4109_v57 = vadd.f32 1.0, %v6689_v36  ;;  %v3920_v13 = vadd.f32 %v3856_v44, %v9159_v12  ;;  %v3921_v49 = vadd.f32 %v3857_v5, %v9172_v1 }
 0x55c   : > { %v4172_v30 = vmul.f32 %v4108_v10, %v9342_v22  ;;  %v3487_v47 = vmul.f32 %v6691_v17, %v10239_v37  ;;  %v9399_v62 = vmul.f32 0.5, %v9172_v1  ;;  %v3731_v27 = vmul.f32 0.044715, %v9209_v7 }
 0x55d   : > { %6004 = vmatprep.mubr.bf16.mxu0 %v4220_v19  ;;  %v4173_v8 = vmul.f32 %v4109_v57, %v3661_v48  ;;  %v3984_v53 = vmul.f32 0.7978846, %v3920_v13  ;;  %v3985_v6 = vmul.f32 0.7978846, %v3921_v49  ;;  %v3794_v3 = vmul.f32 %v3730_v41, %v9205_v14 }
 0x55e   : > { %v6693_v21 = vpop.eup %6692  ;;  %v9404_v12 = vadd.f32 %v9202_v50, %v3552_v9  ;;  %v9407_v32 = vadd.f32 %v9202_v50, %v3553_v46  ;;  %v3554_v22 = vmul.f32 %v9194_v24, %v3486_v42  ;;  %v3795_v1 = vmul.f32 %v3731_v27, %v9209_v7  ;;  %v10240_v46 = vld [vmem:[#allocation31_spill] sm:$0xff] }
 0x55f   : > { %v4221_v45 = vpack.c.bf16 %v4173_v8, %v4172_v30  ;;  %v3555_v58 = vmul.f32 %v9194_v24, %v3487_v47  ;;  %6700 = vtanh.f32 %v3984_v53  ;;  %v3858_v48 = vmul.f32 %v3794_v3, %v9205_v14  ;;  %v10241_v47 = vld [vmem:[#allocation32_spill] sm:$0xff] }
 0x560   : > { %6702 = vtanh.f32 %v3985_v6  ;;  %v9414_v31 = vmul.f32 0.5, %v9205_v14  ;;  %v3859_v9 = vmul.f32 %v3795_v1, %v9209_v7  ;;  %v3732_v20 = vmul.f32 0.044715, %v9214_v11 }
 0x561   : > { %6005 = vmatmul.mubr.bf16.gmra.mrb[92].mxu0 %v4221_v45  ;;  %v3488_v34 = vmul.f32 %v6693_v21, %v10240_v46  ;;  %v9420_v61 = vmul.f32 0.5, %v9209_v7  ;;  %v3922_v33 = vadd.f32 %v3858_v48, %v9205_v14  ;;  %v3733_v26 = vmul.f32 0.044715, %v9218_v56 }
 0x562   : > { %v6695_v43 = vpop.eup %6694  ;;  %v9425_v23 = vadd.f32 %v9202_v50, %v3554_v22  ;;  %v3923_v44 = vadd.f32 %v3859_v9, %v9209_v7  ;;  %v9429_v5 = vmul.f32 0.5, %v9214_v11  ;;  %v3796_v36 = vmul.f32 %v3732_v20, %v9214_v11 }
 0x563   : > { %v6697_v10 = vpop.eup %6696  ;;  %v9433_v40 = vadd.f32 %v9202_v50, %v3555_v58  ;;  %v3986_v42 = vmul.f32 0.7978846, %v3922_v33  ;;  %v9436_v14 = vmul.f32 0.5, %v9218_v56  ;;  %v3797_v41 = vmul.f32 %v3733_v26, %v9218_v56 }
 0x564   : > { %v6699_v17 = vpop.eup %6698  ;;  %v4110_v19 = vadd.f32 1.0, %v6697_v10  ;;  %v3987_v57 = vmul.f32 0.7978846, %v3923_v44  ;;  %v3860_v7 = vmul.f32 %v3796_v36, %v9214_v11  ;;  %v3734_v13 = vmul.f32 0.044715, %v9228_v16 }
 0x565   : > { %v4111_v49 = vadd.f32 1.0, %v6699_v17  ;;  %v3556_v30 = vmul.f32 %v9194_v24, %v3488_v34  ;;  %6704 = vtanh.f32 %v3986_v42  ;;  %v3861_v37 = vmul.f32 %v3797_v41, %v9218_v56  ;;  %v3231_v17 = vpop.xlane.xlu0 %3230 }
 0x566   : > { %v3489_v27 = vmul.f32 %v6695_v43, %v10241_v47  ;;  %6706 = vtanh.f32 %v3987_v57  ;;  %v3924_v8 = vadd.f32 %v3860_v7, %v9214_v11  ;;  %v3735_v53 = vmul.f32 0.044715, %v9252_v63 }
 0x567   : > { %v4174_v6 = vmul.f32 %v4110_v19, %v9367_v2  ;;  %v4175_v3 = vmul.f32 %v4111_v49, %v9371_v39  ;;  %v3925_v21 = vadd.f32 %v3861_v37, %v9218_v56  ;;  %v3798_v22 = vmul.f32 %v3734_v13, %v9228_v16 }
 0x568   : > { %v3988_v1 = vmul.f32 0.7978846, %v3924_v8  ;;  %v9451_v45 = vmul.f32 0.5, %v9228_v16  ;;  %v3799_v58 = vmul.f32 %v3735_v53, %v9252_v63  ;;  %v3736_v48 = vmul.f32 0.044715, %v9261_v18 }
 0x569   : > { %v6701_v9 = vpop.eup %6700  ;;  %v4222_v11 = vpack.c.bf16 %v4175_v3, %v4174_v6  ;;  %v3989_v20 = vmul.f32 0.7978846, %v3925_v21  ;;  %v3862_v46 = vmul.f32 %v3798_v22, %v9228_v16  ;;  %v3737_v2 = vmul.f32 0.044715, %v9264_v59  ;;  %v3233_v6 = vpop.xlane.xlu1 %3232 }
 0x56a   : > { %v6703_v39 = vpop.eup %6702  ;;  %v4112_v34 = vadd.f32 1.0, %v6701_v9  ;;  %6708 = vtanh.f32 %v3988_v1  ;;  %v3863_v56 = vmul.f32 %v3799_v58, %v9252_v63  ;;  %v3800_v33 = vmul.f32 %v3736_v48, %v9261_v18 }
 0x56b   : > { %6008 = vmatprep.mubr.bf16.mxu0 %v4222_v11  ;;  %v4113_v26 = vadd.f32 1.0, %v6703_v39  ;;  %6710 = vtanh.f32 %v3989_v20  ;;  %v3926_v43 = vadd.f32 %v3862_v46, %v9228_v16  ;;  %v3801_v44 = vmul.f32 %v3737_v2, %v9264_v59 }
 0x56c   : > { %v3557_v36 = vmul.f32 %v9194_v24, %v3489_v27  ;;  %v9463_v10 = vmul.f32 0.5, %v9252_v63  ;;  %v3927_v42 = vadd.f32 %v3863_v56, %v9252_v63  ;;  %v3864_v41 = vmul.f32 %v3800_v33, %v9261_v18 }
 0x56d   : > { %v4176_v19 = vmul.f32 %v4112_v34, %v9387_v60  ;;  %v4177_v57 = vmul.f32 %v4113_v26, %v9399_v62  ;;  %v3990_v7 = vmul.f32 0.7978846, %v3926_v43  ;;  %v3865_v13 = vmul.f32 %v3801_v44, %v9264_v59 }
 0x56e   : > { %v3991_v16 = vmul.f32 0.7978846, %v3927_v42  ;;  %v3928_v49 = vadd.f32 %v3864_v41, %v9261_v18  ;;  %v3738_v37 = vmul.f32 0.044715, %v9270_v52  ;;  %v3739_v47 = vmul.f32 0.044715, %v9296_v54 }
 0x56f   : > { %v6705_v27 = vpop.eup %6704  ;;  %v4223_v8 = vpack.c.bf16 %v4177_v57, %v4176_v19  ;;  %6712 = vtanh.f32 %v3990_v7  ;;  %v3929_v63 = vadd.f32 %v3865_v13, %v9264_v59  ;;  %v3298_v53 = vmul.f32 0.0078125, %v3231_v17 }
 0x570   : > { %v6707_v60 = vpop.eup %6706  ;;  %v4114_v3 = vadd.f32 1.0, %v6705_v27  ;;  %6714 = vtanh.f32 %v3991_v16  ;;  %v3992_v62 = vmul.f32 0.7978846, %v3928_v49  ;;  %v3802_v21 = vmul.f32 %v3738_v37, %v9270_v52 }
 0x571   : > { %6009 = vmatmul.mubr.bf16.gmra.mrb[96].mxu0 %v4223_v8  ;;  %v4115_v22 = vadd.f32 1.0, %v6707_v60  ;;  %v3993_v1 = vmul.f32 0.7978846, %v3929_v63  ;;  %v3803_v58 = vmul.f32 %v3739_v47, %v9296_v54  ;;  %v3362_v48 = vadd.f32 1e-05, %v3298_v53 }
 0x572   : > { %v9477_v9 = vadd.f32 %v9202_v50, %v3556_v30  ;;  %6716 = vtanh.f32 %v3992_v62  ;;  %v3866_v11 = vmul.f32 %v3802_v21, %v9270_v52  ;;  %v3299_v20 = vmul.f32 0.0078125, %v3233_v6 }
 0x573   : > { %v4178_v46 = vmul.f32 %v4114_v3, %v9414_v31  ;;  %v4179_v2 = vmul.f32 %v4115_v22, %v9420_v61  ;;  %6718 = vtanh.f32 %v3993_v1  ;;  %v3867_v39 = vmul.f32 %v3803_v58, %v9296_v54 }
 0x574   : > { %v6709_v34 = vpop.eup %6708  ;;  %v9484_v56 = vadd.f32 %v9202_v50, %v3557_v36  ;;  %v3930_v33 = vadd.f32 %v3866_v11, %v9270_v52  ;;  %6720 = vrsqrt.f32 %v3362_v48  ;;  %v3363_v30 = vadd.f32 1e-05, %v3299_v20 }
 0x575   : > { %v6711_v26 = vpop.eup %6710  ;;  %v4224_v43 = vpack.c.bf16 %v4179_v2, %v4178_v46  ;;  %v4116_v44 = vadd.f32 1.0, %v6709_v34  ;;  %v3931_v42 = vadd.f32 %v3867_v39, %v9296_v54  ;;  %v3740_v31 = vmul.f32 0.044715, %v9303_v51 }
 0x576   : > { %v4117_v41 = vadd.f32 1.0, %v6711_v26  ;;  %v3672_v61 = vmul.f32 0.5, %v9261_v18  ;;  %v3994_v17 = vmul.f32 0.7978846, %v3930_v33  ;;  %v3741_v19 = vmul.f32 0.044715, %v9307_v28 }
 0x577   : > { %6012 = vmatprep.mubr.bf16.mxu0 %v4224_v43  ;;  %v3673_v36 = vmul.f32 0.5, %v9264_v59  ;;  %v9493_v57 = vmul.f32 0.5, %v9270_v52  ;;  %v3995_v7 = vmul.f32 0.7978846, %v3931_v42  ;;  %v3804_v13 = vmul.f32 %v3740_v31, %v9303_v51  ;;  %v10242_v42 = vld [vmem:[#allocation8_spill] sm:$0xff] }
 0x578   : > { %v4180_v16 = vmul.f32 %v4116_v44, %v9429_v5  ;;  %v4181_v49 = vmul.f32 %v4117_v41, %v9436_v14  ;;  %6722 = vtanh.f32 %v3994_v17  ;;  %v3805_v37 = vmul.f32 %v3741_v19, %v9307_v28 }
 0x579   : > { %v6713_v18 = vpop.eup %6712  ;;  %6724 = vtanh.f32 %v3995_v7  ;;  %v3868_v47 = vmul.f32 %v3804_v13, %v9303_v51  ;;  %v3742_v27 = vmul.f32 0.044715, %v9312_v25  ;;  %v3743_v59 = vmul.f32 0.044715, %v9323_v38 }
 0x57a   : > { %v6715_v52 = vpop.eup %6714  ;;  %v4225_v8 = vpack.c.bf16 %v4181_v49, %v4180_v16  ;;  %v4118_v63 = vadd.f32 1.0, %v6713_v18  ;;  %6726 = vrsqrt.f32 %v3363_v30  ;;  %v3869_v53 = vmul.f32 %v3805_v37, %v9307_v28 }
 0x57b   : > { %v4119_v5 = vadd.f32 1.0, %v6715_v52  ;;  %v3932_v14 = vadd.f32 %v3868_v47, %v9303_v51  ;;  %v3806_v6 = vmul.f32 %v3742_v27, %v9312_v25  ;;  %v3807_v60 = vmul.f32 %v3743_v59, %v9323_v38 }
 0x57c   : > { %v6717_v3 = vpop.eup %6716  ;;  %6013 = vmatmul.mubr.bf16.gmra.mrb[100].mxu0 %v4225_v8  ;;  %v4182_v62 = vmul.f32 %v4118_v63, %v9451_v45  ;;  %v3675_v21 = vmul.f32 0.5, %v9296_v54  ;;  %v3933_v22 = vadd.f32 %v3869_v53, %v9307_v28  ;;  %v3744_v1 = vmul.f32 0.044715, %v9348_v55 }
 0x57d   : > { %v6719_v58 = vpop.eup %6718  ;;  %v4183_v48 = vmul.f32 %v4119_v5, %v9463_v10  ;;  %v4120_v11 = vadd.f32 1.0, %v6717_v3  ;;  %v3996_v20 = vmul.f32 0.7978846, %v3932_v14  ;;  %v3870_v46 = vmul.f32 %v3806_v6, %v9312_v25  ;;  %v10243_v6 = vld [vmem:[#allocation2_spill] sm:$0xff] }
 0x57e   : > { %v6721_v2 = vpop.eup %6720  ;;  %v4121_v39 = vadd.f32 1.0, %v6719_v58  ;;  %v3997_v34 = vmul.f32 0.7978846, %v3933_v22  ;;  %v3871_v33 = vmul.f32 %v3807_v60, %v9323_v38  ;;  %v3745_v45 = vmul.f32 0.044715, %v9361_v29 }
 0x57f   : > { %v4226_v30 = vpack.c.bf16 %v4183_v48, %v4182_v62  ;;  %v4184_v54 = vmul.f32 %v4120_v11, %v3672_v61  ;;  %v3676_v26 = vmul.f32 0.5, %v9303_v51  ;;  %6728 = vtanh.f32 %v3996_v20 }
 0x580   : > { %v4185_v43 = vmul.f32 %v4121_v39, %v3673_v36  ;;  %6730 = vtanh.f32 %v3997_v34  ;;  %v3934_v10 = vadd.f32 %v3870_v46, %v9312_v25  ;;  %v3935_v44 = vadd.f32 %v3871_v33, %v9323_v38  ;;  %v9558_v39 = vld [vmem:[%s9949_s5 + $0x4] ss:$0 sm:$0xff] }
 0x581   : > { %6016 = vmatprep.mubr.bf16.mxu0 %v4226_v30  ;;  %v3490_v31 = vmul.f32 %v6721_v2, %v10242_v42  ;;  %v3677_v41 = vmul.f32 0.5, %v9307_v28  ;;  %v3808_v17 = vmul.f32 %v3744_v1, %v9348_v55  ;;  %v3809_v19 = vmul.f32 %v3745_v45, %v9361_v29 }
 0x582   : > { %v6723_v7 = vpop.eup %6722  ;;  %v4227_v61 = vpack.c.bf16 %v4185_v43, %v4184_v54  ;;  %v9522_v51 = vmul.f32 0.5, %v9312_v25  ;;  %v3998_v36 = vmul.f32 0.7978846, %v3934_v10  ;;  %v3999_v13 = vmul.f32 0.7978846, %v3935_v44 }
 0x583   : > { %v6725_v16 = vpop.eup %6724  ;;  %v4122_v49 = vadd.f32 1.0, %v6723_v7  ;;  %v9525_v37 = vmul.f32 0.5, %v9323_v38  ;;  %v9528_v18 = vmul.f32 0.5, %v9348_v55  ;;  %v3872_v28 = vmul.f32 %v3808_v17, %v9348_v55 }
 0x584   : > { %v6727_v47 = vpop.eup %6726  ;;  %6017 = vmatmul.mubr.bf16.gmra.mrb[104].mxu0 %v4227_v61  ;;  %v4123_v27 = vadd.f32 1.0, %v6725_v16  ;;  %6732 = vtanh.f32 %v3998_v36  ;;  %v9532_v59 = vmul.f32 0.5, %v9361_v29  ;;  %v3873_v25 = vmul.f32 %v3809_v19, %v9361_v29 }
 0x585   : > { %v4186_v52 = vmul.f32 %v4122_v49, %v9493_v57  ;;  %v3558_v8 = vmul.f32 %v9194_v24, %v3490_v31  ;;  %6734 = vtanh.f32 %v3999_v13  ;;  %v3936_v38 = vadd.f32 %v3872_v28, %v9348_v55 }
 0x586   : > { %v4187_v63 = vmul.f32 %v4123_v27, %v3675_v21  ;;  %v3937_v53 = vadd.f32 %v3873_v25, %v9361_v29  ;;  %v3746_v5 = vmul.f32 0.044715, %v9364_v35  ;;  %v3747_v14 = vmul.f32 0.044715, %v9375_v4 }
 0x587   : > { %v3491_v60 = vmul.f32 %v6727_v47, %v10243_v6  ;;  %v4000_v3 = vmul.f32 0.7978846, %v3936_v38  ;;  %v9543_v62 = vmul.f32 0.5, %v9364_v35  ;;  %v3748_v57 = vmul.f32 0.044715, %v9404_v12 }
 0x588   : > { %v4228_v22 = vpack.c.bf16 %v4187_v63, %v4186_v52  ;;  %v4001_v24 = vmul.f32 0.7978846, %v3937_v53  ;;  %v3810_v1 = vmul.f32 %v3746_v5, %v9364_v35  ;;  %v3811_v55 = vmul.f32 %v3747_v14, %v9375_v4 }
 0x589   : > { %v6729_v21 = vpop.eup %6728  ;;  %v9549_v29 = vadd.f32 %v9202_v50, %v3558_v8  ;;  %6736 = vtanh.f32 %v4000_v3  ;;  %v3749_v58 = vmul.f32 0.044715, %v9407_v32  ;;  %v3812_v48 = vmul.f32 %v3748_v57, %v9404_v12 }
 0x58a   : > { %v6731_v11 = vpop.eup %6730  ;;  %6020 = vmatprep.mubr.bf16.mxu0 %v4228_v22  ;;  %v4124_v20 = vadd.f32 1.0, %v6729_v21  ;;  %6738 = vtanh.f32 %v4001_v24  ;;  %v3874_v46 = vmul.f32 %v3810_v1, %v9364_v35  ;;  %v3875_v2 = vmul.f32 %v3811_v55, %v9375_v4  ;;  %v3235_v21 = vpop.xlane.xlu0 %3234 }
 0x58b   : > { %v3559_v50 = vmul.f32 %v9558_v39, %v3491_v60  ;;  %v4125_v34 = vadd.f32 1.0, %v6731_v11  ;;  %v3813_v33 = vmul.f32 %v3749_v58, %v9407_v32  ;;  %v3876_v45 = vmul.f32 %v3812_v48, %v9404_v12  ;;  %v3237_v58 = vpop.xlane.xlu1 %3236 }
 0x58c   : > { %v4188_v30 = vmul.f32 %v4124_v20, %v3676_v26  ;;  %v3938_v54 = vadd.f32 %v3874_v46, %v9364_v35  ;;  %v3939_v43 = vadd.f32 %v3875_v2, %v9375_v4  ;;  %v3750_v10 = vmul.f32 0.044715, %v9425_v23 }
 0x58d   : > { %v4189_v44 = vmul.f32 %v4125_v34, %v3677_v41  ;;  %v3877_v42 = vmul.f32 %v3813_v33, %v9407_v32  ;;  %v3940_v31 = vadd.f32 %v3876_v45, %v9404_v12  ;;  %v3751_v17 = vmul.f32 0.044715, %v9433_v40  ;;  %v4726_v34 = vld [vmem:[%s9951_s7] sm:$0xff] }
 0x58e   : > { %v6733_v19 = vpop.eup %6732  ;;  %v9570_v7 = vmul.f32 0.5, %v9375_v4  ;;  %v4002_v61 = vmul.f32 0.7978846, %v3938_v54  ;;  %v4003_v36 = vmul.f32 0.7978846, %v3939_v43  ;;  %v3814_v26 = vmul.f32 %v3750_v10, %v9425_v23 }
 0x58f   : > { %v6735_v35 = vpop.eup %6734  ;;  %v4229_v13 = vpack.c.bf16 %v4189_v44, %v4188_v30  ;;  %v4126_v16 = vadd.f32 1.0, %v6733_v19  ;;  %v3941_v49 = vadd.f32 %v3877_v42, %v9407_v32  ;;  %v4004_v41 = vmul.f32 0.7978846, %v3940_v31  ;;  %v9579_v4 = vld [vmem:[%s9949_s5 + $0x5] ss:$0 sm:$0xff]  ;;  %v4728_v44 = vld [vmem:[%s9951_s7 + $0x10] sm:$0xff] }
 0x590   : > { %v4127_v28 = vadd.f32 1.0, %v6735_v35  ;;  %6740 = vtanh.f32 %v4002_v61  ;;  %v3815_v47 = vmul.f32 %v3751_v17, %v9433_v40  ;;  %v3878_v27 = vmul.f32 %v3814_v26, %v9425_v23  ;;  %v4729_v42 = vld [vmem:[%s9951_s7 + $0x18] sm:$0xff] }
 0x591   : > { %v9582_v25 = vadd.f32 %v9579_v4, %v3559_v50  ;;  %6021 = vmatmul.mubr.bf16.gmra.mrb[108].mxu0 %v4229_v13  ;;  %v4190_v52 = vmul.f32 %v4126_v16, %v9522_v51  ;;  %6742 = vtanh.f32 %v4003_v36  ;;  %v4005_v8 = vmul.f32 0.7978846, %v3941_v49 }
 0x592   : > { %v4191_v38 = vmul.f32 %v4127_v28, %v9525_v37  ;;  %6744 = vtanh.f32 %v4004_v41  ;;  %v3879_v63 = vmul.f32 %v3815_v47, %v9433_v40  ;;  %v3942_v53 = vadd.f32 %v3878_v27, %v9425_v23 }
 0x593   : > { %v6737_v5 = vpop.eup %6736  ;;  %v9589_v14 = vmul.f32 0.5, %v9404_v12  ;;  %6746 = vtanh.f32 %v4005_v8  ;;  %v3752_v6 = vmul.f32 0.044715, %v9477_v9  ;;  %v3753_v60 = vmul.f32 0.044715, %v9484_v56  ;;  %v4731_v8 = vld [vmem:[%s9951_s7 + $0x28] sm:$0xff] }
 0x594   : > { %v6739_v3 = vpop.eup %6738  ;;  %v4230_v51 = vpack.c.bf16 %v4191_v38, %v4190_v52  ;;  %v4128_v57 = vadd.f32 1.0, %v6737_v5  ;;  %v3943_v22 = vadd.f32 %v3879_v63, %v9433_v40  ;;  %v4006_v37 = vmul.f32 0.7978846, %v3942_v53  ;;  %v4730_v52 = vld [vmem:[%s9951_s7 + $0x20] sm:$0xff] }
 0x595   : > { %v4129_v24 = vadd.f32 1.0, %v6739_v3  ;;  %v9595_v1 = vmul.f32 0.5, %v9407_v32  ;;  %v3816_v55 = vmul.f32 %v3752_v6, %v9477_v9  ;;  %v3817_v12 = vmul.f32 %v3753_v60, %v9484_v56 }
 0x596   : > { %6024 = vmatprep.mubr.bf16.mxu0 %v4230_v51  ;;  %v4192_v48 = vmul.f32 %v4128_v57, %v9528_v18  ;;  %v4007_v11 = vmul.f32 0.7978846, %v3943_v22  ;;  %6748 = vtanh.f32 %v4006_v37  ;;  %v3754_v20 = vmul.f32 0.044715, %v9549_v29  ;;  %v4727_v18 = vld [vmem:[%s9951_s7 + $0x8] sm:$0xff]  ;;  %v4733_v22 = vld [vmem:[%s9951_s7 + $0x38] sm:$0xff] }
 0x597   : > { %v4193_v46 = vmul.f32 %v4129_v24, %v9532_v59  ;;  %v3880_v2 = vmul.f32 %v3816_v55, %v9477_v9  ;;  %v3881_v32 = vmul.f32 %v3817_v12, %v9484_v56  ;;  %v3755_v50 = vmul.f32 0.044715, %v9582_v25 }
 0x598   : > { %6750 = vtanh.f32 %v4007_v11  ;;  %v3818_v33 = vmul.f32 %v3754_v20, %v9549_v29  ;;  %v3300_v45 = vmul.f32 0.0078125, %v3235_v21  ;;  %v3301_v30 = vmul.f32 0.0078125, %v3237_v58 }
 0x599   : > { %v4231_v59 = vpack.c.bf16 %v4193_v46, %v4192_v48  ;;  %v3944_v54 = vadd.f32 %v3880_v2, %v9477_v9  ;;  %v3945_v43 = vadd.f32 %v3881_v32, %v9484_v56  ;;  %v3819_v10 = vmul.f32 %v3755_v50, %v9582_v25 }
 0x59a   : > { %v6741_v31 = vpop.eup %6740  ;;  %v3882_v17 = vmul.f32 %v3818_v33, %v9549_v29  ;;  %v3364_v19 = vadd.f32 1e-05, %v3300_v45  ;;  %v3365_v61 = vadd.f32 1e-05, %v3301_v30  ;;  %v6160_v36 = vpack.c.bf16 %v4727_v18, %v4726_v34  ;;  %v4736_v33 = vld [vmem:[%s9951_s7 + $0x50] sm:$0xff]  ;;  %v4737_v45 = vld [vmem:[%s9951_s7 + $0x58] sm:$0xff] }
 0x59b   : > { %v6743_v26 = vpop.eup %6742  ;;  %6025 = vmatmul.mubr.bf16.gmra.mrb[112].mxu0 %v4231_v59  ;;  %v4130_v35 = vadd.f32 1.0, %v6741_v31  ;;  %v4008_v13 = vmul.f32 0.7978846, %v3944_v54  ;;  %v4009_v16 = vmul.f32 0.7978846, %v3945_v43  ;;  %v3883_v49 = vmul.f32 %v3819_v10, %v9582_v25 }
 0x59c   : > { %v6745_v41 = vpop.eup %6744  ;;  %v4131_v28 = vadd.f32 1.0, %v6743_v26  ;;  %v3946_v47 = vadd.f32 %v3882_v17, %v9549_v29  ;;  %6752 = vrsqrt.f32 %v3364_v19  ;;  %6184 = vmatprep.subr.bf16.mxu1 %v6160_v36  ;;  %v6164_v27 = vpack.c.bf16 %v4729_v42, %v4728_v44  ;;  %6161 = vmatprep.subr.bf16.mxu0 %v6160_v36 }
 0x59d   : > { %v6747_v38 = vpop.eup %6746  ;;  %v4194_v63 = vmul.f32 %v4130_v35, %v9543_v62  ;;  %v4132_v53 = vadd.f32 1.0, %v6745_v41  ;;  %6754 = vtanh.f32 %v4008_v13  ;;  %v3947_v5 = vadd.f32 %v3883_v49, %v9582_v25  ;;  %6190 = vmatpush3.bf16.msra.mxu1 %v6160_v36  ;;  %6163 = vmatpush3.bf16.msra.mxu0 %v6160_v36  ;;  %v4732_v62 = vld [vmem:[%s9951_s7 + $0x30] sm:$0xff] }
 0x59e   : > { %v4195_v6 = vmul.f32 %v4131_v28, %v9570_v7  ;;  %v4133_v60 = vadd.f32 1.0, %v6747_v38  ;;  %6756 = vtanh.f32 %v4009_v16  ;;  %v4010_v3 = vmul.f32 0.7978846, %v3946_v47  ;;  %6185 = vmatprep.subr.bf16.mxu1 %v6164_v27  ;;  %6165 = vmatprep.subr.bf16.mxu0 %v6164_v27 }
 0x59f   : > { %v4011_v51 = vmul.f32 0.7978846, %v3947_v5  ;;  %6758 = vrsqrt.f32 %v3365_v61  ;;  %v6168_v57 = vpack.c.bf16 %v4731_v8, %v4730_v52  ;;  %v4196_v7 = vmul.f32 %v4132_v53, %v9589_v14  ;;  %v4734_v14 = vld [vmem:[%s9951_s7 + $0x40] sm:$0xff] }
 0x5a0   : > { %v6749_v37 = vpop.eup %6748  ;;  %v4232_v24 = vpack.c.bf16 %v4195_v6, %v4194_v63  ;;  %v4197_v55 = vmul.f32 %v4133_v60, %v9595_v1  ;;  %6760 = vtanh.f32 %v4010_v3  ;;  %v6172_v48 = vpack.c.bf16 %v4733_v22, %v4732_v62  ;;  %v4735_v1 = vld [vmem:[%s9951_s7 + $0x48] sm:$0xff] }
 0x5a1   : > { %v4134_v12 = vadd.f32 1.0, %v6749_v37  ;;  %6762 = vtanh.f32 %v4011_v51  ;;  %6191 = vmatpush3.bf16.msra.mxu1 %v6164_v27  ;;  %6167 = vmatpush3.bf16.msra.mxu0 %v6164_v27  ;;  %v3686_v11 = vmul.f32 0.5, %v9425_v23  ;;  %v3687_v20 = vmul.f32 0.5, %v9433_v40 }
 0x5a2   : > { %v6751_v21 = vpop.eup %6750  ;;  %6028 = vmatprep.mubr.bf16.mxu0 %v4232_v24  ;;  %v4233_v58 = vpack.c.bf16 %v4197_v55, %v4196_v7  ;;  %6169 = vmatprep.subr.bf16.mxu0 %v6168_v57  ;;  %v6176_v23 = vpack.c.bf16 %v4735_v1, %v4734_v14  ;;  %v3688_v43 = vmul.f32 0.5, %v9477_v9  ;;  %v3689_v10 = vmul.f32 0.5, %v9484_v56  ;;  %v4600_v1 = vld [vmem:[%s9676_s30 + $0x10] sm:$0xff] }
 0x5a3   : > { %v4135_v46 = vadd.f32 1.0, %v6751_v21  ;;  %6186 = vmatprep.subr.bf16.mxu1 %v6168_v57  ;;  %v4198_v2 = vmul.f32 %v4134_v12, %v3686_v11  ;;  %v6180_v17 = vpack.c.bf16 %v4737_v45, %v4736_v33  ;;  %v3690_v9 = vmul.f32 0.5, %v9549_v29  ;;  %v4598_v12 = vld [vmem:[%s9676_s30] sm:$0xff] }
 0x5a4   : > { %6029 = vmatmul.mubr.bf16.gmra.mrb[116].mxu0 %v4233_v58  ;;  %v3691_v56 = vmul.f32 0.5, %v9582_v25  ;;  %v4602_v33 = vld [vmem:[%s9676_s30 + $0x20] sm:$0xff] }
 0x5a5   : > { %v4199_v32 = vmul.f32 %v4135_v46, %v3687_v20  ;;  %6171 = vmatpush3.bf16.msra.mxu0 %v6168_v57  ;;  %6192 = vmatpush3.bf16.msra.mxu1 %v6168_v57  ;;  %v9669_v57 = vld [vmem:[%s9950_s6] ss:$0 sm:$0xff]  ;;  %v4599_v46 = vld [vmem:[%s9676_s30 + $0x8] sm:$0xff] }
 0x5a6   : > { %v6753_v50 = vpop.eup %6752  ;;  %6173 = vmatprep.subr.bf16.mxu0 %v6172_v48  ;;  %6187 = vmatprep.subr.bf16.mxu1 %v6172_v48 }
 0x5a7   : > { %v6755_v40 = vpop.eup %6754  ;;  %v4234_v34 = vpack.c.bf16 %v4199_v32, %v4198_v2  ;;  %v3492_v18 = vmul.f32 %v6753_v50, %v8954_v15 }
 0x5a8   : > { %v6757_v30 = vpop.eup %6756  ;;  %v4136_v59 = vadd.f32 1.0, %v6755_v40 }
 0x5a9   : > { %v6759_v54 = vpop.eup %6758  ;;  %6032 = vmatprep.mubr.bf16.mxu0 %v4234_v34  ;;  %v4137_v44 = vadd.f32 1.0, %v6757_v30  ;;  %v3560_v42 = vmul.f32 %v9558_v39, %v3492_v18  ;;  %6175 = vmatpush3.bf16.msra.mxu0 %v6172_v48 }
 0x5aa   : > { %v6761_v15 = vpop.eup %6760  ;;  %v3493_v31 = vmul.f32 %v6759_v54, %v8960_v0  ;;  %6177 = vmatprep.subr.bf16.mxu0 %v6176_v23  ;;  %6193 = vmatpush3.bf16.msra.mxu1 %v6172_v48  ;;  %v4200_v61 = vmul.f32 %v4136_v59, %v3688_v43  ;;  %v4603_v43 = vld [vmem:[%s9676_s30 + $0x28] sm:$0xff] }
 0x5ab   : > { %v6763_v19 = vpop.eup %6762  ;;  %v4201_v36 = vmul.f32 %v4137_v44, %v3689_v10  ;;  %v4138_v26 = vadd.f32 1.0, %v6761_v15  ;;  %v3628_v35 = vadd.f32 %v9579_v4, %v3560_v42  ;;  %6188 = vmatprep.subr.bf16.mxu1 %v6176_v23  ;;  %v4604_v10 = vld [vmem:[%s9676_s30 + $0x30] sm:$0xff] }
 0x5ac   : > { %v4139_v13 = vadd.f32 1.0, %v6763_v19  ;;  %v3561_v16 = vmul.f32 %v9558_v39, %v3493_v31  ;;  %v4605_v19 = vld [vmem:[%s9676_s30 + $0x38] sm:$0xff] }
 0x5ad   : > { %v4235_v49 = vpack.c.bf16 %v4201_v36, %v4200_v61  ;;  %v3756_v41 = vmul.f32 0.044715, %v3628_v35  ;;  %6179 = vmatpush3.bf16.msra.mxu0 %v6176_v23  ;;  %v4202_v0 = vmul.f32 %v4138_v26, %v3690_v9  ;;  %v3692_v24 = vmul.f32 0.5, %v3628_v35 }
 0x5ae   : > { %v4203_v28 = vmul.f32 %v4139_v13, %v3691_v56  ;;  %v3629_v47 = vadd.f32 %v9579_v4, %v3561_v16  ;;  %6181 = vmatprep.subr.bf16.mxu0 %v6180_v17  ;;  %6194 = vmatpush3.bf16.msra.mxu1 %v6176_v23  ;;  %v4601_v23 = vld [vmem:[%s9676_s30 + $0x18] sm:$0xff] }
 0x5af   : > { %6033 = vmatmul.mubr.bf16.gmra.mrb[120].mxu0 %v4235_v49  ;;  %v3820_v27 = vmul.f32 %v3756_v41, %v3628_v35  ;;  %6189 = vmatprep.subr.bf16.mxu1 %v6180_v17  ;;  %v4607_v49 = vld [vmem:[%s9676_s30 + $0x48] sm:$0xff]  ;;  %v4608_v41 = vld [vmem:[%s9676_s30 + $0x50] sm:$0xff] }
 0x5b0   : > { %v4236_v52 = vpack.c.bf16 %v4203_v28, %v4202_v0  ;;  %v3757_v8 = vmul.f32 0.044715, %v3629_v47  ;;  %v3693_v7 = vmul.f32 0.5, %v3629_v47 }
 0x5b1   : > { %v3884_v29 = vmul.f32 %v3820_v27, %v3628_v35  ;;  %6183 = vmatpush3.bf16.msra.mxu0 %v6180_v17 }
 0x5b2   : > { %6036 = vmatprep.mubr.bf16.mxu0 %v4236_v52  ;;  %v3821_v25 = vmul.f32 %v3757_v8, %v3629_v47  ;;  %6195 = vmatpush3.bf16.msra.mxu1 %v6180_v17  ;;  %v4609_v8 = vld [vmem:[%s9676_s30 + $0x58] sm:$0xff] }
 0x5b3   : > { %v3948_v39 = vadd.f32 %v3884_v29, %v3628_v35  ;;  %v4606_v35 = vld [vmem:[%s9676_s30 + $0x40] sm:$0xff] }
 0x5b4   : > { %v3885_v38 = vmul.f32 %v3821_v25, %v3629_v47 }
 0x5b5   : > { %v4012_v63 = vmul.f32 0.7978846, %v3948_v39 }
 0x5b6   : > { %v3949_v53 = vadd.f32 %v3885_v38, %v3629_v47  ;;  %v4610_v38 = vld [vmem:[%s9676_s30 + $0x60] sm:$0xff] }
 0x5b7   : > { %6764 = vtanh.f32 %v4012_v63 }
 0x5b8   : > { %v4013_v4 = vmul.f32 0.7978846, %v3949_v53 }
 0x5ba   : > { %6766 = vtanh.f32 %v4013_v4 }
 0x5bb   : > { %v5978_v5 = vpop.f32.mrb[64].mxu0 }
 0x5bc   : > { %v4343_v6 = vpop.f32.mrb[65].mxu0  ;;  %v4352_v14 = vadd.f32 %v5978_v5, %v9669_v57 }
 0x5bd   : > { %v5979_v60 = vpop.f32.mrb[66].mxu0  ;;  %v4344_v37 = vadd.f32 %v9669_v57, %v4343_v6  ;;  %v4611_v6 = vld [vmem:[%s9676_s30 + $0x68] sm:$0xff] }
 0x5be   : > { %v4346_v3 = vpop.f32.mrb[67].mxu0  ;;  %v4355_v32 = vadd.f32 %v5979_v60, %v9669_v57  ;;  %v4664_v50 = vmul.f32 %v4600_v1, %v4352_v14  ;;  %v4612_v60 = vld [vmem:[%s9676_s30 + $0x70] sm:$0xff] }
 0x5bf   : > { %v4662_v48 = vmul.f32 %v4598_v12, %v4344_v37  ;;  %v4347_v20 = vadd.f32 %v9669_v57, %v4346_v3  ;;  %v4616_v14 = vld [vmem:[%s9676_s30 + $0x90] sm:$0xff] }
 0x5c0   : > { %v4665_v40 = vmul.f32 %v4601_v23, %v4355_v32 }
 0x5c1   : > { %v6765_v51 = vpop.eup %6764  ;;  %v4663_v2 = vmul.f32 %v4599_v46, %v4347_v20  ;;  %v4615_v46 = vld [vmem:[%s9676_s30 + $0x88] sm:$0xff] }
 0x5c2   : > { %v4140_v62 = vadd.f32 1.0, %v6765_v51 }
 0x5c4   : > { %v6767_v22 = vpop.eup %6766  ;;  %v4204_v21 = vmul.f32 %v4140_v62, %v3692_v24  ;;  %v4613_v24 = vld [vmem:[%s9676_s30 + $0x78] sm:$0xff] }
 0x5c5   : > { %v4141_v55 = vadd.f32 1.0, %v6767_v22 }
 0x5c7   : > { %v4205_v58 = vmul.f32 %v4141_v55, %v3693_v7 }
 0x5c9   : > { %v4237_v11 = vpack.c.bf16 %v4205_v58, %v4204_v21  ;;  %v4614_v21 = vld [vmem:[%s9676_s30 + $0x80] sm:$0xff] }
 0x5cb   : > { %6037 = vmatmul.mubr.bf16.gmra.mrb[124].mxu0 %v4237_v11 }
 0x5cc   : > { %6064 = vmatprep.mubr.msk.f32.mxu0 %vm4738_vm1, %v4662_v48 }
 0x5d3   : > { %6065 = vmatmul.mubr.msk.f32.vlgmr.msra.gmra.mrb[128].mxu0 %vm4738_vm1, %v4663_v2 }
 0x5d4   : > { %6067 = vmatprep.mubr.msk.f32.mxu0 %vm4738_vm1, %v4664_v50 }
 0x5d6   : > { %v5982_v34 = vpop.f32.mrb[68].mxu0 }
 0x5d7   : > { %v4359_v18 = vpop.f32.mrb[69].mxu0  ;;  %6068 = vmatmul.mubr.msk.f32.gmra.mrb[130].mxu0 %vm4738_vm1, %v4665_v40  ;;  %v4368_v59 = vadd.f32 %v5982_v34, %v9669_v57  ;;  %v4617_v40 = vld [vmem:[%s9676_s30 + $0x98] sm:$0xff] }
 0x5d8   : > { %v4360_v45 = vadd.f32 %v9669_v57, %v4359_v18  ;;  %v5983_v30 = vpop.f32.mrb[70].mxu0 }
 0x5d9   : > { %v4362_v54 = vpop.f32.mrb[71].mxu0  ;;  %v4371_v15 = vadd.f32 %v5983_v30, %v9669_v57  ;;  %v4668_v17 = vmul.f32 %v4604_v10, %v4368_v59  ;;  %v4619_v10 = vld [vmem:[%s9676_s30 + $0xa8] sm:$0xff] }
 0x5da   : > { %v4666_v44 = vmul.f32 %v4602_v33, %v4360_v45  ;;  %v4363_v42 = vadd.f32 %v9669_v57, %v4362_v54  ;;  %v4618_v45 = vld [vmem:[%s9676_s30 + $0xa0] sm:$0xff] }
 0x5db   : > { %v4669_v61 = vmul.f32 %v4605_v19, %v4371_v15 }
 0x5dc   : > { %v4667_v31 = vmul.f32 %v4603_v43, %v4363_v42  ;;  %6070 = vmatprep.mubr.msk.f32.mxu1 %vm4738_vm1, %v4666_v44  ;;  %v4620_v44 = vld [vmem:[%s9676_s30 + $0xb0] sm:$0xff] }
 0x5de   : > { %6071 = vmatmul.mubr.msk.f32.vlgmr.msra.gmra.mrb[64].mxu1 %vm4738_vm1, %v4667_v31 }
 0x5df   : > { %6073 = vmatprep.mubr.msk.f32.mxu1 %vm4738_vm1, %v4668_v17 }
 0x5e2   : > { %6074 = vmatmul.mubr.msk.f32.gmra.mrb[66].mxu1 %vm4738_vm1, %v4669_v61  ;;  %v4621_v61 = vld [vmem:[%s9676_s30 + $0xb8] sm:$0xff] }
 0x5e4   : > { %v5986_v36 = vpop.f32.mrb[72].mxu0 }
 0x5e5   : > { %v4375_v26 = vpop.f32.mrb[73].mxu0  ;;  %v4384_v13 = vadd.f32 %v5986_v36, %v9669_v57 }
 0x5e6   : > { %v4376_v9 = vadd.f32 %v9669_v57, %v4375_v26  ;;  %v5987_v56 = vpop.f32.mrb[74].mxu0 }
 0x5e7   : > { %v4378_v16 = vpop.f32.mrb[75].mxu0  ;;  %v4387_v47 = vadd.f32 %v5987_v56, %v9669_v57  ;;  %v4672_v52 = vmul.f32 %v4608_v41, %v4384_v13  ;;  %v4623_v41 = vld [vmem:[%s9676_s30 + $0xc8] sm:$0xff] }
 0x5e8   : > { %v4670_v0 = vmul.f32 %v4606_v35, %v4376_v9  ;;  %v4379_v28 = vadd.f32 %v9669_v57, %v4378_v16  ;;  %v4622_v9 = vld [vmem:[%s9676_s30 + $0xc0] sm:$0xff] }
 0x5e9   : > { %v4673_v29 = vmul.f32 %v4609_v8, %v4387_v47 }
 0x5ea   : > { %v4671_v27 = vmul.f32 %v4607_v49, %v4379_v28  ;;  %6076 = vmatprep.mubr.msk.f32.mxu1 %vm4738_vm1, %v4670_v0  ;;  %v4624_v0 = vld [vmem:[%s9676_s30 + $0xd0] sm:$0xff] }
 0x5ec   : > { %6077 = vmatmul.mubr.msk.f32.gmra.mrb[68].mxu1 %vm4738_vm1, %v4671_v27 }
 0x5ed   : > { %6079 = vmatprep.mubr.msk.f32.mxu1 %vm4738_vm1, %v4672_v52 }
 0x5f0   : > { %6080 = vmatmul.mubr.msk.f32.gmra.mrb[70].mxu1 %vm4738_vm1, %v4673_v29  ;;  %v4625_v29 = vld [vmem:[%s9676_s30 + $0xd8] sm:$0xff] }
 0x5f3   : > { %v5990_v25 = vpop.f32.mrb[76].mxu0 }
 0x5f4   : > { %v4391_v39 = vpop.f32.mrb[77].mxu0  ;;  %v4400_v4 = vadd.f32 %v5990_v25, %v9669_v57 }
 0x5f5   : > { %v4392_v63 = vadd.f32 %v9669_v57, %v4391_v39  ;;  %v5991_v53 = vpop.f32.mrb[78].mxu0 }
 0x5f6   : > { %v4394_v5 = vpop.f32.mrb[79].mxu0  ;;  %v4403_v62 = vadd.f32 %v5991_v53, %v9669_v57  ;;  %v4676_v37 = vmul.f32 %v4612_v60, %v4400_v4  ;;  %v4627_v60 = vld [vmem:[%s9676_s30 + $0xe8] sm:$0xff] }
 0x5f7   : > { %v4674_v3 = vmul.f32 %v4610_v38, %v4392_v63  ;;  %v4395_v51 = vadd.f32 %v9669_v57, %v4394_v5  ;;  %v4626_v63 = vld [vmem:[%s9676_s30 + $0xe0] sm:$0xff] }
 0x5f8   : > { %v4677_v7 = vmul.f32 %v4613_v24, %v4403_v62 }
 0x5f9   : > { %v4675_v22 = vmul.f32 %v4611_v6, %v4395_v51  ;;  %6082 = vmatprep.mubr.msk.f32.mxu1 %vm4738_vm1, %v4674_v3  ;;  %v4628_v3 = vld [vmem:[%s9676_s30 + $0xf0] sm:$0xff] }
 0x5fb   : > { %6083 = vmatmul.mubr.msk.f32.gmra.mrb[72].mxu1 %vm4738_vm1, %v4675_v22 }
 0x5fc   : > { %6085 = vmatprep.mubr.msk.f32.mxu1 %vm4738_vm1, %v4676_v37 }
 0x5ff   : > { %6086 = vmatmul.mubr.msk.f32.gmra.mrb[74].mxu1 %vm4738_vm1, %v4677_v7  ;;  %v4629_v7 = vld [vmem:[%s9676_s30 + $0xf8] sm:$0xff] }
 0x603   : > { %v5994_v55 = vpop.f32.mrb[80].mxu0 }
 0x604   : > { %v4407_v12 = vpop.f32.mrb[81].mxu0  ;;  %v4416_v11 = vadd.f32 %v5994_v55, %v9669_v57 }
 0x605   : > { %v4408_v58 = vadd.f32 %v9669_v57, %v4407_v12  ;;  %v5995_v48 = vpop.f32.mrb[82].mxu0 }
 0x606   : > { %v4410_v20 = vpop.f32.mrb[83].mxu0  ;;  %v4419_v32 = vadd.f32 %v5995_v48, %v9669_v57  ;;  %v4680_v23 = vmul.f32 %v4616_v14, %v4416_v11  ;;  %v4631_v14 = vld [vmem:[%s9676_s30 + $0x108] sm:$0xff] }
 0x607   : > { %v4678_v1 = vmul.f32 %v4614_v21, %v4408_v58  ;;  %v4411_v2 = vadd.f32 %v9669_v57, %v4410_v20  ;;  %v4630_v58 = vld [vmem:[%s9676_s30 + $0x100] sm:$0xff] }
 0x608   : > { %v4681_v34 = vmul.f32 %v4617_v40, %v4419_v32 }
 0x609   : > { %v4679_v50 = vmul.f32 %v4615_v46, %v4411_v2  ;;  %6088 = vmatprep.mubr.msk.f32.mxu1 %vm4738_vm1, %v4678_v1  ;;  %v4632_v1 = vld [vmem:[%s9676_s30 + $0x110] sm:$0xff] }
 0x60b   : > { %6089 = vmatmul.mubr.msk.f32.gmra.mrb[76].mxu1 %vm4738_vm1, %v4679_v50 }
 0x60c   : > { %6091 = vmatprep.mubr.msk.f32.mxu1 %vm4738_vm1, %v4680_v23 }
 0x60f   : > { %6092 = vmatmul.mubr.msk.f32.gmra.mrb[78].mxu1 %vm4738_vm1, %v4681_v34  ;;  %v4633_v34 = vld [vmem:[%s9676_s30 + $0x118] sm:$0xff] }
 0x612   : > { %v5998_v18 = vpop.f32.mrb[84].mxu0 }
 0x613   : > { %v4423_v33 = vpop.f32.mrb[85].mxu0  ;;  %v4432_v54 = vadd.f32 %v5998_v18, %v9669_v57 }
 0x614   : > { %v4424_v30 = vadd.f32 %v9669_v57, %v4423_v33  ;;  %v5999_v59 = vpop.f32.mrb[86].mxu0 }
 0x615   : > { %v4426_v43 = vpop.f32.mrb[87].mxu0  ;;  %v4435_v31 = vadd.f32 %v5999_v59, %v9669_v57  ;;  %v4684_v19 = vmul.f32 %v4620_v44, %v4432_v54  ;;  %v4635_v44 = vld [vmem:[%s9676_s30 + $0x128] sm:$0xff] }
 0x616   : > { %v4682_v42 = vmul.f32 %v4618_v45, %v4424_v30  ;;  %v4427_v15 = vadd.f32 %v9669_v57, %v4426_v43  ;;  %v4634_v30 = vld [vmem:[%s9676_s30 + $0x120] sm:$0xff] }
 0x617   : > { %v4685_v36 = vmul.f32 %v4621_v61, %v4435_v31 }
 0x618   : > { %v4683_v17 = vmul.f32 %v4619_v10, %v4427_v15  ;;  %6094 = vmatprep.mubr.msk.f32.mxu1 %vm4738_vm1, %v4682_v42  ;;  %v4636_v42 = vld [vmem:[%s9676_s30 + $0x130] sm:$0xff] }
 0x61a   : > { %6095 = vmatmul.mubr.msk.f32.gmra.mrb[80].mxu1 %vm4738_vm1, %v4683_v17 }
 0x61b   : > { %6097 = vmatprep.mubr.msk.f32.mxu1 %vm4738_vm1, %v4684_v19 }
 0x61e   : > { %6098 = vmatmul.mubr.msk.f32.gmra.mrb[82].mxu1 %vm4738_vm1, %v4685_v36  ;;  %v4637_v36 = vld [vmem:[%s9676_s30 + $0x138] sm:$0xff] }
 0x624   : > { %v6002_v26 = vpop.f32.mrb[88].mxu0 }
 0x625   : > { %v4439_v35 = vpop.f32.mrb[89].mxu0  ;;  %v4448_v16 = vadd.f32 %v6002_v26, %v9669_v57 }
 0x626   : > { %v4440_v56 = vadd.f32 %v9669_v57, %v4439_v35  ;;  %v6003_v13 = vpop.f32.mrb[90].mxu0 }
 0x627   : > { %v4442_v49 = vpop.f32.mrb[91].mxu0  ;;  %v4451_v27 = vadd.f32 %v6003_v13, %v9669_v57  ;;  %v4688_v8 = vmul.f32 %v4624_v0, %v4448_v16  ;;  %v4639_v0 = vld [vmem:[%s9676_s30 + $0x148] sm:$0xff] }
 0x628   : > { %v4686_v28 = vmul.f32 %v4622_v9, %v4440_v56  ;;  %v4443_v47 = vadd.f32 %v9669_v57, %v4442_v49  ;;  %v4638_v9 = vld [vmem:[%s9676_s30 + $0x140] sm:$0xff] }
 0x629   : > { %v4689_v25 = vmul.f32 %v4625_v29, %v4451_v27 }
 0x62a   : > { %v4687_v52 = vmul.f32 %v4623_v41, %v4443_v47  ;;  %6100 = vmatprep.mubr.msk.f32.mxu1 %vm4738_vm1, %v4686_v28  ;;  %v4640_v28 = vld [vmem:[%s9676_s30 + $0x150] sm:$0xff] }
 0x62c   : > { %6101 = vmatmul.mubr.msk.f32.gmra.mrb[84].mxu1 %vm4738_vm1, %v4687_v52 }
 0x62d   : > { %6103 = vmatprep.mubr.msk.f32.mxu1 %vm4738_vm1, %v4688_v8 }
 0x630   : > { %6104 = vmatmul.mubr.msk.f32.gmra.mrb[86].mxu1 %vm4738_vm1, %v4689_v25  ;;  %v4641_v25 = vld [vmem:[%s9676_s30 + $0x158] sm:$0xff] }
 0x634   : > { %v6006_v39 = vpop.f32.mrb[92].mxu0 }
 0x635   : > { %v4455_v38 = vpop.f32.mrb[93].mxu0  ;;  %v4464_v5 = vadd.f32 %v6006_v39, %v9669_v57 }
 0x636   : > { %v4456_v53 = vadd.f32 %v9669_v57, %v4455_v38  ;;  %v6007_v4 = vpop.f32.mrb[94].mxu0 }
 0x637   : > { %v4458_v6 = vpop.f32.mrb[95].mxu0  ;;  %v4467_v22 = vadd.f32 %v6007_v4, %v9669_v57  ;;  %v4692_v24 = vmul.f32 %v4628_v3, %v4464_v5  ;;  %v4643_v3 = vld [vmem:[%s9676_s30 + $0x168] sm:$0xff] }
 0x638   : > { %v4690_v51 = vmul.f32 %v4626_v63, %v4456_v53  ;;  %v4459_v62 = vadd.f32 %v9669_v57, %v4458_v6  ;;  %v4642_v53 = vld [vmem:[%s9676_s30 + $0x160] sm:$0xff] }
 0x639   : > { %v4693_v55 = vmul.f32 %v4629_v7, %v4467_v22 }
 0x63a   : > { %v4691_v37 = vmul.f32 %v4627_v60, %v4459_v62  ;;  %6106 = vmatprep.mubr.msk.f32.mxu1 %vm4738_vm1, %v4690_v51  ;;  %v4644_v51 = vld [vmem:[%s9676_s30 + $0x170] sm:$0xff] }
 0x63c   : > { %6107 = vmatmul.mubr.msk.f32.gmra.mrb[88].mxu1 %vm4738_vm1, %v4691_v37 }
 0x63d   : > { %6109 = vmatprep.mubr.msk.f32.mxu1 %vm4738_vm1, %v4692_v24 }
 0x640   : > { %6110 = vmatmul.mubr.msk.f32.gmra.mrb[90].mxu1 %vm4738_vm1, %v4693_v55  ;;  %v4645_v55 = vld [vmem:[%s9676_s30 + $0x178] sm:$0xff] }
 0x644   : > { %v6010_v12 = vpop.f32.mrb[96].mxu0 }
 0x645   : > { %v4471_v21 = vpop.f32.mrb[97].mxu0  ;;  %v4480_v20 = vadd.f32 %v6010_v12, %v9669_v57 }
 0x646   : > { %v4472_v48 = vadd.f32 %v9669_v57, %v4471_v21  ;;  %v6011_v11 = vpop.f32.mrb[98].mxu0 }
 0x647   : > { %v4474_v46 = vpop.f32.mrb[99].mxu0  ;;  %v4483_v50 = vadd.f32 %v6011_v11, %v9669_v57  ;;  %v4696_v40 = vmul.f32 %v4632_v1, %v4480_v20  ;;  %v4647_v1 = vld [vmem:[%s9676_s30 + $0x188] sm:$0xff] }
 0x648   : > { %v4694_v2 = vmul.f32 %v4630_v58, %v4472_v48  ;;  %v4475_v32 = vadd.f32 %v9669_v57, %v4474_v46  ;;  %v4646_v48 = vld [vmem:[%s9676_s30 + $0x180] sm:$0xff] }
 0x649   : > { %v4697_v18 = vmul.f32 %v4633_v34, %v4483_v50 }
 0x64a   : > { %v4695_v23 = vmul.f32 %v4631_v14, %v4475_v32  ;;  %6112 = vmatprep.mubr.msk.f32.mxu1 %vm4738_vm1, %v4694_v2  ;;  %v4648_v2 = vld [vmem:[%s9676_s30 + $0x190] sm:$0xff] }
 0x64c   : > { %6113 = vmatmul.mubr.msk.f32.gmra.mrb[92].mxu1 %vm4738_vm1, %v4695_v23 }
 0x64d   : > { %6115 = vmatprep.mubr.msk.f32.mxu1 %vm4738_vm1, %v4696_v40 }
 0x64f   : > { %v6014_v33 = vpop.f32.mrb[100].mxu0 }
 0x650   : > { %v4487_v45 = vpop.f32.mrb[101].mxu0  ;;  %6116 = vmatmul.mubr.msk.f32.gmra.mrb[94].mxu1 %vm4738_vm1, %v4697_v18  ;;  %v4496_v43 = vadd.f32 %v6014_v33, %v9669_v57  ;;  %v4649_v18 = vld [vmem:[%s9676_s30 + $0x198] sm:$0xff] }
 0x651   : > { %v4488_v59 = vadd.f32 %v9669_v57, %v4487_v45  ;;  %v6015_v54 = vpop.f32.mrb[102].mxu0 }
 0x652   : > { %v4490_v10 = vpop.f32.mrb[103].mxu0  ;;  %v4499_v17 = vadd.f32 %v6015_v54, %v9669_v57  ;;  %v4700_v61 = vmul.f32 %v4636_v42, %v4496_v43  ;;  %v4651_v42 = vld [vmem:[%s9676_s30 + $0x1a8] sm:$0xff] }
 0x653   : > { %v4698_v15 = vmul.f32 %v4634_v30, %v4488_v59  ;;  %v4491_v31 = vadd.f32 %v9669_v57, %v4490_v10  ;;  %v4650_v59 = vld [vmem:[%s9676_s30 + $0x1a0] sm:$0xff] }
 0x654   : > { %v4701_v56 = vmul.f32 %v4637_v36, %v4499_v17 }
 0x655   : > { %v4699_v19 = vmul.f32 %v4635_v44, %v4491_v31  ;;  %6118 = vmatprep.mubr.msk.f32.mxu1 %vm4738_vm1, %v4698_v15  ;;  %v4652_v15 = vld [vmem:[%s9676_s30 + $0x1b0] sm:$0xff] }
 0x657   : > { %v6018_v26 = vpop.f32.mrb[104].mxu0  ;;  %6119 = vmatmul.mubr.msk.f32.gmra.mrb[96].mxu1 %vm4738_vm1, %v4699_v19 }
 0x658   : > { %v4503_v35 = vpop.f32.mrb[105].mxu0  ;;  %6121 = vmatprep.mubr.msk.f32.mxu1 %vm4738_vm1, %v4700_v61  ;;  %v4512_v49 = vadd.f32 %v6018_v26, %v9669_v57  ;;  %v4653_v26 = vld [vmem:[%s9676_s30 + $0x1b8] sm:$0xff] }
 0x659   : > { %v4504_v13 = vadd.f32 %v9669_v57, %v4503_v35  ;;  %v6019_v16 = vpop.f32.mrb[106].mxu0 }
 0x65a   : > { %v4506_v41 = vpop.f32.mrb[107].mxu0  ;;  %v4515_v52 = vadd.f32 %v6019_v16, %v9669_v57  ;;  %v4704_v29 = vmul.f32 %v4640_v28, %v4512_v49  ;;  %v4655_v28 = vld [vmem:[%s9676_s30 + $0x1c8] sm:$0xff] }
 0x65b   : > { %v4702_v47 = vmul.f32 %v4638_v9, %v4504_v13  ;;  %v4507_v27 = vadd.f32 %v9669_v57, %v4506_v41  ;;  %6122 = vmatmul.mubr.msk.f32.gmra.mrb[98].mxu1 %vm4738_vm1, %v4701_v56  ;;  %v4654_v13 = vld [vmem:[%s9676_s30 + $0x1c0] sm:$0xff] }
 0x65c   : > { %v4705_v39 = vmul.f32 %v4641_v25, %v4515_v52 }
 0x65d   : > { %v4703_v8 = vmul.f32 %v4639_v0, %v4507_v27  ;;  %6124 = vmatprep.mubr.msk.f32.mxu1 %vm4738_vm1, %v4702_v47  ;;  %v4656_v47 = vld [vmem:[%s9676_s30 + $0x1d0] sm:$0xff] }
 0x65f   : > { %6125 = vmatmul.mubr.msk.f32.gmra.mrb[100].mxu1 %vm4738_vm1, %v4703_v8 }
 0x660   : > { %6127 = vmatprep.mubr.msk.f32.mxu1 %vm4738_vm1, %v4704_v29 }
 0x663   : > { %6128 = vmatmul.mubr.msk.f32.gmra.mrb[102].mxu1 %vm4738_vm1, %v4705_v39  ;;  %v4657_v39 = vld [vmem:[%s9676_s30 + $0x1d8] sm:$0xff] }
 0x664   : > { %v6022_v38 = vpop.f32.mrb[108].mxu0 }
 0x665   : > { %v4519_v63 = vpop.f32.mrb[109].mxu0  ;;  %v4528_v6 = vadd.f32 %v6022_v38, %v9669_v57 }
 0x666   : > { %v4520_v4 = vadd.f32 %v9669_v57, %v4519_v63  ;;  %v6023_v5 = vpop.f32.mrb[110].mxu0 }
 0x667   : > { %v4522_v60 = vpop.f32.mrb[111].mxu0  ;;  %v4531_v37 = vadd.f32 %v6023_v5, %v9669_v57  ;;  %v4708_v7 = vmul.f32 %v4644_v51, %v4528_v6  ;;  %v4659_v51 = vld [vmem:[%s9676_s30 + $0x1e8] sm:$0xff] }
 0x668   : > { %v4706_v62 = vmul.f32 %v4642_v53, %v4520_v4  ;;  %v4523_v22 = vadd.f32 %v9669_v57, %v4522_v60  ;;  %v4658_v4 = vld [vmem:[%s9676_s30 + $0x1e0] sm:$0xff] }
 0x669   : > { %v4709_v12 = vmul.f32 %v4645_v55, %v4531_v37 }
 0x66a   : > { %v4707_v24 = vmul.f32 %v4643_v3, %v4523_v22  ;;  %6130 = vmatprep.mubr.msk.f32.mxu1 %vm4738_vm1, %v4706_v62  ;;  %v4660_v62 = vld [vmem:[%s9676_s30 + $0x1f0] sm:$0xff] }
 0x66c   : > { %6131 = vmatmul.mubr.msk.f32.gmra.mrb[104].mxu1 %vm4738_vm1, %v4707_v24 }
 0x66d   : > { %6133 = vmatprep.mubr.msk.f32.mxu1 %vm4738_vm1, %v4708_v7 }
 0x66e   : > { %v6026_v21 = vpop.f32.mrb[112].mxu0 }
 0x66f   : > { %v4535_v58 = vpop.f32.mrb[113].mxu0  ;;  %v4544_v46 = vadd.f32 %v6026_v21, %v9669_v57 }
 0x670   : > { %v4536_v11 = vadd.f32 %v9669_v57, %v4535_v58  ;;  %v6027_v20 = vpop.f32.mrb[114].mxu0  ;;  %6134 = vmatmul.mubr.msk.f32.gmra.mrb[106].mxu1 %vm4738_vm1, %v4709_v12  ;;  %v4661_v12 = vld [vmem:[%s9676_s30 + $0x1f8] sm:$0xff] }
 0x671   : > { %v4538_v14 = vpop.f32.mrb[115].mxu0  ;;  %v4547_v23 = vadd.f32 %v6027_v20, %v9669_v57  ;;  %v4712_v34 = vmul.f32 %v4648_v2, %v4544_v46 }
 0x672   : > { %v4710_v32 = vmul.f32 %v4646_v48, %v4536_v11  ;;  %v4539_v50 = vadd.f32 %v9669_v57, %v4538_v14 }
 0x673   : > { %v4713_v45 = vmul.f32 %v4649_v18, %v4547_v23 }
 0x674   : > { %v4711_v40 = vmul.f32 %v4647_v1, %v4539_v50  ;;  %6136 = vmatprep.mubr.msk.f32.mxu1 %vm4738_vm1, %v4710_v32 }
 0x676   : > { %6137 = vmatmul.mubr.msk.f32.gmra.mrb[108].mxu1 %vm4738_vm1, %v4711_v40 }
 0x677   : > { %v6030_v33 = vpop.f32.mrb[116].mxu0  ;;  %6139 = vmatprep.mubr.msk.f32.mxu1 %vm4738_vm1, %v4712_v34 }
 0x678   : > { %v4551_v30 = vpop.f32.mrb[117].mxu0  ;;  %v4560_v10 = vadd.f32 %v6030_v33, %v9669_v57 }
 0x679   : > { %v4552_v54 = vadd.f32 %v9669_v57, %v4551_v30  ;;  %v6031_v43 = vpop.f32.mrb[118].mxu0 }
 0x67a   : > { %v4554_v44 = vpop.f32.mrb[119].mxu0  ;;  %6140 = vmatmul.mubr.msk.f32.gmra.mrb[110].mxu1 %vm4738_vm1, %v4713_v45  ;;  %v4563_v19 = vadd.f32 %v6031_v43, %v9669_v57  ;;  %v4716_v36 = vmul.f32 %v4652_v15, %v4560_v10 }
 0x67b   : > { %v4714_v31 = vmul.f32 %v4650_v59, %v4552_v54  ;;  %v4555_v17 = vadd.f32 %v9669_v57, %v4554_v44 }
 0x67c   : > { %v4717_v35 = vmul.f32 %v4653_v26, %v4563_v19 }
 0x67d   : > { %v4715_v61 = vmul.f32 %v4651_v42, %v4555_v17  ;;  %6142 = vmatprep.mubr.msk.f32.mxu1 %vm4738_vm1, %v4714_v31 }
 0x67f   : > { %6143 = vmatmul.mubr.msk.f32.gmra.mrb[112].mxu1 %vm4738_vm1, %v4715_v61 }
 0x680   : > { %6145 = vmatprep.mubr.msk.f32.mxu1 %vm4738_vm1, %v4716_v36 }
 0x682   : > { %v6034_v9 = vpop.f32.mrb[120].mxu0 }
 0x683   : > { %v4567_v56 = vpop.f32.mrb[121].mxu0  ;;  %6146 = vmatmul.mubr.msk.f32.gmra.mrb[114].mxu1 %vm4738_vm1, %v4717_v35  ;;  %v4576_v41 = vadd.f32 %v6034_v9, %v9669_v57 }
 0x684   : > { %v4568_v16 = vadd.f32 %v9669_v57, %v4567_v56  ;;  %v6035_v49 = vpop.f32.mrb[122].mxu0 }
 0x685   : > { %v4570_v0 = vpop.f32.mrb[123].mxu0  ;;  %v4579_v8 = vadd.f32 %v6035_v49, %v9669_v57  ;;  %v4720_v25 = vmul.f32 %v4656_v47, %v4576_v41 }
 0x686   : > { %v4718_v27 = vmul.f32 %v4654_v13, %v4568_v16  ;;  %v4571_v52 = vadd.f32 %v9669_v57, %v4570_v0 }
 0x687   : > { %v4721_v38 = vmul.f32 %v4657_v39, %v4579_v8 }
 0x688   : > { %v4719_v29 = vmul.f32 %v4655_v28, %v4571_v52  ;;  %6148 = vmatprep.mubr.msk.f32.mxu1 %vm4738_vm1, %v4718_v27 }
 0x68a   : > { %6149 = vmatmul.mubr.msk.f32.gmra.mrb[116].mxu1 %vm4738_vm1, %v4719_v29 }
 0x68b   : > { %6151 = vmatprep.mubr.msk.f32.mxu1 %vm4738_vm1, %v4720_v25 }
 0x68e   : > { %6152 = vmatmul.mubr.msk.f32.gmra.mrb[118].mxu1 %vm4738_vm1, %v4721_v38 }
 0x69e   : > { %v6038_v63 = vpop.f32.mrb[124].mxu0 }
 0x69f   : > { %v4583_v53 = vpop.f32.mrb[125].mxu0  ;;  %v4592_v60 = vadd.f32 %v6038_v63, %v9669_v57 }
 0x6a0   : > { %v4584_v5 = vadd.f32 %v9669_v57, %v4583_v53  ;;  %v6039_v6 = vpop.f32.mrb[126].mxu0 }
 0x6a1   : > { %v4586_v3 = vpop.f32.mrb[127].mxu0  ;;  %v4595_v24 = vadd.f32 %v6039_v6, %v9669_v57  ;;  %v4724_v55 = vmul.f32 %v4660_v62, %v4592_v60 }
 0x6a2   : > { %v4722_v22 = vmul.f32 %v4658_v4, %v4584_v5  ;;  %v4587_v37 = vadd.f32 %v9669_v57, %v4586_v3 }
 0x6a3   : > { %v4725_v58 = vmul.f32 %v4661_v12, %v4595_v24 }
 0x6a4   : > { %v4723_v7 = vmul.f32 %v4659_v51, %v4587_v37  ;;  %6154 = vmatprep.mubr.msk.f32.mxu1 %vm4738_vm1, %v4722_v22 }
 0x6a6   : > { %6155 = vmatmul.mubr.msk.f32.gmra.mrb[120].mxu1 %vm4738_vm1, %v4723_v7  ;;  %v6066_v57 = vpop.f32.mrb[128].mxu0 }
 0x6a7   : > { %6157 = vmatprep.mubr.msk.f32.mxu1 %vm4738_vm1, %v4724_v55  ;;  %5317 = vst [vmem:[%s9871_s12 + $0x8] sm:$0xff] %v6066_v57  ;;  %v4997_v21 = vpop.f32.mrb[129].mxu0 }
 0x6a8   : > { %5316 = vst [vmem:[%s9871_s12] sm:$0xff] %v4997_v21 }
 0x6aa   : > { %6158 = vmatmul.mubr.msk.f32.gmra.mrb[122].mxu1 %vm4738_vm1, %v4725_v58  ;;  %v6069_v48 = vpop.f32.mrb[130].mxu0 }
 0x6ab   : > { %5319 = vst [vmem:[%s9871_s12 + $0x18] sm:$0xff] %v6069_v48  ;;  %v5007_v11 = vpop.f32.mrb[131].mxu0 }
 0x6ac   : > { %5318 = vst [vmem:[%s9871_s12 + $0x10] sm:$0xff] %v5007_v11 }
 0x6b1   : > { %v6072_v20 = vpop.f32.mrb[64].mxu1 }
 0x6b2   : > { %5321 = vst [vmem:[%s9871_s12 + $0x28] sm:$0xff] %v6072_v20  ;;  %v5017_v46 = vpop.f32.mrb[65].mxu1 }
 0x6b3   : > { %5320 = vst [vmem:[%s9871_s12 + $0x20] sm:$0xff] %v5017_v46 }
 0x6b5   : > { %v6075_v14 = vpop.f32.mrb[66].mxu1 }
 0x6b6   : > { %5323 = vst [vmem:[%s9871_s12 + $0x38] sm:$0xff] %v6075_v14  ;;  %v5027_v1 = vpop.f32.mrb[67].mxu1 }
 0x6b7   : > { %5322 = vst [vmem:[%s9871_s12 + $0x30] sm:$0xff] %v5027_v1 }
 0x6bf   : > { %v6078_v2 = vpop.f32.mrb[68].mxu1 }
 0x6c0   : > { %5325 = vst [vmem:[%s9871_s12 + $0x48] sm:$0xff] %v6078_v2  ;;  %v5037_v32 = vpop.f32.mrb[69].mxu1 }
 0x6c1   : > { %5324 = vst [vmem:[%s9871_s12 + $0x40] sm:$0xff] %v5037_v32 }
 0x6c3   : > { %v6081_v50 = vpop.f32.mrb[70].mxu1 }
 0x6c4   : > { %5327 = vst [vmem:[%s9871_s12 + $0x58] sm:$0xff] %v6081_v50  ;;  %v5047_v23 = vpop.f32.mrb[71].mxu1 }
 0x6c5   : > { %5326 = vst [vmem:[%s9871_s12 + $0x50] sm:$0xff] %v5047_v23 }
 0x6ce   : > { %v6084_v40 = vpop.f32.mrb[72].mxu1 }
 0x6cf   : > { %5329 = vst [vmem:[%s9871_s12 + $0x68] sm:$0xff] %v6084_v40  ;;  %v5057_v34 = vpop.f32.mrb[73].mxu1 }
 0x6d0   : > { %5328 = vst [vmem:[%s9871_s12 + $0x60] sm:$0xff] %v5057_v34 }
 0x6d2   : > { %v6087_v18 = vpop.f32.mrb[74].mxu1 }
 0x6d3   : > { %5331 = vst [vmem:[%s9871_s12 + $0x78] sm:$0xff] %v6087_v18  ;;  %v5067_v33 = vpop.f32.mrb[75].mxu1 }
 0x6d4   : > { %5330 = vst [vmem:[%s9871_s12 + $0x70] sm:$0xff] %v5067_v33 }
 0x6de   : > { %v6090_v45 = vpop.f32.mrb[76].mxu1 }
 0x6df   : > { %5333 = vst [vmem:[%s9871_s12 + $0x88] sm:$0xff] %v6090_v45  ;;  %v5077_v30 = vpop.f32.mrb[77].mxu1 }
 0x6e0   : > { %5332 = vst [vmem:[%s9871_s12 + $0x80] sm:$0xff] %v5077_v30 }
 0x6e2   : > { %v6093_v59 = vpop.f32.mrb[78].mxu1 }
 0x6e3   : > { %5335 = vst [vmem:[%s9871_s12 + $0x98] sm:$0xff] %v6093_v59  ;;  %v5087_v54 = vpop.f32.mrb[79].mxu1 }
 0x6e4   : > { %5334 = vst [vmem:[%s9871_s12 + $0x90] sm:$0xff] %v5087_v54 }
 0x6ed   : > { %v6096_v43 = vpop.f32.mrb[80].mxu1 }
 0x6ee   : > { %5337 = vst [vmem:[%s9871_s12 + $0xa8] sm:$0xff] %v6096_v43  ;;  %v5097_v10 = vpop.f32.mrb[81].mxu1 }
 0x6ef   : > { %5336 = vst [vmem:[%s9871_s12 + $0xa0] sm:$0xff] %v5097_v10 }
 0x6f1   : > { %v6099_v44 = vpop.f32.mrb[82].mxu1 }
 0x6f2   : > { %5339 = vst [vmem:[%s9871_s12 + $0xb8] sm:$0xff] %v6099_v44  ;;  %v5107_v42 = vpop.f32.mrb[83].mxu1 }
 0x6f3   : > { %5338 = vst [vmem:[%s9871_s12 + $0xb0] sm:$0xff] %v5107_v42 }
 0x6ff   : > { %v6102_v15 = vpop.f32.mrb[84].mxu1 }
 0x700   : > { %5341 = vst [vmem:[%s9871_s12 + $0xc8] sm:$0xff] %v6102_v15  ;;  %v5117_v31 = vpop.f32.mrb[85].mxu1 }
 0x701   : > { %5340 = vst [vmem:[%s9871_s12 + $0xc0] sm:$0xff] %v5117_v31 }
 0x703   : > { %v6105_v17 = vpop.f32.mrb[86].mxu1 }
 0x704   : > { %5343 = vst [vmem:[%s9871_s12 + $0xd8] sm:$0xff] %v6105_v17  ;;  %v5127_v19 = vpop.f32.mrb[87].mxu1 }
 0x705   : > { %5342 = vst [vmem:[%s9871_s12 + $0xd0] sm:$0xff] %v5127_v19 }
 0x70f   : > { %v6108_v61 = vpop.f32.mrb[88].mxu1 }
 0x710   : > { %5345 = vst [vmem:[%s9871_s12 + $0xe8] sm:$0xff] %v6108_v61  ;;  %v5137_v36 = vpop.f32.mrb[89].mxu1 }
 0x711   : > { %5344 = vst [vmem:[%s9871_s12 + $0xe0] sm:$0xff] %v5137_v36 }
 0x713   : > { %v6111_v26 = vpop.f32.mrb[90].mxu1 }
 0x714   : > { %5347 = vst [vmem:[%s9871_s12 + $0xf8] sm:$0xff] %v6111_v26  ;;  %v5147_v35 = vpop.f32.mrb[91].mxu1 }
 0x715   : > { %5346 = vst [vmem:[%s9871_s12 + $0xf0] sm:$0xff] %v5147_v35 }
 0x71f   : > { %v6114_v9 = vpop.f32.mrb[92].mxu1 }
 0x720   : > { %5349 = vst [vmem:[%s9871_s12 + $0x108] sm:$0xff] %v6114_v9  ;;  %v5157_v56 = vpop.f32.mrb[93].mxu1 }
 0x721   : > { %5348 = vst [vmem:[%s9871_s12 + $0x100] sm:$0xff] %v5157_v56 }
 0x723   : > { %v6117_v13 = vpop.f32.mrb[94].mxu1 }
 0x724   : > { %5351 = vst [vmem:[%s9871_s12 + $0x118] sm:$0xff] %v6117_v13  ;;  %v5167_v16 = vpop.f32.mrb[95].mxu1 }
 0x725   : > { %5350 = vst [vmem:[%s9871_s12 + $0x110] sm:$0xff] %v5167_v16 }
 0x72a   : > { %v6120_v49 = vpop.f32.mrb[96].mxu1 }
 0x72b   : > { %5353 = vst [vmem:[%s9871_s12 + $0x128] sm:$0xff] %v6120_v49  ;;  %v5177_v41 = vpop.f32.mrb[97].mxu1 }
 0x72c   : > { %5352 = vst [vmem:[%s9871_s12 + $0x120] sm:$0xff] %v5177_v41 }
 0x72e   : > { %v6123_v0 = vpop.f32.mrb[98].mxu1 }
 0x72f   : > { %5355 = vst [vmem:[%s9871_s12 + $0x138] sm:$0xff] %v6123_v0  ;;  %v5187_v28 = vpop.f32.mrb[99].mxu1 }
 0x730   : > { %5354 = vst [vmem:[%s9871_s12 + $0x130] sm:$0xff] %v5187_v28 }
 0x732   : > { %v6126_v47 = vpop.f32.mrb[100].mxu1 }
 0x733   : > { %5357 = vst [vmem:[%s9871_s12 + $0x148] sm:$0xff] %v6126_v47  ;;  %v5197_v27 = vpop.f32.mrb[101].mxu1 }
 0x734   : > { %5356 = vst [vmem:[%s9871_s12 + $0x140] sm:$0xff] %v5197_v27 }
 0x736   : > { %v6129_v52 = vpop.f32.mrb[102].mxu1 }
 0x737   : > { %5359 = vst [vmem:[%s9871_s12 + $0x158] sm:$0xff] %v6129_v52  ;;  %v5207_v8 = vpop.f32.mrb[103].mxu1 }
 0x738   : > { %5358 = vst [vmem:[%s9871_s12 + $0x150] sm:$0xff] %v5207_v8 }
 0x73f   : > { %v6132_v29 = vpop.f32.mrb[104].mxu1 }
 0x740   : > { %5361 = vst [vmem:[%s9871_s12 + $0x168] sm:$0xff] %v6132_v29  ;;  %v5217_v25 = vpop.f32.mrb[105].mxu1 }
 0x741   : > { %5360 = vst [vmem:[%s9871_s12 + $0x160] sm:$0xff] %v5217_v25 }
 0x743   : > { %v6135_v39 = vpop.f32.mrb[106].mxu1 }
 0x744   : > { %5363 = vst [vmem:[%s9871_s12 + $0x178] sm:$0xff] %v6135_v39  ;;  %v5227_v38 = vpop.f32.mrb[107].mxu1 }
 0x745   : > { %5362 = vst [vmem:[%s9871_s12 + $0x170] sm:$0xff] %v5227_v38 }
 0x749   : > { %v6138_v63 = vpop.f32.mrb[108].mxu1 }
 0x74a   : > { %5365 = vst [vmem:[%s9871_s12 + $0x188] sm:$0xff] %v6138_v63  ;;  %v5237_v53 = vpop.f32.mrb[109].mxu1 }
 0x74b   : > { %5364 = vst [vmem:[%s9871_s12 + $0x180] sm:$0xff] %v5237_v53 }
 0x74d   : > { %v6141_v4 = vpop.f32.mrb[110].mxu1 }
 0x74e   : > { %5367 = vst [vmem:[%s9871_s12 + $0x198] sm:$0xff] %v6141_v4  ;;  %v5247_v5 = vpop.f32.mrb[111].mxu1 }
 0x74f   : > { %5366 = vst [vmem:[%s9871_s12 + $0x190] sm:$0xff] %v5247_v5 }
 0x752   : > { %v6144_v6 = vpop.f32.mrb[112].mxu1 }
 0x753   : > { %5369 = vst [vmem:[%s9871_s12 + $0x1a8] sm:$0xff] %v6144_v6  ;;  %v5257_v60 = vpop.f32.mrb[113].mxu1 }
 0x754   : > { %5368 = vst [vmem:[%s9871_s12 + $0x1a0] sm:$0xff] %v5257_v60 }
 0x756   : > { %v6147_v3 = vpop.f32.mrb[114].mxu1 }
 0x757   : > { %5371 = vst [vmem:[%s9871_s12 + $0x1b8] sm:$0xff] %v6147_v3  ;;  %v5267_v51 = vpop.f32.mrb[115].mxu1 }
 0x758   : > { %5370 = vst [vmem:[%s9871_s12 + $0x1b0] sm:$0xff] %v5267_v51 }
 0x75d   : > { %v6150_v62 = vpop.f32.mrb[116].mxu1 }
 0x75e   : > { %5373 = vst [vmem:[%s9871_s12 + $0x1c8] sm:$0xff] %v6150_v62  ;;  %v5277_v22 = vpop.f32.mrb[117].mxu1 }
 0x75f   : > { %5372 = vst [vmem:[%s9871_s12 + $0x1c0] sm:$0xff] %v5277_v22 }
 0x761   : > { %v6153_v37 = vpop.f32.mrb[118].mxu1 }
 0x762   : > { %5375 = vst [vmem:[%s9871_s12 + $0x1d8] sm:$0xff] %v6153_v37  ;;  %v5287_v24 = vpop.f32.mrb[119].mxu1 }
 0x763   : > { %5374 = vst [vmem:[%s9871_s12 + $0x1d0] sm:$0xff] %v5287_v24 }
 0x779   : > { %v6156_v7 = vpop.f32.mrb[120].mxu1 }
 0x77a   : > { %5377 = vst [vmem:[%s9871_s12 + $0x1e8] sm:$0xff] %v6156_v7  ;;  %v5297_v55 = vpop.f32.mrb[121].mxu1 }
 0x77b   : > { %5376 = vst [vmem:[%s9871_s12 + $0x1e0] sm:$0xff] %v5297_v55 }
 0x77d   : > { %v6159_v12 = vpop.f32.mrb[122].mxu1 }
 0x77e   : > { %5379 = vst [vmem:[%s9871_s12 + $0x1f8] sm:$0xff] %v6159_v12  ;;  %v5307_v57 = vpop.f32.mrb[123].mxu1 }
 0x77f   : > { %5378 = vst [vmem:[%s9871_s12 + $0x1f0] sm:$0xff] %v5307_v57 }
 0x780 PF: > { %s18_s27 = sadd.s32 1, %s6782_s27  }
 0x781   : > { %p15_p4 = scmp.ge.s32.totalorder %s18_s27, 4  }
 0x783   :  { %17 = sbr.rel (!%p15_p4) target bundleno = 1 (0x1), region = 85 }

</bundles_post_ra>
